<compile_context>
chip_gen: v7x
topology: tpu7x:2x2x1
jax: 0.10.0
libtpu: 0.0.40
codegen_flags: <defaults>
</compile_context>

<pallas_src>
import functools
import math

import jax
import jax.numpy as jnp
import numpy as np
from jax import lax
from jax.experimental import pallas as pl
from jax.experimental.pallas import tpu as pltpu

_EPS = 1e-5
_S = 28          # per-image row stride in the stacked (rows, lanes) layout
B_TILE = 8       # images per grid step

# (name, ksize, cin, cout)
_CONV_CFG = [
    ("c1", 3, 1, 8),
    ("c2", 3, 8, 16),
    ("t1", 1, 16, 8),
    ("c3a", 3, 8, 12),
    ("c3b", 3, 12, 16),
    ("c3c", 3, 16, 20),
    ("h1", 1, 20, 16),
    ("h2", 1, 16, 10),
]

_ARG_KEYS = [
    "c1_w", "c1_s", "c1_b",
    "c2_w", "c2_s", "c2_b",
    "t1_w", "t1_s", "t1_b",
    "c3a_w", "c3a_s", "c3a_b",
    "c3b_w", "c3b_s", "c3b_b",
    "c3c_w", "c3c_s", "c3c_b",
    "gap_p",
    "h1_w", "h1_s", "h1_b",
    "h2_w",
]


# ----------------------------- in-kernel helpers ----------------------------

def _conv3(a, w_ref, s_ref, b_ref, out_rows, row_step):
    """Banded 3x3 'valid' conv + ReLU + folded BN.

    a      : (R, Win*Cin) f32 activation (images stacked on rows).
    w_ref  : (3, Win*Cin, Wout*Cout) bf16 banded weights (dj folded in).
    s_ref, b_ref : (1, Wout*Cout) f32 folded-BN scale / bias.
    Returns (out_rows, Wout*Cout) f32.
    """
    def sl(d):
        # Row-shifted slice; cast to bf16 right at the MXU input.
        return a[d * row_step:d * row_step + out_rows, :].astype(jnp.bfloat16)

    acc = jnp.dot(sl(0), w_ref[0], preferred_element_type=jnp.float32)
    acc = acc + jnp.dot(sl(1), w_ref[1], preferred_element_type=jnp.float32)
    acc = acc + jnp.dot(sl(2), w_ref[2], preferred_element_type=jnp.float32)
    acc = jnp.maximum(acc, 0.0)                       # ReLU
    return acc * s_ref[...] + b_ref[...]              # folded BN (post-ReLU)


def _conv1x1(a, w_ref, s_ref, b_ref):
    acc = jnp.dot(a.astype(jnp.bfloat16), w_ref[...],
                  preferred_element_type=jnp.float32)
    acc = jnp.maximum(acc, 0.0)
    return acc * s_ref[...] + b_ref[...]


def _net3_kernel(x_ref,
                 w1_ref, s1_ref, b1_ref,
                 w2_ref, s2_ref, b2_ref,
                 wt_ref, st_ref, bt_ref,
                 w3a_ref, s3a_ref, b3a_ref,
                 w3b_ref, s3b_ref, b3b_ref,
                 w3c_ref, s3c_ref, b3c_ref,
                 gap_ref, wh1_ref, sh1_ref, bh1_ref,
                 wh2_ref,
                 o_ref):
    nb = x_ref.shape[0] // _S                          # images in this block
    x = x_ref[...]                                     # (nb*28, 28) f32

    # convblock1: 28 -> 26, 1 -> 8 ch
    r1 = _S * (nb - 1) + 26
    a1 = _conv3(x, w1_ref, s1_ref, b1_ref, r1, 1)      # (r1, 26*8=208)
    # convblock2: 26 -> 24, 8 -> 16 ch
    r2 = _S * (nb - 1) + 24
    a2 = _conv3(a1, w2_ref, s2_ref, b2_ref, r2, 1)     # (r2, 24*16=384)

    # ---- MaxPool2d(2,2), fully in registers ("dilated", no compaction) ----
    # W direction: output group j lives at even lane group 2j (16 ch wide).
    wmax = jnp.maximum(a2[:, 0:368], a2[:, 16:384])    # (r2, 368)
    # H direction: pooled row i of image b lives at physical row 28b + 2i.
    rp = r2 - 1
    pooled = jnp.maximum(wmax[0:rp, :], wmax[1:rp + 1, :])   # (rp, 368)

    # trans1: 1x1 conv 16 -> 8; lane compaction folded into the weight.
    at = _conv1x1(pooled, wt_ref, st_ref, bt_ref)      # (rp, 12*8=96)

    # convblock3: rows stay dilated (step 2); valid rows 28b + 2i.
    r3 = _S * (nb - 1) + 19
    a3 = _conv3(at, w3a_ref, s3a_ref, b3a_ref, r3, 2)  # (r3, 10*12=120)
    r4 = _S * (nb - 1) + 15
    a4 = _conv3(a3, w3b_ref, s3b_ref, b3b_ref, r4, 2)  # (r4, 8*16=128)
    r5 = _S * (nb - 1) + 11
    a5 = _conv3(a4, w3c_ref, s3c_ref, b3c_ref, r5, 2)  # (r5, 6*20=120)

    # ---- GAP (AvgPool 6x6) + head ------------------------------------------
    # Row reduction over the 6 valid rows per image via a 0/1 selection
    # matmul; the W-direction sum and the 1/36 are folded into wh1.
    rowsum = jnp.dot(gap_ref[...], a5.astype(jnp.bfloat16),
                     preferred_element_type=jnp.float32)        # (nb, 120)
    h = jnp.dot(rowsum.astype(jnp.bfloat16), wh1_ref[...],
                preferred_element_type=jnp.float32)             # (nb, 16)
    h = jnp.maximum(h, 0.0) * sh1_ref[...] + bh1_ref[...]
    logits = jnp.dot(h.astype(jnp.bfloat16), wh2_ref[...],
                     preferred_element_type=jnp.float32)        # (nb, 10)

    # ---- log_softmax --------------------------------------------------------
    m = jnp.max(logits, axis=-1, keepdims=True)
    z = logits - m
    lse = jnp.log(jnp.sum(jnp.exp(z), axis=-1, keepdims=True))
    o_ref[...] = z - lse


# ----------------------------- parameters -----------------------------------

def init_params(key):
    """Deterministic random conv weights + BatchNorm running stats (eval)."""
    params = {}
    keys = jax.random.split(key, len(_CONV_CFG))
    for k, (name, ks, cin, cout) in zip(keys, _CONV_CFG):
        kw, k1, k2, k3, k4 = jax.random.split(k, 5)
        fan_in = ks * ks * cin
        params[name + "_w"] = (jax.random.normal(kw, (ks, ks, cin, cout),
                                                 jnp.float32)
                               / math.sqrt(fan_in))
        if name != "h2":                    # every conv but the last has BN
            params[name + "_gamma"] = 1.0 + 0.1 * jax.random.normal(k1, (cout,), jnp.float32)
            params[name + "_beta"] = 0.1 * jax.random.normal(k2, (cout,), jnp.float32)
            params[name + "_mean"] = 0.1 * jax.random.normal(k3, (cout,), jnp.float32)
            params[name + "_var"] = 0.5 + jax.random.uniform(k4, (cout,), dtype=jnp.float32)
    return params


def _banded_weights(w, win):
    """(3,3,Cin,Cout) -> (3, Win*Cin, (Win-2)*Cout) banded bf16 (dj folded)."""
    wnp = np.asarray(w, np.float32)
    _, _, cin, cout = wnp.shape
    wout = win - 2
    out = np.zeros((3, win * cin, wout * cout), np.float32)
    for di in range(3):
        for dj in range(3):
            for p in range(wout):
                out[di, (p + dj) * cin:(p + dj + 1) * cin,
                    p * cout:(p + 1) * cout] = wnp[di, dj]
    return jnp.asarray(out, jnp.bfloat16)


def _trans1_fold(w):
    """1x1 conv 16->8 acting on the un-compacted maxpool lanes: (368, 96)."""
    wnp = np.asarray(w, np.float32).reshape(16, 8)
    out = np.zeros((23 * 16, 12 * 8), np.float32)
    for j in range(12):                     # valid pooled group j = lane group 2j
        out[32 * j:32 * j + 16, 8 * j:8 * j + 8] = wnp
    return jnp.asarray(out, jnp.bfloat16)


def _gap_matrix(nb):
    """(nb, R5) 0/1 row-selection matrix: picks the 6 valid rows per image."""
    r5 = _S * (nb - 1) + 11
    p = np.zeros((nb, r5), np.float32)
    for b in range(nb):
        for i in range(6):
            p[b, _S * b + 2 * i] = 1.0
    return jnp.asarray(p, jnp.bfloat16)


def _fold_bn(params, name, cout, wo):
    s = params[name + "_gamma"] / jnp.sqrt(params[name + "_var"] + _EPS)
    b = params[name + "_beta"] - params[name + "_mean"] * s
    s = jnp.tile(s.reshape(1, cout), (1, wo)).astype(jnp.float32)
    b = jnp.tile(b.reshape(1, cout), (1, wo)).astype(jnp.float32)
    return s, b


def prepare_params(params, nb=B_TILE):
    """One-time weight prep: fold BN, build banded MXU weights (bf16)."""
    prep = {}
    prep["c1_w"] = _banded_weights(params["c1_w"], 28)
    prep["c1_s"], prep["c1_b"] = _fold_bn(params, "c1", 8, 26)
    prep["c2_w"] = _banded_weights(params["c2_w"], 26)
    prep["c2_s"], prep["c2_b"] = _fold_bn(params, "c2", 16, 24)
    prep["t1_w"] = _trans1_fold(params["t1_w"])
    prep["t1_s"], prep["t1_b"] = _fold_bn(params, "t1", 8, 12)
    prep["c3a_w"] = _banded_weights(params["c3a_w"], 12)
    prep["c3a_s"], prep["c3a_b"] = _fold_bn(params, "c3a", 12, 10)
    prep["c3b_w"] = _banded_weights(params["c3b_w"], 10)
    prep["c3b_s"], prep["c3b_b"] = _fold_bn(params, "c3b", 16, 8)
    prep["c3c_w"] = _banded_weights(params["c3c_w"], 8)
    prep["c3c_s"], prep["c3c_b"] = _fold_bn(params, "c3c", 20, 6)
    prep["gap_p"] = _gap_matrix(nb)
    # GAP (x 1/36) and the 6 spatial positions folded into the h1 weight.
    wh1 = np.asarray(params["h1_w"], np.float32).reshape(20, 16) / 36.0
    prep["h1_w"] = jnp.asarray(np.tile(wh1, (6, 1)), jnp.bfloat16)   # (120, 16)
    prep["h1_s"], prep["h1_b"] = _fold_bn(params, "h1", 16, 1)
    prep["h2_w"] = jnp.asarray(
        np.asarray(params["h2_w"], np.float32).reshape(16, 10), jnp.bfloat16)
    return prep


# ----------------------------- forward pass ---------------------------------

def _const_spec(arr):
    nd = arr.ndim
    # Full-array block + constant block index -> stays VMEM-resident across grid.
    return pl.BlockSpec(arr.shape, lambda i, _nd=nd: (0,) * _nd)


@functools.partial(jax.jit, static_argnames=("block_b",))
def net3_forward(x_nchw, prep, block_b=B_TILE):
    n = x_nchw.shape[0]
    n_pad = ((n + block_b - 1) // block_b) * block_b
    x = x_nchw.reshape(n, 28, 28).astype(jnp.float32)
    if n_pad != n:
        x = jnp.concatenate(
            [x, jnp.zeros((n_pad - n, 28, 28), jnp.float32)], axis=0)
    # Stack images along rows: (n_pad*28, 28), channel count 1 on lanes.
    x2 = x.reshape(n_pad * 28, 28)

    args = [prep[k] for k in _ARG_KEYS]
    in_specs = [pl.BlockSpec((block_b * _S, 28), lambda i: (i, 0))]
    in_specs += [_const_spec(a) for a in args]

    out = pl.pallas_call(
        _net3_kernel,
        out_shape=jax.ShapeDtypeStruct((n_pad, 10), jnp.float32),
        grid_spec=pltpu.PrefetchScalarGridSpec(
            num_scalar_prefetch=0,
            grid=(n_pad // block_b,),
            in_specs=in_specs,
            out_specs=pl.BlockSpec((block_b, 10), lambda i: (i, 0)),
        ),
        compiler_params=pltpu.CompilerParams(
            dimension_semantics=("parallel",)),
    )(x2, *args)
    return out[:n]


# ----------------------------- pure-JAX reference ---------------------------

def _ref_forward(x_nchw, params):
    """XLA reference with the same bf16 rounding points as the kernel."""
    f32, bf16 = jnp.float32, jnp.bfloat16

    def conv(x, w):
        return lax.conv_general_dilated(
            x, w.astype(bf16).astype(f32), window_strides=(1, 1),
            padding="VALID", dimension_numbers=("NCHW", "HWIO", "NCHW"))

    def block(x, name):
        y = conv(x, params[name + "_w"])
        y = jnp.maximum(y, 0.0)
        s = params[name + "_gamma"] / jnp.sqrt(params[name + "_var"] + _EPS)
        b = params[name + "_beta"] - params[name + "_mean"] * s
        y = y * s[None, :, None, None] + b[None, :, None, None]
        return y.astype(bf16).astype(f32)

    x = x_nchw.astype(f32).astype(bf16).astype(f32)
    x = block(x, "c1")
    x = block(x, "c2")
    x = lax.reduce_window(x, -jnp.inf, lax.max,
                          (1, 1, 2, 2), (1, 1, 2, 2), "VALID")
    x = block(x, "t1")
    x = block(x, "c3a")
    x = block(x, "c3b")
    x = block(x, "c3c")
    x = jnp.mean(x, axis=(2, 3), keepdims=True).astype(bf16).astype(f32)
    x = block(x, "h1")
    logits = conv(x, params["h2_w"]).reshape(-1, 10)
    return jax.nn.log_softmax(logits, axis=-1)


if __name__ == "__main__":
    key = jax.random.PRNGKey(0)
    pkey, xkey = jax.random.split(key)
    raw_params = init_params(pkey)
    prep = prepare_params(raw_params)

    # MNIST-like NCHW input; 16 images -> 2 grid steps of B_TILE=8.
    x = jax.random.normal(xkey, (16, 1, 28, 28), jnp.float32)
    out = jax.block_until_ready(net3_forward(x, prep))
    assert out.shape == (16, 10), out.shape
    assert bool(jnp.all(jnp.isfinite(out)))
    # exp(log_softmax) rows must sum to 1
    assert bool(jnp.allclose(jnp.sum(jnp.exp(out), axis=-1), 1.0, atol=1e-4))

    ref = jax.block_until_ready(_ref_forward(x, raw_params))
    max_diff = float(jnp.max(jnp.abs(out - ref)))
    assert max_diff < 0.1, f"max |pallas - ref| = {max_diff}"
    print("KERNEL_OK")
</pallas_src>

<mosaic_0001>
module attributes {stable_mosaic.version = 11 : i64} {
  func.func @_net3_kernel(%arg0: i32, %arg1: memref<224x28xf32, #tpu.memory_space<vmem>>, %arg2: memref<3x28x208xbf16, #tpu.memory_space<vmem>>, %arg3: memref<1x208xf32, #tpu.memory_space<vmem>>, %arg4: memref<1x208xf32, #tpu.memory_space<vmem>>, %arg5: memref<3x208x384xbf16, #tpu.memory_space<vmem>>, %arg6: memref<1x384xf32, #tpu.memory_space<vmem>>, %arg7: memref<1x384xf32, #tpu.memory_space<vmem>>, %arg8: memref<368x96xbf16, #tpu.memory_space<vmem>>, %arg9: memref<1x96xf32, #tpu.memory_space<vmem>>, %arg10: memref<1x96xf32, #tpu.memory_space<vmem>>, %arg11: memref<3x96x120xbf16, #tpu.memory_space<vmem>>, %arg12: memref<1x120xf32, #tpu.memory_space<vmem>>, %arg13: memref<1x120xf32, #tpu.memory_space<vmem>>, %arg14: memref<3x120x128xbf16, #tpu.memory_space<vmem>>, %arg15: memref<1x128xf32, #tpu.memory_space<vmem>>, %arg16: memref<1x128xf32, #tpu.memory_space<vmem>>, %arg17: memref<3x128x120xbf16, #tpu.memory_space<vmem>>, %arg18: memref<1x120xf32, #tpu.memory_space<vmem>>, %arg19: memref<1x120xf32, #tpu.memory_space<vmem>>, %arg20: memref<8x207xbf16, #tpu.memory_space<vmem>>, %arg21: memref<120x16xbf16, #tpu.memory_space<vmem>>, %arg22: memref<1x16xf32, #tpu.memory_space<vmem>>, %arg23: memref<1x16xf32, #tpu.memory_space<vmem>>, %arg24: memref<16x10xbf16, #tpu.memory_space<vmem>>, %arg25: memref<8x10xf32, #tpu.memory_space<vmem>>) attributes {dimension_semantics = [#tpu.dimension_semantics<parallel>], iteration_bounds = array<i64: 2>, scalar_prefetch = 0 : i64, scratch_operands = 0 : i64, tpu.core_type = #tpu.core_type<tc>, window_params = [{transform_indices = @transform_0, window_bounds = array<i64: 224, 28>}, {pipeline_mode = #tpu.pipeline_mode<synchronous>, transform_indices = @transform_1, window_bounds = array<i64: 3, 28, 208>}, {pipeline_mode = #tpu.pipeline_mode<synchronous>, transform_indices = @transform_2, window_bounds = array<i64: 1, 208>}, {pipeline_mode = #tpu.pipeline_mode<synchronous>, transform_indices = @transform_3, window_bounds = array<i64: 1, 208>}, {pipeline_mode = #tpu.pipeline_mode<synchronous>, transform_indices = @transform_4, window_bounds = array<i64: 3, 208, 384>}, {pipeline_mode = #tpu.pipeline_mode<synchronous>, transform_indices = @transform_5, window_bounds = array<i64: 1, 384>}, {pipeline_mode = #tpu.pipeline_mode<synchronous>, transform_indices = @transform_6, window_bounds = array<i64: 1, 384>}, {pipeline_mode = #tpu.pipeline_mode<synchronous>, transform_indices = @transform_7, window_bounds = array<i64: 368, 96>}, {pipeline_mode = #tpu.pipeline_mode<synchronous>, transform_indices = @transform_8, window_bounds = array<i64: 1, 96>}, {pipeline_mode = #tpu.pipeline_mode<synchronous>, transform_indices = @transform_9, window_bounds = array<i64: 1, 96>}, {pipeline_mode = #tpu.pipeline_mode<synchronous>, transform_indices = @transform_10, window_bounds = array<i64: 3, 96, 120>}, {pipeline_mode = #tpu.pipeline_mode<synchronous>, transform_indices = @transform_11, window_bounds = array<i64: 1, 120>}, {pipeline_mode = #tpu.pipeline_mode<synchronous>, transform_indices = @transform_12, window_bounds = array<i64: 1, 120>}, {pipeline_mode = #tpu.pipeline_mode<synchronous>, transform_indices = @transform_13, window_bounds = array<i64: 3, 120, 128>}, {pipeline_mode = #tpu.pipeline_mode<synchronous>, transform_indices = @transform_14, window_bounds = array<i64: 1, 128>}, {pipeline_mode = #tpu.pipeline_mode<synchronous>, transform_indices = @transform_15, window_bounds = array<i64: 1, 128>}, {pipeline_mode = #tpu.pipeline_mode<synchronous>, transform_indices = @transform_16, window_bounds = array<i64: 3, 128, 120>}, {pipeline_mode = #tpu.pipeline_mode<synchronous>, transform_indices = @transform_17, window_bounds = array<i64: 1, 120>}, {pipeline_mode = #tpu.pipeline_mode<synchronous>, transform_indices = @transform_18, window_bounds = array<i64: 1, 120>}, {pipeline_mode = #tpu.pipeline_mode<synchronous>, transform_indices = @transform_19, window_bounds = array<i64: 8, 207>}, {pipeline_mode = #tpu.pipeline_mode<synchronous>, transform_indices = @transform_20, window_bounds = array<i64: 120, 16>}, {pipeline_mode = #tpu.pipeline_mode<synchronous>, transform_indices = @transform_21, window_bounds = array<i64: 1, 16>}, {pipeline_mode = #tpu.pipeline_mode<synchronous>, transform_indices = @transform_22, window_bounds = array<i64: 1, 16>}, {pipeline_mode = #tpu.pipeline_mode<synchronous>, transform_indices = @transform_23, window_bounds = array<i64: 16, 10>}, {transform_indices = @transform_24, window_bounds = array<i64: 8, 10>}]} {
    %c0 = arith.constant 0 : index
    %c0_0 = arith.constant 0 : index
    %0 = vector.load %arg1[%c0, %c0_0] : memref<224x28xf32, #tpu.memory_space<vmem>>, vector<224x28xf32>
    %1 = vector.extract_strided_slice %0 {offsets = [0, 0], sizes = [222, 28], strides = [1, 1]} : vector<224x28xf32> to vector<222x28xf32>
    %2 = arith.truncf %1 : vector<222x28xf32> to vector<222x28xbf16>
    %c0_1 = arith.constant 0 : index
    %c0_2 = arith.constant 0 : index
    %c0_3 = arith.constant 0 : index
    %3 = vector.load %arg2[%c0_1, %c0_2, %c0_3] : memref<3x28x208xbf16, #tpu.memory_space<vmem>>, vector<1x28x208xbf16>
    %4 = vector.shape_cast %3 : vector<1x28x208xbf16> to vector<28x208xbf16>
    %cst = arith.constant dense<0.000000e+00> : vector<222x208xf32>
    %5 = tpu.matmul %2, %4, %cst {dimension_numbers = #tpu.dot_dimension_numbers<[1], [0], [0], [1], [0, 0, 1, 1], [], []>} : vector<222x28xbf16>, vector<28x208xbf16>, vector<222x208xf32> -> vector<222x208xf32>
    %6 = vector.extract_strided_slice %0 {offsets = [1, 0], sizes = [222, 28], strides = [1, 1]} : vector<224x28xf32> to vector<222x28xf32>
    %7 = arith.truncf %6 : vector<222x28xf32> to vector<222x28xbf16>
    %c1 = arith.constant 1 : index
    %c0_4 = arith.constant 0 : index
    %c0_5 = arith.constant 0 : index
    %8 = vector.load %arg2[%c1, %c0_4, %c0_5] : memref<3x28x208xbf16, #tpu.memory_space<vmem>>, vector<1x28x208xbf16>
    %9 = vector.shape_cast %8 : vector<1x28x208xbf16> to vector<28x208xbf16>
    %cst_6 = arith.constant dense<0.000000e+00> : vector<222x208xf32>
    %10 = tpu.matmul %7, %9, %cst_6 {dimension_numbers = #tpu.dot_dimension_numbers<[1], [0], [0], [1], [0, 0, 1, 1], [], []>} : vector<222x28xbf16>, vector<28x208xbf16>, vector<222x208xf32> -> vector<222x208xf32>
    %11 = arith.addf %5, %10 : vector<222x208xf32>
    %12 = vector.extract_strided_slice %0 {offsets = [2, 0], sizes = [222, 28], strides = [1, 1]} : vector<224x28xf32> to vector<222x28xf32>
    %13 = arith.truncf %12 : vector<222x28xf32> to vector<222x28xbf16>
    %c2 = arith.constant 2 : index
    %c0_7 = arith.constant 0 : index
    %c0_8 = arith.constant 0 : index
    %14 = vector.load %arg2[%c2, %c0_7, %c0_8] : memref<3x28x208xbf16, #tpu.memory_space<vmem>>, vector<1x28x208xbf16>
    %15 = vector.shape_cast %14 : vector<1x28x208xbf16> to vector<28x208xbf16>
    %cst_9 = arith.constant dense<0.000000e+00> : vector<222x208xf32>
    %16 = tpu.matmul %13, %15, %cst_9 {dimension_numbers = #tpu.dot_dimension_numbers<[1], [0], [0], [1], [0, 0, 1, 1], [], []>} : vector<222x28xbf16>, vector<28x208xbf16>, vector<222x208xf32> -> vector<222x208xf32>
    %17 = arith.addf %11, %16 : vector<222x208xf32>
    %cst_10 = arith.constant 0.000000e+00 : f32
    %18 = vector.broadcast %cst_10 : f32 to vector<222x208xf32>
    %19 = arith.maximumf %17, %18 : vector<222x208xf32>
    %c0_11 = arith.constant 0 : index
    %c0_12 = arith.constant 0 : index
    %20 = vector.load %arg3[%c0_11, %c0_12] : memref<1x208xf32, #tpu.memory_space<vmem>>, vector<1x208xf32>
    %21 = vector.broadcast %20 : vector<1x208xf32> to vector<222x208xf32>
    %22 = arith.mulf %19, %21 : vector<222x208xf32>
    %c0_13 = arith.constant 0 : index
    %c0_14 = arith.constant 0 : index
    %23 = vector.load %arg4[%c0_13, %c0_14] : memref<1x208xf32, #tpu.memory_space<vmem>>, vector<1x208xf32>
    %24 = vector.broadcast %23 : vector<1x208xf32> to vector<222x208xf32>
    %25 = arith.addf %22, %24 : vector<222x208xf32>
    %26 = vector.extract_strided_slice %25 {offsets = [0, 0], sizes = [220, 208], strides = [1, 1]} : vector<222x208xf32> to vector<220x208xf32>
    %27 = arith.truncf %26 : vector<220x208xf32> to vector<220x208xbf16>
    %c0_15 = arith.constant 0 : index
    %c0_16 = arith.constant 0 : index
    %c0_17 = arith.constant 0 : index
    %28 = vector.load %arg5[%c0_15, %c0_16, %c0_17] : memref<3x208x384xbf16, #tpu.memory_space<vmem>>, vector<1x208x384xbf16>
    %29 = vector.shape_cast %28 : vector<1x208x384xbf16> to vector<208x384xbf16>
    %cst_18 = arith.constant dense<0.000000e+00> : vector<220x384xf32>
    %30 = tpu.matmul %27, %29, %cst_18 {dimension_numbers = #tpu.dot_dimension_numbers<[1], [0], [0], [1], [0, 0, 1, 1], [], []>} : vector<220x208xbf16>, vector<208x384xbf16>, vector<220x384xf32> -> vector<220x384xf32>
    %31 = vector.extract_strided_slice %25 {offsets = [1, 0], sizes = [220, 208], strides = [1, 1]} : vector<222x208xf32> to vector<220x208xf32>
    %32 = arith.truncf %31 : vector<220x208xf32> to vector<220x208xbf16>
    %c1_19 = arith.constant 1 : index
    %c0_20 = arith.constant 0 : index
    %c0_21 = arith.constant 0 : index
    %33 = vector.load %arg5[%c1_19, %c0_20, %c0_21] : memref<3x208x384xbf16, #tpu.memory_space<vmem>>, vector<1x208x384xbf16>
    %34 = vector.shape_cast %33 : vector<1x208x384xbf16> to vector<208x384xbf16>
    %cst_22 = arith.constant dense<0.000000e+00> : vector<220x384xf32>
    %35 = tpu.matmul %32, %34, %cst_22 {dimension_numbers = #tpu.dot_dimension_numbers<[1], [0], [0], [1], [0, 0, 1, 1], [], []>} : vector<220x208xbf16>, vector<208x384xbf16>, vector<220x384xf32> -> vector<220x384xf32>
    %36 = arith.addf %30, %35 : vector<220x384xf32>
    %37 = vector.extract_strided_slice %25 {offsets = [2, 0], sizes = [220, 208], strides = [1, 1]} : vector<222x208xf32> to vector<220x208xf32>
    %38 = arith.truncf %37 : vector<220x208xf32> to vector<220x208xbf16>
    %c2_23 = arith.constant 2 : index
    %c0_24 = arith.constant 0 : index
    %c0_25 = arith.constant 0 : index
    %39 = vector.load %arg5[%c2_23, %c0_24, %c0_25] : memref<3x208x384xbf16, #tpu.memory_space<vmem>>, vector<1x208x384xbf16>
    %40 = vector.shape_cast %39 : vector<1x208x384xbf16> to vector<208x384xbf16>
    %cst_26 = arith.constant dense<0.000000e+00> : vector<220x384xf32>
    %41 = tpu.matmul %38, %40, %cst_26 {dimension_numbers = #tpu.dot_dimension_numbers<[1], [0], [0], [1], [0, 0, 1, 1], [], []>} : vector<220x208xbf16>, vector<208x384xbf16>, vector<220x384xf32> -> vector<220x384xf32>
    %42 = arith.addf %36, %41 : vector<220x384xf32>
    %cst_27 = arith.constant 0.000000e+00 : f32
    %43 = vector.broadcast %cst_27 : f32 to vector<220x384xf32>
    %44 = arith.maximumf %42, %43 : vector<220x384xf32>
    %c0_28 = arith.constant 0 : index
    %c0_29 = arith.constant 0 : index
    %45 = vector.load %arg6[%c0_28, %c0_29] : memref<1x384xf32, #tpu.memory_space<vmem>>, vector<1x384xf32>
    %46 = vector.broadcast %45 : vector<1x384xf32> to vector<220x384xf32>
    %47 = arith.mulf %44, %46 : vector<220x384xf32>
    %c0_30 = arith.constant 0 : index
    %c0_31 = arith.constant 0 : index
    %48 = vector.load %arg7[%c0_30, %c0_31] : memref<1x384xf32, #tpu.memory_space<vmem>>, vector<1x384xf32>
    %49 = vector.broadcast %48 : vector<1x384xf32> to vector<220x384xf32>
    %50 = arith.addf %47, %49 : vector<220x384xf32>
    %51 = vector.extract_strided_slice %50 {offsets = [0, 0], sizes = [220, 368], strides = [1, 1]} : vector<220x384xf32> to vector<220x368xf32>
    %52 = vector.extract_strided_slice %50 {offsets = [0, 16], sizes = [220, 368], strides = [1, 1]} : vector<220x384xf32> to vector<220x368xf32>
    %53 = arith.maximumf %51, %52 : vector<220x368xf32>
    %54 = vector.extract_strided_slice %53 {offsets = [0, 0], sizes = [219, 368], strides = [1, 1]} : vector<220x368xf32> to vector<219x368xf32>
    %55 = vector.extract_strided_slice %53 {offsets = [1, 0], sizes = [219, 368], strides = [1, 1]} : vector<220x368xf32> to vector<219x368xf32>
    %56 = arith.maximumf %54, %55 : vector<219x368xf32>
    %57 = arith.truncf %56 : vector<219x368xf32> to vector<219x368xbf16>
    %c0_32 = arith.constant 0 : index
    %c0_33 = arith.constant 0 : index
    %58 = vector.load %arg8[%c0_32, %c0_33] : memref<368x96xbf16, #tpu.memory_space<vmem>>, vector<368x96xbf16>
    %cst_34 = arith.constant dense<0.000000e+00> : vector<219x96xf32>
    %59 = tpu.matmul %57, %58, %cst_34 {dimension_numbers = #tpu.dot_dimension_numbers<[1], [0], [0], [1], [0, 0, 1, 1], [], []>} : vector<219x368xbf16>, vector<368x96xbf16>, vector<219x96xf32> -> vector<219x96xf32>
    %cst_35 = arith.constant 0.000000e+00 : f32
    %60 = vector.broadcast %cst_35 : f32 to vector<219x96xf32>
    %61 = arith.maximumf %59, %60 : vector<219x96xf32>
    %c0_36 = arith.constant 0 : index
    %c0_37 = arith.constant 0 : index
    %62 = vector.load %arg9[%c0_36, %c0_37] : memref<1x96xf32, #tpu.memory_space<vmem>>, vector<1x96xf32>
    %63 = vector.broadcast %62 : vector<1x96xf32> to vector<219x96xf32>
    %64 = arith.mulf %61, %63 : vector<219x96xf32>
    %c0_38 = arith.constant 0 : index
    %c0_39 = arith.constant 0 : index
    %65 = vector.load %arg10[%c0_38, %c0_39] : memref<1x96xf32, #tpu.memory_space<vmem>>, vector<1x96xf32>
    %66 = vector.broadcast %65 : vector<1x96xf32> to vector<219x96xf32>
    %67 = arith.addf %64, %66 : vector<219x96xf32>
    %68 = vector.extract_strided_slice %67 {offsets = [0, 0], sizes = [215, 96], strides = [1, 1]} : vector<219x96xf32> to vector<215x96xf32>
    %69 = arith.truncf %68 : vector<215x96xf32> to vector<215x96xbf16>
    %c0_40 = arith.constant 0 : index
    %c0_41 = arith.constant 0 : index
    %c0_42 = arith.constant 0 : index
    %70 = vector.load %arg11[%c0_40, %c0_41, %c0_42] : memref<3x96x120xbf16, #tpu.memory_space<vmem>>, vector<1x96x120xbf16>
    %71 = vector.shape_cast %70 : vector<1x96x120xbf16> to vector<96x120xbf16>
    %cst_43 = arith.constant dense<0.000000e+00> : vector<215x120xf32>
    %72 = tpu.matmul %69, %71, %cst_43 {dimension_numbers = #tpu.dot_dimension_numbers<[1], [0], [0], [1], [0, 0, 1, 1], [], []>} : vector<215x96xbf16>, vector<96x120xbf16>, vector<215x120xf32> -> vector<215x120xf32>
    %73 = vector.extract_strided_slice %67 {offsets = [2, 0], sizes = [215, 96], strides = [1, 1]} : vector<219x96xf32> to vector<215x96xf32>
    %74 = arith.truncf %73 : vector<215x96xf32> to vector<215x96xbf16>
    %c1_44 = arith.constant 1 : index
    %c0_45 = arith.constant 0 : index
    %c0_46 = arith.constant 0 : index
    %75 = vector.load %arg11[%c1_44, %c0_45, %c0_46] : memref<3x96x120xbf16, #tpu.memory_space<vmem>>, vector<1x96x120xbf16>
    %76 = vector.shape_cast %75 : vector<1x96x120xbf16> to vector<96x120xbf16>
    %cst_47 = arith.constant dense<0.000000e+00> : vector<215x120xf32>
    %77 = tpu.matmul %74, %76, %cst_47 {dimension_numbers = #tpu.dot_dimension_numbers<[1], [0], [0], [1], [0, 0, 1, 1], [], []>} : vector<215x96xbf16>, vector<96x120xbf16>, vector<215x120xf32> -> vector<215x120xf32>
    %78 = arith.addf %72, %77 : vector<215x120xf32>
    %79 = vector.extract_strided_slice %67 {offsets = [4, 0], sizes = [215, 96], strides = [1, 1]} : vector<219x96xf32> to vector<215x96xf32>
    %80 = arith.truncf %79 : vector<215x96xf32> to vector<215x96xbf16>
    %c2_48 = arith.constant 2 : index
    %c0_49 = arith.constant 0 : index
    %c0_50 = arith.constant 0 : index
    %81 = vector.load %arg11[%c2_48, %c0_49, %c0_50] : memref<3x96x120xbf16, #tpu.memory_space<vmem>>, vector<1x96x120xbf16>
    %82 = vector.shape_cast %81 : vector<1x96x120xbf16> to vector<96x120xbf16>
    %cst_51 = arith.constant dense<0.000000e+00> : vector<215x120xf32>
    %83 = tpu.matmul %80, %82, %cst_51 {dimension_numbers = #tpu.dot_dimension_numbers<[1], [0], [0], [1], [0, 0, 1, 1], [], []>} : vector<215x96xbf16>, vector<96x120xbf16>, vector<215x120xf32> -> vector<215x120xf32>
    %84 = arith.addf %78, %83 : vector<215x120xf32>
    %cst_52 = arith.constant 0.000000e+00 : f32
    %85 = vector.broadcast %cst_52 : f32 to vector<215x120xf32>
    %86 = arith.maximumf %84, %85 : vector<215x120xf32>
    %c0_53 = arith.constant 0 : index
    %c0_54 = arith.constant 0 : index
    %87 = vector.load %arg12[%c0_53, %c0_54] : memref<1x120xf32, #tpu.memory_space<vmem>>, vector<1x120xf32>
    %88 = vector.broadcast %87 : vector<1x120xf32> to vector<215x120xf32>
    %89 = arith.mulf %86, %88 : vector<215x120xf32>
    %c0_55 = arith.constant 0 : index
    %c0_56 = arith.constant 0 : index
    %90 = vector.load %arg13[%c0_55, %c0_56] : memref<1x120xf32, #tpu.memory_space<vmem>>, vector<1x120xf32>
    %91 = vector.broadcast %90 : vector<1x120xf32> to vector<215x120xf32>
    %92 = arith.addf %89, %91 : vector<215x120xf32>
    %93 = vector.extract_strided_slice %92 {offsets = [0, 0], sizes = [211, 120], strides = [1, 1]} : vector<215x120xf32> to vector<211x120xf32>
    %94 = arith.truncf %93 : vector<211x120xf32> to vector<211x120xbf16>
    %c0_57 = arith.constant 0 : index
    %c0_58 = arith.constant 0 : index
    %c0_59 = arith.constant 0 : index
    %95 = vector.load %arg14[%c0_57, %c0_58, %c0_59] : memref<3x120x128xbf16, #tpu.memory_space<vmem>>, vector<1x120x128xbf16>
    %96 = vector.shape_cast %95 : vector<1x120x128xbf16> to vector<120x128xbf16>
    %cst_60 = arith.constant dense<0.000000e+00> : vector<211x128xf32>
    %97 = tpu.matmul %94, %96, %cst_60 {dimension_numbers = #tpu.dot_dimension_numbers<[1], [0], [0], [1], [0, 0, 1, 1], [], []>} : vector<211x120xbf16>, vector<120x128xbf16>, vector<211x128xf32> -> vector<211x128xf32>
    %98 = vector.extract_strided_slice %92 {offsets = [2, 0], sizes = [211, 120], strides = [1, 1]} : vector<215x120xf32> to vector<211x120xf32>
    %99 = arith.truncf %98 : vector<211x120xf32> to vector<211x120xbf16>
    %c1_61 = arith.constant 1 : index
    %c0_62 = arith.constant 0 : index
    %c0_63 = arith.constant 0 : index
    %100 = vector.load %arg14[%c1_61, %c0_62, %c0_63] : memref<3x120x128xbf16, #tpu.memory_space<vmem>>, vector<1x120x128xbf16>
    %101 = vector.shape_cast %100 : vector<1x120x128xbf16> to vector<120x128xbf16>
    %cst_64 = arith.constant dense<0.000000e+00> : vector<211x128xf32>
    %102 = tpu.matmul %99, %101, %cst_64 {dimension_numbers = #tpu.dot_dimension_numbers<[1], [0], [0], [1], [0, 0, 1, 1], [], []>} : vector<211x120xbf16>, vector<120x128xbf16>, vector<211x128xf32> -> vector<211x128xf32>
    %103 = arith.addf %97, %102 : vector<211x128xf32>
    %104 = vector.extract_strided_slice %92 {offsets = [4, 0], sizes = [211, 120], strides = [1, 1]} : vector<215x120xf32> to vector<211x120xf32>
    %105 = arith.truncf %104 : vector<211x120xf32> to vector<211x120xbf16>
    %c2_65 = arith.constant 2 : index
    %c0_66 = arith.constant 0 : index
    %c0_67 = arith.constant 0 : index
    %106 = vector.load %arg14[%c2_65, %c0_66, %c0_67] : memref<3x120x128xbf16, #tpu.memory_space<vmem>>, vector<1x120x128xbf16>
    %107 = vector.shape_cast %106 : vector<1x120x128xbf16> to vector<120x128xbf16>
    %cst_68 = arith.constant dense<0.000000e+00> : vector<211x128xf32>
    %108 = tpu.matmul %105, %107, %cst_68 {dimension_numbers = #tpu.dot_dimension_numbers<[1], [0], [0], [1], [0, 0, 1, 1], [], []>} : vector<211x120xbf16>, vector<120x128xbf16>, vector<211x128xf32> -> vector<211x128xf32>
    %109 = arith.addf %103, %108 : vector<211x128xf32>
    %cst_69 = arith.constant 0.000000e+00 : f32
    %110 = vector.broadcast %cst_69 : f32 to vector<211x128xf32>
    %111 = arith.maximumf %109, %110 : vector<211x128xf32>
    %c0_70 = arith.constant 0 : index
    %c0_71 = arith.constant 0 : index
    %112 = vector.load %arg15[%c0_70, %c0_71] : memref<1x128xf32, #tpu.memory_space<vmem>>, vector<1x128xf32>
    %113 = vector.broadcast %112 : vector<1x128xf32> to vector<211x128xf32>
    %114 = arith.mulf %111, %113 : vector<211x128xf32>
    %c0_72 = arith.constant 0 : index
    %c0_73 = arith.constant 0 : index
    %115 = vector.load %arg16[%c0_72, %c0_73] : memref<1x128xf32, #tpu.memory_space<vmem>>, vector<1x128xf32>
    %116 = vector.broadcast %115 : vector<1x128xf32> to vector<211x128xf32>
    %117 = arith.addf %114, %116 : vector<211x128xf32>
    %118 = vector.extract_strided_slice %117 {offsets = [0, 0], sizes = [207, 128], strides = [1, 1]} : vector<211x128xf32> to vector<207x128xf32>
    %119 = arith.truncf %118 : vector<207x128xf32> to vector<207x128xbf16>
    %c0_74 = arith.constant 0 : index
    %c0_75 = arith.constant 0 : index
    %c0_76 = arith.constant 0 : index
    %120 = vector.load %arg17[%c0_74, %c0_75, %c0_76] : memref<3x128x120xbf16, #tpu.memory_space<vmem>>, vector<1x128x120xbf16>
    %121 = vector.shape_cast %120 : vector<1x128x120xbf16> to vector<128x120xbf16>
    %cst_77 = arith.constant dense<0.000000e+00> : vector<207x120xf32>
    %122 = tpu.matmul %119, %121, %cst_77 {dimension_numbers = #tpu.dot_dimension_numbers<[1], [0], [0], [1], [0, 0, 1, 1], [], []>} : vector<207x128xbf16>, vector<128x120xbf16>, vector<207x120xf32> -> vector<207x120xf32>
    %123 = vector.extract_strided_slice %117 {offsets = [2, 0], sizes = [207, 128], strides = [1, 1]} : vector<211x128xf32> to vector<207x128xf32>
    %124 = arith.truncf %123 : vector<207x128xf32> to vector<207x128xbf16>
    %c1_78 = arith.constant 1 : index
    %c0_79 = arith.constant 0 : index
    %c0_80 = arith.constant 0 : index
    %125 = vector.load %arg17[%c1_78, %c0_79, %c0_80] : memref<3x128x120xbf16, #tpu.memory_space<vmem>>, vector<1x128x120xbf16>
    %126 = vector.shape_cast %125 : vector<1x128x120xbf16> to vector<128x120xbf16>
    %cst_81 = arith.constant dense<0.000000e+00> : vector<207x120xf32>
    %127 = tpu.matmul %124, %126, %cst_81 {dimension_numbers = #tpu.dot_dimension_numbers<[1], [0], [0], [1], [0, 0, 1, 1], [], []>} : vector<207x128xbf16>, vector<128x120xbf16>, vector<207x120xf32> -> vector<207x120xf32>
    %128 = arith.addf %122, %127 : vector<207x120xf32>
    %129 = vector.extract_strided_slice %117 {offsets = [4, 0], sizes = [207, 128], strides = [1, 1]} : vector<211x128xf32> to vector<207x128xf32>
    %130 = arith.truncf %129 : vector<207x128xf32> to vector<207x128xbf16>
    %c2_82 = arith.constant 2 : index
    %c0_83 = arith.constant 0 : index
    %c0_84 = arith.constant 0 : index
    %131 = vector.load %arg17[%c2_82, %c0_83, %c0_84] : memref<3x128x120xbf16, #tpu.memory_space<vmem>>, vector<1x128x120xbf16>
    %132 = vector.shape_cast %131 : vector<1x128x120xbf16> to vector<128x120xbf16>
    %cst_85 = arith.constant dense<0.000000e+00> : vector<207x120xf32>
    %133 = tpu.matmul %130, %132, %cst_85 {dimension_numbers = #tpu.dot_dimension_numbers<[1], [0], [0], [1], [0, 0, 1, 1], [], []>} : vector<207x128xbf16>, vector<128x120xbf16>, vector<207x120xf32> -> vector<207x120xf32>
    %134 = arith.addf %128, %133 : vector<207x120xf32>
    %cst_86 = arith.constant 0.000000e+00 : f32
    %135 = vector.broadcast %cst_86 : f32 to vector<207x120xf32>
    %136 = arith.maximumf %134, %135 : vector<207x120xf32>
    %c0_87 = arith.constant 0 : index
    %c0_88 = arith.constant 0 : index
    %137 = vector.load %arg18[%c0_87, %c0_88] : memref<1x120xf32, #tpu.memory_space<vmem>>, vector<1x120xf32>
    %138 = vector.broadcast %137 : vector<1x120xf32> to vector<207x120xf32>
    %139 = arith.mulf %136, %138 : vector<207x120xf32>
    %c0_89 = arith.constant 0 : index
    %c0_90 = arith.constant 0 : index
    %140 = vector.load %arg19[%c0_89, %c0_90] : memref<1x120xf32, #tpu.memory_space<vmem>>, vector<1x120xf32>
    %141 = vector.broadcast %140 : vector<1x120xf32> to vector<207x120xf32>
    %142 = arith.addf %139, %141 : vector<207x120xf32>
    %c0_91 = arith.constant 0 : index
    %c0_92 = arith.constant 0 : index
    %143 = vector.load %arg20[%c0_91, %c0_92] : memref<8x207xbf16, #tpu.memory_space<vmem>>, vector<8x207xbf16>
    %144 = arith.truncf %142 : vector<207x120xf32> to vector<207x120xbf16>
    %cst_93 = arith.constant dense<0.000000e+00> : vector<8x120xf32>
    %145 = tpu.matmul %143, %144, %cst_93 {dimension_numbers = #tpu.dot_dimension_numbers<[1], [0], [0], [1], [0, 0, 1, 1], [], []>} : vector<8x207xbf16>, vector<207x120xbf16>, vector<8x120xf32> -> vector<8x120xf32>
    %146 = arith.truncf %145 : vector<8x120xf32> to vector<8x120xbf16>
    %c0_94 = arith.constant 0 : index
    %c0_95 = arith.constant 0 : index
    %147 = vector.load %arg21[%c0_94, %c0_95] : memref<120x16xbf16, #tpu.memory_space<vmem>>, vector<120x16xbf16>
    %cst_96 = arith.constant dense<0.000000e+00> : vector<8x16xf32>
    %148 = tpu.matmul %146, %147, %cst_96 {dimension_numbers = #tpu.dot_dimension_numbers<[1], [0], [0], [1], [0, 0, 1, 1], [], []>} : vector<8x120xbf16>, vector<120x16xbf16>, vector<8x16xf32> -> vector<8x16xf32>
    %cst_97 = arith.constant 0.000000e+00 : f32
    %149 = vector.broadcast %cst_97 : f32 to vector<8x16xf32>
    %150 = arith.maximumf %148, %149 : vector<8x16xf32>
    %c0_98 = arith.constant 0 : index
    %c0_99 = arith.constant 0 : index
    %151 = vector.load %arg22[%c0_98, %c0_99] : memref<1x16xf32, #tpu.memory_space<vmem>>, vector<1x16xf32>
    %152 = vector.broadcast %151 : vector<1x16xf32> to vector<8x16xf32>
    %153 = arith.mulf %150, %152 : vector<8x16xf32>
    %c0_100 = arith.constant 0 : index
    %c0_101 = arith.constant 0 : index
    %154 = vector.load %arg23[%c0_100, %c0_101] : memref<1x16xf32, #tpu.memory_space<vmem>>, vector<1x16xf32>
    %155 = vector.broadcast %154 : vector<1x16xf32> to vector<8x16xf32>
    %156 = arith.addf %153, %155 : vector<8x16xf32>
    %157 = arith.truncf %156 : vector<8x16xf32> to vector<8x16xbf16>
    %c0_102 = arith.constant 0 : index
    %c0_103 = arith.constant 0 : index
    %158 = vector.load %arg24[%c0_102, %c0_103] : memref<16x10xbf16, #tpu.memory_space<vmem>>, vector<16x10xbf16>
    %cst_104 = arith.constant dense<0.000000e+00> : vector<8x10xf32>
    %159 = tpu.matmul %157, %158, %cst_104 {dimension_numbers = #tpu.dot_dimension_numbers<[1], [0], [0], [1], [0, 0, 1, 1], [], []>} : vector<8x16xbf16>, vector<16x10xbf16>, vector<8x10xf32> -> vector<8x10xf32>
    %cst_105 = arith.constant dense<0xFF800000> : vector<8xf32>
    %160 = vector.multi_reduction <maximumf>, %159, %cst_105 [1] : vector<8x10xf32> to vector<8xf32>
    %161 = vector.shape_cast %160 : vector<8xf32> to vector<8x1xf32>
    %162 = vector.broadcast %161 : vector<8x1xf32> to vector<8x10xf32>
    %163 = arith.subf %159, %162 : vector<8x10xf32>
    %164 = math.exp %163 : vector<8x10xf32>
    %cst_106 = arith.constant dense<0.000000e+00> : vector<8xf32>
    %165 = vector.multi_reduction <add>, %164, %cst_106 [1] : vector<8x10xf32> to vector<8xf32>
    %166 = vector.shape_cast %165 : vector<8xf32> to vector<8x1xf32>
    %167 = math.log %166 : vector<8x1xf32>
    %168 = vector.broadcast %167 : vector<8x1xf32> to vector<8x10xf32>
    %169 = arith.subf %163, %168 : vector<8x10xf32>
    %c0_107 = arith.constant 0 : index
    %c0_108 = arith.constant 0 : index
    %170 = vector.load %arg25[%c0_107, %c0_108] : memref<8x10xf32, #tpu.memory_space<vmem>>, vector<8x10xf32>
    tpu.vector_store %arg25[%c0_107, %c0_108], %169 {strides = array<i32>} : memref<8x10xf32, #tpu.memory_space<vmem>>, vector<8x10xf32>,
    return
  }
  func.func @transform_0(%arg0: i32) -> (i32, i32) {
    %c0_i32 = arith.constant 0 : i32
    %c0_i32_0 = arith.constant 0 : i32
    return %arg0, %c0_i32 : i32, i32
  }
  func.func @transform_1(%arg0: i32) -> (i32, i32, i32) {
    %c0_i32 = arith.constant 0 : i32
    %c0_i32_0 = arith.constant 0 : i32
    %c0_i32_1 = arith.constant 0 : i32
    %c0_i32_2 = arith.constant 0 : i32
    return %c0_i32, %c0_i32_0, %c0_i32_1 : i32, i32, i32
  }
  func.func @transform_2(%arg0: i32) -> (i32, i32) {
    %c0_i32 = arith.constant 0 : i32
    %c0_i32_0 = arith.constant 0 : i32
    %c0_i32_1 = arith.constant 0 : i32
    return %c0_i32, %c0_i32_0 : i32, i32
  }
  func.func @transform_3(%arg0: i32) -> (i32, i32) {
    %c0_i32 = arith.constant 0 : i32
    %c0_i32_0 = arith.constant 0 : i32
    %c0_i32_1 = arith.constant 0 : i32
    return %c0_i32, %c0_i32_0 : i32, i32
  }
  func.func @transform_4(%arg0: i32) -> (i32, i32, i32) {
    %c0_i32 = arith.constant 0 : i32
    %c0_i32_0 = arith.constant 0 : i32
    %c0_i32_1 = arith.constant 0 : i32
    %c0_i32_2 = arith.constant 0 : i32
    return %c0_i32, %c0_i32_0, %c0_i32_1 : i32, i32, i32
  }
  func.func @transform_5(%arg0: i32) -> (i32, i32) {
    %c0_i32 = arith.constant 0 : i32
    %c0_i32_0 = arith.constant 0 : i32
    %c0_i32_1 = arith.constant 0 : i32
    return %c0_i32, %c0_i32_0 : i32, i32
  }
  func.func @transform_6(%arg0: i32) -> (i32, i32) {
    %c0_i32 = arith.constant 0 : i32
    %c0_i32_0 = arith.constant 0 : i32
    %c0_i32_1 = arith.constant 0 : i32
    return %c0_i32, %c0_i32_0 : i32, i32
  }
  func.func @transform_7(%arg0: i32) -> (i32, i32) {
    %c0_i32 = arith.constant 0 : i32
    %c0_i32_0 = arith.constant 0 : i32
    %c0_i32_1 = arith.constant 0 : i32
    return %c0_i32, %c0_i32_0 : i32, i32
  }
  func.func @transform_8(%arg0: i32) -> (i32, i32) {
    %c0_i32 = arith.constant 0 : i32
    %c0_i32_0 = arith.constant 0 : i32
    %c0_i32_1 = arith.constant 0 : i32
    return %c0_i32, %c0_i32_0 : i32, i32
  }
  func.func @transform_9(%arg0: i32) -> (i32, i32) {
    %c0_i32 = arith.constant 0 : i32
    %c0_i32_0 = arith.constant 0 : i32
    %c0_i32_1 = arith.constant 0 : i32
    return %c0_i32, %c0_i32_0 : i32, i32
  }
  func.func @transform_10(%arg0: i32) -> (i32, i32, i32) {
    %c0_i32 = arith.constant 0 : i32
    %c0_i32_0 = arith.constant 0 : i32
    %c0_i32_1 = arith.constant 0 : i32
    %c0_i32_2 = arith.constant 0 : i32
    return %c0_i32, %c0_i32_0, %c0_i32_1 : i32, i32, i32
  }
  func.func @transform_11(%arg0: i32) -> (i32, i32) {
    %c0_i32 = arith.constant 0 : i32
    %c0_i32_0 = arith.constant 0 : i32
    %c0_i32_1 = arith.constant 0 : i32
    return %c0_i32, %c0_i32_0 : i32, i32
  }
  func.func @transform_12(%arg0: i32) -> (i32, i32) {
    %c0_i32 = arith.constant 0 : i32
    %c0_i32_0 = arith.constant 0 : i32
    %c0_i32_1 = arith.constant 0 : i32
    return %c0_i32, %c0_i32_0 : i32, i32
  }
  func.func @transform_13(%arg0: i32) -> (i32, i32, i32) {
    %c0_i32 = arith.constant 0 : i32
    %c0_i32_0 = arith.constant 0 : i32
    %c0_i32_1 = arith.constant 0 : i32
    %c0_i32_2 = arith.constant 0 : i32
    return %c0_i32, %c0_i32_0, %c0_i32_1 : i32, i32, i32
  }
  func.func @transform_14(%arg0: i32) -> (i32, i32) {
    %c0_i32 = arith.constant 0 : i32
    %c0_i32_0 = arith.constant 0 : i32
    %c0_i32_1 = arith.constant 0 : i32
    return %c0_i32, %c0_i32_0 : i32, i32
  }
  func.func @transform_15(%arg0: i32) -> (i32, i32) {
    %c0_i32 = arith.constant 0 : i32
    %c0_i32_0 = arith.constant 0 : i32
    %c0_i32_1 = arith.constant 0 : i32
    return %c0_i32, %c0_i32_0 : i32, i32
  }
  func.func @transform_16(%arg0: i32) -> (i32, i32, i32) {
    %c0_i32 = arith.constant 0 : i32
    %c0_i32_0 = arith.constant 0 : i32
    %c0_i32_1 = arith.constant 0 : i32
    %c0_i32_2 = arith.constant 0 : i32
    return %c0_i32, %c0_i32_0, %c0_i32_1 : i32, i32, i32
  }
  func.func @transform_17(%arg0: i32) -> (i32, i32) {
    %c0_i32 = arith.constant 0 : i32
    %c0_i32_0 = arith.constant 0 : i32
    %c0_i32_1 = arith.constant 0 : i32
    return %c0_i32, %c0_i32_0 : i32, i32
  }
  func.func @transform_18(%arg0: i32) -> (i32, i32) {
    %c0_i32 = arith.constant 0 : i32
    %c0_i32_0 = arith.constant 0 : i32
    %c0_i32_1 = arith.constant 0 : i32
    return %c0_i32, %c0_i32_0 : i32, i32
  }
  func.func @transform_19(%arg0: i32) -> (i32, i32) {
    %c0_i32 = arith.constant 0 : i32
    %c0_i32_0 = arith.constant 0 : i32
    %c0_i32_1 = arith.constant 0 : i32
    return %c0_i32, %c0_i32_0 : i32, i32
  }
  func.func @transform_20(%arg0: i32) -> (i32, i32) {
    %c0_i32 = arith.constant 0 : i32
    %c0_i32_0 = arith.constant 0 : i32
    %c0_i32_1 = arith.constant 0 : i32
    return %c0_i32, %c0_i32_0 : i32, i32
  }
  func.func @transform_21(%arg0: i32) -> (i32, i32) {
    %c0_i32 = arith.constant 0 : i32
    %c0_i32_0 = arith.constant 0 : i32
    %c0_i32_1 = arith.constant 0 : i32
    return %c0_i32, %c0_i32_0 : i32, i32
  }
  func.func @transform_22(%arg0: i32) -> (i32, i32) {
    %c0_i32 = arith.constant 0 : i32
    %c0_i32_0 = arith.constant 0 : i32
    %c0_i32_1 = arith.constant 0 : i32
    return %c0_i32, %c0_i32_0 : i32, i32
  }
  func.func @transform_23(%arg0: i32) -> (i32, i32) {
    %c0_i32 = arith.constant 0 : i32
    %c0_i32_0 = arith.constant 0 : i32
    %c0_i32_1 = arith.constant 0 : i32
    return %c0_i32, %c0_i32_0 : i32, i32
  }
  func.func @transform_24(%arg0: i32) -> (i32, i32) {
    %c0_i32 = arith.constant 0 : i32
    %c0_i32_0 = arith.constant 0 : i32
    return %arg0, %c0_i32 : i32, i32
  }
}

</mosaic_0001>

<bundles_post_ra>
// kernel: net3_forward.1
= control target key start
LH: loop header
LB: loop body
LE: loop exit
PB: predicated region body
PF: predicated region fallthrough
CT: control target
= control target key end

     0   :  { %s16544_s0 = inlined_call_operand.vmem [shape: f32[448,28], index: 0, kind: input, shape index: {}]   ;;  %s16545_s1 = inlined_call_operand.hbm [shape: bf16[3,28,208], index: 1, kind: input, shape index: {}]   ;;  %s16546_s2 = inlined_call_operand.hbm [shape: f32[1,208], index: 2, kind: input, shape index: {}]   ;;  %s16547_s3 = inlined_call_operand.hbm [shape: f32[1,208], index: 3, kind: input, shape index: {}]   ;;  %s16548_s4 = inlined_call_operand.hbm [shape: bf16[3,208,384], index: 4, kind: input, shape index: {}]   ;;  %s16549_s5 = inlined_call_operand.hbm [shape: f32[1,384], index: 5, kind: input, shape index: {}]   ;;  %s16550_s6 = inlined_call_operand.hbm [shape: f32[1,384], index: 6, kind: input, shape index: {}]   ;;  %s16551_s7 = inlined_call_operand.vmem [shape: bf16[368,96], index: 7, kind: input, shape index: {}]   ;;  %s16552_s8 = inlined_call_operand.vmem [shape: f32[1,96], index: 8, kind: input, shape index: {}]   ;;  %s16553_s9 = inlined_call_operand.vmem [shape: f32[1,96], index: 9, kind: input, shape index: {}]   ;;  %s16554_s10 = inlined_call_operand.hbm [shape: bf16[3,96,120], index: 10, kind: input, shape index: {}]   ;;  %s16555_s11 = inlined_call_operand.hbm [shape: f32[1,120], index: 11, kind: input, shape index: {}]   ;;  %s16556_s12 = inlined_call_operand.hbm [shape: f32[1,120], index: 12, kind: input, shape index: {}]   ;;  %s16557_s13 = inlined_call_operand.vmem [shape: bf16[3,120,128], index: 13, kind: input, shape index: {}]   ;;  %s16558_s14 = inlined_call_operand.hbm [shape: f32[1,128], index: 14, kind: input, shape index: {}]   ;;  %s16559_s15 = inlined_call_operand.hbm [shape: f32[1,128], index: 15, kind: input, shape index: {}]   ;;  %s16560_s16 = inlined_call_operand.vmem [shape: bf16[3,128,120], index: 16, kind: input, shape index: {}]   ;;  %s16561_s17 = inlined_call_operand.hbm [shape: f32[1,120], index: 17, kind: input, shape index: {}]   ;;  %s16562_s18 = inlined_call_operand.hbm [shape: f32[1,120], index: 18, kind: input, shape index: {}]   ;;  %s16563_s19 = inlined_call_operand.vmem [shape: bf16[8,207], index: 19, kind: input, shape index: {}]   ;;  %s16564_s20 = inlined_call_operand.vmem [shape: bf16[120,16], index: 20, kind: input, shape index: {}]   ;;  %s16565_s21 = inlined_call_operand.vmem [shape: f32[1,16], index: 21, kind: input, shape index: {}]   ;;  %s16566_s22 = inlined_call_operand.vmem [shape: f32[1,16], index: 22, kind: input, shape index: {}]   ;;  %s16567_s23 = inlined_call_operand.vmem [shape: bf16[16,10], index: 23, kind: input, shape index: {}]   ;;  %s16568_s24 = inlined_call_operand.hbm [shape: f32[16,10], index: 24, kind: output, shape index: {}]  }
   0x1   :  { %16676 = sst [smem:[#allocation87_spill]] %s16544_s0 }
   0x2   :  { %16677 = sst [smem:[#allocation88_spill]] %s16545_s1 }
   0x3   :  { %16678 = sst [smem:[#allocation89_spill]] %s16546_s2 }
   0x4   :  { %16679 = sst [smem:[#allocation90_spill]] %s16547_s3 }
   0x5   :  { %16680 = sst [smem:[#allocation91_spill]] %s16548_s4 }
   0x6   :  { %16681 = sst [smem:[#allocation92_spill]] %s16549_s5 }
   0x7   :  { %16682 = sst [smem:[#allocation93_spill]] %s16550_s6 }
   0x8   :  { %16683 = sst [smem:[#allocation94_spill]] %s16551_s7 }
   0x9   :  { %16684 = sst [smem:[#allocation95_spill]] %s16552_s8 }
   0xa   :  { %16685 = sst [smem:[#allocation96_spill]] %s16555_s11 }
   0xb   :  { %16686 = sst [smem:[#allocation97_spill]] %s16558_s14 }
   0xc   :  { %16687 = sst [smem:[#allocation98_spill]] %s16561_s17 }
   0xd   :  { %16688 = sst [smem:[#allocation99_spill]] %s16565_s21 }
   0xe   :  { %16689 = sst [smem:[#allocation100_spill]] %s16566_s22 }
   0xf   :  { %16690 = sst [smem:[#allocation101_spill]] %s16567_s23 }
  0x10   :  { %16691 = sst [smem:[#allocation102_spill]] %s16568_s24 }
  0x11   :  { %29 = vsyncpa [#allocation3], 0 }
  0x12   :  { %30 = vsyncpa [#allocation6], 0 }
  0x13   :  { %31 = vsyncpa [#allocation9], 0 }
  0x14   :  { %32 = vsyncpa [#allocation12], 0 }
  0x15   :  { %33 = vsyncpa [#allocation15], 0 }
  0x16   :  { %34 = vsyncpa [#allocation18], 0 }
  0x17   :  { %35 = vsyncpa [#allocation21], 0 }
  0x18   :  { %36 = vsyncpa [#allocation4], 0 }
  0x19   :  { %38 = vsyncpa [#allocation4 + $0x1], 0  ;;  %s12593_s5 = smov 0   ;;  %s12595_s26 = smov 0  }
  0x1a   :  { %s12597_s27 = smov 0   ;;  %s12599_s28 = smov 0  }
  0x1b LB: > { %16692 = sst [smem:[#allocation32_spill]] %s12429_s5  ;;  %s12614_s6 = sadd.s32 4294967295, %s12441_s28   ;;  %s12441_s28 = sphi %s12599_s28, %s16993_s28   ;;  %s12437_s27 = sphi %s12597_s27, %s16996_s27   ;;  %s12433_s26 = sphi %s12595_s26, %s16995_s26   ;;  %s12429_s5 = sphi %s12593_s5, %s16994_s5  }
  0x1c   : > { %16693 = sst [smem:[#allocation33_spill]] %s12433_s26  ;;  %s9358_s2 = sadd.s32 4294967294, %s12441_s28  }
  0x1d   : > { %16694 = sst [smem:[#allocation34_spill]] %s12437_s27  ;;  %s12618_s29 = sadd.s32 1, %s12441_s28  }
  0x1e   : > { %16695 = sst [smem:[#allocation35_spill]] %s12441_s28  ;;  %s560_s0 = sadd.s32 1, %s12437_s27 }
  0x1f   : > { %16696 = sst [smem:[#allocation36_spill]] %s12618_s29  ;;  %s557_s7 = ssub.s32 %s12441_s28, %s12618_s29 }
  0x20   : > { %p570_p0 = scmp.ne.s32.totalorder %s12437_s27, %s12433_s26  ;;  %p558_p1 = scmp.eq.s32.totalorder %s557_s7, 0 }
  0x21   : > { %p571_p2 = scmp.eq.s32.totalorder %s12614_s6, 1  ;;  %p576_p3 = scmp.ne.s32.totalorder %s12433_s26, %s12429_s5 }
  0x22   : > { %p577_p4 = scmp.eq.s32.totalorder %s9358_s2, 1  ;;  %p9359_p7 = scmp.ge.s32.totalorder %s12441_s28, 1 }
  0x23   : > { %s12629_s30 = scalar_select %p558_p1, %s12437_s27, %s560_s0  }
  0x24   : > { %p12631_p5 = por %p571_p2, %p570_p0  ;;  %p12635_p6 = por %p577_p4, %p576_p3 }
  0x25   : > { %16697 = sst [smem:[#allocation37_spill]] %s12629_s30  ;;  %p584_p8 = scmp.lt.s32.totalorder %s12441_s28, 3 }
  0x26   : > { %s16698_s3 = scalar_select %p12631_p5, 1, 0 }
  0x27   : > { %s16700_s25 = scalar_select %p12635_p6, 1, 0 }
  0x28   : > { %16699 = sst [smem:[#allocation38_spill]] %s16698_s3  ;;  %p16586_p9 = scmp.eq.s32.totalorder %s12614_s6, 0 }
  0x29   : > { %16701 = sst [smem:[#allocation39_spill]] %s16700_s25  ;;  %p12642_p10 = pnand %p9359_p7, %p584_p8 }
  0x2a   : > { %s12443_s4 = smov [#allocation5]   ;;  %s12444_s2 = smov [#allocation8]  }
  0x2b   : > { %s16702_s8 = scalar_select %p12642_p10, 1, 0 }
  0x2c   : > { %s610_s1 = sshll.u32 %s12443_s4, 4  ;;  %p11377_p11 = pneg %p12642_p10  ;;  %s611_s1 = int_to_ptr.vmem [resolvable:$true] %s610_s1 }
  0x2d   : > { %s631_s0 = sshll.u32 %s12444_s2, 4  ;;  %s12445_s30 = smov [#allocation11]   ;;  %s12654_s0 = int_to_ptr.vmem [resolvable:$true] %s631_s0 }
  0x2e   : > { %p12650_p12 = pnand %p16586_p9, %p11377_p11  ;;  %s12656_s27 = sshll.u32 %s12445_s30, 4  ;;  %s657_s27 = int_to_ptr.vmem [resolvable:$true] %s12656_s27 }
  0x2f   : > { %s16704_s5 = sld [smem:[#allocation89_spill]] }
  0x30   : > { %p12666_p0 = pneg %p12650_p12 }
  0x35   : > { %s16705_s24 = smov %s16704_s5  ;;  %s11987_s4 = scalar_lea.hbm %s16704_s5, 32 }
  0x36   : > { %p11988_p13 = scmp.ne.s32.totalorder %s16705_s24, %s11987_s4  ;;  %p11994_p3 = scmp.lt.u32.totalorder %s11987_s4, %s16705_s24 }
  0x38   : > { %p11990_p1 = pnand %p12666_p0, %p11988_p13 }
  0x3a   : > { %p11991_p2 = pneg %p11990_p1 }
  0x3c   : > { %p11996_p4 = pnand %p11994_p3, %p11991_p2 }
  0x3e   : > { %11999 = shalt.err (!%p11996_p4)
}
  0x3f   : > { %s12000_s5 = scalar_lea.vmem %s611_s1, 32  ;;  %p12008_p9 = scmp.lt.s32.totalorder %s611_s1, %s611_s1 }
  0x40   : > { %p12001_p7 = scmp.ne.s32.totalorder %s611_s1, %s12000_s5  ;;  %p12009_p6 = scmp.lt.s32.totalorder %s12000_s5, %s12000_s5 }
  0x42   : > { %p12003_p8 = pnand %p12001_p7, %p12666_p0  ;;  %p12010_p5 = por %p12009_p6, %p12008_p9 }
  0x44   : > { %p12004_p11 = pneg %p12003_p8 }
  0x46   : > { %p12011_p10 = pnand %p12010_p5, %p12004_p11 }
  0x48   : > { %12014 = shalt.err (!%p12011_p10)
}
  0x49   : > { %11383 = dma.hbm_to_vmem [thread:$0]  (!%p12650_p12), %s16705_s24, 32, %s611_s1, [#allocation6]  }
  0x4a   : > { %s16707_s25 = sld [smem:[#allocation91_spill]] }
  0x50   : > { %s12015_s4 = scalar_lea.hbm %s16707_s25, 14976 }
  0x51   : > { %p12016_p13 = scmp.ne.s32.totalorder %s16707_s25, %s12015_s4  ;;  %p12022_p5 = scmp.lt.u32.totalorder %s12015_s4, %s16707_s25 }
  0x53   : > { %p12018_p1 = pnand %p12016_p13, %p12666_p0 }
  0x55   : > { %p12019_p6 = pneg %p12018_p1 }
  0x57   : > { %p12024_p9 = pnand %p12022_p5, %p12019_p6 }
  0x59   : > { %12027 = shalt.err (!%p12024_p9)
}
  0x5a   : > { %s12028_s1 = scalar_lea.vmem %s12654_s0, 14976  ;;  %p12036_p4 = scmp.lt.s32.totalorder %s12654_s0, %s12654_s0 }
  0x5b   : > { %p12029_p10 = scmp.ne.s32.totalorder %s12654_s0, %s12028_s1  ;;  %p12037_p7 = scmp.lt.s32.totalorder %s12028_s1, %s12028_s1 }
  0x5d   : > { %p12031_p2 = pnand %p12029_p10, %p12666_p0  ;;  %p12038_p8 = por %p12037_p7, %p12036_p4 }
  0x5f   : > { %p12032_p3 = pneg %p12031_p2 }
  0x61   : > { %p12039_p11 = pnand %p12038_p8, %p12032_p3 }
  0x63   : > { %12042 = shalt.err (!%p12039_p11)
}
  0x64   : > { %s12446_s22 = smov 192   ;;  %s12447_s21 = smov 12  }
  0x65   : > { %11389 = dma.hbm_to_vmem [thread:$0]  (!%p12650_p12), %s16707_s25, 14976, %s12654_s0, [#allocation9], %s12446_s22, %s12446_s22, %s12447_s21  }
  0x66   : > { %s16708_s4 = sld [smem:[#allocation93_spill]] }
  0x6c   : > { %s12043_s30 = scalar_lea.hbm %s16708_s4, 48 }
  0x6d   : > { %p12044_p13 = scmp.ne.s32.totalorder %s16708_s4, %s12043_s30  ;;  %p12050_p5 = scmp.lt.u32.totalorder %s12043_s30, %s16708_s4 }
  0x6f   : > { %p12046_p1 = pnand %p12044_p13, %p12666_p0 }
  0x71   : > { %p12047_p6 = pneg %p12046_p1 }
  0x73   : > { %p12052_p9 = pnand %p12050_p5, %p12047_p6 }
  0x75   : > { %12055 = shalt.err (!%p12052_p9)
}
  0x76   : > { %s12056_s28 = scalar_lea.vmem %s657_s27, 48  ;;  %s12063_s0 = scalar_lea.vmem %s657_s27, 64 }
  0x77   : > { %p12057_p10 = scmp.ne.s32.totalorder %s657_s27, %s12056_s28  ;;  %p12064_p4 = scmp.lt.s32.totalorder %s657_s27, %s657_s27 }
  0x78   : > { %p12065_p7 = scmp.lt.s32.totalorder %s12063_s0, %s12056_s28 }
  0x79   : > { %p12059_p2 = pnand %p12057_p10, %p12666_p0 }
  0x7a   : > { %p12066_p8 = por %p12065_p7, %p12064_p4 }
  0x7b   : > { %p12060_p3 = pneg %p12059_p2 }
  0x7d   : > { %p12067_p11 = pnand %p12066_p8, %p12060_p3 }
  0x7f   : > { %12070 = shalt.err (!%p12067_p11)
}
  0x80   : > { %11395 = dma.hbm_to_vmem [thread:$0]  (!%p12650_p12), %s16708_s4, 48, %s657_s27, [#allocation12]  }
  0x81   : > { %s12448_s23 = smov [#allocation14]   ;;  %s12449_s29 = smov [#allocation17]  }
  0x82   : > { %s689_s24 = sshll.u32 %s12448_s23, 4  ;;  %s714_s26 = sshll.u32 %s12449_s29, 4  ;;  %s690_s24 = int_to_ptr.vmem [resolvable:$true] %s689_s24  ;;  %s715_s26 = int_to_ptr.vmem [resolvable:$true] %s714_s26 }
  0x83   : > { %s16709_s11 = sld [smem:[#allocation96_spill]] }
  0x89   : > { %s12071_s5 = scalar_lea.hbm %s16709_s11, 16 }
  0x8a   : > { %p12072_p13 = scmp.ne.s32.totalorder %s16709_s11, %s12071_s5  ;;  %p12078_p5 = scmp.lt.u32.totalorder %s12071_s5, %s16709_s11 }
  0x8c   : > { %p12074_p1 = pnand %p12072_p13, %p12666_p0 }
  0x8e   : > { %p12075_p6 = pneg %p12074_p1 }
  0x90   : > { %p12080_p9 = pnand %p12078_p5, %p12075_p6 }
  0x92   : > { %12083 = shalt.err (!%p12080_p9)
}
  0x93   : > { %s12084_s27 = scalar_lea.vmem %s690_s24, 16  ;;  %s12091_s21 = scalar_lea.vmem %s690_s24, 32 }
  0x94   : > { %p12085_p10 = scmp.ne.s32.totalorder %s690_s24, %s12084_s27  ;;  %p12092_p4 = scmp.lt.s32.totalorder %s690_s24, %s690_s24 }
  0x95   : > { %p12093_p7 = scmp.lt.s32.totalorder %s12091_s21, %s12084_s27 }
  0x96   : > { %p12087_p2 = pnand %p12085_p10, %p12666_p0 }
  0x97   : > { %p12094_p8 = por %p12093_p7, %p12092_p4 }
  0x98   : > { %p12088_p3 = pneg %p12087_p2 }
  0x9a   : > { %p12095_p11 = pnand %p12094_p8, %p12088_p3 }
  0x9c   : > { %12098 = shalt.err (!%p12095_p11)
}
  0x9d   : > { %11401 = dma.hbm_to_vmem [thread:$0]  (!%p12650_p12), %s16709_s11, 16, %s690_s24, [#allocation15]  }
  0x9e   : > { %s16710_s14 = sld [smem:[#allocation97_spill]] }
  0xa4   : > { %s12099_s5 = scalar_lea.hbm %s16710_s14, 16 }
  0xa5   : > { %p12100_p13 = scmp.ne.s32.totalorder %s16710_s14, %s12099_s5  ;;  %p12106_p5 = scmp.lt.u32.totalorder %s12099_s5, %s16710_s14 }
  0xa7   : > { %p12102_p1 = pnand %p12100_p13, %p12666_p0 }
  0xa9   : > { %p12103_p6 = pneg %p12102_p1 }
  0xab   : > { %p12108_p9 = pnand %p12106_p5, %p12103_p6 }
  0xad   : > { %12111 = shalt.err (!%p12108_p9)
}
  0xae   : > { %s12112_s27 = scalar_lea.vmem %s715_s26, 16  ;;  %s12119_s24 = scalar_lea.vmem %s715_s26, 32 }
  0xaf   : > { %p12113_p10 = scmp.ne.s32.totalorder %s715_s26, %s12112_s27  ;;  %p12120_p4 = scmp.lt.s32.totalorder %s715_s26, %s715_s26 }
  0xb0   : > { %p12121_p7 = scmp.lt.s32.totalorder %s12119_s24, %s12112_s27 }
  0xb1   : > { %p12115_p2 = pnand %p12113_p10, %p12666_p0 }
  0xb2   : > { %p12122_p8 = por %p12121_p7, %p12120_p4 }
  0xb3   : > { %p12116_p3 = pneg %p12115_p2 }
  0xb5   : > { %p12123_p11 = pnand %p12122_p8, %p12116_p3 }
  0xb7   : > { %12126 = shalt.err (!%p12123_p11)
}
  0xb8   : > { %11407 = dma.hbm_to_vmem [thread:$0]  (!%p12650_p12), %s16710_s14, 16, %s715_s26, [#allocation18]  }
  0xb9   : > { %s12450_s29 = smov [#allocation20]   ;;  %s12451_s30 = smov [#allocation2]  }
  0xba   : > { %s739_s3 = sshll.u32 %s12450_s29, 4  ;;  %s596_s5 = sshll.u32 %s12451_s30, 4  ;;  %s740_s3 = int_to_ptr.vmem [resolvable:$true] %s739_s3  ;;  %s597_s5 = int_to_ptr.vmem [resolvable:$true] %s596_s5 }
  0xbb   : > { %s16711_s17 = sld [smem:[#allocation98_spill]] }
  0xc1   : > { %s12127_s0 = scalar_lea.hbm %s16711_s17, 16 }
  0xc2   : > { %p12128_p13 = scmp.ne.s32.totalorder %s16711_s17, %s12127_s0  ;;  %p12134_p5 = scmp.lt.u32.totalorder %s12127_s0, %s16711_s17 }
  0xc4   : > { %p12130_p1 = pnand %p12128_p13, %p12666_p0 }
  0xc6   : > { %p12131_p6 = pneg %p12130_p1 }
  0xc8   : > { %p12136_p9 = pnand %p12134_p5, %p12131_p6 }
  0xca   : > { %12139 = shalt.err (!%p12136_p9)
}
  0xcb   : > { %s12140_s26 = scalar_lea.vmem %s740_s3, 16  ;;  %s12147_s23 = scalar_lea.vmem %s740_s3, 32 }
  0xcc   : > { %p12141_p10 = scmp.ne.s32.totalorder %s740_s3, %s12140_s26  ;;  %p12148_p4 = scmp.lt.s32.totalorder %s740_s3, %s740_s3 }
  0xcd   : > { %p12149_p7 = scmp.lt.s32.totalorder %s12147_s23, %s12140_s26 }
  0xce   : > { %p12143_p2 = pnand %p12141_p10, %p12666_p0 }
  0xcf   : > { %p12150_p8 = por %p12149_p7, %p12148_p4 }
  0xd0   : > { %p12144_p3 = pneg %p12143_p2 }
  0xd2   : > { %p12151_p11 = pnand %p12150_p8, %p12144_p3 }
  0xd4   : > { %12154 = shalt.err (!%p12151_p11)
}
  0xd5   : > { %11413 = dma.hbm_to_vmem [thread:$0]  (!%p12650_p12), %s16711_s17, 16, %s740_s3, [#allocation21]  }
  0xd6   : > { %s16712_s0 = sld [smem:[#allocation88_spill]] }
  0xdc   : > { %s12155_s22 = scalar_lea.hbm %s16712_s0, 1536 }
  0xdd   : > { %p12156_p13 = scmp.ne.s32.totalorder %s16712_s0, %s12155_s22  ;;  %p12162_p5 = scmp.lt.u32.totalorder %s12155_s22, %s16712_s0 }
  0xdf   : > { %p12158_p1 = pnand %p12156_p13, %p12666_p0 }
  0xe1   : > { %p12159_p6 = pneg %p12158_p1 }
  0xe3   : > { %p12164_p9 = pnand %p12162_p5, %p12159_p6 }
  0xe5   : > { %12167 = shalt.err (!%p12164_p9)
}
  0xe6   : > { %s12168_s23 = scalar_lea.vmem %s597_s5, 1536  ;;  %p12176_p4 = scmp.lt.s32.totalorder %s597_s5, %s597_s5 }
  0xe7   : > { %p12169_p10 = scmp.ne.s32.totalorder %s597_s5, %s12168_s23  ;;  %p12177_p7 = scmp.lt.s32.totalorder %s12168_s23, %s12168_s23 }
  0xe9   : > { %p12171_p2 = pnand %p12169_p10, %p12666_p0  ;;  %p12178_p8 = por %p12177_p7, %p12176_p4 }
  0xeb   : > { %p12172_p3 = pneg %p12171_p2 }
  0xed   : > { %p12179_p11 = pnand %p12178_p8, %p12172_p3 }
  0xef   : > { %12182 = shalt.err (!%p12179_p11)
}
  0xf0   : > { %s12452_s3 = smov 128   ;;  %s12453_s29 = smov 8  }
  0xf1   : > { %11380 = dma.hbm_to_vmem [thread:$0]  (!%p12650_p12), %s16712_s0, 1536, %s597_s5, [#allocation3], %s12452_s3, %s12452_s3, %s12453_s29  }
  0xf2   : > { %s12454_s28 = smov [#allocation7]   ;;  %s12455_s27 = smov [#allocation10]  }
  0xf3   : > { %s621_s22 = sshll.u32 %s12454_s28, 4  ;;  %s645_s24 = sshll.u32 %s12455_s27, 4  ;;  %s622_s22 = int_to_ptr.vmem [resolvable:$true] %s621_s22  ;;  %s646_s24 = int_to_ptr.vmem [resolvable:$true] %s645_s24 }
  0xf4   : > { %s16713_s23 = sld [smem:[#allocation90_spill]] }
  0xfa   : > { %s12183_s4 = scalar_lea.hbm %s16713_s23, 32 }
  0xfb   : > { %p12184_p13 = scmp.ne.s32.totalorder %s16713_s23, %s12183_s4  ;;  %p12190_p5 = scmp.lt.u32.totalorder %s12183_s4, %s16713_s23 }
  0xfd   : > { %p12186_p1 = pnand %p12184_p13, %p12666_p0 }
  0xff   : > { %p12187_p6 = pneg %p12186_p1 }
 0x101   : > { %p12192_p9 = pnand %p12190_p5, %p12187_p6 }
 0x103   : > { %12195 = shalt.err (!%p12192_p9)
}
 0x104   : > { %s12196_s5 = scalar_lea.vmem %s622_s22, 32  ;;  %p12204_p4 = scmp.lt.s32.totalorder %s622_s22, %s622_s22 }
 0x105   : > { %p12197_p10 = scmp.ne.s32.totalorder %s622_s22, %s12196_s5  ;;  %p12205_p7 = scmp.lt.s32.totalorder %s12196_s5, %s12196_s5 }
 0x107   : > { %p12199_p2 = pnand %p12197_p10, %p12666_p0  ;;  %p12206_p8 = por %p12205_p7, %p12204_p4 }
 0x109   : > { %p12200_p3 = pneg %p12199_p2 }
 0x10b   : > { %p12207_p11 = pnand %p12206_p8, %p12200_p3 }
 0x10d   : > { %12210 = shalt.err (!%p12207_p11)
}
 0x10e   : > { %11386 = dma.hbm_to_vmem [thread:$0]  (!%p12650_p12), %s16713_s23, 32, %s622_s22, [#allocation6]  }
 0x10f   : > { %s16714_s4 = sld [smem:[#allocation92_spill]] }
 0x115   : > { %s12211_s3 = scalar_lea.hbm %s16714_s4, 48 }
 0x116   : > { %p12212_p13 = scmp.ne.s32.totalorder %s16714_s4, %s12211_s3  ;;  %p12218_p5 = scmp.lt.u32.totalorder %s12211_s3, %s16714_s4 }
 0x118   : > { %p12214_p1 = pnand %p12212_p13, %p12666_p0 }
 0x11a   : > { %p12215_p6 = pneg %p12214_p1 }
 0x11c   : > { %p12220_p9 = pnand %p12218_p5, %p12215_p6 }
 0x11e   : > { %12223 = shalt.err (!%p12220_p9)
}
 0x11f   : > { %s12224_s27 = scalar_lea.vmem %s646_s24, 48  ;;  %s12231_s22 = scalar_lea.vmem %s646_s24, 64 }
 0x120   : > { %p12225_p10 = scmp.ne.s32.totalorder %s646_s24, %s12224_s27  ;;  %p12232_p4 = scmp.lt.s32.totalorder %s646_s24, %s646_s24 }
 0x121   : > { %p12233_p7 = scmp.lt.s32.totalorder %s12231_s22, %s12224_s27 }
 0x122   : > { %p12227_p2 = pnand %p12225_p10, %p12666_p0 }
 0x123   : > { %p12234_p8 = por %p12233_p7, %p12232_p4 }
 0x124   : > { %p12228_p3 = pneg %p12227_p2 }
 0x126   : > { %p12235_p11 = pnand %p12234_p8, %p12228_p3 }
 0x128   : > { %12238 = shalt.err (!%p12235_p11)
}
 0x129   : > { %11392 = dma.hbm_to_vmem [thread:$0]  (!%p12650_p12), %s16714_s4, 48, %s646_s24, [#allocation9]  }
 0x12a   : > { %s12456_s5 = smov [#allocation13]   ;;  %s12239_s25 = scalar_lea.hbm %s16554_s10, 2304 }
 0x12b   : > { %s675_s11 = sshll.u32 %s12456_s5, 4  ;;  %p12240_p13 = scmp.ne.s32.totalorder %s16554_s10, %s12239_s25  ;;  %s676_s11 = int_to_ptr.vmem [resolvable:$true] %s675_s11 }
 0x12c   : > { %p12246_p5 = scmp.lt.u32.totalorder %s12239_s25, %s16554_s10 }
 0x12d   : > { %p12242_p1 = pnand %p12240_p13, %p12666_p0 }
 0x12f   : > { %p12243_p6 = pneg %p12242_p1 }
 0x131   : > { %p12248_p9 = pnand %p12246_p5, %p12243_p6 }
 0x133   : > { %12251 = shalt.err (!%p12248_p9)
}
 0x134   : > { %s12252_s24 = scalar_lea.vmem %s676_s11, 2304  ;;  %p12260_p4 = scmp.lt.s32.totalorder %s676_s11, %s676_s11 }
 0x135   : > { %p12253_p10 = scmp.ne.s32.totalorder %s676_s11, %s12252_s24  ;;  %p12261_p7 = scmp.lt.s32.totalorder %s12252_s24, %s12252_s24 }
 0x137   : > { %p12255_p2 = pnand %p12253_p10, %p12666_p0  ;;  %p12262_p8 = por %p12261_p7, %p12260_p4 }
 0x139   : > { %p12256_p3 = pneg %p12255_p2 }
 0x13b   : > { %p12263_p11 = pnand %p12262_p8, %p12256_p3 }
 0x13d   : > { %12266 = shalt.err (!%p12263_p11)
}
 0x13e   : > { %s12457_s28 = smov 64   ;;  %s12458_s27 = smov 4  }
 0x13f   : > { %11398 = dma.hbm_to_vmem [thread:$0]  (!%p12650_p12), %s16554_s10, 2304, %s676_s11, [#allocation12], %s12457_s28, %s12457_s28, %s12458_s27  }
 0x140   : > { %s12459_s26 = smov [#allocation16]   ;;  %s12460_s14 = smov [#allocation19]  }
 0x141   : > { %s700_s5 = sshll.u32 %s12459_s26, 4  ;;  %s725_s17 = sshll.u32 %s12460_s14, 4  ;;  %s701_s5 = int_to_ptr.vmem [resolvable:$true] %s700_s5  ;;  %s12850_s17 = int_to_ptr.vmem [resolvable:$true] %s725_s17 }
 0x142   : > { %s12267_s29 = scalar_lea.hbm %s16556_s12, 16 }
 0x143   : > { %p12268_p13 = scmp.ne.s32.totalorder %s16556_s12, %s12267_s29  ;;  %p12274_p5 = scmp.lt.u32.totalorder %s12267_s29, %s16556_s12 }
 0x145   : > { %p12270_p1 = pnand %p12268_p13, %p12666_p0 }
 0x147   : > { %p12271_p6 = pneg %p12270_p1 }
 0x149   : > { %p12276_p9 = pnand %p12274_p5, %p12271_p6 }
 0x14b   : > { %12279 = shalt.err (!%p12276_p9)
}
 0x14c   : > { %s12280_s28 = scalar_lea.vmem %s701_s5, 16  ;;  %s12287_s27 = scalar_lea.vmem %s701_s5, 32 }
 0x14d   : > { %p12281_p10 = scmp.ne.s32.totalorder %s701_s5, %s12280_s28  ;;  %p12288_p4 = scmp.lt.s32.totalorder %s701_s5, %s701_s5 }
 0x14e   : > { %p12289_p7 = scmp.lt.s32.totalorder %s12287_s27, %s12280_s28 }
 0x14f   : > { %p12283_p2 = pnand %p12281_p10, %p12666_p0 }
 0x150   : > { %p12290_p8 = por %p12289_p7, %p12288_p4 }
 0x151   : > { %p12284_p3 = pneg %p12283_p2 }
 0x153   : > { %p12291_p11 = pnand %p12290_p8, %p12284_p3 }
 0x155   : > { %12294 = shalt.err (!%p12291_p11)
}
 0x156   : > { %11404 = dma.hbm_to_vmem [thread:$0]  (!%p12650_p12), %s16556_s12, 16, %s701_s5, [#allocation15]  }
 0x157   : > { %s12295_s25 = scalar_lea.hbm %s16559_s15, 16 }
 0x158   : > { %p12296_p13 = scmp.ne.s32.totalorder %s16559_s15, %s12295_s25  ;;  %p12302_p5 = scmp.lt.u32.totalorder %s12295_s25, %s16559_s15 }
 0x15a   : > { %p12298_p1 = pnand %p12296_p13, %p12666_p0 }
 0x15c   : > { %p12299_p6 = pneg %p12298_p1 }
 0x15e   : > { %p12304_p9 = pnand %p12302_p5, %p12299_p6 }
 0x160   : > { %12307 = shalt.err (!%p12304_p9)
}
 0x161   : > { %s12308_s5 = scalar_lea.vmem %s12850_s17, 16  ;;  %s12315_s24 = scalar_lea.vmem %s12850_s17, 32 }
 0x162   : > { %p12309_p10 = scmp.ne.s32.totalorder %s12850_s17, %s12308_s5  ;;  %p12316_p4 = scmp.lt.s32.totalorder %s12850_s17, %s12850_s17 }
 0x163   : > { %p12317_p7 = scmp.lt.s32.totalorder %s12315_s24, %s12308_s5 }
 0x164   : > { %p12311_p2 = pnand %p12309_p10, %p12666_p0 }
 0x165   : > { %p12318_p8 = por %p12317_p7, %p12316_p4 }
 0x166   : > { %p12312_p3 = pneg %p12311_p2 }
 0x168   : > { %p12319_p11 = pnand %p12318_p8, %p12312_p3 }
 0x16a   : > { %12322 = shalt.err (!%p12319_p11)
}
 0x16b   : > { %11410 = dma.hbm_to_vmem [thread:$0]  (!%p12650_p12), %s16559_s15, 16, %s12850_s17, [#allocation18]  }
 0x16c   : > { %s12461_s27 = smov [#allocation22]   ;;  %s12323_s14 = scalar_lea.hbm %s16562_s18, 16 }
 0x16d   : > { %s750_s22 = sshll.u32 %s12461_s27, 4  ;;  %p12324_p13 = scmp.ne.s32.totalorder %s16562_s18, %s12323_s14  ;;  %s751_s22 = int_to_ptr.vmem [resolvable:$true] %s750_s22 }
 0x16e   : > { %p12330_p5 = scmp.lt.u32.totalorder %s12323_s14, %s16562_s18 }
 0x16f   : > { %p12326_p1 = pnand %p12324_p13, %p12666_p0 }
 0x171   : > { %p12327_p6 = pneg %p12326_p1 }
 0x173   : > { %p12332_p9 = pnand %p12330_p5, %p12327_p6 }
 0x175   : > { %12335 = shalt.err (!%p12332_p9)
}
 0x176   : > { %s12336_s17 = scalar_lea.vmem %s751_s22, 16  ;;  %s12343_s1 = scalar_lea.vmem %s751_s22, 32 }
 0x177   : > { %p12337_p10 = scmp.ne.s32.totalorder %s751_s22, %s12336_s17  ;;  %p12344_p4 = scmp.lt.s32.totalorder %s751_s22, %s751_s22 }
 0x178   : > { %p12345_p7 = scmp.lt.s32.totalorder %s12343_s1, %s12336_s17 }
 0x179   : > { %p12339_p2 = pnand %p12337_p10, %p12666_p0 }
 0x17a   : > { %p12346_p8 = por %p12345_p7, %p12344_p4 }
 0x17b   : > { %p12340_p3 = pneg %p12339_p2 }
 0x17d   : > { %p12347_p11 = pnand %p12346_p8, %p12340_p3 }
 0x17f   : > { %12350 = shalt.err (!%p12347_p11)
}
 0x180   : > { %11416 = dma.hbm_to_vmem [thread:$0]  (!%p12650_p12), %s16562_s18, 16, %s751_s22, [#allocation21]  }
 0x181   : > { %p16715_p13 = scmp.ne.s32.totalorder %s16702_s8, 0 }
 0x183   : > { %787 = sbr.rel (%p16715_p13) target bundleno = 4344 (0x10f8), region = 116 }
 0x18a   : > { %p16716_p1 = scmp.eq.s32.totalorder %s12614_s6, 0 }
 0x18c   : > { %12396 = dma.done.wait (%p16716_p1), [#allocation3], 1536   ;;  %p16717_p0 = pmov %p16716_p1 }
 0x18e   : > { %12398 = vsyncadd (%p16717_p0), [#allocation3], 4294965760  ;;  %p16718_p6 = pmov %p16717_p0 }
 0x18f   : > { %p16719_p5 = pmov %p16717_p0 }
 0x190   : > { %12400 = dma.done.wait (%p16718_p6), [#allocation6], 64  }
 0x191   : > { %12402 = vsyncadd (%p16719_p5), [#allocation6], 4294967232  ;;  %p16720_p9 = pmov %p16717_p0 }
 0x192   : > { %p16721_p12 = pmov %p16717_p0 }
 0x193   : > { %12404 = dma.done.wait (%p16720_p9), [#allocation9], 15024  }
 0x194   : > { %12406 = vsyncadd (%p16721_p12), [#allocation9], 4294952272  ;;  %p16722_p10 = pmov %p16717_p0 }
 0x195   : > { %p16723_p2 = pmov %p16717_p0 }
 0x196   : > { %12408 = dma.done.wait (%p16722_p10), [#allocation12], 2352  }
 0x197   : > { %12410 = vsyncadd (%p16723_p2), [#allocation12], 4294964944  ;;  %p16724_p3 = pmov %p16717_p0 }
 0x198   : > { %p16725_p4 = pmov %p16717_p0 }
 0x199   : > { %12412 = dma.done.wait (%p16724_p3), [#allocation15], 32  }
 0x19a   : > { %12414 = vsyncadd (%p16725_p4), [#allocation15], 4294967264  ;;  %p16726_p7 = pmov %p16717_p0 }
 0x19b   : > { %p16727_p8 = pmov %p16717_p0 }
 0x19c   : > { %12416 = dma.done.wait (%p16726_p7), [#allocation18], 32  }
 0x19d   : > { %12418 = vsyncadd (%p16727_p8), [#allocation18], 4294967264  ;;  %p16728_p11 = pmov %p16717_p0 }
 0x19e   : > { %p16729_p13 = pmov %p16717_p0 }
 0x19f   : > { %12420 = dma.done.wait (%p16728_p11), [#allocation21], 32  }
 0x1a0   : > { %12422 = vsyncadd (%p16729_p13), [#allocation21], 4294967264  ;;  %s901_s8 = smul.u32 28, %s12614_s6  ;;  %v16592_v0 = vmov 0   ;;  %v11709_v1 = vld [vmem:[#allocation2 + $0x24] ss:$8 sps:$4 sm:$0xff]  }
 0x1a1   : > { %1171 = vmatprep.mubr.bf16.mxu0 %v16592_v0  ;;  %s16730_s28 = sld [smem:[#allocation87_spill]]  ;;  %v11711_v2 = vld [vmem:[#allocation2 + $0x20] ss:$8 sps:$4 sm:$0xff]   ;;  %vm1132_vm0 = vcmask 1045504   ;;  %1139 = vmatprep.subr.bf16.mxu0 %v11709_v1  ;;  %v11717_v12 = vld [vmem:[#allocation2 + $0x4] ss:$8 sps:$4 sm:$0xff]  }
 0x1a2   : > { %p902_p1 = scmp.lt.s32.totalorder %s901_s8, 55  ;;  %v11712_v3 = vld [vmem:[#allocation2 + $0x34] ss:$8 sps:$4 sm:$0x3f]   ;;  %1140 = vmatpush1.bf16.msra.mxu0 %v11711_v2  ;;  %vm959_vm1 = vsmask.f32 7424 }
 0x1a3   : > { %v11714_v4 = vld [vmem:[#allocation2 + $0x30] ss:$8 sps:$4 sm:$0x3f]   ;;  %9394 = vmatprep.subr.msk.bf16.mxu0 %vm1132_vm0, %v11712_v3  ;;  %vm1089_vm2 = vcmask 228352   ;;  %v11715_v22 = vld [vmem:[#allocation2] ss:$8 sps:$4 sm:$0xff]  }
 0x1a4   : > { %s16998_s8 = smov (!%p902_p1, %s901_s8), 55  ;;  %v1134_v8 = vsel %vm1132_vm0, %v11714_v4, 0  ;;  %v11718_v28 = vld [vmem:[#allocation2 + $0x14] ss:$8 sps:$4 sm:$0x3f]   ;;  %vm1556_vm3 = vcmask 1046528  }
 0x1a5   : > { %s9389_s7 = sshll.u32 %s16998_s8, 3  ;;  %v11720_v29 = vld [vmem:[#allocation2 + $0x10] ss:$8 sps:$4 sm:$0x3f]   ;;  %v11723_v36 = vld [vmem:[#allocation2 + $0x44] ss:$8 sps:$4 sm:$0xff]  }
 0x1a6   : > { %1142 = vmatpush1.bf16.msra.mxu0 %v1134_v8  ;;  %v1359_v35 = vsel %vm1132_vm0, %v11720_v29, 0  ;;  %vm2648_vm4 = vcmask 654336   ;;  %s16753_s26 = sld [smem:[#allocation94_spill]]  ;;  %vm4902_vm5 = vcmask 916480   ;;  %vm6318_vm6 = vcmask 785408   ;;  %s16983_s29 = sld [smem:[#allocation100_spill]] }
 0x1a7   : > { %s12947_s27 = scalar_lea.vmem %s16730_s28, %s9389_s7  ;;  %1364 = vmatprep.subr.bf16.mxu0 %v11717_v12  ;;  %s12463_s7 = smov 112   ;;  %vm7286_vm7 = vcmask 1043456   ;;  %vm7243_vm8 = vcmask 982016   ;;  %vm12465_vm9 = vmmov 0   ;;  %vm8918_vm10 = vcmask 646144  }
 0x1a8   : > { %v908_v5 = vld [vmem:[%s12947_s27] sm:$0xff]  ;;  %v909_v6 = vld [vmem:[%s12947_s27 + $0x8] sm:$0xff]  ;;  %v910_v7 = vld [vmem:[%s12947_s27 + $0x10] sm:$0xff]  ;;  %vm8922_vm11 = vcmask 1047552   ;;  %vm9101_vm12 = vcmask 130048   ;;  %vm9145_vm13 = vcmask 80896  }
 0x1a9   : > { %v911_v9 = vld [vmem:[%s12947_s27 + $0x18] sm:$0xff]  ;;  %v12955_v10 = vpack.c.bf16 %v909_v6, %v908_v5  ;;  %v912_v13 = vld [vmem:[%s12947_s27 + $0x20] sm:$0xff]  ;;  %v913_v16 = vld [vmem:[%s12947_s27 + $0x28] sm:$0xff]  ;;  %s16984_s30 = sld [smem:[#allocation33_spill]]  ;;  %s16985_s17 = sld [smem:[#allocation38_spill]] }
 0x1aa   : > { %v12957_v11 = vpack.c.bf16 %v911_v9, %v910_v7  ;;  %v12964_v18 = vpack.c.bf16 %v913_v16, %v912_v13  ;;  %v914_v25 = vld [vmem:[%s12947_s27 + $0x30] sm:$0xff]  ;;  %v915_v26 = vld [vmem:[%s12947_s27 + $0x38] sm:$0xff]  ;;  %v916_v33 = vld [vmem:[%s12947_s27 + $0x40] sm:$0xff]  ;;  %s9922_s24 = sshll.u32 %s12614_s6, 7  ;;  %s16986_s28 = sld [smem:[#allocation102_spill]] }
 0x1ab   : > { %v961_v14 = vshrl.u32 %v12955_v10, 16  ;;  %v963_v15 = vshll.u32 %v12955_v10, 16  ;;  %v12973_v32 = vpack.c.bf16 %v915_v26, %v914_v25  ;;  %v917_v34 = vld [vmem:[%s12947_s27 + $0x48] sm:$0xff]  ;;  %v918_v41 = vld [vmem:[%s12947_s27 + $0x50] sm:$0xff]  ;;  %v919_v42 = vld [vmem:[%s12947_s27 + $0x58] sm:$0xff]  ;;  %s12467_s6 = smov [#allocation23]  }
 0x1ac   : > { %v968_v17 = vshll.u32 %v12957_v11, 16  ;;  %v972_v23 = vshrl.u32 %v12957_v11, 16  ;;  %v976_v24 = vshll.u32 %v12964_v18, 16  ;;  %v980_v38 = vshrl.u32 %v12964_v18, 16  ;;  %v920_v53 = vld [vmem:[%s12947_s27 + $0x60] sm:$0xff]  ;;  %v921_v54 = vld [vmem:[%s12947_s27 + $0x68] sm:$0xff]  ;;  %s16754_s14 = smov %s16753_s26 }
 0x1ad   : > { %v965_v19 = vrot.slane %v963_v15, 1  ;;  %v984_v39 = vshll.u32 %v12973_v32, 16  ;;  %v12982_v40 = vpack.c.bf16 %v917_v34, %v916_v33  ;;  %v12989_v46 = vpack.c.bf16 %v919_v42, %v918_v41  ;;  %v922_v57 = vld [vmem:[%s12947_s27 + $0x70] sm:$0xff]  ;;  %v923_v58 = vld [vmem:[%s12947_s27 + $0x78] sm:$0xff]  ;;  %v924_v6 = vld [vmem:[%s12947_s27 + $0x80] sm:$0xff]  ;;  %s12355_s25 = sshll.u32 %s12467_s6, 4  ;;  %s12356_s25 = int_to_ptr.vmem [resolvable:$false] %s12355_s25 }
 0x1ae   : > { %v970_v20 = vrot.slane %v968_v17, 1  ;;  %v978_v31 = vrot.slane %v976_v24, 1  ;;  %v988_v48 = vshrl.u32 %v12973_v32, 16  ;;  %v13000_v56 = vpack.c.bf16 %v921_v54, %v920_v53  ;;  %v925_v7 = vld [vmem:[%s12947_s27 + $0x88] sm:$0xff]  ;;  %v926_v8 = vld [vmem:[%s12947_s27 + $0x90] sm:$0xff]  ;;  %v927_v9 = vld [vmem:[%s12947_s27 + $0x98] sm:$0xff] }
 0x1af   : > { %v966_v21 = vor.u32 %v965_v19, %v961_v14  ;;  %v986_v44 = vrot.slane %v984_v39, 1  ;;  %v992_v45 = vshll.u32 %v12982_v40, 16  ;;  %v996_v50 = vshrl.u32 %v12982_v40, 16  ;;  %v928_v12 = vld [vmem:[%s12947_s27 + $0xa0] sm:$0xff]  ;;  %v929_v13 = vld [vmem:[%s12947_s27 + $0xa8] sm:$0xff]  ;;  %v930_v14 = vld [vmem:[%s12947_s27 + $0xb0] sm:$0xff] }
 0x1b0   : > { %v974_v30 = vor.u32 %v972_v23, %v970_v20  ;;  %v982_v43 = vor.u32 %v980_v38, %v978_v31  ;;  %v1000_v51 = vshll.u32 %v12989_v46, 16  ;;  %v1008_v61 = vshll.u32 %v13000_v56, 16  ;;  %v931_v15 = vld [vmem:[%s12947_s27 + $0xb8] sm:$0xff]  ;;  %v932_v16 = vld [vmem:[%s12947_s27 + $0xc0] sm:$0xff]  ;;  %v933_v17 = vld [vmem:[%s12947_s27 + $0xc8] sm:$0xff]  ;;  %s898_s1 = sand.u32 1, %s16984_s30   ;;  %s16987_s22 = smov %s16986_s28 }
 0x1b1   : > { %v971_v27 = vsel %vm959_vm1, %v966_v21, %v970_v20  ;;  %v994_v49 = vrot.slane %v992_v45, 1  ;;  %v990_v52 = vor.u32 %v988_v48, %v986_v44  ;;  %v13007_v62 = vpack.c.bf16 %v923_v58, %v922_v57  ;;  %v934_v25 = vld [vmem:[%s12947_s27 + $0xd0] sm:$0xff]  ;;  %v935_v26 = vld [vmem:[%s12947_s27 + $0xd8] sm:$0xff]  ;;  %s16979_s27 = sld [smem:[#allocation95_spill]]  ;;  %s9388_s5 = sshll.u32 %s898_s1, 3 }
 0x1b2   : > { %9395 = vmatmul.mubr.msk.bf16.vlgmr.msra.gmra.mrb[0].mxu0 %vm1089_vm2, %v971_v27  ;;  %v979_v37 = vsel %vm959_vm1, %v974_v30, %v978_v31  ;;  %v987_v47 = vsel %vm959_vm1, %v982_v43, %v986_v44  ;;  %v1002_v60 = vrot.slane %v1000_v51, 1  ;;  %v1004_v1 = vshrl.u32 %v12989_v46, 16  ;;  %s900_s8 = scalar_lea.vmem [#allocation23], %s9388_s5  ;;  %s9160_s21 = scalar_lea.sflag [#allocation4], %s898_s1 }
 0x1b3   : > { %1365 = vmatpush1.bf16.msra.mxu0 %v11715_v22  ;;  %1181 = vmatprep.mubr.bf16.mxu0 %v16592_v0  ;;  %v995_v55 = vsel %vm959_vm1, %v990_v52, %v994_v49  ;;  %v998_v59 = vor.u32 %v996_v50, %v994_v49  ;;  %v1010_v2 = vrot.slane %v1008_v61, 1  ;;  %v1012_v3 = vshrl.u32 %v13000_v56, 16  ;;  %p16988_p6 = scmp.ne.s32.totalorder %s16985_s17, 0  ;;  %s12357_s3 = scalar_lea.vmem %s12356_s25, 256 }
 0x1b4   : > { %9413 = vmatprep.subr.msk.bf16.mxu0 %vm1132_vm0, %v11718_v28  ;;  %v1016_v4 = vshll.u32 %v13007_v62, 16  ;;  %v1006_v5 = vor.u32 %v1004_v1, %v1002_v60  ;;  %v13026_v20 = vpack.c.bf16 %v925_v7, %v924_v6  ;;  %v13028_v21 = vpack.c.bf16 %v927_v9, %v926_v8  ;;  %v11726_v6 = vld [vmem:[#allocation2 + $0x50] ss:$8 sps:$4 sm:$0x3f]   ;;  %v11727_v9 = vld [vmem:[#allocation8 + $0x13c] ss:$12 sps:$4 sm:$0xff]  }
 0x1b5   : > { %v1003_v63 = vsel %vm959_vm1, %v998_v59, %v1002_v60  ;;  %v13031_v22 = vpack.c.bf16 %v929_v13, %v928_v12  ;;  %v13033_v23 = vpack.c.bf16 %v931_v15, %v930_v14  ;;  %v13035_v24 = vpack.c.bf16 %v933_v17, %v932_v16  ;;  %v11724_v7 = vld [vmem:[#allocation2 + $0x54] ss:$8 sps:$4 sm:$0x3f]   ;;  %v11730_v13 = vld [vmem:[#allocation8 + $0x154] ss:$12 sps:$4 sm:$0xff]   ;;  %2691 = vmatprep.subr.bf16.mxu1 %v11727_v9 }
 0x1b6   : > { %v1011_v19 = vsel %vm959_vm1, %v1006_v5, %v1010_v2  ;;  %v1014_v27 = vor.u32 %v1012_v3, %v1010_v2  ;;  %v1018_v28 = vrot.slane %v1016_v4, 1  ;;  %v1024_v29 = vshll.u32 %v13026_v20, 16  ;;  %v11721_v5 = vld [vmem:[#allocation2 + $0x40] ss:$8 sps:$4 sm:$0xff]   ;;  %v11733_v15 = vld [vmem:[#allocation8 + $0x16c] ss:$12 sps:$4 sm:$0xff]  }
 0x1b7   : > { %1367 = vmatpush1.bf16.msra.mxu0 %v1359_v35  ;;  %v1032_v30 = vshll.u32 %v13028_v21, 16  ;;  %v1040_v31 = vshll.u32 %v13031_v22, 16  ;;  %v1048_v33 = vshll.u32 %v13033_v23, 16  ;;  %v1056_v34 = vshll.u32 %v13035_v24, 16  ;;  %v11729_v12 = vld [vmem:[#allocation8 + $0x138] ss:$12 sps:$4 sm:$0xff]  }
 0x1b8   : > { %1650 = vmatprep.subr.bf16.mxu0 %v11723_v36  ;;  %v1019_v35 = vsel %vm959_vm1, %v1014_v27, %v1018_v28  ;;  %v1020_v36 = vshrl.u32 %v13007_v62, 16  ;;  %v1026_v38 = vrot.slane %v1024_v29, 1  ;;  %v1028_v39 = vshrl.u32 %v13026_v20, 16  ;;  %2692 = vmatpush1.bf16.msra.mxu1 %v11729_v12  ;;  %v11732_v14 = vld [vmem:[#allocation8 + $0x150] ss:$12 sps:$4 sm:$0xff]  }
 0x1b9   : > { %v1036_v41 = vshrl.u32 %v13028_v21, 16  ;;  %v1034_v42 = vrot.slane %v1032_v30, 1  ;;  %v1044_v43 = vshrl.u32 %v13031_v22, 16  ;;  %v1052_v44 = vshrl.u32 %v13033_v23, 16  ;;  %2693 = vmatprep.subr.bf16.mxu1 %v11730_v13  ;;  %v11735_v16 = vld [vmem:[#allocation8 + $0x168] ss:$12 sps:$4 sm:$0xff]  }
 0x1ba   : > { %9396 = vmatmul.mubr.msk.bf16.gmra.mrb[4].mxu0 %vm1089_vm2, %v979_v37  ;;  %v13047_v37 = vpack.c.bf16 %v935_v26, %v934_v25  ;;  %v1042_v45 = vrot.slane %v1040_v31, 1  ;;  %v1058_v48 = vrot.slane %v1056_v34, 1  ;;  %v1022_v49 = vor.u32 %v1020_v36, %v1018_v28  ;;  %v11736_v17 = vld [vmem:[#allocation8 + $0x184] ss:$12 sps:$4 sm:$0xff]   ;;  %v11739_v25 = vld [vmem:[#allocation8 + $0x19c] ss:$12 sps:$4 sm:$0xff]  }
 0x1bb   : > { %1191 = vmatprep.mubr.bf16.mxu0 %v16592_v0  ;;  %v1060_v50 = vshrl.u32 %v13035_v24, 16  ;;  %v1030_v53 = vor.u32 %v1028_v39, %v1026_v38  ;;  %v1645_v8 = vsel %vm1132_vm0, %v11726_v6, 0  ;;  %v11741_v26 = vld [vmem:[#allocation8 + $0x198] ss:$12 sps:$4 sm:$0xff]   ;;  %v11742_v27 = vld [vmem:[#allocation8 + $0x1b4] ss:$12 sps:$4 sm:$0xff]  }
 0x1bc   : > { %v1064_v51 = vshll.u32 %v13047_v37, 16  ;;  %v1027_v52 = vsel %vm959_vm1, %v1022_v49, %v1026_v38  ;;  %v1046_v58 = vor.u32 %v1044_v43, %v1042_v45  ;;  %v1068_v2 = vshrl.u32 %v13047_v37, 16  ;;  %2694 = vmatpush1.bf16.msra.mxu1 %v11732_v14  ;;  %v11744_v30 = vld [vmem:[#allocation8 + $0x1b0] ss:$12 sps:$4 sm:$0xff]   ;;  %v11745_v31 = vld [vmem:[#allocation8 + $0x1cc] ss:$12 sps:$4 sm:$0xff]  }
 0x1bd   : > { %v1035_v54 = vsel %vm959_vm1, %v1030_v53, %v1034_v42  ;;  %2695 = vmatprep.subr.bf16.mxu1 %v11733_v15  ;;  %v1557_v28 = vrot.slane %v12955_v10, 1  ;;  %v1558_v29 = vrot.slane %v12957_v11, 1  ;;  %v11747_v34 = vld [vmem:[#allocation8 + $0x1c8] ss:$12 sps:$4 sm:$0xff]   ;;  %v1564_v38 = vrot.slane %v12982_v40, 1 }
 0x1be   : > { %v1066_v1 = vrot.slane %v1064_v51, 1  ;;  %v11748_v49 = vld [vmem:[#allocation8 + $0x1e4] ss:$12 sps:$4 sm:$0xff]   ;;  %v11751_v51 = vld [vmem:[#allocation8 + $0x1fc] ss:$12 sps:$4 sm:$0xff]  }
 0x1bf   : > { %v11754_v53 = vld [vmem:[#allocation8 + $0x214] ss:$12 sps:$4 sm:$0xff]   ;;  %v2003_v6 = vld [vmem:[#allocation7] sm:$0x3] }
 0x1c0   : > { %v1070_v4 = vor.u32 %v1068_v2, %v1066_v1  ;;  %2696 = vmatpush1.bf16.msra.mxu1 %v11735_v16  ;;  %v1935_v2 = vld [vmem:[#allocation5] sm:$0x3] }
 0x1c1   : > { %2697 = vmatprep.subr.bf16.mxu1 %v11736_v17 }
 0x1c2   : > { %9397 = vmatmul.mubr.msk.bf16.gmra.mrb[8].mxu0 %vm1089_vm2, %v987_v47  ;;  %v1050_v47 = vrot.slane %v1048_v33, 1  ;;  %v1559_v33 = vsel %vm1556_vm3, %v1557_v28, %v1558_v29 }
 0x1c3   : > { %1201 = vmatprep.mubr.bf16.mxu0 %v16592_v0 }
 0x1c4   : > { %v1051_v59 = vsel %vm959_vm1, %v1046_v58, %v1050_v47  ;;  %v1054_v60 = vor.u32 %v1052_v44, %v1050_v47  ;;  %v11760_v58 = vld [vmem:[#allocation8 + $0x244] ss:$12 sps:$4 sm:$0xff]  }
 0x1c6   : > { %v1059_v61 = vsel %vm959_vm1, %v1054_v60, %v1058_v48  ;;  %v11765_v60 = vld [vmem:[#allocation8 + $0x258] ss:$12 sps:$4 sm:$0xff]  }
 0x1ca   : > { %9398 = vmatmul.mubr.msk.bf16.gmra.mrb[12].mxu0 %vm1089_vm2, %v995_v55  ;;  %v1038_v55 = vor.u32 %v1036_v41, %v1034_v42 }
 0x1cb   : > { %1211 = vmatprep.mubr.bf16.mxu0 %v16592_v0 }
 0x1cc   : > { %v1043_v57 = vsel %vm959_vm1, %v1038_v55, %v1042_v45  ;;  %v11757_v55 = vld [vmem:[#allocation8 + $0x22c] ss:$12 sps:$4 sm:$0xff]  }
 0x1d2   : > { %9399 = vmatmul.mubr.msk.bf16.gmra.mrb[16].mxu0 %vm1089_vm2, %v1003_v63  ;;  %v1062_v63 = vor.u32 %v1060_v50, %v1058_v48  ;;  %v11750_v50 = vld [vmem:[#allocation8 + $0x1e0] ss:$12 sps:$4 sm:$0xff]  }
 0x1d3   : > { %1221 = vmatprep.mubr.bf16.mxu0 %v16592_v0 }
 0x1d4   : > { %v1067_v3 = vsel %vm959_vm1, %v1062_v63, %v1066_v1 }
 0x1da   : > { %9400 = vmatmul.mubr.msk.bf16.gmra.mrb[20].mxu0 %vm1089_vm2, %v1011_v19  ;;  %v11738_v19 = vld [vmem:[#allocation8 + $0x180] ss:$12 sps:$4 sm:$0xff]  }
 0x1db   : > { %1231 = vmatprep.mubr.bf16.mxu0 %v16592_v0  ;;  %2698 = vmatpush1.bf16.msra.mxu1 %v11738_v19 }
 0x1dc   : > { %2699 = vmatprep.subr.bf16.mxu1 %v11739_v25 }
 0x1df   : > { %2700 = vmatpush1.bf16.msra.mxu1 %v11741_v26 }
 0x1e0   : > { %2701 = vmatprep.subr.bf16.mxu1 %v11742_v27 }
 0x1e2   : > { %9401 = vmatmul.mubr.msk.bf16.gmra.mrb[24].mxu0 %vm1089_vm2, %v1019_v35  ;;  %v1560_v35 = vrot.slane %v12964_v18, 1 }
 0x1e3   : > { %1241 = vmatprep.mubr.bf16.mxu0 %v16592_v0  ;;  %2702 = vmatpush1.bf16.msra.mxu1 %v11744_v30 }
 0x1e4   : > { %2703 = vmatprep.subr.bf16.mxu1 %v11745_v31 }
 0x1e7   : > { %2704 = vmatpush1.bf16.msra.mxu1 %v11747_v34 }
 0x1e8   : > { %2705 = vmatprep.subr.bf16.mxu1 %v11748_v49 }
 0x1ea   : > { %9402 = vmatmul.mubr.msk.bf16.gmra.mrb[28].mxu0 %vm1089_vm2, %v1027_v52  ;;  %v11753_v52 = vld [vmem:[#allocation8 + $0x1f8] ss:$12 sps:$4 sm:$0xff]  }
 0x1eb   : > { %1251 = vmatprep.mubr.bf16.mxu0 %v16592_v0  ;;  %2706 = vmatpush1.bf16.msra.mxu1 %v11750_v50 }
 0x1ec   : > { %2707 = vmatprep.subr.bf16.mxu1 %v11751_v51 }
 0x1ef   : > { %2708 = vmatpush1.bf16.msra.mxu1 %v11753_v52 }
 0x1f0   : > { %2709 = vmatprep.subr.bf16.mxu1 %v11754_v53 }
 0x1f2   : > { %9403 = vmatmul.mubr.msk.bf16.gmra.mrb[32].mxu0 %vm1089_vm2, %v1035_v54  ;;  %v11756_v54 = vld [vmem:[#allocation8 + $0x210] ss:$12 sps:$4 sm:$0xff]  }
 0x1f3   : > { %1261 = vmatprep.mubr.bf16.mxu0 %v16592_v0  ;;  %2710 = vmatpush1.bf16.msra.mxu1 %v11756_v54 }
 0x1f4   : > { %2711 = vmatprep.subr.bf16.mxu1 %v11757_v55 }
 0x1fa   : > { %9404 = vmatmul.mubr.msk.bf16.gmra.mrb[36].mxu0 %vm1089_vm2, %v1043_v57  ;;  %v11759_v57 = vld [vmem:[#allocation8 + $0x228] ss:$12 sps:$4 sm:$0xff]  }
 0x1fb   : > { %1271 = vmatprep.mubr.bf16.mxu0 %v16592_v0  ;;  %2712 = vmatpush1.bf16.msra.mxu1 %v11759_v57 }
 0x1fc   : > { %2713 = vmatprep.subr.bf16.mxu1 %v11760_v58 }
 0x202   : > { %9405 = vmatmul.mubr.msk.bf16.gmra.mrb[40].mxu0 %vm1089_vm2, %v1051_v59  ;;  %v11762_v59 = vld [vmem:[#allocation8 + $0x240] ss:$12 sps:$4 sm:$0xff]  }
 0x203   : > { %1281 = vmatprep.mubr.bf16.mxu0 %v16592_v0  ;;  %2714 = vmatpush1.bf16.msra.mxu1 %v11762_v59 }
 0x20a   : > { %9406 = vmatmul.mubr.msk.bf16.gmra.mrb[44].mxu0 %vm1089_vm2, %v1059_v61  ;;  %v1937_v61 = vlaneseq }
 0x20b   : > { %1291 = vmatprep.mubr.bf16.mxu0 %v16592_v0 }
 0x20c   : > { %v13177_v63 = vshrl.u32 %v1937_v61, 7 }
 0x20e   : > { %16731 = vst [vmem:[#allocation40_spill] sm:$0xff] %v13177_v63  ;;  %v13180_v1 = vsub.s32 0, %v13177_v63 }
 0x210   : > { %16732 = vst [vmem:[#allocation41_spill] sm:$0xff] %v13180_v1  ;;  %v13193_v15 = vrot.slane %v2003_v6, %v13180_v1 }
 0x212   : > { %9407 = vmatmul.mubr.msk.bf16.gmra.mrb[48].mxu0 %vm1089_vm2, %v1067_v3  ;;  %v13183_v3 = vsub.s32 1, %v13177_v63 }
 0x213   : > { %1301 = vmatprep.mubr.bf16.mxu0 %v16592_v0 }
 0x214   : > { %16733 = vst [vmem:[#allocation42_spill] sm:$0xff] %v13183_v3  ;;  %v13197_v25 = vrot.slane %v2003_v6, %v13183_v3 }
 0x21a   : > { %9408 = vmatmul.mubr.msk.bf16.gmra.mrb[52].mxu0 %vm1089_vm2, %v1070_v4  ;;  %v13186_v4 = vrot.slane %v1935_v2, %v13180_v1 }
 0x21b   : > { %1396 = vmatprep.mubr.bf16.mxu0 %v16592_v0 }
 0x222   : > { %9414 = vmatmul.mubr.msk.bf16.vlgmr.msra.gmra.mrb[0].mxu0 %vm1089_vm2, %v12955_v10  ;;  %v1561_v10 = vsel %vm1556_vm3, %v1558_v29, %v1560_v35 }
 0x223   : > { %1651 = vmatpush1.bf16.msra.mxu0 %v11721_v5  ;;  %1406 = vmatprep.mubr.bf16.mxu0 %v16592_v0 }
 0x224   : > { %9432 = vmatprep.subr.msk.bf16.mxu0 %vm1132_vm0, %v11724_v7  ;;  %v13189_v7 = vrot.slane %v1935_v2, %v13183_v3 }
 0x227   : > { %1653 = vmatpush1.bf16.msra.mxu0 %v1645_v8 }
 0x22a   : > { %9415 = vmatmul.mubr.msk.bf16.gmra.mrb[4].mxu0 %vm1089_vm2, %v12957_v11  ;;  %v1562_v11 = vrot.slane %v12973_v32, 1 }
 0x22b   : > { %1416 = vmatprep.mubr.bf16.mxu0 %v16592_v0 }
 0x22c   : > { %v1563_v36 = vsel %vm1556_vm3, %v1560_v35, %v1562_v11  ;;  %v1565_v39 = vsel %vm1556_vm3, %v1562_v11, %v1564_v38 }
 0x232   : > { %9416 = vmatmul.mubr.msk.bf16.gmra.mrb[8].mxu0 %vm1089_vm2, %v12964_v18  ;;  %v1566_v18 = vrot.slane %v12989_v46, 1 }
 0x233   : > { %1426 = vmatprep.mubr.bf16.mxu0 %v16592_v0 }
 0x234   : > { %v1567_v41 = vsel %vm1556_vm3, %v1564_v38, %v1566_v18 }
 0x23a   : > { %9417 = vmatmul.mubr.msk.bf16.gmra.mrb[12].mxu0 %vm1089_vm2, %v12973_v32  ;;  %v1568_v32 = vrot.slane %v13000_v56, 1 }
 0x23b   : > { %1436 = vmatprep.mubr.bf16.mxu0 %v16592_v0 }
 0x23c   : > { %v1569_v42 = vsel %vm1556_vm3, %v1566_v18, %v1568_v32 }
 0x242   : > { %9418 = vmatmul.mubr.msk.bf16.gmra.mrb[16].mxu0 %vm1089_vm2, %v12982_v40  ;;  %v1570_v40 = vrot.slane %v13007_v62, 1 }
 0x243   : > { %1446 = vmatprep.mubr.bf16.mxu0 %v16592_v0 }
 0x244   : > { %v1571_v43 = vsel %vm1556_vm3, %v1568_v32, %v1570_v40 }
 0x24a   : > { %9419 = vmatmul.mubr.msk.bf16.gmra.mrb[20].mxu0 %vm1089_vm2, %v12989_v46  ;;  %v1572_v46 = vrot.slane %v13026_v20, 1 }
 0x24b   : > { %1456 = vmatprep.mubr.bf16.mxu0 %v16592_v0 }
 0x24c   : > { %v1573_v44 = vsel %vm1556_vm3, %v1570_v40, %v1572_v46 }
 0x252   : > { %9420 = vmatmul.mubr.msk.bf16.gmra.mrb[24].mxu0 %vm1089_vm2, %v13000_v56  ;;  %v1574_v56 = vrot.slane %v13028_v21, 1 }
 0x253   : > { %1466 = vmatprep.mubr.bf16.mxu0 %v16592_v0 }
 0x254   : > { %v1575_v45 = vsel %vm1556_vm3, %v1572_v46, %v1574_v56 }
 0x25a   : > { %9421 = vmatmul.mubr.msk.bf16.gmra.mrb[28].mxu0 %vm1089_vm2, %v13007_v62  ;;  %v1576_v62 = vrot.slane %v13031_v22, 1 }
 0x25b   : > { %1476 = vmatprep.mubr.bf16.mxu0 %v16592_v0 }
 0x25c   : > { %v1577_v47 = vsel %vm1556_vm3, %v1574_v56, %v1576_v62 }
 0x262   : > { %9422 = vmatmul.mubr.msk.bf16.gmra.mrb[32].mxu0 %vm1089_vm2, %v13026_v20  ;;  %v1578_v20 = vrot.slane %v13033_v23, 1 }
 0x263   : > { %1486 = vmatprep.mubr.bf16.mxu0 %v16592_v0 }
 0x264   : > { %v1579_v48 = vsel %vm1556_vm3, %v1576_v62, %v1578_v20 }
 0x26a   : > { %9423 = vmatmul.mubr.msk.bf16.gmra.mrb[36].mxu0 %vm1089_vm2, %v13028_v21  ;;  %v1580_v21 = vrot.slane %v13035_v24, 1 }
 0x26b   : > { %1496 = vmatprep.mubr.bf16.mxu0 %v16592_v0 }
 0x272   : > { %9424 = vmatmul.mubr.msk.bf16.gmra.mrb[40].mxu0 %vm1089_vm2, %v13031_v22  ;;  %v1581_v22 = vsel %vm1556_vm3, %v1578_v20, %v1580_v21 }
 0x273   : > { %1506 = vmatprep.mubr.bf16.mxu0 %v16592_v0 }
 0x27a   : > { %9425 = vmatmul.mubr.msk.bf16.gmra.mrb[44].mxu0 %vm1089_vm2, %v13033_v23  ;;  %v1582_v23 = vrot.slane %v13047_v37, 1 }
 0x27b   : > { %1516 = vmatprep.mubr.bf16.mxu0 %v16592_v0 }
 0x282   : > { %9426 = vmatmul.mubr.msk.bf16.gmra.mrb[48].mxu0 %vm1089_vm2, %v13035_v24  ;;  %v1583_v24 = vsel %vm1556_vm3, %v1580_v21, %v1582_v23 }
 0x283   : > { %1526 = vmatprep.mubr.bf16.mxu0 %v16592_v0 }
 0x28a   : > { %9427 = vmatmul.mubr.msk.bf16.gmra.mrb[52].mxu0 %vm1089_vm2, %v13047_v37  ;;  %v11763_v37 = vld [vmem:[#allocation8 + $0x25c] ss:$12 sps:$4 sm:$0xff]  }
 0x28b   : > { %1682 = vmatprep.mubr.bf16.mxu0 %v16592_v0  ;;  %2715 = vmatprep.subr.bf16.mxu1 %v11763_v37 }
 0x28c   : > { %2716 = vmatpush1.bf16.msra.mxu1 %v11765_v60 }
 0x28d   : > { %2864 = vmatprep.subr.bf16.mxu1 %v16592_v0 }
 0x292   : > { %9433 = vmatmul.mubr.msk.bf16.vlgmr.msra.gmra.mrb[0].mxu0 %vm1089_vm2, %v1559_v33 }
 0x293   : > { %1692 = vmatprep.mubr.bf16.mxu0 %v16592_v0 }
 0x29a   : > { %9434 = vmatmul.mubr.msk.bf16.gmra.mrb[4].mxu0 %vm1089_vm2, %v1561_v10 }
 0x29b   : > { %1702 = vmatprep.mubr.bf16.mxu0 %v16592_v0 }
 0x2a2   : > { %9435 = vmatmul.mubr.msk.bf16.gmra.mrb[8].mxu0 %vm1089_vm2, %v1563_v36 }
 0x2a3   : > { %1712 = vmatprep.mubr.bf16.mxu0 %v16592_v0 }
 0x2aa   : > { %9436 = vmatmul.mubr.msk.bf16.gmra.mrb[12].mxu0 %vm1089_vm2, %v1565_v39 }
 0x2ab   : > { %1722 = vmatprep.mubr.bf16.mxu0 %v16592_v0 }
 0x2b2   : > { %9437 = vmatmul.mubr.msk.bf16.gmra.mrb[16].mxu0 %vm1089_vm2, %v1567_v41 }
 0x2b3   : > { %1732 = vmatprep.mubr.bf16.mxu0 %v16592_v0 }
 0x2ba   : > { %9438 = vmatmul.mubr.msk.bf16.gmra.mrb[20].mxu0 %vm1089_vm2, %v1569_v42 }
 0x2bb   : > { %1742 = vmatprep.mubr.bf16.mxu0 %v16592_v0 }
 0x2c2   : > { %9439 = vmatmul.mubr.msk.bf16.gmra.mrb[24].mxu0 %vm1089_vm2, %v1571_v43 }
 0x2c3   : > { %1752 = vmatprep.mubr.bf16.mxu0 %v16592_v0 }
 0x2ca   : > { %9440 = vmatmul.mubr.msk.bf16.gmra.mrb[28].mxu0 %vm1089_vm2, %v1573_v44 }
 0x2cb   : > { %1762 = vmatprep.mubr.bf16.mxu0 %v16592_v0 }
 0x2d2   : > { %9441 = vmatmul.mubr.msk.bf16.gmra.mrb[32].mxu0 %vm1089_vm2, %v1575_v45 }
 0x2d3   : > { %1772 = vmatprep.mubr.bf16.mxu0 %v16592_v0 }
 0x2da   : > { %9442 = vmatmul.mubr.msk.bf16.gmra.mrb[36].mxu0 %vm1089_vm2, %v1577_v47 }
 0x2db   : > { %1782 = vmatprep.mubr.bf16.mxu0 %v16592_v0 }
 0x2e2   : > { %9443 = vmatmul.mubr.msk.bf16.gmra.mrb[40].mxu0 %vm1089_vm2, %v1579_v48 }
 0x2e3   : > { %1792 = vmatprep.mubr.bf16.mxu0 %v16592_v0 }
 0x2ea   : > { %9444 = vmatmul.mubr.msk.bf16.gmra.mrb[44].mxu0 %vm1089_vm2, %v1581_v22 }
 0x2eb   : > { %1802 = vmatprep.mubr.bf16.mxu0 %v16592_v0 }
 0x2f2   : > { %9445 = vmatmul.mubr.msk.bf16.gmra.mrb[48].mxu0 %vm1089_vm2, %v1583_v24 }
 0x2f3   : > { %1812 = vmatprep.mubr.bf16.mxu0 %v16592_v0 }
 0x2fa   : > { %9446 = vmatmul.mubr.msk.bf16.gmra.mrb[52].mxu0 %vm1089_vm2, %v1582_v23 }
 0x365   : > { %v1684_v5 = vpop.f32.mrb[0].mxu0 }
 0x366   : > { %v1879_v8 = vmax.f32 %v1684_v5, 0.0  ;;  %v1686_v9 = vpop.f32.mrb[1].mxu0 }
 0x367   : > { %v1880_v12 = vmax.f32 %v1686_v9, 0.0  ;;  %v1688_v13 = vpop.f32.mrb[2].mxu0 }
 0x368   : > { %v1947_v14 = vmul.f32 %v13186_v4, %v1879_v8  ;;  %v1881_v16 = vmax.f32 %v1688_v13, 0.0  ;;  %v1690_v17 = vpop.f32.mrb[3].mxu0 }
 0x369   : > { %v1948_v19 = vmul.f32 %v13189_v7, %v1880_v12  ;;  %v1882_v26 = vmax.f32 %v1690_v17, 0.0 }
 0x36a   : > { %v1949_v27 = vmul.f32 %v13186_v4, %v1881_v16  ;;  %v2015_v29 = vadd.f32 %v13193_v15, %v1947_v14  ;;  %v11766_v16 = vld [vmem:[#allocation8 + $0x140] ss:$12 sps:$4 sm:$0xff]  }
 0x36b   : > { %v1950_v28 = vmul.f32 %v13189_v7, %v1882_v26  ;;  %v2016_v31 = vadd.f32 %v13197_v25, %v1948_v19 }
 0x36c   : > { %v2017_v30 = vadd.f32 %v13193_v15, %v1949_v27 }
 0x36d   : > { %v2018_v33 = vadd.f32 %v13197_v25, %v1950_v28  ;;  %v1694_v34 = vpop.f32.mrb[4].mxu0 }
 0x36e   : > { %v13205_v35 = vpack.c.bf16 %v2017_v30, %v2015_v29  ;;  %v1883_v10 = vmax.f32 %v1694_v34, 0.0  ;;  %v1696_v11 = vpop.f32.mrb[5].mxu0 }
 0x36f   : > { %v13207_v36 = vpack.c.bf16 %v2018_v33, %v2016_v31  ;;  %v1884_v38 = vmax.f32 %v1696_v11, 0.0  ;;  %v1698_v39 = vpop.f32.mrb[6].mxu0 }
 0x370   : > { %v1951_v18 = vmul.f32 %v13186_v4, %v1883_v10  ;;  %v1885_v41 = vmax.f32 %v1698_v39, 0.0  ;;  %v1700_v32 = vpop.f32.mrb[7].mxu0  ;;  %v2207_v62 = vshll.u32 %v13205_v35, 16  ;;  %v2205_v2 = vshrl.u32 %v13205_v35, 16 }
 0x371   : > { %v1952_v42 = vmul.f32 %v13189_v7, %v1884_v38  ;;  %v1886_v40 = vmax.f32 %v1700_v32, 0.0  ;;  %v2219_v44 = vshll.u32 %v13207_v36, 16  ;;  %v2217_v37 = vshrl.u32 %v13207_v36, 16 }
 0x372   : > { %v1953_v43 = vmul.f32 %v13186_v4, %v1885_v41  ;;  %v2019_v56 = vadd.f32 %v13193_v15, %v1951_v18  ;;  %v2209_v55 = vrot.slane %v2207_v62, 1  ;;  %v11767_v41 = vld [vmem:[#allocation8 + $0x158] ss:$12 sps:$4 sm:$0xff]  }
 0x373   : > { %v1954_v46 = vmul.f32 %v13189_v7, %v1886_v40  ;;  %v2020_v47 = vadd.f32 %v13197_v25, %v1952_v42  ;;  %v2221_v23 = vrot.slane %v2219_v44, 1 }
 0x374   : > { %v2021_v45 = vadd.f32 %v13193_v15, %v1953_v43  ;;  %v2210_v14 = vor.u32 %v2209_v55, %v2205_v2 }
 0x375   : > { %v2022_v20 = vadd.f32 %v13197_v25, %v1954_v46  ;;  %v1704_v48 = vpop.f32.mrb[8].mxu0  ;;  %v2222_v8 = vor.u32 %v2221_v23, %v2217_v37 }
 0x376   : > { %v13219_v21 = vpack.c.bf16 %v2021_v45, %v2019_v56  ;;  %v1887_v49 = vmax.f32 %v1704_v48, 0.0  ;;  %v1706_v50 = vpop.f32.mrb[9].mxu0 }
 0x377   : > { %v13221_v22 = vpack.c.bf16 %v2022_v20, %v2020_v47  ;;  %v1888_v51 = vmax.f32 %v1706_v50, 0.0  ;;  %v1708_v52 = vpop.f32.mrb[10].mxu0  ;;  %v11768_v50 = vld [vmem:[#allocation8 + $0x170] ss:$12 sps:$4 sm:$0xff]  }
 0x378   : > { %v1955_v53 = vmul.f32 %v13186_v4, %v1887_v49  ;;  %v1889_v54 = vmax.f32 %v1708_v52, 0.0  ;;  %v1710_v24 = vpop.f32.mrb[11].mxu0  ;;  %v2212_v57 = vshll.u32 %v13219_v21, 16  ;;  %v2228_v44 = vshrl.u32 %v13219_v21, 16 }
 0x379   : > { %v1956_v58 = vmul.f32 %v13189_v7, %v1888_v51  ;;  %v1890_v59 = vmax.f32 %v1710_v24, 0.0  ;;  %v2224_v60 = vshll.u32 %v13221_v22, 16  ;;  %v2236_v42 = vshrl.u32 %v13221_v22, 16 }
 0x37a   : > { %v1957_v61 = vmul.f32 %v13186_v4, %v1889_v54  ;;  %v2214_v5 = vrot.slane %v2212_v57, 1  ;;  %v2023_v12 = vadd.f32 %v13193_v15, %v1955_v53 }
 0x37b   : > { %v1958_v6 = vmul.f32 %v13189_v7, %v1890_v59  ;;  %v2226_v9 = vrot.slane %v2224_v60, 1  ;;  %v2024_v17 = vadd.f32 %v13197_v25, %v1956_v58 }
 0x37c   : > { %v2025_v13 = vadd.f32 %v13193_v15, %v1957_v61  ;;  %v13243_v31 = vsel %vm959_vm1, %v2210_v14, %v2214_v5  ;;  %v2230_v49 = vor.u32 %v2228_v44, %v2214_v5 }
 0x37d   : > { %v2026_v19 = vadd.f32 %v13197_v25, %v1958_v6  ;;  %v1714_v26 = vpop.f32.mrb[12].mxu0  ;;  %v13236_v27 = vsel %vm959_vm1, %v2222_v8, %v2226_v9  ;;  %v2238_v45 = vor.u32 %v2236_v42, %v2226_v9  ;;  %v11769_v6 = vld [vmem:[#allocation8 + $0x188] ss:$12 sps:$4 sm:$0xff]  }
 0x37e   : > { %v13238_v28 = vpack.c.bf16 %v2025_v13, %v2023_v12  ;;  %v1891_v29 = vmax.f32 %v1714_v26, 0.0  ;;  %v1716_v30 = vpop.f32.mrb[13].mxu0  ;;  %9486 = vmatprep.mubr.msk.bf16.mxu1 %vm2648_vm4, %v13236_v27 }
 0x37f   : > { %v13245_v33 = vpack.c.bf16 %v2026_v19, %v2024_v17  ;;  %v1892_v34 = vmax.f32 %v1716_v30, 0.0  ;;  %v1718_v10 = vpop.f32.mrb[14].mxu0  ;;  %2724 = vmatmul.mubr.bf16.vlgmr.msra.gmra.mrb[0].mxu1 %v13243_v31 }
 0x380   : > { %v1959_v11 = vmul.f32 %v13186_v4, %v1891_v29  ;;  %v1893_v38 = vmax.f32 %v1718_v10, 0.0  ;;  %v1720_v39 = vpop.f32.mrb[15].mxu0  ;;  %2865 = vmatpush1.bf16.msra.mxu1 %v11766_v16  ;;  %v2232_v18 = vshll.u32 %v13238_v28, 16  ;;  %v2244_v16 = vshrl.u32 %v13238_v28, 16 }
 0x381   : > { %v1960_v32 = vmul.f32 %v13189_v7, %v1892_v34  ;;  %v1894_v40 = vmax.f32 %v1720_v39, 0.0  ;;  %v2240_v43 = vshll.u32 %v13245_v33, 16  ;;  %2866 = vmatprep.subr.bf16.mxu1 %v16592_v0  ;;  %v2252_v12 = vshrl.u32 %v13245_v33, 16 }
 0x382   : > { %v1961_v46 = vmul.f32 %v13186_v4, %v1893_v38  ;;  %v2234_v56 = vrot.slane %v2232_v18, 1  ;;  %v2027_v20 = vadd.f32 %v13193_v15, %v1959_v11  ;;  %v11770_v11 = vld [vmem:[#allocation8 + $0x1a0] ss:$12 sps:$4 sm:$0xff]  }
 0x383   : > { %v1962_v62 = vmul.f32 %v13189_v7, %v1894_v40  ;;  %v2242_v47 = vrot.slane %v2240_v43, 1  ;;  %v2028_v51 = vadd.f32 %v13197_v25, %v1960_v32 }
 0x384   : > { %v2029_v48 = vadd.f32 %v13193_v15, %v1961_v46  ;;  %2867 = vmatpush1.bf16.msra.mxu1 %v11767_v41  ;;  %v13270_v57 = vsel %vm959_vm1, %v2230_v49, %v2234_v56  ;;  %v2246_v10 = vor.u32 %v2244_v16, %v2234_v56 }
 0x385   : > { %v2030_v52 = vadd.f32 %v13197_v25, %v1962_v62  ;;  %v1724_v23 = vpop.f32.mrb[16].mxu0  ;;  %v13262_v53 = vsel %vm959_vm1, %v2238_v45, %v2242_v47  ;;  %2868 = vmatprep.subr.bf16.mxu1 %v16592_v0  ;;  %v2254_v26 = vor.u32 %v2252_v12, %v2242_v47 }
 0x386   : > { %v13265_v54 = vpack.c.bf16 %v2029_v48, %v2027_v20  ;;  %v1895_v24 = vmax.f32 %v1724_v23, 0.0  ;;  %v1726_v55 = vpop.f32.mrb[17].mxu0  ;;  %9487 = vmatprep.mubr.msk.bf16.mxu1 %vm2648_vm4, %v13262_v53  ;;  %v11771_v48 = vld [vmem:[#allocation8 + $0x1b8] ss:$12 sps:$4 sm:$0xff]  }
 0x387   : > { %v13272_v58 = vpack.c.bf16 %v2030_v52, %v2028_v51  ;;  %v1896_v59 = vmax.f32 %v1726_v55, 0.0  ;;  %v1728_v37 = vpop.f32.mrb[18].mxu0  ;;  %2734 = vmatmul.mubr.bf16.gmra.mrb[4].mxu1 %v13270_v57 }
 0x388   : > { %v1963_v60 = vmul.f32 %v13186_v4, %v1895_v24  ;;  %v1897_v61 = vmax.f32 %v1728_v37, 0.0  ;;  %v1730_v2 = vpop.f32.mrb[19].mxu0  ;;  %v2248_v5 = vshll.u32 %v13265_v54, 16  ;;  %2869 = vmatpush1.bf16.msra.mxu1 %v11768_v50  ;;  %v2260_v24 = vshrl.u32 %v13265_v54, 16 }
 0x389   : > { %v1964_v8 = vmul.f32 %v13189_v7, %v1896_v59  ;;  %v1898_v9 = vmax.f32 %v1730_v2, 0.0  ;;  %v2256_v13 = vshll.u32 %v13272_v58, 16  ;;  %2870 = vmatprep.subr.bf16.mxu1 %v16592_v0  ;;  %v2268_v51 = vshrl.u32 %v13272_v58, 16 }
 0x38a   : > { %v1965_v14 = vmul.f32 %v13186_v4, %v1897_v61  ;;  %v2250_v17 = vrot.slane %v2248_v5, 1  ;;  %v2031_v30 = vadd.f32 %v13193_v15, %v1963_v60 }
 0x38b   : > { %v1966_v19 = vmul.f32 %v13189_v7, %v1898_v9  ;;  %v2258_v29 = vrot.slane %v2256_v13, 1  ;;  %v2032_v38 = vadd.f32 %v13197_v25, %v1964_v8 }
 0x38c   : > { %v2033_v34 = vadd.f32 %v13193_v15, %v1965_v14  ;;  %2871 = vmatpush1.bf16.msra.mxu1 %v11769_v6  ;;  %v13297_v43 = vsel %vm959_vm1, %v2246_v10, %v2250_v17  ;;  %v2262_v5 = vor.u32 %v2260_v24, %v2250_v17  ;;  %v11772_v6 = vld [vmem:[#allocation8 + $0x1d0] ss:$12 sps:$4 sm:$0xff]  }
 0x38d   : > { %v2034_v39 = vadd.f32 %v13197_v25, %v1966_v19  ;;  %v1734_v18 = vpop.f32.mrb[20].mxu0  ;;  %v13289_v41 = vsel %vm959_vm1, %v2254_v26, %v2258_v29  ;;  %2872 = vmatprep.subr.bf16.mxu1 %v16592_v0  ;;  %v2270_v37 = vor.u32 %v2268_v51, %v2258_v29 }
 0x38e   : > { %v13292_v32 = vpack.c.bf16 %v2033_v34, %v2031_v30  ;;  %v1899_v42 = vmax.f32 %v1734_v18, 0.0  ;;  %v1736_v40 = vpop.f32.mrb[21].mxu0  ;;  %9488 = vmatprep.mubr.msk.bf16.mxu1 %vm2648_vm4, %v13289_v41 }
 0x38f   : > { %v13299_v46 = vpack.c.bf16 %v2034_v39, %v2032_v38  ;;  %v1900_v44 = vmax.f32 %v1736_v40, 0.0  ;;  %v1738_v56 = vpop.f32.mrb[22].mxu0  ;;  %2744 = vmatmul.mubr.bf16.gmra.mrb[8].mxu1 %v13297_v43  ;;  %v11773_v39 = vld [vmem:[#allocation8 + $0x1e8] ss:$12 sps:$4 sm:$0xff]  }
 0x390   : > { %v1967_v45 = vmul.f32 %v13186_v4, %v1899_v42  ;;  %v1901_v62 = vmax.f32 %v1738_v56, 0.0  ;;  %v1740_v47 = vpop.f32.mrb[23].mxu0  ;;  %v2264_v20 = vshll.u32 %v13292_v32, 16  ;;  %2873 = vmatpush1.bf16.msra.mxu1 %v11770_v11 }
 0x391   : > { %v1968_v49 = vmul.f32 %v13189_v7, %v1900_v44  ;;  %v1902_v50 = vmax.f32 %v1740_v47, 0.0  ;;  %v2272_v52 = vshll.u32 %v13299_v46, 16  ;;  %2874 = vmatprep.subr.bf16.mxu1 %v16592_v0  ;;  %v2284_v40 = vshrl.u32 %v13299_v46, 16 }
 0x392   : > { %v1969_v23 = vmul.f32 %v13186_v4, %v1901_v62  ;;  %v2266_v55 = vrot.slane %v2264_v20, 1  ;;  %v2035_v61 = vadd.f32 %v13193_v15, %v1967_v45  ;;  %v2276_v45 = vshrl.u32 %v13292_v32, 16 }
 0x393   : > { %v1970_v59 = vmul.f32 %v13189_v7, %v1902_v50  ;;  %v2274_v60 = vrot.slane %v2272_v52, 1  ;;  %v2036_v8 = vadd.f32 %v13197_v25, %v1968_v49  ;;  %v11774_v52 = vld [vmem:[#allocation8 + $0x200] ss:$12 sps:$4 sm:$0xff]  }
 0x394   : > { %v2037_v2 = vadd.f32 %v13193_v15, %v1969_v23  ;;  %2875 = vmatpush1.bf16.msra.mxu1 %v11771_v48  ;;  %v13324_v17 = vsel %vm959_vm1, %v2262_v5, %v2266_v55  ;;  %v2278_v51 = vor.u32 %v2276_v45, %v2266_v55 }
 0x395   : > { %v2038_v9 = vadd.f32 %v13197_v25, %v1970_v59  ;;  %v1744_v12 = vpop.f32.mrb[24].mxu0  ;;  %v13316_v13 = vsel %vm959_vm1, %v2270_v37, %v2274_v60  ;;  %2876 = vmatprep.subr.bf16.mxu1 %v16592_v0  ;;  %v2286_v20 = vor.u32 %v2284_v40, %v2274_v60 }
 0x396   : > { %v13319_v14 = vpack.c.bf16 %v2037_v2, %v2035_v61  ;;  %v1903_v16 = vmax.f32 %v1744_v12, 0.0  ;;  %v1746_v19 = vpop.f32.mrb[25].mxu0  ;;  %9489 = vmatprep.mubr.msk.bf16.mxu1 %vm2648_vm4, %v13316_v13 }
 0x397   : > { %v13326_v26 = vpack.c.bf16 %v2038_v9, %v2036_v8  ;;  %v1904_v29 = vmax.f32 %v1746_v19, 0.0  ;;  %v1748_v30 = vpop.f32.mrb[26].mxu0  ;;  %2754 = vmatmul.mubr.bf16.gmra.mrb[12].mxu1 %v13324_v17 }
 0x398   : > { %v1971_v34 = vmul.f32 %v13186_v4, %v1903_v16  ;;  %v1905_v10 = vmax.f32 %v1748_v30, 0.0  ;;  %v1750_v11 = vpop.f32.mrb[27].mxu0  ;;  %v2280_v38 = vshll.u32 %v13319_v14, 16  ;;  %2877 = vmatpush1.bf16.msra.mxu1 %v11772_v6 }
 0x399   : > { %v1972_v18 = vmul.f32 %v13189_v7, %v1904_v29  ;;  %v1906_v42 = vmax.f32 %v1750_v11, 0.0  ;;  %v2288_v44 = vshll.u32 %v13326_v26, 16  ;;  %2878 = vmatprep.subr.bf16.mxu1 %v16592_v0  ;;  %v11775_v29 = vld [vmem:[#allocation8 + $0x218] ss:$12 sps:$4 sm:$0xff]  }
 0x39a   : > { %v1973_v56 = vmul.f32 %v13186_v4, %v1905_v10  ;;  %v2282_v62 = vrot.slane %v2280_v38, 1  ;;  %v2039_v49 = vadd.f32 %v13193_v15, %v1971_v34  ;;  %v2300_v10 = vshrl.u32 %v13326_v26, 16 }
 0x39b   : > { %v1974_v47 = vmul.f32 %v13189_v7, %v1906_v42  ;;  %v2290_v48 = vrot.slane %v2288_v44, 1  ;;  %v2040_v23 = vadd.f32 %v13197_v25, %v1972_v18 }
 0x39c   : > { %v2041_v50 = vadd.f32 %v13193_v15, %v1973_v56  ;;  %2879 = vmatpush1.bf16.msra.mxu1 %v11773_v39  ;;  %v13351_v55 = vsel %vm959_vm1, %v2278_v51, %v2282_v62  ;;  %v2292_v39 = vshrl.u32 %v13319_v14, 16 }
 0x39d   : > { %v2042_v24 = vadd.f32 %v13197_v25, %v1974_v47  ;;  %v1754_v59 = vpop.f32.mrb[28].mxu0  ;;  %v13343_v37 = vsel %vm959_vm1, %v2286_v20, %v2290_v48  ;;  %2880 = vmatprep.subr.bf16.mxu1 %v16592_v0  ;;  %v2302_v40 = vor.u32 %v2300_v10, %v2290_v48  ;;  %v11776_v20 = vld [vmem:[#allocation8 + $0x230] ss:$12 sps:$4 sm:$0xff]  }
 0x39e   : > { %v13346_v61 = vpack.c.bf16 %v2041_v50, %v2039_v49  ;;  %v1907_v60 = vmax.f32 %v1754_v59, 0.0  ;;  %v1756_v2 = vpop.f32.mrb[29].mxu0  ;;  %9490 = vmatprep.mubr.msk.bf16.mxu1 %vm2648_vm4, %v13343_v37  ;;  %v2294_v47 = vor.u32 %v2292_v39, %v2282_v62 }
 0x39f   : > { %v13353_v5 = vpack.c.bf16 %v2042_v24, %v2040_v23  ;;  %v1908_v6 = vmax.f32 %v1756_v2, 0.0  ;;  %v1758_v8 = vpop.f32.mrb[30].mxu0  ;;  %2764 = vmatmul.mubr.bf16.gmra.mrb[16].mxu1 %v13351_v55 }
 0x3a0   : > { %v1975_v9 = vmul.f32 %v13186_v4, %v1907_v60  ;;  %v1909_v12 = vmax.f32 %v1758_v8, 0.0  ;;  %v1760_v16 = vpop.f32.mrb[31].mxu0  ;;  %v2296_v19 = vshll.u32 %v13346_v61, 16  ;;  %2881 = vmatpush1.bf16.msra.mxu1 %v11774_v52 }
 0x3a1   : > { %v1976_v30 = vmul.f32 %v13189_v7, %v1908_v6  ;;  %v1910_v34 = vmax.f32 %v1760_v16, 0.0  ;;  %v2304_v11 = vshll.u32 %v13353_v5, 16  ;;  %2882 = vmatprep.subr.bf16.mxu1 %v16592_v0  ;;  %v11777_v16 = vld [vmem:[#allocation8 + $0x248] ss:$12 sps:$4 sm:$0xff]  }
 0x3a2   : > { %v1977_v38 = vmul.f32 %v13186_v4, %v1909_v12  ;;  %v2298_v18 = vrot.slane %v2296_v19, 1  ;;  %v2043_v56 = vadd.f32 %v13193_v15, %v1975_v9 }
 0x3a3   : > { %v1978_v42 = vmul.f32 %v13189_v7, %v1910_v34  ;;  %v2306_v44 = vrot.slane %v2304_v11, 1  ;;  %v2044_v49 = vadd.f32 %v13197_v25, %v1976_v30  ;;  %v2316_v30 = vshrl.u32 %v13353_v5, 16 }
 0x3a4   : > { %v2045_v45 = vadd.f32 %v13193_v15, %v1977_v38  ;;  %2883 = vmatpush1.bf16.msra.mxu1 %v11775_v29  ;;  %v13378_v62 = vsel %vm959_vm1, %v2294_v47, %v2298_v18  ;;  %v2308_v11 = vshrl.u32 %v13346_v61, 16 }
 0x3a5   : > { %v2046_v50 = vadd.f32 %v13197_v25, %v1978_v42  ;;  %v1764_v51 = vpop.f32.mrb[32].mxu0  ;;  %v13370_v52 = vsel %vm959_vm1, %v2302_v40, %v2306_v44  ;;  %2884 = vmatprep.subr.bf16.mxu1 %v16592_v0  ;;  %v2318_v42 = vor.u32 %v2316_v30, %v2306_v44 }
 0x3a6   : > { %v13373_v23 = vpack.c.bf16 %v2045_v45, %v2043_v56  ;;  %v1911_v48 = vmax.f32 %v1764_v51, 0.0  ;;  %v1766_v24 = vpop.f32.mrb[33].mxu0  ;;  %9491 = vmatprep.mubr.msk.bf16.mxu1 %vm2648_vm4, %v13370_v52  ;;  %v2310_v47 = vor.u32 %v2308_v11, %v2298_v18 }
 0x3a7   : > { %v13380_v59 = vpack.c.bf16 %v2046_v50, %v2044_v49  ;;  %v1912_v60 = vmax.f32 %v1766_v24, 0.0  ;;  %v1768_v2 = vpop.f32.mrb[34].mxu0  ;;  %2774 = vmatmul.mubr.bf16.gmra.mrb[20].mxu1 %v13378_v62  ;;  %v11781_v24 = vld [vmem:[#allocation8 + $0x4] ss:$12 sps:$4 sm:$0xff]  }
 0x3a8   : > { %16734 = vst [vmem:[#allocation43_spill] sm:$0xff] %v13373_v23  ;;  %v1979_v6 = vmul.f32 %v13186_v4, %v1911_v48  ;;  %v1913_v8 = vmax.f32 %v1768_v2, 0.0  ;;  %v1770_v9 = vpop.f32.mrb[35].mxu0  ;;  %v2312_v12 = vshll.u32 %v13373_v23, 16  ;;  %2885 = vmatpush1.bf16.msra.mxu1 %v11776_v20  ;;  %v11778_v20 = vld [vmem:[#allocation8 + $0x260] ss:$12 sps:$4 sm:$0xff]  }
 0x3a9   : > { %16735 = vst [vmem:[#allocation44_spill] sm:$0xff] %v13380_v59  ;;  %v1980_v19 = vmul.f32 %v13189_v7, %v1912_v60  ;;  %v1914_v29 = vmax.f32 %v1770_v9, 0.0  ;;  %v2320_v34 = vshll.u32 %v13380_v59, 16  ;;  %2886 = vmatprep.subr.bf16.mxu1 %v16592_v0 }
 0x3aa   : > { %v1981_v10 = vmul.f32 %v13186_v4, %v1913_v8  ;;  %v2314_v38 = vrot.slane %v2312_v12, 1  ;;  %v2047_v56 = vadd.f32 %v13193_v15, %v1979_v6 }
 0x3ab   : > { %v1982_v39 = vmul.f32 %v13189_v7, %v1914_v29  ;;  %v2322_v40 = vrot.slane %v2320_v34, 1  ;;  %v2048_v49 = vadd.f32 %v13197_v25, %v1980_v19 }
 0x3ac   : > { %v2049_v45 = vadd.f32 %v13193_v15, %v1981_v10  ;;  %2887 = vmatpush1.bf16.msra.mxu1 %v11777_v16  ;;  %v13405_v18 = vsel %vm959_vm1, %v2310_v47, %v2314_v38  ;;  %v2332_v10 = vshrl.u32 %v13380_v59, 16 }
 0x3ad   : > { %v2050_v50 = vadd.f32 %v13197_v25, %v1982_v39  ;;  %v1774_v51 = vpop.f32.mrb[36].mxu0  ;;  %v13397_v48 = vsel %vm959_vm1, %v2318_v42, %v2322_v40  ;;  %2888 = vmatprep.subr.bf16.mxu1 %v16592_v0  ;;  %v2324_v42 = vshrl.u32 %v13373_v23, 16 }
 0x3ae   : > { %v13400_v44 = vpack.c.bf16 %v2049_v45, %v2047_v56  ;;  %v1915_v60 = vmax.f32 %v1774_v51, 0.0  ;;  %v1776_v2 = vpop.f32.mrb[37].mxu0  ;;  %9492 = vmatprep.mubr.msk.bf16.mxu1 %vm2648_vm4, %v13397_v48  ;;  %v2334_v47 = vor.u32 %v2332_v10, %v2322_v40 }
 0x3af   : > { %v13407_v6 = vpack.c.bf16 %v2050_v50, %v2048_v49  ;;  %v1916_v8 = vmax.f32 %v1776_v2, 0.0  ;;  %v1778_v9 = vpop.f32.mrb[38].mxu0  ;;  %2784 = vmatmul.mubr.bf16.gmra.mrb[24].mxu1 %v13405_v18  ;;  %v2326_v51 = vor.u32 %v2324_v42, %v2314_v38 }
 0x3b0   : > { %16736 = vst [vmem:[#allocation45_spill] sm:$0xff] %v13400_v44  ;;  %v1983_v12 = vmul.f32 %v13186_v4, %v1915_v60  ;;  %v1917_v16 = vmax.f32 %v1778_v9, 0.0  ;;  %v1780_v19 = vpop.f32.mrb[39].mxu0  ;;  %v2328_v29 = vshll.u32 %v13400_v44, 16  ;;  %2889 = vmatpush1.bf16.msra.mxu1 %v11778_v20 }
 0x3b1   : > { %16737 = vst [vmem:[#allocation46_spill] sm:$0xff] %v13407_v6  ;;  %v1984_v30 = vmul.f32 %v13189_v7, %v1916_v8  ;;  %v1918_v34 = vmax.f32 %v1780_v19, 0.0  ;;  %v2336_v11 = vshll.u32 %v13407_v6, 16  ;;  %3245 = vmatprep.subr.bf16.mxu1 %v11781_v24 }
 0x3b2   : > { %v1985_v39 = vmul.f32 %v13186_v4, %v1917_v16  ;;  %v2330_v56 = vrot.slane %v2328_v29, 1  ;;  %v2051_v50 = vadd.f32 %v13193_v15, %v1983_v12 }
 0x3b3   : > { %v1986_v45 = vmul.f32 %v13189_v7, %v1918_v34  ;;  %v2338_v49 = vrot.slane %v2336_v11, 1  ;;  %v2052_v60 = vadd.f32 %v13197_v25, %v1984_v30 }
 0x3b4   : > { %v2053_v20 = vadd.f32 %v13193_v15, %v1985_v39  ;;  %v13430_v40 = vsel %vm959_vm1, %v2326_v51, %v2330_v56 }
 0x3b5   : > { %v2054_v2 = vadd.f32 %v13197_v25, %v1986_v45  ;;  %v1784_v8 = vpop.f32.mrb[40].mxu0  ;;  %v13423_v24 = vsel %vm959_vm1, %v2334_v47, %v2338_v49  ;;  %v2348_v45 = vshrl.u32 %v13407_v6, 16 }
 0x3b6   : > { %v13425_v9 = vpack.c.bf16 %v2053_v20, %v2051_v50  ;;  %v1919_v16 = vmax.f32 %v1784_v8, 0.0  ;;  %v1786_v19 = vpop.f32.mrb[41].mxu0  ;;  %9493 = vmatprep.mubr.msk.bf16.mxu1 %vm2648_vm4, %v13423_v24  ;;  %v2340_v20 = vshrl.u32 %v13400_v44, 16 }
 0x3b7   : > { %v13432_v12 = vpack.c.bf16 %v2054_v2, %v2052_v60  ;;  %v1920_v38 = vmax.f32 %v1786_v19, 0.0  ;;  %v1788_v29 = vpop.f32.mrb[42].mxu0  ;;  %2794 = vmatmul.mubr.bf16.gmra.mrb[28].mxu1 %v13430_v40  ;;  %v2350_v2 = vor.u32 %v2348_v45, %v2338_v49 }
 0x3b8   : > { %16738 = vst [vmem:[#allocation47_spill] sm:$0xff] %v13425_v9  ;;  %v1987_v30 = vmul.f32 %v13186_v4, %v1919_v16  ;;  %v1921_v34 = vmax.f32 %v1788_v29, 0.0  ;;  %v1790_v10 = vpop.f32.mrb[43].mxu0  ;;  %v2344_v11 = vshll.u32 %v13425_v9, 16  ;;  %v2342_v29 = vor.u32 %v2340_v20, %v2330_v56 }
 0x3b9   : > { %16739 = vst [vmem:[#allocation48_spill] sm:$0xff] %v13432_v12  ;;  %v1988_v39 = vmul.f32 %v13189_v7, %v1920_v38  ;;  %v1922_v42 = vmax.f32 %v1790_v10, 0.0  ;;  %v2352_v47 = vshll.u32 %v13432_v12, 16 }
 0x3ba   : > { %v1989_v50 = vmul.f32 %v13186_v4, %v1921_v34  ;;  %v2346_v51 = vrot.slane %v2344_v11, 1  ;;  %v2055_v16 = vadd.f32 %v13193_v15, %v1987_v30 }
 0x3bb   : > { %v1990_v60 = vmul.f32 %v13189_v7, %v1922_v42  ;;  %v2354_v8 = vrot.slane %v2352_v47, 1  ;;  %v2056_v38 = vadd.f32 %v13197_v25, %v1988_v39 }
 0x3bc   : > { %v2057_v19 = vadd.f32 %v13193_v15, %v1989_v50  ;;  %v13455_v49 = vsel %vm959_vm1, %v2342_v29, %v2346_v51 }
 0x3bd   : > { %v2058_v10 = vadd.f32 %v13197_v25, %v1990_v60  ;;  %v1794_v0 = vpop.f32.mrb[44].mxu0  ;;  %v13448_v1 = vsel %vm959_vm1, %v2350_v2, %v2354_v8  ;;  %v2364_v60 = vshrl.u32 %v13432_v12, 16 }
 0x3be   : > { %v13450_v34 = vpack.c.bf16 %v2057_v19, %v2055_v16  ;;  %v1923_v11 = vmax.f32 %v1794_v0, 0.0  ;;  %v1796_v3 = vpop.f32.mrb[45].mxu0  ;;  %9494 = vmatprep.mubr.msk.bf16.mxu1 %vm2648_vm4, %v13448_v1 }
 0x3bf   : > { %v13457_v30 = vpack.c.bf16 %v2058_v10, %v2056_v38  ;;  %v1924_v56 = vmax.f32 %v1796_v3, 0.0  ;;  %v1798_v39 = vpop.f32.mrb[46].mxu0  ;;  %2804 = vmatmul.mubr.bf16.gmra.mrb[32].mxu1 %v13455_v49  ;;  %v2356_v3 = vshrl.u32 %v13425_v9, 16  ;;  %v2366_v38 = vor.u32 %v2364_v60, %v2354_v8 }
 0x3c0   : > { %16740 = vst [vmem:[#allocation49_spill] sm:$0xff] %v13450_v34  ;;  %v1991_v42 = vmul.f32 %v13186_v4, %v1923_v11  ;;  %v1925_v45 = vmax.f32 %v1798_v39, 0.0  ;;  %v1800_v47 = vpop.f32.mrb[47].mxu0  ;;  %v2360_v50 = vshll.u32 %v13450_v34, 16 }
 0x3c1   : > { %16741 = vst [vmem:[#allocation50_spill] sm:$0xff] %v13457_v30  ;;  %v1992_v0 = vmul.f32 %v13189_v7, %v1924_v56  ;;  %v1926_v20 = vmax.f32 %v1800_v47, 0.0  ;;  %v2368_v2 = vshll.u32 %v13457_v30, 16  ;;  %v2358_v63 = vor.u32 %v2356_v3, %v2346_v51 }
 0x3c2   : > { %v1993_v16 = vmul.f32 %v13186_v4, %v1925_v45  ;;  %v2362_v19 = vrot.slane %v2360_v50, 1  ;;  %v2059_v11 = vadd.f32 %v13193_v15, %v1991_v42 }
 0x3c3   : > { %v1994_v29 = vmul.f32 %v13189_v7, %v1926_v20  ;;  %v2370_v10 = vrot.slane %v2368_v2, 1  ;;  %v2060_v56 = vadd.f32 %v13197_v25, %v1992_v0 }
 0x3c4   : > { %v2061_v39 = vadd.f32 %v13193_v15, %v1993_v16  ;;  %v13480_v8 = vsel %vm959_vm1, %v2358_v63, %v2362_v19 }
 0x3c5   : > { %v2062_v47 = vadd.f32 %v13197_v25, %v1994_v29  ;;  %v1804_v12 = vpop.f32.mrb[48].mxu0  ;;  %v13473_v44 = vsel %vm959_vm1, %v2366_v38, %v2370_v10  ;;  %v2380_v29 = vshrl.u32 %v13457_v30, 16 }
 0x3c6   : > { %v13475_v45 = vpack.c.bf16 %v2061_v39, %v2059_v11  ;;  %v1927_v50 = vmax.f32 %v1804_v12, 0.0  ;;  %v1806_v9 = vpop.f32.mrb[49].mxu0  ;;  %9495 = vmatprep.mubr.msk.bf16.mxu1 %vm2648_vm4, %v13473_v44 }
 0x3c7   : > { %v13482_v42 = vpack.c.bf16 %v2062_v47, %v2060_v56  ;;  %v1928_v51 = vmax.f32 %v1806_v9, 0.0  ;;  %v1808_v0 = vpop.f32.mrb[50].mxu0  ;;  %2814 = vmatmul.mubr.bf16.gmra.mrb[36].mxu1 %v13480_v8  ;;  %v2372_v9 = vshrl.u32 %v13450_v34, 16  ;;  %v2382_v56 = vor.u32 %v2380_v29, %v2370_v10 }
 0x3c8   : > { %v1995_v20 = vmul.f32 %v13186_v4, %v1927_v50  ;;  %v1929_v60 = vmax.f32 %v1808_v0, 0.0  ;;  %v1810_v2 = vpop.f32.mrb[51].mxu0  ;;  %v2376_v16 = vshll.u32 %v13475_v45, 16 }
 0x3c9   : > { %16742 = vst [vmem:[#allocation51_spill] sm:$0xff] %v13482_v42  ;;  %v1996_v12 = vmul.f32 %v13189_v7, %v1928_v51  ;;  %v1930_v3 = vmax.f32 %v1810_v2, 0.0  ;;  %v2384_v63 = vshll.u32 %v13482_v42, 16  ;;  %v2374_v6 = vor.u32 %v2372_v9, %v2362_v19 }
 0x3ca   : > { %v1997_v38 = vmul.f32 %v13186_v4, %v1929_v60  ;;  %v2378_v11 = vrot.slane %v2376_v16, 1  ;;  %v2063_v50 = vadd.f32 %v13193_v15, %v1995_v20 }
 0x3cb   : > { %v1998_v39 = vmul.f32 %v13189_v7, %v1930_v3  ;;  %v2386_v47 = vrot.slane %v2384_v63, 1  ;;  %v2064_v51 = vadd.f32 %v13197_v25, %v1996_v12 }
 0x3cc   : > { %v2065_v0 = vadd.f32 %v13193_v15, %v1997_v38  ;;  %v13505_v10 = vsel %vm959_vm1, %v2374_v6, %v2378_v11 }
 0x3cd   : > { %v2066_v2 = vadd.f32 %v13197_v25, %v1998_v39  ;;  %v1814_v30 = vpop.f32.mrb[52].mxu0  ;;  %v13498_v23 = vsel %vm959_vm1, %v2382_v56, %v2386_v47  ;;  %v2396_v39 = vshrl.u32 %v13482_v42, 16 }
 0x3ce   : > { %v13500_v60 = vpack.c.bf16 %v2065_v0, %v2063_v50  ;;  %v1931_v16 = vmax.f32 %v1814_v30, 0.0  ;;  %v1816_v34 = vpop.f32.mrb[53].mxu0  ;;  %9496 = vmatprep.mubr.msk.bf16.mxu1 %vm2648_vm4, %v13498_v23 }
 0x3cf   : > { %v13507_v20 = vpack.c.bf16 %v2066_v2, %v2064_v51  ;;  %v1932_v19 = vmax.f32 %v1816_v34, 0.0  ;;  %v1818_v12 = vpop.f32.mrb[54].mxu0  ;;  %2824 = vmatmul.mubr.bf16.gmra.mrb[40].mxu1 %v13505_v10  ;;  %v2388_v34 = vshrl.u32 %v13475_v45, 16  ;;  %v2398_v51 = vor.u32 %v2396_v39, %v2386_v47 }
 0x3d0   : > { %v1999_v3 = vmul.f32 %v13186_v4, %v1931_v16  ;;  %v1933_v29 = vmax.f32 %v1818_v12, 0.0  ;;  %v1820_v63 = vpop.f32.mrb[55].mxu0  ;;  %v2392_v38 = vshll.u32 %v13500_v60, 16 }
 0x3d1   : > { %v2000_v30 = vmul.f32 %v13189_v7, %v1932_v19  ;;  %v1934_v9 = vmax.f32 %v1820_v63, 0.0  ;;  %v2400_v6 = vshll.u32 %v13507_v20, 16  ;;  %v2390_v59 = vor.u32 %v2388_v34, %v2378_v11 }
 0x3d2   : > { %v2001_v56 = vmul.f32 %v13186_v4, %v1933_v29  ;;  %v2394_v50 = vrot.slane %v2392_v38, 1  ;;  %v2067_v16 = vadd.f32 %v13193_v15, %v1999_v3  ;;  %v2412_v11 = vshrl.u32 %v13507_v20, 16 }
 0x3d3   : > { %v2002_v0 = vmul.f32 %v13189_v7, %v1934_v9  ;;  %v2402_v2 = vrot.slane %v2400_v6, 1  ;;  %v2068_v19 = vadd.f32 %v13197_v25, %v2000_v30  ;;  %v2404_v3 = vshrl.u32 %v13500_v60, 16 }
 0x3d4   : > { %v2069_v12 = vadd.f32 %v13193_v15, %v2001_v56  ;;  %v13530_v7 = vsel %vm959_vm1, %v2390_v59, %v2394_v50 }
 0x3d5   : > { %v2070_v63 = vadd.f32 %v13197_v25, %v2002_v0  ;;  %v13523_v42 = vsel %vm959_vm1, %v2398_v51, %v2402_v2  ;;  %v2414_v38 = vor.u32 %v2412_v11, %v2402_v2  ;;  %v2406_v39 = vor.u32 %v2404_v3, %v2394_v50  ;;  %v11779_v50 = vld [vmem:[#allocation8] ss:$12 sps:$4 sm:$0xff]   ;;  %v11784_v51 = vld [vmem:[#allocation8 + $0x1c] ss:$12 sps:$4 sm:$0xff]   ;;  %v11782_v2 = vld [vmem:[#allocation8 + $0x18] ss:$12 sps:$4 sm:$0xff]  }
 0x3d6   : > { %v13525_v4 = vpack.c.bf16 %v2069_v12, %v2067_v16  ;;  %9497 = vmatprep.mubr.msk.bf16.mxu1 %vm2648_vm4, %v13523_v42  ;;  %v11787_v16 = vld [vmem:[#allocation8 + $0x34] ss:$12 sps:$4 sm:$0xff]   ;;  %v11785_v12 = vld [vmem:[#allocation8 + $0x30] ss:$12 sps:$4 sm:$0xff]  }
 0x3d7   : > { %v13532_v47 = vpack.c.bf16 %v2070_v63, %v2068_v19  ;;  %2834 = vmatmul.mubr.bf16.gmra.mrb[44].mxu1 %v13530_v7  ;;  %v11790_v19 = vld [vmem:[#allocation8 + $0x4c] ss:$12 sps:$4 sm:$0xff]   ;;  %v11797_v11 = vld [vmem:[#allocation8 + $0x90] ss:$12 sps:$4 sm:$0xff]  }
 0x3d8   : > { %v2408_v15 = vshll.u32 %v13525_v4, 16  ;;  %v2420_v34 = vshrl.u32 %v13525_v4, 16  ;;  %v11791_v63 = vld [vmem:[#allocation8 + $0x60] ss:$12 sps:$4 sm:$0xff]  }
 0x3d9   : > { %v2416_v25 = vshll.u32 %v13532_v47, 16  ;;  %v2423_v9 = vshrl.u32 %v13532_v47, 16  ;;  %v11803_v3 = vld [vmem:[#allocation8 + $0xc0] ss:$12 sps:$4 sm:$0xff]  }
 0x3da   : > { %v2410_v29 = vrot.slane %v2408_v15, 1  ;;  %v11794_v15 = vld [vmem:[#allocation8 + $0x78] ss:$12 sps:$4 sm:$0xff]  }
 0x3db   : > { %v2418_v30 = vrot.slane %v2416_v25, 1  ;;  %v11800_v25 = vld [vmem:[#allocation8 + $0xa8] ss:$12 sps:$4 sm:$0xff]  }
 0x3dc   : > { %v13548_v56 = vsel %vm959_vm1, %v2406_v39, %v2410_v29  ;;  %v13554_v0 = vor.u32 %v2420_v34, %v2410_v29  ;;  %v11806_v29 = vld [vmem:[#allocation8 + $0xd8] ss:$12 sps:$4 sm:$0xff]   ;;  %v11833_v39 = vld [vmem:[#allocation8 + $0x274] ss:$12 sps:$4 sm:$0xff]  }
 0x3dd   : > { %v13541_v59 = vsel %vm959_vm1, %v2414_v38, %v2418_v30  ;;  %v13543_v6 = vor.u32 %v2423_v9, %v2418_v30  ;;  %v11809_v38 = vld [vmem:[#allocation8 + $0xf0] ss:$12 sps:$4 sm:$0xff]   ;;  %v11812_v30 = vld [vmem:[#allocation8 + $0x108] ss:$12 sps:$4 sm:$0xff]   ;;  %v11815_v9 = vld [vmem:[#allocation8 + $0x120] ss:$12 sps:$4 sm:$0xff]  }
 0x3de   : > { %9498 = vmatprep.mubr.msk.bf16.mxu1 %vm2648_vm4, %v13541_v59  ;;  %v16747_v34 = vld [vmem:[#allocation45_spill] sm:$0xff] }
 0x3df   : > { %2844 = vmatmul.mubr.bf16.gmra.mrb[48].mxu1 %v13548_v56 }
 0x3e0   : > { %9499 = vmatprep.mubr.msk.bf16.mxu1 %vm2648_vm4, %v13543_v6 }
 0x3e7   : > { %2854 = vmatmul.mubr.bf16.gmra.mrb[52].mxu1 %v13554_v0 }
 0x3e8   : > { %9500 = vmatprep.mubr.msk.bf16.mxu1 %vm2648_vm4, %v13236_v27  ;;  %v11788_v27 = vld [vmem:[#allocation8 + $0x48] ss:$12 sps:$4 sm:$0xff]  }
 0x3ef   : > { %2897 = vmatmul.mubr.bf16.vlgmr.msra.gmra.mrb[56].mxu1 %v13243_v31  ;;  %v11793_v31 = vld [vmem:[#allocation8 + $0x64] ss:$12 sps:$4 sm:$0xff]  }
 0x3f0   : > { %9501 = vmatprep.mubr.msk.bf16.mxu1 %vm2648_vm4, %v13262_v53  ;;  %3246 = vmatpush1.bf16.msra.mxu1 %v11779_v50  ;;  %v11796_v53 = vld [vmem:[#allocation8 + $0x7c] ss:$12 sps:$4 sm:$0xff]   ;;  %v16749_v50 = vld [vmem:[#allocation47_spill] sm:$0xff] }
 0x3f1   : > { %3247 = vmatprep.subr.bf16.mxu1 %v11784_v51  ;;  %v16750_v51 = vld [vmem:[#allocation50_spill] sm:$0xff] }
 0x3f4   : > { %3248 = vmatpush1.bf16.msra.mxu1 %v11782_v2  ;;  %v16751_v2 = vld [vmem:[#allocation49_spill] sm:$0xff] }
 0x3f5   : > { %3249 = vmatprep.subr.bf16.mxu1 %v11787_v16  ;;  %v16752_v16 = vld [vmem:[#allocation51_spill] sm:$0xff] }
 0x3f7   : > { %2905 = vmatmul.mubr.bf16.gmra.mrb[60].mxu1 %v13270_v57  ;;  %v11799_v57 = vld [vmem:[#allocation8 + $0x94] ss:$12 sps:$4 sm:$0xff]  }
 0x3f8   : > { %9502 = vmatprep.mubr.msk.bf16.mxu1 %vm2648_vm4, %v13289_v41  ;;  %3250 = vmatpush1.bf16.msra.mxu1 %v11785_v12  ;;  %v11802_v41 = vld [vmem:[#allocation8 + $0xac] ss:$12 sps:$4 sm:$0xff]   ;;  %v11831_v12 = vld [vmem:[#allocation8 + $0x270] ss:$12 sps:$4 sm:$0xff]  }
 0x3f9   : > { %3251 = vmatprep.subr.bf16.mxu1 %v11790_v19  ;;  %v11836_v19 = vld [vmem:[#allocation8 + $0x28c] ss:$12 sps:$4 sm:$0xff]  }
 0x3fc   : > { %3252 = vmatpush1.bf16.msra.mxu1 %v11788_v27  ;;  %v11834_v27 = vld [vmem:[#allocation8 + $0x288] ss:$12 sps:$4 sm:$0xff]  }
 0x3fd   : > { %3253 = vmatprep.subr.bf16.mxu1 %v11793_v31  ;;  %v11839_v31 = vld [vmem:[#allocation8 + $0x2a4] ss:$12 sps:$4 sm:$0xff]  }
 0x3ff   : > { %2913 = vmatmul.mubr.bf16.gmra.mrb[64].mxu1 %v13297_v43  ;;  %v11805_v43 = vld [vmem:[#allocation8 + $0xc4] ss:$12 sps:$4 sm:$0xff]  }
 0x400   : > { %9503 = vmatprep.mubr.msk.bf16.mxu1 %vm2648_vm4, %v13316_v13  ;;  %3254 = vmatpush1.bf16.msra.mxu1 %v11791_v63  ;;  %v11808_v13 = vld [vmem:[#allocation8 + $0xdc] ss:$12 sps:$4 sm:$0xff]   ;;  %v11837_v63 = vld [vmem:[#allocation8 + $0x2a0] ss:$12 sps:$4 sm:$0xff]  }
 0x401   : > { %3255 = vmatprep.subr.bf16.mxu1 %v11796_v53  ;;  %v11842_v53 = vld [vmem:[#allocation8 + $0x2bc] ss:$12 sps:$4 sm:$0xff]  }
 0x404   : > { %3256 = vmatpush1.bf16.msra.mxu1 %v11794_v15  ;;  %v11840_v15 = vld [vmem:[#allocation8 + $0x2b8] ss:$12 sps:$4 sm:$0xff]  }
 0x405   : > { %3257 = vmatprep.subr.bf16.mxu1 %v11799_v57  ;;  %v11845_v57 = vld [vmem:[#allocation8 + $0x2d4] ss:$12 sps:$4 sm:$0xff]  }
 0x407   : > { %2921 = vmatmul.mubr.bf16.gmra.mrb[68].mxu1 %v13324_v17  ;;  %v11811_v17 = vld [vmem:[#allocation8 + $0xf4] ss:$12 sps:$4 sm:$0xff]  }
 0x408   : > { %9504 = vmatprep.mubr.msk.bf16.mxu1 %vm2648_vm4, %v13343_v37  ;;  %3258 = vmatpush1.bf16.msra.mxu1 %v11797_v11  ;;  %v11814_v37 = vld [vmem:[#allocation8 + $0x10c] ss:$12 sps:$4 sm:$0xff]   ;;  %v11843_v11 = vld [vmem:[#allocation8 + $0x2d0] ss:$12 sps:$4 sm:$0xff]  }
 0x409   : > { %3259 = vmatprep.subr.bf16.mxu1 %v11802_v41  ;;  %v11848_v41 = vld [vmem:[#allocation8 + $0x2ec] ss:$12 sps:$4 sm:$0xff]  }
 0x40c   : > { %3260 = vmatpush1.bf16.msra.mxu1 %v11800_v25  ;;  %v11846_v25 = vld [vmem:[#allocation8 + $0x2e8] ss:$12 sps:$4 sm:$0xff]  }
 0x40d   : > { %3261 = vmatprep.subr.bf16.mxu1 %v11805_v43  ;;  %v11851_v43 = vld [vmem:[#allocation8 + $0x304] ss:$12 sps:$4 sm:$0xff]  }
 0x40f   : > { %2929 = vmatmul.mubr.bf16.gmra.mrb[72].mxu1 %v13351_v55  ;;  %v11817_v55 = vld [vmem:[#allocation8 + $0x124] ss:$12 sps:$4 sm:$0xff]  }
 0x410   : > { %9505 = vmatprep.mubr.msk.bf16.mxu1 %vm2648_vm4, %v13370_v52  ;;  %3262 = vmatpush1.bf16.msra.mxu1 %v11803_v3  ;;  %v16743_v52 = vmov 0   ;;  %v11849_v3 = vld [vmem:[#allocation8 + $0x300] ss:$12 sps:$4 sm:$0xff]  }
 0x411   : > { %3263 = vmatprep.subr.bf16.mxu1 %v11808_v13  ;;  %v11854_v13 = vld [vmem:[#allocation8 + $0x31c] ss:$12 sps:$4 sm:$0xff]  }
 0x414   : > { %3264 = vmatpush1.bf16.msra.mxu1 %v11806_v29  ;;  %v11852_v29 = vld [vmem:[#allocation8 + $0x318] ss:$12 sps:$4 sm:$0xff]  }
 0x415   : > { %3265 = vmatprep.subr.bf16.mxu1 %v11811_v17  ;;  %v11857_v17 = vld [vmem:[#allocation8 + $0x334] ss:$12 sps:$4 sm:$0xff]  }
 0x417   : > { %2937 = vmatmul.mubr.bf16.gmra.mrb[76].mxu1 %v13378_v62  ;;  %v11820_v62 = vld [vmem:[#allocation8 + $0x38] ss:$12 sps:$4 sm:$0xff]  }
 0x418   : > { %9506 = vmatprep.mubr.msk.bf16.mxu1 %vm2648_vm4, %v13397_v48  ;;  %3266 = vmatpush1.bf16.msra.mxu1 %v11809_v38  ;;  %v11821_v48 = vld [vmem:[#allocation8 + $0x50] ss:$12 sps:$4 sm:$0xff]  }
 0x419   : > { %3267 = vmatprep.subr.bf16.mxu1 %v11814_v37  ;;  %v11855_v38 = vld [vmem:[#allocation8 + $0x330] ss:$12 sps:$4 sm:$0xff]   ;;  %v11860_v37 = vld [vmem:[#allocation8 + $0x34c] ss:$12 sps:$4 sm:$0xff]  }
 0x41c   : > { %3268 = vmatpush1.bf16.msra.mxu1 %v11812_v30  ;;  %v11858_v30 = vld [vmem:[#allocation8 + $0x348] ss:$12 sps:$4 sm:$0xff]  }
 0x41d   : > { %3269 = vmatprep.subr.bf16.mxu1 %v11817_v55  ;;  %v11863_v55 = vld [vmem:[#allocation8 + $0x364] ss:$12 sps:$4 sm:$0xff]  }
 0x41f   : > { %2945 = vmatmul.mubr.bf16.gmra.mrb[80].mxu1 %v13405_v18  ;;  %v11823_v18 = vld [vmem:[#allocation8 + $0x80] ss:$12 sps:$4 sm:$0xff]  }
 0x420   : > { %9507 = vmatprep.mubr.msk.bf16.mxu1 %vm2648_vm4, %v13423_v24  ;;  %3270 = vmatpush1.bf16.msra.mxu1 %v11815_v9  ;;  %v11824_v24 = vld [vmem:[#allocation8 + $0x98] ss:$12 sps:$4 sm:$0xff]   ;;  %v11861_v9 = vld [vmem:[#allocation8 + $0x360] ss:$12 sps:$4 sm:$0xff]  }
 0x421   : > { %3418 = vmatprep.subr.bf16.mxu1 %v16743_v52 }
 0x427   : > { %2953 = vmatmul.mubr.bf16.gmra.mrb[84].mxu1 %v13430_v40  ;;  %v11825_v40 = vld [vmem:[#allocation8 + $0xb0] ss:$12 sps:$4 sm:$0xff]  }
 0x428   : > { %9508 = vmatprep.mubr.msk.bf16.mxu1 %vm2648_vm4, %v13448_v1  ;;  %v11818_v1 = vld [vmem:[#allocation8 + $0x8] ss:$12 sps:$4 sm:$0xff]  }
 0x42f   : > { %2961 = vmatmul.mubr.bf16.gmra.mrb[88].mxu1 %v13455_v49  ;;  %v11826_v49 = vld [vmem:[#allocation8 + $0xc8] ss:$12 sps:$4 sm:$0xff]  }
 0x430   : > { %9509 = vmatprep.mubr.msk.bf16.mxu1 %vm2648_vm4, %v13473_v44  ;;  %v11822_v44 = vld [vmem:[#allocation8 + $0x68] ss:$12 sps:$4 sm:$0xff]  }
 0x437   : > { %2969 = vmatmul.mubr.bf16.gmra.mrb[92].mxu1 %v13480_v8  ;;  %v11827_v8 = vld [vmem:[#allocation8 + $0xe0] ss:$12 sps:$4 sm:$0xff]  }
 0x438   : > { %9510 = vmatprep.mubr.msk.bf16.mxu1 %vm2648_vm4, %v13498_v23  ;;  %v11819_v23 = vld [vmem:[#allocation8 + $0x20] ss:$12 sps:$4 sm:$0xff]  }
 0x43f   : > { %2977 = vmatmul.mubr.bf16.gmra.mrb[96].mxu1 %v13505_v10  ;;  %v11829_v10 = vld [vmem:[#allocation8 + $0x110] ss:$12 sps:$4 sm:$0xff]  }
 0x440   : > { %9511 = vmatprep.mubr.msk.bf16.mxu1 %vm2648_vm4, %v13523_v42  ;;  %v11828_v42 = vld [vmem:[#allocation8 + $0xf8] ss:$12 sps:$4 sm:$0xff]  }
 0x447   : > { %2985 = vmatmul.mubr.bf16.gmra.mrb[100].mxu1 %v13530_v7  ;;  %v11830_v7 = vld [vmem:[#allocation8 + $0x128] ss:$12 sps:$4 sm:$0xff]  }
 0x448   : > { %9512 = vmatprep.mubr.msk.bf16.mxu1 %vm2648_vm4, %v13541_v59  ;;  %v16744_v59 = vld [vmem:[#allocation44_spill] sm:$0xff] }
 0x44f   : > { %2993 = vmatmul.mubr.bf16.gmra.mrb[104].mxu1 %v13548_v56  ;;  %v16746_v56 = vld [vmem:[#allocation46_spill] sm:$0xff] }
 0x450   : > { %9513 = vmatprep.mubr.msk.bf16.mxu1 %vm2648_vm4, %v13543_v6  ;;  %v16745_v6 = vld [vmem:[#allocation43_spill] sm:$0xff] }
 0x457   : > { %3001 = vmatmul.mubr.bf16.gmra.mrb[108].mxu1 %v13554_v0  ;;  %v16748_v0 = vld [vmem:[#allocation48_spill] sm:$0xff] }
 0x458   : > { %9553 = vmatprep.mubr.msk.bf16.mxu1 %vm2648_vm4, %v13207_v36 }
 0x45f   : > { %3278 = vmatmul.mubr.bf16.vlgmr.msra.gmra.mrb[0].mxu1 %v13205_v35 }
 0x460   : > { %9554 = vmatprep.mubr.msk.bf16.mxu1 %vm2648_vm4, %v13221_v22  ;;  %3419 = vmatpush1.bf16.msra.mxu1 %v11818_v1  ;;  %v11866_v1 = vld [vmem:[#allocation8 + $0x37c] ss:$12 sps:$4 sm:$0xff]  }
 0x461   : > { %3420 = vmatprep.subr.bf16.mxu1 %v16743_v52 }
 0x464   : > { %3421 = vmatpush1.bf16.msra.mxu1 %v11819_v23  ;;  %v11864_v23 = vld [vmem:[#allocation8 + $0x378] ss:$12 sps:$4 sm:$0xff]  }
 0x465   : > { %3422 = vmatprep.subr.bf16.mxu1 %v16743_v52 }
 0x467   : > { %3288 = vmatmul.mubr.bf16.gmra.mrb[4].mxu1 %v13219_v21 }
 0x468   : > { %9555 = vmatprep.mubr.msk.bf16.mxu1 %vm2648_vm4, %v13245_v33  ;;  %3423 = vmatpush1.bf16.msra.mxu1 %v11820_v62  ;;  %v11869_v62 = vld [vmem:[#allocation8 + $0x394] ss:$12 sps:$4 sm:$0xff]  }
 0x469   : > { %3424 = vmatprep.subr.bf16.mxu1 %v16743_v52 }
 0x46c   : > { %3425 = vmatpush1.bf16.msra.mxu1 %v11821_v48  ;;  %v11867_v48 = vld [vmem:[#allocation8 + $0x390] ss:$12 sps:$4 sm:$0xff]  }
 0x46d   : > { %3426 = vmatprep.subr.bf16.mxu1 %v16743_v52 }
 0x46f   : > { %3298 = vmatmul.mubr.bf16.gmra.mrb[8].mxu1 %v13238_v28 }
 0x470   : > { %9556 = vmatprep.mubr.msk.bf16.mxu1 %vm2648_vm4, %v13272_v58  ;;  %3427 = vmatpush1.bf16.msra.mxu1 %v11822_v44  ;;  %v3648_v44 = vrot.slane %v13221_v22, 1 }
 0x471   : > { %3428 = vmatprep.subr.bf16.mxu1 %v16743_v52 }
 0x474   : > { %3429 = vmatpush1.bf16.msra.mxu1 %v11823_v18  ;;  %v3647_v18 = vrot.slane %v13207_v36, 1 }
 0x475   : > { %3430 = vmatprep.subr.bf16.mxu1 %v16743_v52 }
 0x477   : > { %3308 = vmatmul.mubr.bf16.gmra.mrb[12].mxu1 %v13265_v54 }
 0x478   : > { %9557 = vmatprep.mubr.msk.bf16.mxu1 %vm2648_vm4, %v13299_v46  ;;  %3431 = vmatpush1.bf16.msra.mxu1 %v11824_v24  ;;  %v13700_v24 = vsel %vm1556_vm3, %v3647_v18, %v3648_v44 }
 0x479   : > { %3432 = vmatprep.subr.bf16.mxu1 %v16743_v52 }
 0x47c   : > { %3433 = vmatpush1.bf16.msra.mxu1 %v11825_v40  ;;  %v3645_v40 = vrot.slane %v13219_v21, 1 }
 0x47d   : > { %3434 = vmatprep.subr.bf16.mxu1 %v16743_v52 }
 0x47f   : > { %3318 = vmatmul.mubr.bf16.gmra.mrb[16].mxu1 %v13292_v32 }
 0x480   : > { %9558 = vmatprep.mubr.msk.bf16.mxu1 %vm2648_vm4, %v13326_v26  ;;  %3435 = vmatpush1.bf16.msra.mxu1 %v11826_v49  ;;  %v3652_v49 = vrot.slane %v13245_v33, 1 }
 0x481   : > { %3436 = vmatprep.subr.bf16.mxu1 %v16743_v52 }
 0x484   : > { %3437 = vmatpush1.bf16.msra.mxu1 %v11827_v8  ;;  %v3644_v8 = vrot.slane %v13205_v35, 1 }
 0x485   : > { %3438 = vmatprep.subr.bf16.mxu1 %v16743_v52 }
 0x487   : > { %3328 = vmatmul.mubr.bf16.gmra.mrb[20].mxu1 %v13319_v14 }
 0x488   : > { %9559 = vmatprep.mubr.msk.bf16.mxu1 %vm2648_vm4, %v13353_v5  ;;  %3439 = vmatpush1.bf16.msra.mxu1 %v11828_v42  ;;  %v11870_v42 = vld [vmem:[#allocation8 + $0x278] ss:$12 sps:$4 sm:$0xff]  }
 0x489   : > { %3440 = vmatprep.subr.bf16.mxu1 %v16743_v52 }
 0x48c   : > { %3441 = vmatpush1.bf16.msra.mxu1 %v11829_v10  ;;  %v13708_v10 = vsel %vm1556_vm3, %v3644_v8, %v3645_v40 }
 0x48d   : > { %3442 = vmatprep.subr.bf16.mxu1 %v16743_v52 }
 0x48f   : > { %3338 = vmatmul.mubr.bf16.gmra.mrb[24].mxu1 %v13346_v61 }
 0x490   : > { %9560 = vmatprep.mubr.msk.bf16.mxu1 %vm2648_vm4, %v16744_v59  ;;  %3443 = vmatpush1.bf16.msra.mxu1 %v11830_v7 }
 0x491   : > { %3962 = vmatprep.subr.bf16.mxu1 %v11833_v39 }
 0x497   : > { %3348 = vmatmul.mubr.bf16.gmra.mrb[28].mxu1 %v16745_v6 }
 0x498   : > { %9561 = vmatprep.mubr.msk.bf16.mxu1 %vm2648_vm4, %v16746_v56 }
 0x49f   : > { %3358 = vmatmul.mubr.bf16.gmra.mrb[32].mxu1 %v16747_v34 }
 0x4a0   : > { %9562 = vmatprep.mubr.msk.bf16.mxu1 %vm2648_vm4, %v16748_v0 }
 0x4a7   : > { %3368 = vmatmul.mubr.bf16.gmra.mrb[36].mxu1 %v16749_v50 }
 0x4a8   : > { %9563 = vmatprep.mubr.msk.bf16.mxu1 %vm2648_vm4, %v16750_v51 }
 0x4af   : > { %3378 = vmatmul.mubr.bf16.gmra.mrb[40].mxu1 %v16751_v2 }
 0x4b0   : > { %9564 = vmatprep.mubr.msk.bf16.mxu1 %vm2648_vm4, %v16752_v16 }
 0x4b7   : > { %3388 = vmatmul.mubr.bf16.gmra.mrb[44].mxu1 %v13475_v45 }
 0x4b8   : > { %9565 = vmatprep.mubr.msk.bf16.mxu1 %vm2648_vm4, %v13507_v20 }
 0x4bf   : > { %3398 = vmatmul.mubr.bf16.gmra.mrb[48].mxu1 %v13500_v60 }
 0x4c0   : > { %9566 = vmatprep.mubr.msk.bf16.mxu1 %vm2648_vm4, %v13532_v47 }
 0x4c7   : > { %3408 = vmatmul.mubr.bf16.gmra.mrb[52].mxu1 %v13525_v4 }
 0x4c8   : > { %9567 = vmatprep.mubr.msk.bf16.mxu1 %vm2648_vm4, %v13207_v36  ;;  %v13712_v36 = vsel %vm1556_vm3, %v3648_v44, %v3652_v49 }
 0x4cf   : > { %3451 = vmatmul.mubr.bf16.vlgmr.msra.gmra.mrb[56].mxu1 %v13205_v35  ;;  %v3656_v35 = vrot.slane %v13272_v58, 1 }
 0x4d0   : > { %9568 = vmatprep.mubr.msk.bf16.mxu1 %vm2648_vm4, %v13221_v22  ;;  %3963 = vmatpush1.bf16.msra.mxu1 %v11831_v12  ;;  %v11871_v22 = vld [vmem:[#allocation8 + $0x290] ss:$12 sps:$4 sm:$0xff]   ;;  %v11873_v12 = vld [vmem:[#allocation8 + $0x2c0] ss:$12 sps:$4 sm:$0xff]  }
 0x4d1   : > { %3964 = vmatprep.subr.bf16.mxu1 %v11836_v19  ;;  %v13725_v39 = vsel %vm1556_vm3, %v3652_v49, %v3656_v35  ;;  %v11874_v19 = vld [vmem:[#allocation8 + $0x2d8] ss:$12 sps:$4 sm:$0xff]  }
 0x4d4   : > { %3965 = vmatpush1.bf16.msra.mxu1 %v11834_v27 }
 0x4d5   : > { %3966 = vmatprep.subr.bf16.mxu1 %v11839_v31 }
 0x4d7   : > { %3459 = vmatmul.mubr.bf16.gmra.mrb[60].mxu1 %v13219_v21  ;;  %v3650_v21 = vrot.slane %v13238_v28, 1 }
 0x4d8   : > { %9569 = vmatprep.mubr.msk.bf16.mxu1 %vm2648_vm4, %v13245_v33  ;;  %3967 = vmatpush1.bf16.msra.mxu1 %v11837_v63  ;;  %v11872_v33 = vld [vmem:[#allocation8 + $0x2a8] ss:$12 sps:$4 sm:$0xff]   ;;  %v11875_v63 = vld [vmem:[#allocation8 + $0x2f0] ss:$12 sps:$4 sm:$0xff]  }
 0x4d9   : > { %3968 = vmatprep.subr.bf16.mxu1 %v11842_v53  ;;  %v13721_v7 = vsel %vm1556_vm3, %v3645_v40, %v3650_v21  ;;  %v11876_v53 = vld [vmem:[#allocation8 + $0x308] ss:$12 sps:$4 sm:$0xff]  }
 0x4dc   : > { %3969 = vmatpush1.bf16.msra.mxu1 %v11840_v15 }
 0x4dd   : > { %3970 = vmatprep.subr.bf16.mxu1 %v11845_v57 }
 0x4df   : > { %3467 = vmatmul.mubr.bf16.gmra.mrb[64].mxu1 %v13238_v28  ;;  %v3654_v28 = vrot.slane %v13265_v54, 1 }
 0x4e0   : > { %9570 = vmatprep.mubr.msk.bf16.mxu1 %vm2648_vm4, %v13272_v58  ;;  %3971 = vmatpush1.bf16.msra.mxu1 %v11843_v11  ;;  %v3660_v58 = vrot.slane %v13299_v46, 1  ;;  %v11877_v11 = vld [vmem:[#allocation8 + $0x320] ss:$12 sps:$4 sm:$0xff]  }
 0x4e1   : > { %3972 = vmatprep.subr.bf16.mxu1 %v11848_v41  ;;  %v13734_v27 = vsel %vm1556_vm3, %v3650_v21, %v3654_v28  ;;  %v11878_v41 = vld [vmem:[#allocation8 + $0x338] ss:$12 sps:$4 sm:$0xff]  }
 0x4e2   : > { %v13738_v31 = vsel %vm1556_vm3, %v3656_v35, %v3660_v58 }
 0x4e4   : > { %3973 = vmatpush1.bf16.msra.mxu1 %v11846_v25 }
 0x4e5   : > { %3974 = vmatprep.subr.bf16.mxu1 %v11851_v43 }
 0x4e7   : > { %3475 = vmatmul.mubr.bf16.gmra.mrb[68].mxu1 %v13265_v54  ;;  %v3658_v54 = vrot.slane %v13292_v32, 1 }
 0x4e8   : > { %9571 = vmatprep.mubr.msk.bf16.mxu1 %vm2648_vm4, %v13299_v46  ;;  %3975 = vmatpush1.bf16.msra.mxu1 %v11849_v3  ;;  %v3664_v46 = vrot.slane %v13326_v26, 1  ;;  %v11879_v3 = vld [vmem:[#allocation8 + $0x350] ss:$12 sps:$4 sm:$0xff]  }
 0x4e9   : > { %3976 = vmatprep.subr.bf16.mxu1 %v11854_v13  ;;  %v13747_v15 = vsel %vm1556_vm3, %v3654_v28, %v3658_v54  ;;  %v11880_v13 = vld [vmem:[#allocation8 + $0x368] ss:$12 sps:$4 sm:$0xff]   ;;  %v11883_v28 = vld [vmem:[%s16753_s26 + $0x40] sm:$0xff]   ;;  %s16982_s26 = sld [smem:[#allocation99_spill]] }
 0x4ea   : > { %v13751_v57 = vsel %vm1556_vm3, %v3660_v58, %v3664_v46  ;;  %v11884_v58 = vld [vmem:[%s16754_s14] sm:$0xff]   ;;  %9925 = vmatprep.subr.bf16.mxu0 %v11883_v28 }
 0x4eb   : > { %9926 = vmatpush3.bf16.msra.mxu0 %v11884_v58  ;;  %v11895_v58 = vld [vmem:[%s16754_s14 + $0x70] sm:$0xff]  }
 0x4ec   : > { %3977 = vmatpush1.bf16.msra.mxu1 %v11852_v29 }
 0x4ed   : > { %3978 = vmatprep.subr.bf16.mxu1 %v11857_v17 }
 0x4ef   : > { %3483 = vmatmul.mubr.bf16.gmra.mrb[72].mxu1 %v13292_v32  ;;  %v3662_v32 = vrot.slane %v13319_v14, 1 }
 0x4f0   : > { %9572 = vmatprep.mubr.msk.bf16.mxu1 %vm2648_vm4, %v13326_v26  ;;  %3979 = vmatpush1.bf16.msra.mxu1 %v11855_v38  ;;  %v3668_v26 = vrot.slane %v13353_v5, 1  ;;  %v11881_v38 = vld [vmem:[#allocation8 + $0x380] ss:$12 sps:$4 sm:$0xff]  }
 0x4f1   : > { %3980 = vmatprep.subr.bf16.mxu1 %v11860_v37  ;;  %v13760_v25 = vsel %vm1556_vm3, %v3658_v54, %v3662_v32  ;;  %v11882_v37 = vld [vmem:[#allocation8 + $0x398] ss:$12 sps:$4 sm:$0xff]  }
 0x4f2   : > { %v13764_v43 = vsel %vm1556_vm3, %v3664_v46, %v3668_v26 }
 0x4f4   : > { %3981 = vmatpush1.bf16.msra.mxu1 %v11858_v30 }
 0x4f5   : > { %3982 = vmatprep.subr.bf16.mxu1 %v11863_v55 }
 0x4f7   : > { %3491 = vmatmul.mubr.bf16.gmra.mrb[76].mxu1 %v13319_v14  ;;  %v3666_v14 = vrot.slane %v13346_v61, 1 }
 0x4f8   : > { %9573 = vmatprep.mubr.msk.bf16.mxu1 %vm2648_vm4, %v13353_v5  ;;  %3983 = vmatpush1.bf16.msra.mxu1 %v11861_v9  ;;  %v3672_v5 = vrot.slane %v16744_v59, 1  ;;  %v3674_v9 = vrot.slane %v16747_v34, 1 }
 0x4f9   : > { %3984 = vmatprep.subr.bf16.mxu1 %v11866_v1  ;;  %v13773_v29 = vsel %vm1556_vm3, %v3662_v32, %v3666_v14  ;;  %v3680_v1 = vrot.slane %v16748_v0, 1 }
 0x4fa   : > { %v3673_v17 = vsel %vm1556_vm3, %v3668_v26, %v3672_v5 }
 0x4fc   : > { %3985 = vmatpush1.bf16.msra.mxu1 %v11864_v23  ;;  %v3678_v23 = vrot.slane %v16749_v50, 1 }
 0x4fd   : > { %3986 = vmatprep.subr.bf16.mxu1 %v11869_v62  ;;  %v3684_v62 = vrot.slane %v16750_v51, 1 }
 0x4ff   : > { %3499 = vmatmul.mubr.bf16.gmra.mrb[80].mxu1 %v13346_v61  ;;  %v3670_v61 = vrot.slane %v16745_v6, 1  ;;  %v3685_v44 = vsel %vm1556_vm3, %v3680_v1, %v3684_v62 }
 0x500   : > { %9574 = vmatprep.mubr.msk.bf16.mxu1 %vm2648_vm4, %v16744_v59  ;;  %3987 = vmatpush1.bf16.msra.mxu1 %v11867_v48  ;;  %v3676_v59 = vrot.slane %v16746_v56, 1  ;;  %v3679_v48 = vsel %vm1556_vm3, %v3674_v9, %v3678_v23 }
 0x501   : > { %4135 = vmatprep.subr.bf16.mxu1 %v16743_v52  ;;  %v3671_v30 = vsel %vm1556_vm3, %v3666_v14, %v3670_v61 }
 0x502   : > { %v3677_v55 = vsel %vm1556_vm3, %v3672_v5, %v3676_v59 }
 0x507   : > { %3507 = vmatmul.mubr.bf16.gmra.mrb[84].mxu1 %v16745_v6  ;;  %v3675_v6 = vsel %vm1556_vm3, %v3670_v61, %v3674_v9 }
 0x508   : > { %9575 = vmatprep.mubr.msk.bf16.mxu1 %vm2648_vm4, %v16746_v56  ;;  %v3681_v56 = vsel %vm1556_vm3, %v3676_v59, %v3680_v1 }
 0x50f   : > { %3515 = vmatmul.mubr.bf16.gmra.mrb[88].mxu1 %v16747_v34  ;;  %v3682_v34 = vrot.slane %v16751_v2, 1 }
 0x510   : > { %9576 = vmatprep.mubr.msk.bf16.mxu1 %vm2648_vm4, %v16748_v0  ;;  %v3688_v0 = vrot.slane %v16752_v16, 1 }
 0x511   : > { %v3683_v18 = vsel %vm1556_vm3, %v3678_v23, %v3682_v34 }
 0x512   : > { %v3689_v40 = vsel %vm1556_vm3, %v3684_v62, %v3688_v0 }
 0x517   : > { %3523 = vmatmul.mubr.bf16.gmra.mrb[92].mxu1 %v16749_v50  ;;  %v3686_v50 = vrot.slane %v13475_v45, 1 }
 0x518   : > { %9577 = vmatprep.mubr.msk.bf16.mxu1 %vm2648_vm4, %v16750_v51  ;;  %v3692_v51 = vrot.slane %v13507_v20, 1 }
 0x519   : > { %v3687_v49 = vsel %vm1556_vm3, %v3682_v34, %v3686_v50  ;;  %v11892_v34 = vld [vmem:[%s16754_s14 + $0x20] sm:$0xff]  }
 0x51a   : > { %v3693_v8 = vsel %vm1556_vm3, %v3688_v0, %v3692_v51 }
 0x51f   : > { %3531 = vmatmul.mubr.bf16.gmra.mrb[96].mxu1 %v16751_v2  ;;  %v3690_v2 = vrot.slane %v13500_v60, 1 }
 0x520   : > { %9578 = vmatprep.mubr.msk.bf16.mxu1 %vm2648_vm4, %v16752_v16  ;;  %v3696_v16 = vrot.slane %v13532_v47, 1 }
 0x527   : > { %3539 = vmatmul.mubr.bf16.gmra.mrb[100].mxu1 %v13475_v45  ;;  %v3694_v45 = vrot.slane %v13525_v4, 1 }
 0x528   : > { %9579 = vmatprep.mubr.msk.bf16.mxu1 %vm2648_vm4, %v13507_v20 }
 0x529   : > { %v3695_v20 = vsel %vm1556_vm3, %v3690_v2, %v3694_v45 }
 0x52f   : > { %3547 = vmatmul.mubr.bf16.gmra.mrb[104].mxu1 %v13500_v60 }
 0x530   : > { %9580 = vmatprep.mubr.msk.bf16.mxu1 %vm2648_vm4, %v13532_v47 }
 0x537   : > { %3555 = vmatmul.mubr.bf16.gmra.mrb[108].mxu1 %v13525_v4 }
 0x538   : > { %9620 = vmatprep.mubr.msk.bf16.mxu1 %vm2648_vm4, %v13700_v24 }
 0x53f   : > { %3995 = vmatmul.mubr.bf16.vlgmr.msra.gmra.mrb[0].mxu1 %v13708_v10 }
 0x540   : > { %9621 = vmatprep.mubr.msk.bf16.mxu1 %vm2648_vm4, %v13712_v36  ;;  %4136 = vmatpush1.bf16.msra.mxu1 %v11870_v42  ;;  %v3691_v42 = vsel %vm1556_vm3, %v3686_v50, %v3690_v2 }
 0x541   : > { %4137 = vmatprep.subr.bf16.mxu1 %v16743_v52 }
 0x544   : > { %4138 = vmatpush1.bf16.msra.mxu1 %v11871_v22  ;;  %v3697_v22 = vsel %vm1556_vm3, %v3692_v51, %v3696_v16 }
 0x545   : > { %4139 = vmatprep.subr.bf16.mxu1 %v16743_v52 }
 0x547   : > { %4005 = vmatmul.mubr.bf16.gmra.mrb[4].mxu1 %v13721_v7 }
 0x548   : > { %9622 = vmatprep.mubr.msk.bf16.mxu1 %vm2648_vm4, %v13725_v39  ;;  %4140 = vmatpush1.bf16.msra.mxu1 %v11872_v33 }
 0x549   : > { %4141 = vmatprep.subr.bf16.mxu1 %v16743_v52 }
 0x54c   : > { %4142 = vmatpush1.bf16.msra.mxu1 %v11873_v12 }
 0x54d   : > { %4143 = vmatprep.subr.bf16.mxu1 %v16743_v52 }
 0x54f   : > { %4015 = vmatmul.mubr.bf16.gmra.mrb[8].mxu1 %v13734_v27 }
 0x550   : > { %9623 = vmatprep.mubr.msk.bf16.mxu1 %vm2648_vm4, %v13738_v31  ;;  %4144 = vmatpush1.bf16.msra.mxu1 %v11874_v19 }
 0x551   : > { %4145 = vmatprep.subr.bf16.mxu1 %v16743_v52 }
 0x554   : > { %4146 = vmatpush1.bf16.msra.mxu1 %v11875_v63 }
 0x555   : > { %4147 = vmatprep.subr.bf16.mxu1 %v16743_v52 }
 0x557   : > { %4025 = vmatmul.mubr.bf16.gmra.mrb[12].mxu1 %v13747_v15 }
 0x558   : > { %9624 = vmatprep.mubr.msk.bf16.mxu1 %vm2648_vm4, %v13751_v57  ;;  %4148 = vmatpush1.bf16.msra.mxu1 %v11876_v53 }
 0x559   : > { %4149 = vmatprep.subr.bf16.mxu1 %v16743_v52 }
 0x55c   : > { %4150 = vmatpush1.bf16.msra.mxu1 %v11877_v11  ;;  %v11886_v11 = vld [vmem:[%s16754_s14 + $0x8] sm:$0xff]  }
 0x55d   : > { %4151 = vmatprep.subr.bf16.mxu1 %v16743_v52 }
 0x55f   : > { %4035 = vmatmul.mubr.bf16.gmra.mrb[16].mxu1 %v13760_v25 }
 0x560   : > { %9625 = vmatprep.mubr.msk.bf16.mxu1 %vm2648_vm4, %v13764_v43  ;;  %4152 = vmatpush1.bf16.msra.mxu1 %v11878_v41 }
 0x561   : > { %4153 = vmatprep.subr.bf16.mxu1 %v16743_v52 }
 0x564   : > { %4154 = vmatpush1.bf16.msra.mxu1 %v11879_v3 }
 0x565   : > { %4155 = vmatprep.subr.bf16.mxu1 %v16743_v52 }
 0x567   : > { %4045 = vmatmul.mubr.bf16.gmra.mrb[20].mxu1 %v13773_v29 }
 0x568   : > { %9626 = vmatprep.mubr.msk.bf16.mxu1 %vm2648_vm4, %v3673_v17  ;;  %4156 = vmatpush1.bf16.msra.mxu1 %v11880_v13  ;;  %v11887_v13 = vld [vmem:[%s16754_s14 + $0x50] sm:$0xff]  }
 0x569   : > { %4157 = vmatprep.subr.bf16.mxu1 %v16743_v52 }
 0x56c   : > { %4158 = vmatpush1.bf16.msra.mxu1 %v11881_v38 }
 0x56d   : > { %4159 = vmatprep.subr.bf16.mxu1 %v16743_v52 }
 0x56f   : > { %4055 = vmatmul.mubr.bf16.gmra.mrb[24].mxu1 %v3671_v30 }
 0x570   : > { %9627 = vmatprep.mubr.msk.bf16.mxu1 %vm2648_vm4, %v3677_v55  ;;  %4160 = vmatpush1.bf16.msra.mxu1 %v11882_v37  ;;  %v11889_v37 = vld [vmem:[%s16754_s14 + $0x58] sm:$0xff]  }
 0x577   : > { %4065 = vmatmul.mubr.bf16.gmra.mrb[28].mxu1 %v3675_v6 }
 0x578   : > { %9628 = vmatprep.mubr.msk.bf16.mxu1 %vm2648_vm4, %v3681_v56 }
 0x57f   : > { %4075 = vmatmul.mubr.bf16.gmra.mrb[32].mxu1 %v3679_v48 }
 0x580   : > { %9629 = vmatprep.mubr.msk.bf16.mxu1 %vm2648_vm4, %v3685_v44 }
 0x587   : > { %4085 = vmatmul.mubr.bf16.gmra.mrb[36].mxu1 %v3683_v18 }
 0x588   : > { %9630 = vmatprep.mubr.msk.bf16.mxu1 %vm2648_vm4, %v3689_v40 }
 0x58f   : > { %4095 = vmatmul.mubr.bf16.gmra.mrb[40].mxu1 %v3687_v49 }
 0x590   : > { %9631 = vmatprep.mubr.msk.bf16.mxu1 %vm2648_vm4, %v3693_v8 }
 0x597   : > { %4105 = vmatmul.mubr.bf16.gmra.mrb[44].mxu1 %v3691_v42 }
 0x598   : > { %9632 = vmatprep.mubr.msk.bf16.mxu1 %vm2648_vm4, %v3697_v22 }
 0x59f   : > { %4115 = vmatmul.mubr.bf16.gmra.mrb[48].mxu1 %v3695_v20 }
 0x5a0   : > { %9633 = vmatprep.mubr.msk.bf16.mxu1 %vm2648_vm4, %v3696_v16 }
 0x5a7   : > { %4125 = vmatmul.mubr.bf16.gmra.mrb[52].mxu1 %v3694_v45 }
 0x5a8   : > { %9634 = vmatprep.mubr.msk.bf16.mxu1 %vm2648_vm4, %v13700_v24 }
 0x5af   : > { %4168 = vmatmul.mubr.bf16.vlgmr.msra.gmra.mrb[56].mxu1 %v13708_v10 }
 0x5b0   : > { %9635 = vmatprep.mubr.msk.bf16.mxu1 %vm2648_vm4, %v13712_v36 }
 0x5b7   : > { %4176 = vmatmul.mubr.bf16.gmra.mrb[60].mxu1 %v13721_v7 }
 0x5b8   : > { %9636 = vmatprep.mubr.msk.bf16.mxu1 %vm2648_vm4, %v13725_v39 }
 0x5bf   : > { %4184 = vmatmul.mubr.bf16.gmra.mrb[64].mxu1 %v13734_v27 }
 0x5c0   : > { %9637 = vmatprep.mubr.msk.bf16.mxu1 %vm2648_vm4, %v13738_v31 }
 0x5c7   : > { %4192 = vmatmul.mubr.bf16.gmra.mrb[68].mxu1 %v13747_v15 }
 0x5c8   : > { %9638 = vmatprep.mubr.msk.bf16.mxu1 %vm2648_vm4, %v13751_v57  ;;  %v11885_v57 = vld [vmem:[%s16754_s14 + $0x48] sm:$0xff]  }
 0x5c9   : > { %9927 = vmatprep.subr.bf16.mxu0 %v11885_v57  ;;  %v11896_v57 = vld [vmem:[%s16754_s14 + $0x30] sm:$0xff]  }
 0x5ca   : > { %9928 = vmatpush3.bf16.msra.mxu0 %v11886_v11 }
 0x5cb   : > { %9929 = vmatprep.subr.bf16.mxu0 %v11887_v13  ;;  %v4448_v13 = vld [vmem:[#allocation10] sm:$0x7] }
 0x5cf   : > { %4200 = vmatmul.mubr.bf16.gmra.mrb[72].mxu1 %v13760_v25 }
 0x5d0   : > { %9639 = vmatprep.mubr.msk.bf16.mxu1 %vm2648_vm4, %v13764_v43 }
 0x5d7   : > { %4208 = vmatmul.mubr.bf16.gmra.mrb[76].mxu1 %v13773_v29  ;;  %v11888_v29 = vld [vmem:[%s16754_s14 + $0x10] sm:$0xff]  }
 0x5d8   : > { %9640 = vmatprep.mubr.msk.bf16.mxu1 %vm2648_vm4, %v3673_v17  ;;  %9930 = vmatpush3.bf16.msra.mxu0 %v11888_v29 }
 0x5d9   : > { %9931 = vmatprep.subr.bf16.mxu0 %v11889_v37 }
 0x5df   : > { %4216 = vmatmul.mubr.bf16.gmra.mrb[80].mxu1 %v3671_v30 }
 0x5e0   : > { %9641 = vmatprep.mubr.msk.bf16.mxu1 %vm2648_vm4, %v3677_v55 }
 0x5e7   : > { %4224 = vmatmul.mubr.bf16.gmra.mrb[84].mxu1 %v3675_v6  ;;  %v11890_v6 = vld [vmem:[%s16754_s14 + $0x18] sm:$0xff]  }
 0x5e8   : > { %9642 = vmatprep.mubr.msk.bf16.mxu1 %vm2648_vm4, %v3681_v56  ;;  %9932 = vmatpush3.bf16.msra.mxu0 %v11890_v6 }
 0x5ef   : > { %4232 = vmatmul.mubr.bf16.gmra.mrb[88].mxu1 %v3679_v48 }
 0x5f0   : > { %9643 = vmatprep.mubr.msk.bf16.mxu1 %vm2648_vm4, %v3685_v44  ;;  %v11891_v44 = vld [vmem:[%s16754_s14 + $0x60] sm:$0xff]  }
 0x5f1   : > { %9933 = vmatprep.subr.bf16.mxu0 %v11891_v44  ;;  %v16766_v44 = vld [vmem:[#allocation40_spill] sm:$0xff] }
 0x5f2   : > { %9934 = vmatpush3.bf16.msra.mxu0 %v11892_v34  ;;  %v4460_v34 = vsub.s32 2, %v16766_v44 }
 0x5f7   : > { %4240 = vmatmul.mubr.bf16.gmra.mrb[92].mxu1 %v3683_v18 }
 0x5f8   : > { %9644 = vmatprep.mubr.msk.bf16.mxu1 %vm2648_vm4, %v3689_v40 }
 0x5ff   : > { %4248 = vmatmul.mubr.bf16.gmra.mrb[96].mxu1 %v3687_v49 }
 0x600   : > { %9645 = vmatprep.mubr.msk.bf16.mxu1 %vm2648_vm4, %v3693_v8 }
 0x607   : > { %4256 = vmatmul.mubr.bf16.gmra.mrb[100].mxu1 %v3691_v42  ;;  %v11894_v42 = vld [vmem:[%s16754_s14 + $0x28] sm:$0xff]  }
 0x608   : > { %9646 = vmatprep.mubr.msk.bf16.mxu1 %vm2648_vm4, %v3697_v22 }
 0x60f   : > { %4264 = vmatmul.mubr.bf16.gmra.mrb[104].mxu1 %v3695_v20 }
 0x610   : > { %9647 = vmatprep.mubr.msk.bf16.mxu1 %vm2648_vm4, %v3696_v16  ;;  %v11893_v16 = vld [vmem:[%s16754_s14 + $0x68] sm:$0xff]  }
 0x611   : > { %9935 = vmatprep.subr.bf16.mxu0 %v11893_v16 }
 0x612   : > { %v13839_v60 = vpop.f32.mrb[0].mxu1  ;;  %9936 = vmatpush3.bf16.msra.mxu0 %v11894_v42  ;;  %v16767_v42 = vld [vmem:[#allocation42_spill] sm:$0xff] }
 0x613   : > { %v13841_v4 = vpop.f32.mrb[1].mxu1  ;;  %9937 = vmatprep.subr.bf16.mxu0 %v11895_v58  ;;  %v13996_v52 = vrot.slane %v4448_v13, %v16767_v42 }
 0x614   : > { %v13843_v47 = vpop.f32.mrb[2].mxu1  ;;  %v4365_v16 = vmax.f32 %v13841_v4, 0.0 }
 0x615   : > { %v13845_v24 = vpop.f32.mrb[3].mxu1 }
 0x616   : > { %9938 = vmatpush3.bf16.msra.mxu0 %v11896_v57  ;;  %v4466_v58 = vmul.f32 %v13996_v52, %v4365_v16  ;;  %v4368_v57 = vmax.f32 %v13845_v24, 0.0 }
 0x617   : > { %4272 = vmatmul.mubr.bf16.gmra.mrb[108].mxu1 %v3694_v45 }
 0x61a   : > { %v13847_v10 = vpop.f32.mrb[4].mxu1 }
 0x61b   : > { %v13849_v36 = vpop.f32.mrb[5].mxu1  ;;  %v4370_v24 = vmax.f32 %v13847_v10, 0.0 }
 0x61c   : > { %v13851_v21 = vpop.f32.mrb[6].mxu1 }
 0x61d   : > { %v13853_v35 = vpop.f32.mrb[7].mxu1 }
 0x61e   : > { %v4374_v4 = vmax.f32 %v13853_v35, 0.0  ;;  %v4367_v35 = vmax.f32 %v13843_v47, 0.0 }
 0x622   : > { %v13855_v33 = vpop.f32.mrb[8].mxu1 }
 0x623   : > { %v13857_v7 = vpop.f32.mrb[9].mxu1 }
 0x624   : > { %v13859_v39 = vpop.f32.mrb[10].mxu1 }
 0x625   : > { %v13861_v12 = vpop.f32.mrb[11].mxu1 }
 0x62a   : > { %v13869_v19 = vpop.f32.mrb[12].mxu1 }
 0x62b   : > { %v13871_v27 = vpop.f32.mrb[13].mxu1 }
 0x62c   : > { %v13873_v31 = vpop.f32.mrb[14].mxu1 }
 0x62d   : > { %v13875_v63 = vpop.f32.mrb[15].mxu1 }
 0x632   : > { %v13877_v54 = vpop.f32.mrb[16].mxu1 }
 0x633   : > { %v13879_v46 = vpop.f32.mrb[17].mxu1 }
 0x634   : > { %v13881_v53 = vpop.f32.mrb[18].mxu1 }
 0x635   : > { %v13883_v15 = vpop.f32.mrb[19].mxu1 }
 0x63a   : > { %v13891_v32 = vpop.f32.mrb[20].mxu1 }
 0x63b   : > { %v13893_v26 = vpop.f32.mrb[21].mxu1 }
 0x63c   : > { %v13895_v41 = vpop.f32.mrb[22].mxu1 }
 0x63d   : > { %v13897_v25 = vpop.f32.mrb[23].mxu1 }
 0x642   : > { %v13899_v43 = vpop.f32.mrb[24].mxu1 }
 0x643   : > { %v13901_v3 = vpop.f32.mrb[25].mxu1 }
 0x644   : > { %v13903_v14 = vpop.f32.mrb[26].mxu1 }
 0x645   : > { %v13905_v5 = vpop.f32.mrb[27].mxu1 }
 0x64a   : > { %v13913_v17 = vpop.f32.mrb[28].mxu1 }
 0x64b   : > { %v13915_v38 = vpop.f32.mrb[29].mxu1 }
 0x64c   : > { %v13917_v61 = vpop.f32.mrb[30].mxu1 }
 0x64d   : > { %v13919_v59 = vpop.f32.mrb[31].mxu1 }
 0x652   : > { %v13924_v30 = vpop.f32.mrb[32].mxu1 }
 0x653   : > { %v13926_v55 = vpop.f32.mrb[33].mxu1 }
 0x654   : > { %v13928_v9 = vpop.f32.mrb[34].mxu1 }
 0x655   : > { %v13930_v1 = vpop.f32.mrb[35].mxu1 }
 0x65a   : > { %v13935_v56 = vpop.f32.mrb[36].mxu1 }
 0x65b   : > { %v13937_v23 = vpop.f32.mrb[37].mxu1 }
 0x65c   : > { %v13939_v62 = vpop.f32.mrb[38].mxu1 }
 0x65d   : > { %v13941_v48 = vpop.f32.mrb[39].mxu1 }
 0x662   : > { %v13949_v0 = vpop.f32.mrb[40].mxu1 }
 0x663   : > { %v13951_v18 = vpop.f32.mrb[41].mxu1 }
 0x664   : > { %v13953_v40 = vpop.f32.mrb[42].mxu1 }
 0x665   : > { %16755 = vst [vmem:[#allocation44_spill] sm:$0xff] %v13953_v40  ;;  %v13955_v50 = vpop.f32.mrb[43].mxu1  ;;  %v4469_v40 = vmul.f32 %v13996_v52, %v4368_v57 }
 0x66a   : > { %v13957_v51 = vpop.f32.mrb[44].mxu1 }
 0x66b   : > { %16756 = vst [vmem:[#allocation43_spill] sm:$0xff] %v13957_v51  ;;  %v13959_v49 = vpop.f32.mrb[45].mxu1 }
 0x66c   : > { %v13961_v8 = vpop.f32.mrb[46].mxu1 }
 0x66d   : > { %16757 = vst [vmem:[#allocation46_spill] sm:$0xff] %v13961_v8  ;;  %v13963_v2 = vpop.f32.mrb[47].mxu1 }
 0x672   : > { %v13971_v22 = vpop.f32.mrb[48].mxu1 }
 0x673   : > { %16758 = vst [vmem:[#allocation45_spill] sm:$0xff] %v13971_v22  ;;  %v13973_v45 = vpop.f32.mrb[49].mxu1  ;;  %v13998_v22 = vrot.slane %v4448_v13, %v4460_v34 }
 0x674   : > { %16759 = vst [vmem:[#allocation48_spill] sm:$0xff] %v13973_v45  ;;  %v13975_v20 = vpop.f32.mrb[50].mxu1 }
 0x675   : > { %16760 = vst [vmem:[#allocation47_spill] sm:$0xff] %v13975_v20  ;;  %v13977_v28 = vpop.f32.mrb[51].mxu1  ;;  %v4549_v20 = vld [vmem:[#allocation11] sm:$0x7] }
 0x676   : > { %16761 = vst [vmem:[#allocation50_spill] sm:$0xff] %v13977_v28  ;;  %v14005_v8 = vrot.slane %v4549_v20, %v4460_v34  ;;  %v16769_v34 = vld [vmem:[#allocation41_spill] sm:$0xff] }
 0x67a   : > { %v13985_v11 = vpop.f32.mrb[52].mxu1 }
 0x67b   : > { %16762 = vst [vmem:[#allocation49_spill] sm:$0xff] %v13985_v11  ;;  %v13987_v29 = vpop.f32.mrb[53].mxu1  ;;  %v14003_v11 = vrot.slane %v4549_v20, %v16767_v42  ;;  %v4371_v42 = vmax.f32 %v13849_v36, 0.0  ;;  %v4364_v36 = vmax.f32 %v13839_v60, 0.0  ;;  %v11897_v60 = vld [vmem:[%s16754_s14 + $0x78] sm:$0xff]  }
 0x67c   : > { %16763 = vst [vmem:[#allocation51_spill] sm:$0xff] %v13987_v29  ;;  %v13989_v37 = vpop.f32.mrb[54].mxu1  ;;  %9939 = vmatprep.subr.bf16.mxu0 %v11897_v60 }
 0x67d   : > { %16764 = vst [vmem:[#allocation52_spill] sm:$0xff] %v13989_v37  ;;  %v13991_v6 = vpop.f32.mrb[55].mxu1  ;;  %v14011_v16 = vadd.f32 %v14003_v11, %v4466_v58  ;;  %v4472_v47 = vmul.f32 %v13996_v52, %v4371_v42 }
 0x67e   : > { %16765 = vst [vmem:[#allocation53_spill] sm:$0xff] %v13991_v6 }
 0x67f   : > { %16768 = vst [vmem:[#allocation40_spill] sm:$0xff] %v14011_v16 }
 0x682   : > { %v4169_v37 = vpop.f32.mrb[56].mxu1 }
 0x683   : > { %v4366_v29 = vmax.f32 %v4169_v37, 0.0  ;;  %v4171_v6 = vpop.f32.mrb[57].mxu1 }
 0x684   : > { %v4172_v44 = vpop.f32.mrb[58].mxu1 }
 0x685   : > { %v4467_v28 = vmul.f32 %v13998_v22, %v4366_v29  ;;  %v4369_v45 = vmax.f32 %v4172_v44, 0.0  ;;  %v4174_v51 = vpop.f32.mrb[59].mxu1  ;;  %v14021_v29 = vrot.slane %v4448_v13, %v16769_v34 }
 0x686   : > { %v4475_v51 = vmul.f32 %v13996_v52, %v4374_v4  ;;  %v14037_v4 = vrot.slane %v4549_v20, %v16769_v34  ;;  %v4373_v34 = vmax.f32 %v13851_v21, 0.0 }
 0x687   : > { %v4470_v37 = vmul.f32 %v13998_v22, %v4369_v45  ;;  %v14017_v6 = vadd.f32 %v14005_v8, %v4467_v28  ;;  %v14031_v45 = vadd.f32 %v14003_v11, %v4469_v40  ;;  %v4471_v28 = vmul.f32 %v14021_v29, %v4370_v24 }
 0x688   : > { %v14044_v40 = vadd.f32 %v14003_v11, %v4475_v51  ;;  %v4465_v20 = vmul.f32 %v14021_v29, %v4364_v36  ;;  %v14057_v51 = vadd.f32 %v14003_v11, %v4472_v47  ;;  %v4474_v60 = vmul.f32 %v14021_v29, %v4373_v34 }
 0x689   : > { %v14025_v57 = vadd.f32 %v14005_v8, %v4470_v37  ;;  %v11504_v10 = vpack.i.bf16 %v14017_v6, %v14011_v16  ;;  %v4468_v37 = vmul.f32 %v14021_v29, %v4367_v35  ;;  %v14052_v35 = vadd.f32 %v14037_v4, %v4471_v28 }
 0x68a   : > { %v4177_v58 = vpop.f32.mrb[60].mxu1  ;;  %16770 = vst [vmem:[#allocation42_spill] sm:$0xff] %v14044_v40  ;;  %16771 = vst [vmem:[#allocation41_spill] sm:$0xff] %v14057_v51  ;;  %v4376_v47 = vmax.f32 %v13855_v33, 0.0  ;;  %v4386_v34 = vmax.f32 %v13875_v63, 0.0  ;;  %v11898_v33 = vld [vmem:[%s16754_s14 + $0x38] sm:$0xff]  }
 0x68b   : > { %v4372_v13 = vmax.f32 %v4177_v58, 0.0  ;;  %11505 = vrot.lane.b32.xlu0 %v11504_v10, %s12463_s7  ;;  %v4179_v44 = vpop.f32.mrb[61].mxu1  ;;  %v11509_v10 = vpack.i.bf16 %v14025_v57, %v14031_v45  ;;  %v14064_v36 = vadd.f32 %v14037_v4, %v4468_v37  ;;  %v11524_v28 = vpack.i.bf16 %v14044_v40, %v14052_v35  ;;  %9940 = vmatpush3.bf16.msra.mxu0 %v11898_v33 }
 0x68c   : > { %v4180_v16 = vpop.f32.mrb[62].mxu1  ;;  %v4377_v44 = vmax.f32 %v13857_v7, 0.0  ;;  %v4383_v37 = vmax.f32 %v13871_v27, 0.0  ;;  %v4477_v63 = vmul.f32 %v14021_v29, %v4376_v47 }
 0x68d   : > { %v4473_v24 = vmul.f32 %v13998_v22, %v4372_v13  ;;  %v4375_v42 = vmax.f32 %v4180_v16, 0.0  ;;  %v4182_v58 = vpop.f32.mrb[63].mxu1  ;;  %v4380_v13 = vmax.f32 %v13861_v12, 0.0 }
 0x68e   : > { %v4478_v12 = vmul.f32 %v13996_v52, %v4377_v44 }
 0x68f   : > { %11510 = vrot.lane.b32.xlu0 %v11509_v10, %s12463_s7  ;;  %v14060_v16 = vadd.f32 %v14005_v8, %v4473_v24  ;;  %v4476_v21 = vmul.f32 %v13998_v22, %v4375_v42  ;;  %v14074_v24 = vadd.f32 %v14037_v4, %v4465_v20  ;;  %v4481_v40 = vmul.f32 %v13996_v52, %v4380_v13 }
 0x690   : > { %v4379_v13 = vmax.f32 %v13859_v39, 0.0  ;;  %v4487_v39 = vmul.f32 %v13996_v52, %v4386_v34  ;;  %v4389_v34 = vmax.f32 %v13879_v46, 0.0 }
 0x691   : > { %v11514_v7 = vpack.i.bf16 %v14060_v16, %v14057_v51  ;;  %v14086_v20 = vadd.f32 %v14005_v8, %v4476_v21  ;;  %v14098_v21 = vadd.f32 %v14003_v11, %v4478_v12 }
 0x692   : > { %v4185_v58 = vpop.f32.mrb[64].mxu1  ;;  %v4480_v33 = vmul.f32 %v14021_v29, %v4379_v13 }
 0x693   : > { %v4378_v10 = vmax.f32 %v4185_v58, 0.0  ;;  %11525 = vrot.lane.b32.xlu0 %v11524_v28, %s12463_s7  ;;  %11515 = vrot.lane.b32.xlu1 %v11514_v7, %s12463_s7  ;;  %v4187_v42 = vpop.f32.mrb[65].mxu1  ;;  %v11519_v28 = vpack.i.bf16 %v14064_v36, %v14074_v24  ;;  %v14092_v7 = vadd.f32 %v14037_v4, %v4474_v60  ;;  %16773 = vst [vmem:[#allocation55_spill] sm:$0xff] %v14098_v21 }
 0x694   : > { %v4188_v51 = vpop.f32.mrb[66].mxu1  ;;  %v4382_v42 = vmax.f32 %v13869_v19, 0.0  ;;  %v14107_v60 = vadd.f32 %v14003_v11, %v4481_v40  ;;  %v11529_v47 = vpack.i.bf16 %v14098_v21, %v14086_v20 }
 0x695   : > { %v4479_v27 = vmul.f32 %v13998_v22, %v4378_v10  ;;  %v4381_v44 = vmax.f32 %v4188_v51, 0.0  ;;  %v4190_v58 = vpop.f32.mrb[67].mxu1  ;;  %16772 = vst [vmem:[#allocation54_spill] sm:$0xff] %v14092_v7  ;;  %v4484_v10 = vmul.f32 %v13996_v52, %v4383_v37  ;;  %v14118_v37 = vadd.f32 %v14037_v4, %v4477_v63 }
 0x697   : > { %v14102_v51 = vadd.f32 %v14005_v8, %v4479_v27  ;;  %v4482_v58 = vmul.f32 %v13998_v22, %v4381_v44  ;;  %11520 = vrot.lane.b32.xlu1 %v11519_v28, %s12463_s7  ;;  %v4483_v27 = vmul.f32 %v14021_v29, %v4382_v42  ;;  %v14123_v44 = vadd.f32 %v14003_v11, %v4484_v10 }
 0x698   : > { %v11539_v13 = vpack.i.bf16 %v14107_v60, %v14118_v37  ;;  %v4392_v42 = vmax.f32 %v13883_v15, 0.0 }
 0x699   : > { %16774 = vst [vmem:[#allocation56_spill] sm:$0xff] %v14102_v51  ;;  %v14111_v19 = vadd.f32 %v14005_v8, %v4482_v58  ;;  %v11534_v12 = vpack.i.bf16 %v14092_v7, %v14102_v51  ;;  %16775 = vst [vmem:[#allocation57_spill] sm:$0xff] %v14123_v44  ;;  %v14129_v51 = vadd.f32 %v14003_v11, %v4487_v39  ;;  %v4385_v39 = vmax.f32 %v13873_v31, 0.0 }
 0x69a   : > { %v4193_v40 = vpop.f32.mrb[68].mxu1 }
 0x69b   : > { %v4384_v28 = vmax.f32 %v4193_v40, 0.0  ;;  %11530 = vrot.lane.b32.xlu1 %v11529_v47, %s12463_s7  ;;  %11535 = vrot.lane.b32.xlu0 %v11534_v12, %s12463_s7  ;;  %v4195_v58 = vpop.f32.mrb[69].mxu1  ;;  %16776 = vst [vmem:[#allocation58_spill] sm:$0xff] %v14129_v51  ;;  %v11544_v46 = vpack.i.bf16 %v14123_v44, %v14111_v19  ;;  %v14138_v47 = vadd.f32 %v14037_v4, %v4480_v33  ;;  %v4388_v40 = vmax.f32 %v13877_v54, 0.0 }
 0x69c   : > { %v4196_v63 = vpop.f32.mrb[70].mxu1  ;;  %v14141_v12 = vadd.f32 %v14037_v4, %v4483_v27  ;;  %v4490_v58 = vmul.f32 %v13996_v52, %v4389_v34  ;;  %v4493_v33 = vmul.f32 %v13996_v52, %v4392_v42  ;;  %v14163_v34 = vld [vmem:[%s16754_s14 + $0x80] sm:$0xff]   ;;  %v4395_v42 = vmax.f32 %v13893_v26, 0.0 }
 0x69d   : > { %v4485_v10 = vmul.f32 %v13998_v22, %v4384_v28  ;;  %v4387_v21 = vmax.f32 %v4196_v63, 0.0  ;;  %v4198_v7 = vpop.f32.mrb[71].mxu1  ;;  %v4489_v63 = vmul.f32 %v14021_v29, %v4388_v40  ;;  %10246 = vmatprep.subr.bf16.mxu0 %v14163_v34 }
 0x69e   : > { %v11554_v31 = vpack.i.bf16 %v14129_v51, %v14141_v12 }
 0x69f   : > { %v14147_v15 = vadd.f32 %v14005_v8, %v4485_v10  ;;  %v4488_v7 = vmul.f32 %v13998_v22, %v4387_v21  ;;  %11540 = vrot.lane.b32.xlu1 %v11539_v13, %s12463_s7  ;;  %11545 = vrot.lane.b32.xlu0 %v11544_v46, %s12463_s7  ;;  %v4486_v21 = vmul.f32 %v14021_v29, %v4385_v39 }
 0x6a0   : > { %v14168_v13 = vadd.f32 %v14003_v11, %v4490_v58  ;;  %v14176_v39 = vadd.f32 %v14003_v11, %v4493_v33  ;;  %v4496_v33 = vmul.f32 %v13996_v52, %v4395_v42 }
 0x6a1   : > { %v14154_v27 = vadd.f32 %v14005_v8, %v4488_v7  ;;  %v11549_v54 = vpack.i.bf16 %v14138_v47, %v14147_v15  ;;  %v4398_v7 = vmax.f32 %v13897_v25, 0.0  ;;  %v4394_v25 = vmax.f32 %v13891_v32, 0.0 }
 0x6a2   : > { %v4201_v28 = vpop.f32.mrb[72].mxu1  ;;  %16777 = vst [vmem:[#allocation59_spill] sm:$0xff] %v14168_v13  ;;  %16778 = vst [vmem:[#allocation60_spill] sm:$0xff] %v14176_v39 }
 0x6a3   : > { %v4390_v10 = vmax.f32 %v4201_v28, 0.0  ;;  %11555 = vrot.lane.b32.xlu0 %v11554_v31, %s12463_s7  ;;  %11550 = vrot.lane.b32.xlu1 %v11549_v54, %s12463_s7  ;;  %v4203_v46 = vpop.f32.mrb[73].mxu1  ;;  %v11559_v26 = vpack.i.bf16 %v14168_v13, %v14154_v27  ;;  %v14182_v31 = vadd.f32 %v14037_v4, %v4486_v21  ;;  %v4391_v54 = vmax.f32 %v13881_v53, 0.0 }
 0x6a4   : > { %v4204_v51 = vpop.f32.mrb[74].mxu1  ;;  %v14187_v28 = vadd.f32 %v14037_v4, %v4489_v63  ;;  %v4495_v42 = vmul.f32 %v14021_v29, %v4394_v25 }
 0x6a5   : > { %v4491_v40 = vmul.f32 %v13998_v22, %v4390_v10  ;;  %v4393_v58 = vmax.f32 %v4204_v51, 0.0  ;;  %v4206_v44 = vpop.f32.mrb[75].mxu1  ;;  %v4492_v63 = vmul.f32 %v14021_v29, %v4391_v54  ;;  %v4404_v54 = vmax.f32 %v13905_v5, 0.0 }
 0x6a6   : > { %v4499_v44 = vmul.f32 %v13996_v52, %v4398_v7  ;;  %v11569_v53 = vpack.i.bf16 %v14176_v39, %v14187_v28 }
 0x6a7   : > { %v14191_v46 = vadd.f32 %v14005_v8, %v4491_v40  ;;  %v4494_v51 = vmul.f32 %v13998_v22, %v4393_v58  ;;  %11560 = vrot.lane.b32.xlu1 %v11559_v26, %s12463_s7  ;;  %v14206_v40 = vadd.f32 %v14003_v11, %v4496_v33  ;;  %v4401_v58 = vmax.f32 %v13901_v3, 0.0 }
 0x6a8   : > { %v14219_v3 = vadd.f32 %v14037_v4, %v4492_v63 }
 0x6a9   : > { %16779 = vst [vmem:[#allocation61_spill] sm:$0xff] %v14191_v46  ;;  %v14197_v21 = vadd.f32 %v14005_v8, %v4494_v51  ;;  %v11564_v32 = vpack.i.bf16 %v14182_v31, %v14191_v46  ;;  %v14212_v51 = vadd.f32 %v14003_v11, %v4499_v44  ;;  %v4400_v44 = vmax.f32 %v13899_v43, 0.0 }
 0x6aa   : > { %v4209_v10 = vpop.f32.mrb[76].mxu1 }
 0x6ab   : > { %v4396_v7 = vmax.f32 %v4209_v10, 0.0  ;;  %11570 = vrot.lane.b32.xlu1 %v11569_v53, %s12463_s7  ;;  %11565 = vrot.lane.b32.xlu0 %v11564_v32, %s12463_s7  ;;  %v4211_v26 = vpop.f32.mrb[77].mxu1  ;;  %16780 = vst [vmem:[#allocation62_spill] sm:$0xff] %v14212_v51  ;;  %v11574_v33 = vpack.i.bf16 %v14206_v40, %v14197_v21  ;;  %v14222_v53 = vadd.f32 %v14037_v4, %v4495_v42  ;;  %v4397_v32 = vmax.f32 %v13895_v41, 0.0 }
 0x6ac   : > { %v4212_v39 = vpop.f32.mrb[78].mxu1  ;;  %v4502_v10 = vmul.f32 %v13996_v52, %v4401_v58  ;;  %v4407_v26 = vmax.f32 %v13915_v38, 0.0 }
 0x6ad   : > { %v4497_v25 = vmul.f32 %v13998_v22, %v4396_v7  ;;  %v4399_v13 = vmax.f32 %v4212_v39, 0.0  ;;  %v4214_v46 = vpop.f32.mrb[79].mxu1  ;;  %v11584_v42 = vpack.i.bf16 %v14212_v51, %v14222_v53  ;;  %v4498_v43 = vmul.f32 %v14021_v29, %v4397_v32 }
 0x6ae   : > { %v4505_v46 = vmul.f32 %v13996_v52, %v4404_v54  ;;  %v4501_v7 = vmul.f32 %v14021_v29, %v4400_v44 }
 0x6af   : > { %v14228_v5 = vadd.f32 %v14005_v8, %v4497_v25  ;;  %v4500_v39 = vmul.f32 %v13998_v22, %v4399_v13  ;;  %11575 = vrot.lane.b32.xlu0 %v11574_v33, %s12463_s7  ;;  %v14243_v13 = vadd.f32 %v14003_v11, %v4502_v10  ;;  %v4410_v33 = vmax.f32 %v13919_v59, 0.0 }
 0x6b0   : > { %v14250_v51 = vadd.f32 %v14003_v11, %v4505_v46  ;;  %v14256_v38 = vadd.f32 %v14037_v4, %v4498_v43  ;;  %v14261_v59 = vadd.f32 %v14037_v4, %v4501_v7  ;;  %v4508_v46 = vmul.f32 %v13996_v52, %v4407_v26 }
 0x6b1   : > { %16781 = vst [vmem:[#allocation63_spill] sm:$0xff] %v14228_v5  ;;  %v14234_v63 = vadd.f32 %v14005_v8, %v4500_v39  ;;  %v11579_v41 = vpack.i.bf16 %v14219_v3, %v14228_v5  ;;  %16782 = vst [vmem:[#allocation64_spill] sm:$0xff] %v14243_v13 }
 0x6b2   : > { %v4217_v58 = vpop.f32.mrb[80].mxu1  ;;  %16783 = vst [vmem:[#allocation65_spill] sm:$0xff] %v14250_v51 }
 0x6b3   : > { %v4402_v54 = vmax.f32 %v4217_v58, 0.0  ;;  %11585 = vrot.lane.b32.xlu0 %v11584_v42, %s12463_s7  ;;  %11580 = vrot.lane.b32.xlu1 %v11579_v41, %s12463_s7  ;;  %v4219_v25 = vpop.f32.mrb[81].mxu1  ;;  %v11589_v10 = vpack.i.bf16 %v14243_v13, %v14234_v63  ;;  %v4403_v42 = vmax.f32 %v13903_v14, 0.0  ;;  %v4406_v41 = vmax.f32 %v13913_v17, 0.0 }
 0x6b4   : > { %v4220_v39 = vpop.f32.mrb[82].mxu1  ;;  %v11599_v14 = vpack.i.bf16 %v14250_v51, %v14261_v59 }
 0x6b5   : > { %v4503_v32 = vmul.f32 %v13998_v22, %v4402_v54  ;;  %v4405_v44 = vmax.f32 %v4220_v39, 0.0  ;;  %v4222_v5 = vpop.f32.mrb[83].mxu1  ;;  %v4511_v54 = vmul.f32 %v13996_v52, %v4410_v33  ;;  %v4504_v7 = vmul.f32 %v14021_v29, %v4403_v42 }
 0x6b6   : > { %v4507_v26 = vmul.f32 %v14021_v29, %v4406_v41  ;;  %v14280_v39 = vadd.f32 %v14003_v11, %v4508_v46  ;;  %v4416_v42 = vmax.f32 %v13930_v1, 0.0 }
 0x6b7   : > { %v14265_v58 = vadd.f32 %v14005_v8, %v4503_v32  ;;  %v4506_v5 = vmul.f32 %v13998_v22, %v4405_v44  ;;  %11590 = vrot.lane.b32.xlu1 %v11589_v10, %s12463_s7  ;;  %v4413_v32 = vmax.f32 %v13926_v55, 0.0  ;;  %v14286_v10 = vadd.f32 %v14003_v11, %v4511_v54 }
 0x6b8   : > { %v14293_v55 = vadd.f32 %v14037_v4, %v4504_v7  ;;  %v4412_v54 = vmax.f32 %v13924_v30, 0.0 }
 0x6b9   : > { %v14271_v43 = vadd.f32 %v14005_v8, %v4506_v5  ;;  %v11594_v17 = vpack.i.bf16 %v14256_v38, %v14265_v58  ;;  %16784 = vst [vmem:[#allocation66_spill] sm:$0xff] %v14286_v10 }
 0x6ba   : > { %v4225_v25 = vpop.f32.mrb[84].mxu1 }
 0x6bb   : > { %v4408_v33 = vmax.f32 %v4225_v25, 0.0  ;;  %11600 = vrot.lane.b32.xlu1 %v11599_v14, %s12463_s7  ;;  %11595 = vrot.lane.b32.xlu0 %v11594_v17, %s12463_s7  ;;  %v4227_v44 = vpop.f32.mrb[85].mxu1  ;;  %v11604_v46 = vpack.i.bf16 %v14280_v39, %v14271_v43  ;;  %v14296_v14 = vadd.f32 %v14037_v4, %v4507_v26  ;;  %v4409_v17 = vmax.f32 %v13917_v61, 0.0 }
 0x6bc   : > { %v4228_v5 = vpop.f32.mrb[86].mxu1  ;;  %v4514_v25 = vmul.f32 %v13996_v52, %v4413_v32  ;;  %v4513_v44 = vmul.f32 %v14021_v29, %v4412_v54 }
 0x6bd   : > { %v4509_v41 = vmul.f32 %v13998_v22, %v4408_v33  ;;  %v4411_v51 = vmax.f32 %v4228_v5, 0.0  ;;  %v4230_v13 = vpop.f32.mrb[87].mxu1  ;;  %v4517_v33 = vmul.f32 %v13996_v52, %v4416_v42  ;;  %v11614_v26 = vpack.i.bf16 %v14286_v10, %v14296_v14 }
 0x6be   : > { %v4510_v30 = vmul.f32 %v14021_v29, %v4409_v17  ;;  %v4419_v5 = vmax.f32 %v13937_v23, 0.0 }
 0x6bf   : > { %v14302_v1 = vadd.f32 %v14005_v8, %v4509_v41  ;;  %v4512_v13 = vmul.f32 %v13998_v22, %v4411_v51  ;;  %11605 = vrot.lane.b32.xlu0 %v11604_v46, %s12463_s7  ;;  %v14317_v51 = vadd.f32 %v14003_v11, %v4514_v25  ;;  %v4422_v46 = vmax.f32 %v13941_v48, 0.0 }
 0x6c0   : > { %v14324_v10 = vadd.f32 %v14003_v11, %v4517_v33  ;;  %v14330_v23 = vadd.f32 %v14037_v4, %v4510_v30  ;;  %v14335_v48 = vadd.f32 %v14037_v4, %v4513_v44  ;;  %v4520_v33 = vmul.f32 %v13996_v52, %v4419_v5 }
 0x6c1   : > { %16785 = vst [vmem:[#allocation67_spill] sm:$0xff] %v14302_v1  ;;  %v14308_v7 = vadd.f32 %v14005_v8, %v4512_v13  ;;  %v11609_v61 = vpack.i.bf16 %v14293_v55, %v14302_v1  ;;  %16786 = vst [vmem:[#allocation68_spill] sm:$0xff] %v14317_v51 }
 0x6c2   : > { %v4233_v32 = vpop.f32.mrb[88].mxu1  ;;  %16787 = vst [vmem:[#allocation69_spill] sm:$0xff] %v14324_v10 }
 0x6c3   : > { %v4414_v42 = vmax.f32 %v4233_v32, 0.0  ;;  %11615 = vrot.lane.b32.xlu0 %v11614_v26, %s12463_s7  ;;  %11610 = vrot.lane.b32.xlu1 %v11609_v61, %s12463_s7  ;;  %v4235_v41 = vpop.f32.mrb[89].mxu1  ;;  %v11619_v25 = vpack.i.bf16 %v14317_v51, %v14308_v7  ;;  %v4415_v26 = vmax.f32 %v13928_v9, 0.0  ;;  %v4418_v61 = vmax.f32 %v13935_v56, 0.0 }
 0x6c4   : > { %v4236_v13 = vpop.f32.mrb[90].mxu1  ;;  %v11629_v9 = vpack.i.bf16 %v14324_v10, %v14335_v48 }
 0x6c5   : > { %v4515_v17 = vmul.f32 %v13998_v22, %v4414_v42  ;;  %v4417_v54 = vmax.f32 %v4236_v13, 0.0  ;;  %v4238_v1 = vpop.f32.mrb[91].mxu1  ;;  %v4523_v42 = vmul.f32 %v13996_v52, %v4422_v46  ;;  %v4516_v44 = vmul.f32 %v14021_v29, %v4415_v26 }
 0x6c6   : > { %v4519_v5 = vmul.f32 %v14021_v29, %v4418_v61  ;;  %v14354_v13 = vadd.f32 %v14003_v11, %v4520_v33  ;;  %v4428_v26 = vmax.f32 %v13955_v50, 0.0 }
 0x6c7   : > { %v14339_v32 = vadd.f32 %v14005_v8, %v4515_v17  ;;  %v4518_v1 = vmul.f32 %v13998_v22, %v4417_v54  ;;  %11620 = vrot.lane.b32.xlu1 %v11619_v25, %s12463_s7  ;;  %v4425_v17 = vmax.f32 %v13951_v18, 0.0  ;;  %v14360_v25 = vadd.f32 %v14003_v11, %v4523_v42 }
 0x6c8   : > { %16788 = vst [vmem:[#allocation70_spill] sm:$0xff] %v14354_v13  ;;  %v14367_v18 = vadd.f32 %v14037_v4, %v4516_v44  ;;  %v4424_v42 = vmax.f32 %v13949_v0, 0.0 }
 0x6c9   : > { %v14345_v30 = vadd.f32 %v14005_v8, %v4518_v1  ;;  %v11624_v56 = vpack.i.bf16 %v14330_v23, %v14339_v32  ;;  %16789 = vst [vmem:[#allocation71_spill] sm:$0xff] %v14360_v25 }
 0x6ca   : > { %v4241_v41 = vpop.f32.mrb[92].mxu1 }
 0x6cb   : > { %v4420_v46 = vmax.f32 %v4241_v41, 0.0  ;;  %11630 = vrot.lane.b32.xlu1 %v11629_v9, %s12463_s7  ;;  %11625 = vrot.lane.b32.xlu0 %v11624_v56, %s12463_s7  ;;  %v4243_v54 = vpop.f32.mrb[93].mxu1  ;;  %v11634_v33 = vpack.i.bf16 %v14354_v13, %v14345_v30  ;;  %v14370_v9 = vadd.f32 %v14037_v4, %v4519_v5  ;;  %v4421_v56 = vmax.f32 %v13939_v62, 0.0 }
 0x6cc   : > { %v4244_v1 = vpop.f32.mrb[94].mxu1  ;;  %v4526_v41 = vmul.f32 %v13996_v52, %v4425_v17  ;;  %v4525_v54 = vmul.f32 %v14021_v29, %v4424_v42 }
 0x6cd   : > { %v4521_v61 = vmul.f32 %v13998_v22, %v4420_v46  ;;  %v4423_v10 = vmax.f32 %v4244_v1, 0.0  ;;  %v4246_v51 = vpop.f32.mrb[95].mxu1  ;;  %v4529_v46 = vmul.f32 %v13996_v52, %v4428_v26  ;;  %v11644_v5 = vpack.i.bf16 %v14360_v25, %v14370_v9 }
 0x6ce   : > { %v4522_v0 = vmul.f32 %v14021_v29, %v4421_v56  ;;  %v4431_v1 = vmax.f32 %v13959_v49, 0.0 }
 0x6cf   : > { %v14376_v50 = vadd.f32 %v14005_v8, %v4521_v61  ;;  %v4524_v51 = vmul.f32 %v13998_v22, %v4423_v10  ;;  %11635 = vrot.lane.b32.xlu0 %v11634_v33, %s12463_s7  ;;  %v14391_v10 = vadd.f32 %v14003_v11, %v4526_v41  ;;  %v4434_v33 = vmax.f32 %v13963_v2, 0.0 }
 0x6d0   : > { %v14398_v25 = vadd.f32 %v14003_v11, %v4529_v46  ;;  %v14404_v49 = vadd.f32 %v14037_v4, %v4522_v0  ;;  %v14409_v2 = vadd.f32 %v14037_v4, %v4525_v54  ;;  %v4532_v46 = vmul.f32 %v13996_v52, %v4431_v1 }
 0x6d1   : > { %16790 = vst [vmem:[#allocation72_spill] sm:$0xff] %v14376_v50  ;;  %v14382_v44 = vadd.f32 %v14005_v8, %v4524_v51  ;;  %v11639_v62 = vpack.i.bf16 %v14367_v18, %v14376_v50  ;;  %16792 = vst [vmem:[#allocation74_spill] sm:$0xff] %v14391_v10 }
 0x6d2   : > { %v4249_v17 = vpop.f32.mrb[96].mxu1  ;;  %16793 = vst [vmem:[#allocation75_spill] sm:$0xff] %v14398_v25  ;;  %16794 = vst [vmem:[#allocation76_spill] sm:$0xff] %v14404_v49 }
 0x6d3   : > { %16791 = vst [vmem:[#allocation73_spill] sm:$0xff] %v14382_v44  ;;  %v4426_v26 = vmax.f32 %v4249_v17, 0.0  ;;  %11645 = vrot.lane.b32.xlu0 %v11644_v5, %s12463_s7  ;;  %11640 = vrot.lane.b32.xlu1 %v11639_v62, %s12463_s7  ;;  %v4251_v61 = vpop.f32.mrb[97].mxu1  ;;  %v11649_v41 = vpack.i.bf16 %v14391_v10, %v14382_v44  ;;  %v16795_v5 = vld [vmem:[#allocation44_spill] sm:$0xff]  ;;  %v16796_v62 = vld [vmem:[#allocation43_spill] sm:$0xff] }
 0x6d4   : > { %v4252_v51 = vpop.f32.mrb[98].mxu1  ;;  %v4427_v17 = vmax.f32 %v16795_v5, 0.0  ;;  %v4430_v61 = vmax.f32 %v16796_v62, 0.0  ;;  %16797 = vst [vmem:[#allocation44_spill] sm:$0xff] %v14409_v2 }
 0x6d5   : > { %v4527_v56 = vmul.f32 %v13998_v22, %v4426_v26  ;;  %v4429_v42 = vmax.f32 %v4252_v51, 0.0  ;;  %v4254_v50 = vpop.f32.mrb[99].mxu1  ;;  %v4535_v26 = vmul.f32 %v13996_v52, %v4434_v33  ;;  %v11659_v51 = vpack.i.bf16 %v14398_v25, %v14409_v2 }
 0x6d6   : > { %v4528_v1 = vmul.f32 %v14021_v29, %v4427_v17 }
 0x6d7   : > { %v14413_v13 = vadd.f32 %v14005_v8, %v4527_v56  ;;  %v4530_v50 = vmul.f32 %v13998_v22, %v4429_v42  ;;  %11650 = vrot.lane.b32.xlu1 %v11649_v41, %s12463_s7  ;;  %v4531_v56 = vmul.f32 %v14021_v29, %v4430_v61  ;;  %v14428_v42 = vadd.f32 %v14003_v11, %v4532_v46  ;;  %v16800_v41 = vld [vmem:[#allocation48_spill] sm:$0xff] }
 0x6d8   : > { %v4437_v62 = vmax.f32 %v16800_v41, 0.0  ;;  %v14434_v25 = vadd.f32 %v14003_v11, %v4535_v26  ;;  %v16806_v26 = vld [vmem:[#allocation45_spill] sm:$0xff] }
 0x6d9   : > { %16798 = vst [vmem:[#allocation43_spill] sm:$0xff] %v14413_v13  ;;  %v14419_v0 = vadd.f32 %v14005_v8, %v4530_v50  ;;  %v11654_v54 = vpack.i.bf16 %v14404_v49, %v14413_v13  ;;  %16799 = vst [vmem:[#allocation77_spill] sm:$0xff] %v14428_v42  ;;  %v16802_v13 = vld [vmem:[#allocation50_spill] sm:$0xff] }
 0x6da   : > { %v4257_v5 = vpop.f32.mrb[100].mxu1  ;;  %16801 = vst [vmem:[#allocation48_spill] sm:$0xff] %v14434_v25  ;;  %v4440_v17 = vmax.f32 %v16802_v13, 0.0  ;;  %v4538_v44 = vmul.f32 %v13996_v52, %v4437_v62 }
 0x6db   : > { %v4432_v33 = vmax.f32 %v4257_v5, 0.0  ;;  %11660 = vrot.lane.b32.xlu1 %v11659_v51, %s12463_s7  ;;  %11655 = vrot.lane.b32.xlu0 %v11654_v54, %s12463_s7  ;;  %v4259_v50 = vpop.f32.mrb[101].mxu1  ;;  %v11664_v46 = vpack.i.bf16 %v14428_v42, %v14419_v0  ;;  %v14441_v5 = vadd.f32 %v14037_v4, %v4528_v1  ;;  %v14444_v51 = vadd.f32 %v14037_v4, %v4531_v56  ;;  %v16805_v54 = vld [vmem:[#allocation46_spill] sm:$0xff] }
 0x6dc   : > { %v4260_v10 = vpop.f32.mrb[102].mxu1  ;;  %v4433_v41 = vmax.f32 %v16805_v54, 0.0  ;;  %v4436_v50 = vmax.f32 %v16806_v26, 0.0 }
 0x6dd   : > { %v4533_v61 = vmul.f32 %v13998_v22, %v4432_v33  ;;  %v4435_v49 = vmax.f32 %v4260_v10, 0.0  ;;  %v4262_v2 = vpop.f32.mrb[103].mxu1  ;;  %16803 = vst [vmem:[#allocation50_spill] sm:$0xff] %v14441_v5  ;;  %16804 = vst [vmem:[#allocation78_spill] sm:$0xff] %v14444_v51  ;;  %v11674_v56 = vpack.i.bf16 %v14434_v25, %v14444_v51 }
 0x6de   : > { %v4541_v2 = vmul.f32 %v13996_v52, %v4440_v17  ;;  %v4534_v62 = vmul.f32 %v14021_v29, %v4433_v41 }
 0x6df   : > { %v14450_v13 = vadd.f32 %v14005_v8, %v4533_v61  ;;  %v4536_v10 = vmul.f32 %v13998_v22, %v4435_v49  ;;  %11665 = vrot.lane.b32.xlu0 %v11664_v46, %s12463_s7  ;;  %v4537_v61 = vmul.f32 %v14021_v29, %v4436_v50  ;;  %v14465_v49 = vadd.f32 %v14003_v11, %v4538_v44  ;;  %v16810_v46 = vld [vmem:[#allocation51_spill] sm:$0xff] }
 0x6e0   : > { %v4443_v26 = vmax.f32 %v16810_v46, 0.0  ;;  %v14471_v42 = vadd.f32 %v14003_v11, %v4541_v2  ;;  %v14477_v50 = vadd.f32 %v14037_v4, %v4534_v62 }
 0x6e1   : > { %16807 = vst [vmem:[#allocation46_spill] sm:$0xff] %v14450_v13  ;;  %v14456_v1 = vadd.f32 %v14005_v8, %v4536_v10  ;;  %v11669_v33 = vpack.i.bf16 %v14441_v5, %v14450_v13  ;;  %16809 = vst [vmem:[#allocation79_spill] sm:$0xff] %v14465_v49 }
 0x6e2   : > { %v4265_v54 = vpop.f32.mrb[104].mxu1  ;;  %16811 = vst [vmem:[#allocation51_spill] sm:$0xff] %v14471_v42  ;;  %16812 = vst [vmem:[#allocation80_spill] sm:$0xff] %v14477_v50 }
 0x6e3   : > { %16808 = vst [vmem:[#allocation45_spill] sm:$0xff] %v14456_v1  ;;  %v4438_v17 = vmax.f32 %v4265_v54, 0.0  ;;  %11675 = vrot.lane.b32.xlu0 %v11674_v56, %s12463_s7  ;;  %11670 = vrot.lane.b32.xlu1 %v11669_v33, %s12463_s7  ;;  %v4267_v10 = vpop.f32.mrb[105].mxu1  ;;  %v11679_v44 = vpack.i.bf16 %v14465_v49, %v14456_v1  ;;  %v16813_v54 = vld [vmem:[#allocation47_spill] sm:$0xff]  ;;  %v14481_v56 = vadd.f32 %v14037_v4, %v4537_v61 }
 0x6e4   : > { %v4268_v25 = vpop.f32.mrb[106].mxu1  ;;  %v4439_v46 = vmax.f32 %v16813_v54, 0.0  ;;  %v4544_v33 = vmul.f32 %v13996_v52, %v4443_v26 }
 0x6e5   : > { %v4539_v41 = vmul.f32 %v13998_v22, %v4438_v17  ;;  %v4441_v13 = vmax.f32 %v4268_v25, 0.0  ;;  %v4270_v5 = vpop.f32.mrb[107].mxu1  ;;  %16814 = vst [vmem:[#allocation47_spill] sm:$0xff] %v14481_v56  ;;  %v16816_v25 = vld [vmem:[#allocation49_spill] sm:$0xff]  ;;  %v11689_v62 = vpack.i.bf16 %v14471_v42, %v14481_v56  ;;  %v16820_v56 = vld [vmem:[#allocation52_spill] sm:$0xff] }
 0x6e6   : > { %v4442_v5 = vmax.f32 %v16816_v25, 0.0  ;;  %v4540_v26 = vmul.f32 %v14021_v29, %v4439_v46  ;;  %v4445_v1 = vmax.f32 %v16820_v56, 0.0 }
 0x6e7   : > { %v14485_v2 = vadd.f32 %v14005_v8, %v4539_v41  ;;  %v4542_v17 = vmul.f32 %v13998_v22, %v4441_v13  ;;  %11680 = vrot.lane.b32.xlu1 %v11679_v44, %s12463_s7  ;;  %v14499_v41 = vadd.f32 %v14003_v11, %v4544_v33  ;;  %v16819_v13 = vld [vmem:[#allocation53_spill] sm:$0xff] }
 0x6e8   : > { %v4446_v49 = vmax.f32 %v16819_v13, 0.0  ;;  %v4543_v25 = vmul.f32 %v14021_v29, %v4442_v5  ;;  %v14510_v13 = vadd.f32 %v14037_v4, %v4540_v26  ;;  %v4546_v56 = vmul.f32 %v14021_v29, %v4445_v1 }
 0x6e9   : > { %16815 = vst [vmem:[#allocation81_spill] sm:$0xff] %v14485_v2  ;;  %v14491_v10 = vadd.f32 %v14005_v8, %v4542_v17  ;;  %v11684_v61 = vpack.i.bf16 %v14477_v50, %v14485_v2  ;;  %16818 = vst [vmem:[#allocation82_spill] sm:$0xff] %v14499_v41 }
 0x6ea   : > { %v4273_v54 = vpop.f32.mrb[108].mxu1  ;;  %16821 = vst [vmem:[#allocation53_spill] sm:$0xff] %v14510_v13 }
 0x6eb   : > { %16817 = vst [vmem:[#allocation49_spill] sm:$0xff] %v14491_v10  ;;  %v4444_v44 = vmax.f32 %v4273_v54, 0.0  ;;  %11690 = vrot.lane.b32.xlu1 %v11689_v62, %s12463_s7  ;;  %11685 = vrot.lane.b32.xlu0 %v11684_v61, %s12463_s7  ;;  %v4275_v17 = vpop.f32.mrb[109].mxu1  ;;  %v11694_v33 = vpack.i.bf16 %v14499_v41, %v14491_v10  ;;  %v4547_v62 = vmul.f32 %v13996_v52, %v4446_v49 }
 0x6ec   : > { %v4276_v42 = vpop.f32.mrb[110].mxu1  ;;  %v14523_v54 = vadd.f32 %v14037_v4, %v4543_v25  ;;  %v16827_v17 = vld [vmem:[#allocation40_spill] sm:$0xff] }
 0x6ed   : > { %v4545_v2 = vmul.f32 %v13998_v22, %v4444_v44  ;;  %v4447_v50 = vmax.f32 %v4276_v42, 0.0  ;;  %v4278_v46 = vpop.f32.mrb[111].mxu1  ;;  %v14528_v52 = vadd.f32 %v14003_v11, %v4547_v62 }
 0x6ee   : > { %16824 = vst [vmem:[#allocation84_spill] sm:$0xff] %v14523_v54 }
 0x6ef   : > { %v14514_v61 = vadd.f32 %v14005_v8, %v4545_v2  ;;  %v4548_v5 = vmul.f32 %v13998_v22, %v4447_v50  ;;  %11695 = vrot.lane.b32.xlu0 %v11694_v33, %s12463_s7  ;;  %16825 = vst [vmem:[#allocation85_spill] sm:$0xff] %v14528_v52  ;;  %v14534_v22 = vadd.f32 %v14037_v4, %v4546_v56 }
 0x6f1   : > { %16822 = vst [vmem:[#allocation52_spill] sm:$0xff] %v14514_v61  ;;  %v14520_v42 = vadd.f32 %v14005_v8, %v4548_v5  ;;  %v11699_v26 = vpack.i.bf16 %v14510_v13, %v14514_v61  ;;  %16826 = vst [vmem:[#allocation86_spill] sm:$0xff] %v14534_v22 }
 0x6f3   : > { %16823 = vst [vmem:[#allocation83_spill] sm:$0xff] %v14520_v42  ;;  %4890 = vrot.lane.b32.xlu0 %v14523_v54, %s12463_s7  ;;  %11700 = vrot.lane.b32.xlu1 %v11699_v26, %s12463_s7  ;;  %v11704_v8 = vpack.i.bf16 %v14520_v42, %v14528_v52 }
 0x6f7   : > { %4896 = vrot.lane.b32.xlu0 %v14534_v22, %s12463_s7  ;;  %11705 = vrot.lane.b32.xlu1 %v11704_v8, %s12463_s7  ;;  %s9173_s7 = sshll.u32 %s900_s8, 4  ;;  %s16503_s7 = int_to_ptr.vmem [resolvable:$true] %s9173_s7 }
 0x6f8   : > { %p12358_p12 = scmp.lt.s32.totalorder %s16503_s7, %s12356_s25 }
 0x6fd   : > { %v11506_v29 = vpop.permute.xlu0 %11505 }
 0x6fe   : > { %v11508_v11 = vunpack.i.h.bf16 %v11506_v29  ;;  %v11507_v1 = vunpack.i.l.bf16 %v11506_v29 }
 0x700   : > { %v4904_v49 = vsel %vm4902_vm5, %v11507_v1, %v11508_v11  ;;  %v5045_v2 = vmax.f32 %v14017_v6, %v11508_v11 }
 0x701   : > { %v11511_v50 = vpop.permute.xlu0 %11510  ;;  %v14544_v25 = vmax.f32 %v16827_v17, %v4904_v49 }
 0x702   : > { %v11513_v44 = vunpack.i.h.bf16 %v11511_v50  ;;  %v11512_v4 = vunpack.i.l.bf16 %v11511_v50  ;;  %v5218_v26 = vrot.slane %v5045_v2, 1 }
 0x703   : > { %v5215_v6 = vrot.slane %v14544_v25, 1 }
 0x704   : > { %v5048_v46 = vmax.f32 %v14025_v57, %v11513_v44  ;;  %v4906_v33 = vsel %vm4902_vm5, %v11512_v4, %v11513_v44 }
 0x705   : > { %v14549_v62 = vmax.f32 %v14031_v45, %v4906_v33  ;;  %v11526_v5 = vpop.permute.xlu0 %11525  ;;  %v11516_v56 = vpop.permute.xlu1 %11515 }
 0x706   : > { %v5219_v8 = vrot.slane %v5048_v46, 1  ;;  %v11527_v29 = vunpack.i.l.bf16 %v11526_v5  ;;  %v11518_v52 = vunpack.i.h.bf16 %v11516_v56  ;;  %v11517_v50 = vunpack.i.l.bf16 %v11516_v56  ;;  %v16828_v56 = vld [vmem:[#allocation41_spill] sm:$0xff] }
 0x707   : > { %v5216_v11 = vrot.slane %v14549_v62, 1 }
 0x708   : > { %v5220_v49 = vsel %vm1556_vm3, %v5218_v26, %v5219_v8  ;;  %v14555_v57 = vmax.f32 %v14060_v16, %v11518_v52  ;;  %v4907_v44 = vsel %vm4902_vm5, %v11527_v29, %v11517_v50  ;;  %v4908_v45 = vsel %vm4902_vm5, %v11517_v50, %v11518_v52 }
 0x709   : > { %v11521_v17 = vpop.permute.xlu1 %11520  ;;  %v14560_v33 = vsel %vm1556_vm3, %v5215_v6, %v5216_v11  ;;  %v5463_v22 = vmax.f32 %v5045_v2, %v5220_v49  ;;  %v14564_v61 = vmax.f32 %v14052_v35, %v4907_v44  ;;  %v14567_v41 = vmax.f32 %v16828_v56, %v4908_v45 }
 0x70a   : > { %v5225_v42 = vrot.slane %v14555_v57, 1  ;;  %v11523_v26 = vunpack.i.h.bf16 %v11521_v17  ;;  %v11528_v16 = vunpack.i.h.bf16 %v11526_v5  ;;  %v11522_v13 = vunpack.i.l.bf16 %v11521_v17 }
 0x70b   : > { %v5462_v2 = vmax.f32 %v14544_v25, %v14560_v33  ;;  %v16664_v6 = vrot.slane %v14564_v61, 1 }
 0x70c   : > { %v5226_v29 = vsel %vm1556_vm3, %v5219_v8, %v5225_v42  ;;  %v4905_v50 = vsel %vm4902_vm5, %v11523_v26, %v11512_v4  ;;  %v4903_v49 = vsel %vm4902_vm5, %v11522_v13, %v11507_v1  ;;  %v16829_v4 = vrot.slane %v14567_v41, 1 }
 0x70d   : > { %v5046_v35 = vmax.f32 %v14064_v36, %v4905_v50  ;;  %v11531_v44 = vpop.permute.xlu1 %11530  ;;  %v11536_v45 = vpop.permute.xlu0 %11535  ;;  %v5466_v56 = vmax.f32 %v5048_v46, %v5226_v29  ;;  %v5043_v5 = vmax.f32 %v14074_v24, %v4903_v49  ;;  %v16831_v46 = vld [vmem:[#allocation42_spill] sm:$0xff] }
 0x70e   : > { %v11533_v17 = vunpack.i.h.bf16 %v11531_v44  ;;  %v11532_v8 = vunpack.i.l.bf16 %v11531_v44  ;;  %v11538_v54 = vunpack.i.h.bf16 %v11536_v45  ;;  %v11537_v10 = vunpack.i.l.bf16 %v11536_v45  ;;  %v16832_v50 = vld [vmem:[#allocation54_spill] sm:$0xff] }
 0x70f   : > { %v5213_v52 = vrot.slane %v5046_v35, 1  ;;  %v5224_v25 = vsel %vm1556_vm3, %v5216_v11, %v16829_v4  ;;  %v14581_v33 = vpack.c.bf16 %v5466_v56, %v5463_v22  ;;  %v5212_v26 = vrot.slane %v5043_v5, 1 }
 0x710   : > { %v4910_v36 = vsel %vm4902_vm5, %v11528_v16, %v11532_v8  ;;  %v5054_v13 = vmax.f32 %v14086_v20, %v11532_v8  ;;  %v4909_v1 = vsel %vm4902_vm5, %v11538_v54, %v11528_v16  ;;  %v4912_v22 = vsel %vm4902_vm5, %v11533_v17, %v11537_v10  ;;  %v16833_v8 = vld [vmem:[#allocation55_spill] sm:$0xff] }
 0x711   : > { %16830 = vst [vmem:[#allocation40_spill] sm:$0xff] %v14581_v33  ;;  %v5222_v24 = vsel %vm1556_vm3, %v5213_v52, %v16664_v6  ;;  %v14590_v29 = vmax.f32 %v16831_v46, %v4910_v36  ;;  %v14593_v49 = vmax.f32 %v16832_v50, %v4909_v1  ;;  %v11541_v11 = vpop.permute.xlu1 %11540  ;;  %v11546_v44 = vpop.permute.xlu0 %11545  ;;  %v5214_v45 = vsel %vm1556_vm3, %v5212_v26, %v5213_v52  ;;  %v16834_v46 = vld [vmem:[#allocation56_spill] sm:$0xff] }
 0x712   : > { %v5464_v56 = vmax.f32 %v5046_v35, %v5222_v24  ;;  %v5231_v20 = vrot.slane %v5054_v13, 1  ;;  %v14598_v54 = vmax.f32 %v16833_v8, %v4912_v22  ;;  %v5461_v16 = vmax.f32 %v5043_v5, %v5214_v45 }
 0x713   : > { %v5229_v4 = vrot.slane %v14590_v29, 1  ;;  %v14603_v6 = vmax.f32 %v16834_v46, %v11537_v10  ;;  %v11543_v33 = vunpack.i.h.bf16 %v11541_v11  ;;  %v11542_v51 = vunpack.i.l.bf16 %v11541_v11 }
 0x714   : > { %v5232_v1 = vsel %vm1556_vm3, %v5225_v42, %v5231_v20  ;;  %v5235_v50 = vrot.slane %v14598_v54, 1  ;;  %v5545_v52 = vpack.c.bf16 %v5464_v56, %v5461_v16  ;;  %v11548_v24 = vunpack.i.h.bf16 %v11546_v44 }
 0x715   : > { %v5469_v35 = vmax.f32 %v14555_v57, %v5232_v1  ;;  %v5237_v26 = vrot.slane %v14603_v6, 1  ;;  %v14609_v5 = vpop.permute.xlu0 %11555  ;;  %v11551_v22 = vpop.permute.xlu1 %11550  ;;  %v4911_v45 = vsel %vm4902_vm5, %v11542_v51, %v11533_v17  ;;  %v11547_v8 = vunpack.i.l.bf16 %v11546_v44 }
 0x716   : > { %v5465_v10 = vmax.f32 %v14549_v62, %v5224_v25  ;;  %v11558_v42 = vunpack.i.h.bf16 %v14609_v5  ;;  %v14616_v11 = vmax.f32 %v14118_v37, %v4911_v45  ;;  %v11557_v57 = vunpack.i.l.bf16 %v14609_v5 }
 0x717   : > { %v5238_v46 = vsel %vm1556_vm3, %v5231_v20, %v5237_v26  ;;  %v11553_v56 = vunpack.i.h.bf16 %v11551_v22  ;;  %v4914_v1 = vsel %vm4902_vm5, %v11543_v33, %v11547_v8  ;;  %v14621_v36 = vmax.f32 %v14111_v19, %v11547_v8 }
 0x718   : > { %v5472_v16 = vmax.f32 %v5054_v13, %v5238_v46  ;;  %v5546_v51 = vpack.c.bf16 %v5465_v10, %v5462_v2  ;;  %v5233_v17 = vrot.slane %v14616_v11, 1  ;;  %v14625_v62 = vmax.f32 %v14107_v60, %v4914_v1  ;;  %v11900_v13 = vld [vmem:[%s16754_s14 + $0x88] sm:$0xff]  }
 0x719   : > { %v4915_v25 = vsel %vm4902_vm5, %v11557_v57, %v11548_v24  ;;  %v4913_v37 = vsel %vm4902_vm5, %v11553_v56, %v11543_v33  ;;  %v11561_v44 = vpop.permute.xlu1 %11560  ;;  %v5243_v19 = vrot.slane %v14621_v36, 1  ;;  %v11552_v45 = vunpack.i.l.bf16 %v11551_v22  ;;  %v16837_v1 = vld [vmem:[#allocation57_spill] sm:$0xff] }
 0x71a   : > { %v14632_v20 = vpack.c.bf16 %v5472_v16, %v5469_v35  ;;  %5845 = vmatprep.mubr.bf16.mxu0 %v5546_v51  ;;  %v14636_v2 = vmax.f32 %v14141_v12, %v4915_v25  ;;  %v14639_v60 = vmax.f32 %v14138_v47, %v4913_v37  ;;  %v5241_v5 = vrot.slane %v14625_v62, 1 }
 0x71b   : > { %5846 = vmatmul.mubr.bf16.vlgmr.msra.gmra.mrb[56].mxu0 %v5545_v52  ;;  %v11563_v33 = vunpack.i.h.bf16 %v11561_v44  ;;  %v11562_v8 = vunpack.i.l.bf16 %v11561_v44  ;;  %v14643_v10 = vsel %vm1556_vm3, %v5237_v26, %v5243_v19  ;;  %v16836_v12 = vrot.slane %v14567_v41, 1 }
 0x71c   : > { %16835 = vst [vmem:[#allocation41_spill] sm:$0xff] %v14632_v20  ;;  %10247 = vmatpush3.bf16.msra.mxu0 %v14163_v34  ;;  %v4916_v57 = vsel %vm4902_vm5, %v11548_v24, %v11552_v45  ;;  %v14653_v22 = vmax.f32 %v14147_v15, %v11552_v45  ;;  %v11901_v34 = vld [vmem:[%s16754_s14 + $0x90] sm:$0xff]   ;;  %v5236_v15 = vsel %vm1556_vm3, %v5229_v4, %v5235_v50 }
 0x71d   : > { %v5230_v47 = vsel %vm1556_vm3, %v16836_v12, %v5229_v4  ;;  %v4918_v52 = vsel %vm4902_vm5, %v11558_v42, %v11562_v8  ;;  %v14657_v26 = vmax.f32 %v14154_v27, %v11562_v8  ;;  %v14659_v56 = vpop.permute.xlu1 %11570  ;;  %v11566_v16 = vpop.permute.xlu0 %11565  ;;  %10248 = vmatprep.subr.bf16.mxu0 %v11900_v13  ;;  %v14665_v51 = vmax.f32 %v16837_v1, %v4916_v57  ;;  %v16838_v24 = vld [vmem:[#allocation58_spill] sm:$0xff]  ;;  %v16843_v8 = vld [vmem:[#allocation59_spill] sm:$0xff] }
 0x71e   : > { %v14668_v25 = vmax.f32 %v16838_v24, %v4918_v52  ;;  %v5468_v27 = vmax.f32 %v14567_v41, %v5230_v47  ;;  %v5249_v37 = vrot.slane %v14653_v22, 1  ;;  %v5471_v45 = vmax.f32 %v14590_v29, %v5236_v15  ;;  %v11902_v29 = vld [vmem:[%s16754_s14 + $0x98] sm:$0xff]  }
 0x71f   : > { %v5255_v44 = vrot.slane %v14657_v26, 1  ;;  %v11572_v52 = vunpack.i.l.bf16 %v14659_v56  ;;  %v11568_v1 = vunpack.i.h.bf16 %v11566_v16  ;;  %v11567_v24 = vunpack.i.l.bf16 %v11566_v16 }
 0x720   : > { %10249 = vmatpush3.bf16.msra.mxu0 %v11900_v13  ;;  %v14682_v4 = vsel %vm1556_vm3, %v5243_v19, %v5249_v37  ;;  %v5549_v47 = vpack.c.bf16 %v5471_v45, %v5468_v27  ;;  %v16839_v13 = vrot.slane %v14593_v49, 1  ;;  %v16840_v19 = vrot.slane %v14564_v61, 1 }
 0x721   : > { %v14685_v41 = vsel %vm1556_vm3, %v5249_v37, %v5255_v44  ;;  %v11576_v35 = vpop.permute.xlu0 %11575  ;;  %10250 = vmatprep.subr.bf16.mxu0 %v11901_v34  ;;  %v4919_v15 = vsel %vm4902_vm5, %v11572_v52, %v11563_v33  ;;  %v4917_v57 = vsel %vm4902_vm5, %v11568_v1, %v11558_v42  ;;  %v4920_v42 = vsel %vm4902_vm5, %v11563_v33, %v11567_v24  ;;  %v16842_v52 = vld [vmem:[#allocation61_spill] sm:$0xff] }
 0x722   : > { %v5228_v46 = vsel %vm1556_vm3, %v16840_v19, %v16839_v13  ;;  %v16841_v16 = vmov %v16839_v13  ;;  %5853 = vmatprep.mubr.bf16.mxu0 %v5549_v47  ;;  %v14703_v37 = vmax.f32 %v14187_v28, %v4919_v15  ;;  %v14706_v45 = vmax.f32 %v14182_v31, %v4917_v57 }
 0x723   : > { %v5234_v27 = vsel %vm1556_vm3, %v16841_v16, %v5233_v17  ;;  %v14710_v1 = vmax.f32 %v16842_v52, %v11567_v24  ;;  %v14713_v13 = vmax.f32 %v16843_v8, %v4920_v42  ;;  %v5467_v19 = vmax.f32 %v14564_v61, %v5228_v46  ;;  %v16846_v52 = vld [vmem:[#allocation60_spill] sm:$0xff] }
 0x724   : > { %v5470_v12 = vmax.f32 %v14593_v49, %v5234_v27  ;;  %v11578_v16 = vunpack.i.h.bf16 %v11576_v35  ;;  %10251 = vmatpush3.bf16.msra.mxu0 %v11901_v34  ;;  %v11577_v57 = vunpack.i.l.bf16 %v11576_v35  ;;  %v5242_v61 = vsel %vm1556_vm3, %v5235_v50, %v5241_v5  ;;  %v11903_v35 = vld [vmem:[%s16754_s14 + $0xa0] sm:$0xff]  }
 0x725   : > { %v5261_v31 = vrot.slane %v14710_v1, 1  ;;  %v14720_v33 = vpop.permute.xlu0 %11585  ;;  %v11581_v24 = vpop.permute.xlu1 %11580  ;;  %10252 = vmatprep.subr.bf16.mxu0 %v11902_v29  ;;  %v16844_v49 = vrot.slane %v14665_v51, 1  ;;  %v5474_v50 = vmax.f32 %v14598_v54, %v5242_v61  ;;  %v16848_v61 = vrot.slane %v14636_v2, 1 }
 0x726   : > { %v5548_v15 = vpack.c.bf16 %v5470_v12, %v5467_v19  ;;  %v16845_v12 = vunpack.i.h.bf16 %v14659_v56  ;;  %v14743_v42 = vmax.f32 %v14197_v21, %v11577_v57  ;;  %v11583_v47 = vunpack.i.h.bf16 %v11581_v24 }
 0x727   : > { %v5248_v46 = vsel %vm1556_vm3, %v5241_v5, %v16844_v49  ;;  %v14737_v34 = vsel %vm1556_vm3, %v5255_v44, %v5261_v31  ;;  %v11588_v49 = vunpack.i.h.bf16 %v14720_v33  ;;  %v11587_v44 = vunpack.i.l.bf16 %v14720_v33 }
 0x728   : > { %v4922_v27 = vsel %vm4902_vm5, %v16845_v12, %v11577_v57  ;;  %5854 = vmatmul.mubr.bf16.gmra.mrb[60].mxu0 %v5548_v15  ;;  %v5477_v5 = vmax.f32 %v14625_v62, %v5248_v46  ;;  %v5267_v28 = vrot.slane %v14743_v42, 1  ;;  %v11582_v8 = vunpack.i.l.bf16 %v11581_v24  ;;  %v11904_v24 = vld [vmem:[%s16754_s14 + $0xa8] sm:$0xff]  }
 0x729   : > { %v14747_v19 = vmax.f32 %v16846_v52, %v4922_v27  ;;  %v16847_v12 = vrot.slane %v14639_v60, 1  ;;  %v11591_v54 = vpop.permute.xlu1 %11590  ;;  %10253 = vmatpush3.bf16.msra.mxu0 %v11902_v29  ;;  %v4923_v62 = vsel %vm4902_vm5, %v11587_v44, %v11578_v16  ;;  %v16850_v27 = vunpack.i.h.bf16 %v14659_v56 }
 0x72a   : > { %v5552_v15 = vpack.c.bf16 %v5477_v5, %v5474_v50  ;;  %10254 = vmatprep.subr.bf16.mxu0 %v11903_v35  ;;  %v14772_v29 = vmax.f32 %v14222_v53, %v4923_v62  ;;  %v4924_v52 = vsel %vm4902_vm5, %v11578_v16, %v11582_v8  ;;  %v11593_v62 = vunpack.i.h.bf16 %v11591_v54 }
 0x72b   : > { %v5240_v21 = vsel %vm1556_vm3, %v5233_v17, %v16847_v12  ;;  %v5265_v57 = vrot.slane %v14747_v19, 1  ;;  %v16849_v33 = vmov %v16847_v12  ;;  %v14769_v17 = vsel %vm1556_vm3, %v5261_v31, %v5267_v28  ;;  %v16851_v12 = vld [vmem:[#allocation63_spill] sm:$0xff] }
 0x72c   : > { %v5246_v46 = vsel %vm1556_vm3, %v16849_v33, %v16848_v61  ;;  %v4921_v50 = vsel %vm4902_vm5, %v11583_v47, %v16850_v27  ;;  %5861 = vmatprep.mubr.bf16.mxu0 %v5552_v15  ;;  %v14782_v44 = vmax.f32 %v14206_v40, %v4924_v52  ;;  %v14785_v61 = vmax.f32 %v16851_v12, %v11582_v8  ;;  %v11905_v52 = vld [vmem:[%s16754_s14 + $0xb0] sm:$0xff]  }
 0x72d   : > { %v14779_v5 = vmax.f32 %v14219_v3, %v4921_v50  ;;  %v5473_v31 = vmax.f32 %v14616_v11, %v5240_v21  ;;  %v5476_v56 = vmax.f32 %v14639_v60, %v5246_v46  ;;  %v11592_v47 = vunpack.i.l.bf16 %v11591_v54  ;;  %v11596_v33 = vpop.permute.xlu0 %11595  ;;  %10255 = vmatpush3.bf16.msra.mxu0 %v11903_v35  ;;  %v14798_v21 = vpop.permute.xlu1 %11600 }
 0x72e   : > { %v5273_v40 = vrot.slane %v14785_v61, 1  ;;  %v16852_v15 = vrot.slane %v14668_v25, 1  ;;  %v16853_v8 = vrot.slane %v14665_v51, 1  ;;  %10256 = vmatprep.subr.bf16.mxu0 %v11904_v24  ;;  %v16854_v46 = vrot.slane %v14713_v13, 1 }
 0x72f   : > { %v5551_v60 = vpack.c.bf16 %v5476_v56, %v5473_v31  ;;  %v4926_v54 = vsel %vm4902_vm5, %v11588_v49, %v11592_v47  ;;  %v14802_v35 = vmax.f32 %v14234_v63, %v11592_v47  ;;  %v11597_v3 = vunpack.i.l.bf16 %v11596_v33 }
 0x730   : > { %v5254_v11 = vsel %vm1556_vm3, %v16853_v8, %v16852_v15  ;;  %v16855_v27 = vmov %v16852_v15  ;;  %v14813_v12 = vsel %vm1556_vm3, %v5267_v28, %v5273_v40  ;;  %v16856_v15 = vld [vmem:[#allocation62_spill] sm:$0xff]  ;;  %v11603_v8 = vunpack.i.h.bf16 %v14798_v21 }
 0x731   : > { %v5260_v50 = vsel %vm1556_vm3, %v16855_v27, %v16854_v46  ;;  %v14816_v31 = vmax.f32 %v16856_v15, %v4926_v54  ;;  %v5480_v56 = vmax.f32 %v14665_v51, %v5254_v11  ;;  %5862 = vmatmul.mubr.bf16.gmra.mrb[64].mxu0 %v5551_v60  ;;  %v5279_v47 = vrot.slane %v14802_v35, 1  ;;  %v11606_v53 = vpop.permute.xlu0 %11605 }
 0x732   : > { %v5483_v63 = vmax.f32 %v14668_v25, %v5260_v50  ;;  %v11602_v46 = vunpack.i.l.bf16 %v14798_v21  ;;  %v11598_v27 = vunpack.i.h.bf16 %v11596_v33  ;;  %v16857_v54 = vrot.slane %v14706_v45, 1  ;;  %10257 = vmatpush3.bf16.msra.mxu0 %v11904_v24 }
 0x733   : > { %v5277_v16 = vrot.slane %v14816_v31, 1  ;;  %v16858_v15 = vrot.slane %v14636_v2, 1  ;;  %v14830_v25 = vsel %vm1556_vm3, %v5273_v40, %v5279_v47  ;;  %v16859_v60 = vrot.slane %v14703_v37, 1  ;;  %10258 = vmatprep.subr.bf16.mxu0 %v11905_v52 }
 0x734   : > { %v5555_v28 = vpack.c.bf16 %v5483_v63, %v5480_v56  ;;  %v4927_v11 = vsel %vm4902_vm5, %v11602_v46, %v11593_v62  ;;  %v4925_v21 = vsel %vm4902_vm5, %v11598_v27, %v11588_v49  ;;  %v16860_v50 = vmov %v16857_v54  ;;  %v16861_v49 = vld [vmem:[#allocation64_spill] sm:$0xff] }
 0x735   : > { %v5252_v51 = vsel %vm1556_vm3, %v16858_v15, %v16857_v54  ;;  %v5258_v33 = vsel %vm1556_vm3, %v16860_v50, %v16859_v60  ;;  %v14840_v56 = vmax.f32 %v14261_v59, %v4927_v11  ;;  %v14843_v24 = vmax.f32 %v14256_v38, %v4925_v21 }
 0x736   : > { %5869 = vmatprep.mubr.bf16.mxu0 %v5555_v28  ;;  %v4928_v40 = vsel %vm4902_vm5, %v11593_v62, %v11597_v3  ;;  %v14847_v63 = vmax.f32 %v14265_v58, %v11597_v3  ;;  %v5479_v27 = vmax.f32 %v14636_v2, %v5252_v51  ;;  %v5482_v54 = vmax.f32 %v14706_v45, %v5258_v33  ;;  %v11611_v28 = vpop.permute.xlu1 %11610  ;;  %v14857_v62 = vpop.permute.xlu0 %11615 }
 0x737   : > { %v14850_v46 = vmax.f32 %v16861_v49, %v4928_v40  ;;  %v11608_v15 = vunpack.i.h.bf16 %v11606_v53  ;;  %v11607_v21 = vunpack.i.l.bf16 %v11606_v53  ;;  %10259 = vmatpush3.bf16.msra.mxu0 %v11905_v52  ;;  %v16862_v2 = vrot.slane %v14713_v13, 1  ;;  %v16864_v40 = vld [vmem:[#allocation65_spill] sm:$0xff] }
 0x738   : > { %v5285_v38 = vrot.slane %v14847_v63, 1  ;;  %v5554_v3 = vpack.c.bf16 %v5482_v54, %v5479_v27  ;;  %v16863_v51 = vrot.slane %v14782_v44, 1  ;;  %v11618_v54 = vunpack.i.h.bf16 %v14857_v62 }
 0x739   : > { %v5283_v58 = vrot.slane %v14850_v46, 1  ;;  %v5266_v45 = vsel %vm1556_vm3, %v16862_v2, %v5265_v57  ;;  %v4930_v52 = vsel %vm4902_vm5, %v11603_v8, %v11607_v21  ;;  %v14875_v50 = vmax.f32 %v14271_v43, %v11607_v21 }
 0x73a   : > { %v5272_v60 = vsel %vm1556_vm3, %v5265_v57, %v16863_v51  ;;  %v14871_v53 = vsel %vm1556_vm3, %v5279_v47, %v5285_v38  ;;  %v5486_v33 = vmax.f32 %v14713_v13, %v5266_v45  ;;  %5870 = vmatmul.mubr.bf16.gmra.mrb[68].mxu0 %v5554_v3  ;;  %v14879_v49 = vmax.f32 %v16864_v40, %v4930_v52  ;;  %v11621_v2 = vpop.permute.xlu1 %11620 }
 0x73b   : > { %v5489_v27 = vmax.f32 %v14747_v19, %v5272_v60  ;;  %v11617_v57 = vunpack.i.l.bf16 %v14857_v62  ;;  %v5291_v47 = vrot.slane %v14875_v50, 1  ;;  %v11613_v51 = vunpack.i.h.bf16 %v11611_v28 }
 0x73c   : > { %v11612_v59 = vunpack.i.l.bf16 %v11611_v28  ;;  %v16865_v43 = vrot.slane %v14779_v5, 1  ;;  %v16866_v21 = vrot.slane %v14703_v37, 1  ;;  %v5289_v3 = vrot.slane %v14879_v49, 1 }
 0x73d   : > { %v5558_v45 = vpack.c.bf16 %v5489_v27, %v5486_v33  ;;  %v4931_v19 = vsel %vm4902_vm5, %v11617_v57, %v11608_v15  ;;  %v16867_v60 = vrot.slane %v14772_v29, 1  ;;  %v14898_v40 = vsel %vm1556_vm3, %v5285_v38, %v5291_v47  ;;  %v16869_v57 = vld [vmem:[#allocation67_spill] sm:$0xff] }
 0x73e   : > { %v5264_v13 = vsel %vm1556_vm3, %v16866_v21, %v16865_v43  ;;  %v16868_v62 = vmov %v16865_v43  ;;  %v14901_v28 = vmax.f32 %v14296_v14, %v4931_v19  ;;  %v4929_v11 = vsel %vm4902_vm5, %v11613_v51, %v11603_v8 }
 0x73f   : > { %v5270_v52 = vsel %vm1556_vm3, %v16868_v62, %v16867_v60  ;;  %v4932_v43 = vsel %vm4902_vm5, %v11608_v15, %v11612_v59  ;;  %5877 = vmatprep.mubr.bf16.mxu0 %v5558_v45  ;;  %v14906_v33 = vmax.f32 %v14293_v55, %v4929_v11  ;;  %v14912_v21 = vmax.f32 %v16869_v57, %v11612_v59  ;;  %v11626_v60 = vpop.permute.xlu0 %11625 }
 0x740   : > { %v14909_v27 = vmax.f32 %v14280_v39, %v4932_v43  ;;  %v5485_v38 = vmax.f32 %v14703_v37, %v5264_v13  ;;  %v5488_v19 = vmax.f32 %v14779_v5, %v5270_v52  ;;  %v11623_v8 = vunpack.i.h.bf16 %v11621_v2  ;;  %v14925_v37 = vpop.permute.xlu1 %11630  ;;  %v16871_v52 = vld [vmem:[#allocation66_spill] sm:$0xff] }
 0x741   : > { %v11622_v51 = vunpack.i.l.bf16 %v11621_v2  ;;  %v5297_v11 = vrot.slane %v14912_v21, 1  ;;  %v16870_v39 = vrot.slane %v14782_v44, 1  ;;  %v5284_v2 = vsel %vm1556_vm3, %v5277_v16, %v5283_v58 }
 0x742   : > { %v5295_v55 = vrot.slane %v14909_v27, 1  ;;  %v5557_v13 = vpack.c.bf16 %v5488_v19, %v5485_v38  ;;  %v5495_v38 = vmax.f32 %v14816_v31, %v5284_v2  ;;  %v11628_v14 = vunpack.i.h.bf16 %v11626_v60 }
 0x743   : > { %v5278_v59 = vsel %vm1556_vm3, %v16870_v39, %v5277_v16  ;;  %v4934_v45 = vsel %vm4902_vm5, %v11618_v54, %v11622_v51  ;;  %v14929_v5 = vmax.f32 %v14308_v7, %v11622_v51  ;;  %v14937_v62 = vsel %vm1556_vm3, %v5291_v47, %v5297_v11  ;;  %v11636_v19 = vpop.permute.xlu0 %11635 }
 0x744   : > { %v14940_v43 = vmax.f32 %v16871_v52, %v4934_v45  ;;  %v5492_v57 = vmax.f32 %v14782_v44, %v5278_v59  ;;  %5878 = vmatmul.mubr.bf16.gmra.mrb[72].mxu0 %v5557_v13  ;;  %v11633_v51 = vunpack.i.h.bf16 %v14925_v37  ;;  %v11632_v39 = vunpack.i.l.bf16 %v14925_v37 }
 0x745   : > { %v5303_v7 = vrot.slane %v14929_v5, 1  ;;  %v11627_v15 = vunpack.i.l.bf16 %v11626_v60  ;;  %v16872_v45 = vrot.slane %v14843_v24, 1  ;;  %v16873_v52 = vrot.slane %v14772_v29, 1 }
 0x746   : > { %v5301_v16 = vrot.slane %v14940_v43, 1  ;;  %v5561_v47 = vpack.c.bf16 %v5495_v38, %v5492_v57  ;;  %v4935_v59 = vsel %vm4902_vm5, %v11632_v39, %v11623_v8  ;;  %v4933_v13 = vsel %vm4902_vm5, %v11628_v14, %v11618_v54  ;;  %v11641_v39 = vpop.permute.xlu1 %11640  ;;  %v16876_v54 = vld [vmem:[#allocation68_spill] sm:$0xff] }
 0x747   : > { %v5276_v44 = vsel %vm1556_vm3, %v16873_v52, %v16872_v45  ;;  %v14954_v31 = vsel %vm1556_vm3, %v5297_v11, %v5303_v7  ;;  %v16874_v37 = vrot.slane %v14840_v56, 1  ;;  %v16875_v2 = vmov %v16872_v45 }
 0x748   : > { %5885 = vmatprep.mubr.bf16.mxu0 %v5561_v47  ;;  %v14964_v60 = vmax.f32 %v14335_v48, %v4935_v59  ;;  %v14967_v38 = vmax.f32 %v14330_v23, %v4933_v13  ;;  %v4936_v11 = vsel %vm4902_vm5, %v11623_v8, %v11627_v15  ;;  %v14971_v45 = vmax.f32 %v14339_v32, %v11627_v15  ;;  %v14981_v8 = vpop.permute.xlu0 %11645 }
 0x749   : > { %v5282_v57 = vsel %vm1556_vm3, %v16875_v2, %v16874_v37  ;;  %v14974_v14 = vmax.f32 %v16876_v54, %v4936_v11  ;;  %v5491_v52 = vmax.f32 %v14772_v29, %v5276_v44  ;;  %v11638_v47 = vunpack.i.h.bf16 %v11636_v19  ;;  %v16877_v11 = vld [vmem:[#allocation69_spill] sm:$0xff] }
 0x74a   : > { %v5494_v37 = vmax.f32 %v14843_v24, %v5282_v57  ;;  %v5309_v23 = vrot.slane %v14971_v45, 1  ;;  %v11637_v13 = vunpack.i.l.bf16 %v11636_v19  ;;  %v5290_v29 = vsel %vm1556_vm3, %v5283_v58, %v5289_v3 }
 0x74b   : > { %v5296_v24 = vsel %vm1556_vm3, %v5289_v3, %v5295_v55  ;;  %v5498_v57 = vmax.f32 %v14850_v46, %v5290_v29  ;;  %v11647_v3 = vunpack.i.l.bf16 %v14981_v8  ;;  %v11643_v48 = vunpack.i.h.bf16 %v11641_v39 }
 0x74c   : > { %v5560_v15 = vpack.c.bf16 %v5494_v37, %v5491_v52  ;;  %v14995_v44 = vsel %vm1556_vm3, %v5303_v7, %v5309_v23  ;;  %v4938_v19 = vsel %vm4902_vm5, %v11633_v51, %v11637_v13  ;;  %v14999_v2 = vmax.f32 %v14345_v30, %v11637_v13  ;;  %v11651_v37 = vpop.permute.xlu1 %11650 }
 0x74d   : > { %v15003_v54 = vmax.f32 %v16877_v11, %v4938_v19  ;;  %v5501_v58 = vmax.f32 %v14879_v49, %v5296_v24  ;;  %v11648_v52 = vunpack.i.h.bf16 %v14981_v8  ;;  %v11642_v59 = vunpack.i.l.bf16 %v11641_v39 }
 0x74e   : > { %5886 = vmatmul.mubr.bf16.gmra.mrb[76].mxu0 %v5560_v15  ;;  %v5315_v7 = vrot.slane %v14999_v2, 1  ;;  %v16878_v30 = vrot.slane %v14906_v33, 1  ;;  %v16879_v13 = vrot.slane %v14840_v56, 1  ;;  %v4939_v49 = vsel %vm4902_vm5, %v11647_v3, %v11638_v47  ;;  %v16883_v15 = vld [vmem:[#allocation72_spill] sm:$0xff] }
 0x74f   : > { %v5564_v29 = vpack.c.bf16 %v5501_v58, %v5498_v57  ;;  %v16880_v24 = vrot.slane %v14901_v28, 1  ;;  %v15025_v39 = vmax.f32 %v14370_v9, %v4939_v49  ;;  %v4937_v32 = vsel %vm4902_vm5, %v11643_v48, %v11633_v51  ;;  %v16882_v58 = vld [vmem:[#allocation70_spill] sm:$0xff] }
 0x750   : > { %v5288_v46 = vsel %vm1556_vm3, %v16879_v13, %v16878_v30  ;;  %v16881_v8 = vmov %v16878_v30  ;;  %v15022_v11 = vsel %vm1556_vm3, %v5309_v23, %v5315_v7  ;;  %v4940_v30 = vsel %vm4902_vm5, %v11638_v47, %v11642_v59  ;;  %v11656_v13 = vpop.permute.xlu0 %11655 }
 0x751   : > { %v5294_v19 = vsel %vm1556_vm3, %v16881_v8, %v16880_v24  ;;  %5893 = vmatprep.mubr.bf16.mxu0 %v5564_v29  ;;  %v15030_v57 = vmax.f32 %v14367_v18, %v4937_v32  ;;  %v15033_v3 = vmax.f32 %v16882_v58, %v4940_v30  ;;  %v15036_v24 = vmax.f32 %v16883_v15, %v11642_v59  ;;  %v15049_v32 = vpop.permute.xlu1 %11660  ;;  %v16888_v30 = vld [vmem:[#allocation71_spill] sm:$0xff]  ;;  %v16894_v29 = vld [vmem:[#allocation76_spill] sm:$0xff] }
 0x752   : > { %v5497_v23 = vmax.f32 %v14840_v56, %v5288_v46  ;;  %v5500_v49 = vmax.f32 %v14906_v33, %v5294_v19  ;;  %v11653_v51 = vunpack.i.h.bf16 %v11651_v37  ;;  %v11652_v48 = vunpack.i.l.bf16 %v11651_v37  ;;  %v16885_v33 = vld [vmem:[#allocation73_spill] sm:$0xff] }
 0x753   : > { %16884 = vst [vmem:[#allocation42_spill] sm:$0xff] %v15036_v24  ;;  %v5321_v18 = vrot.slane %v15036_v24, 1  ;;  %v5302_v59 = vsel %vm1556_vm3, %v5295_v55, %v5301_v16  ;;  %v16887_v37 = vrot.slane %v14974_v14, 1  ;;  %v11662_v9 = vunpack.i.l.bf16 %v15049_v32 }
 0x754   : > { %v5563_v56 = vpack.c.bf16 %v5500_v49, %v5497_v23  ;;  %v4942_v46 = vsel %vm4902_vm5, %v11648_v52, %v11652_v48  ;;  %v15053_v15 = vmax.f32 %v16885_v33, %v11652_v48  ;;  %v5504_v55 = vmax.f32 %v14909_v27, %v5302_v59  ;;  %v11666_v49 = vpop.permute.xlu0 %11665 }
 0x755   : > { %v5308_v8 = vsel %vm1556_vm3, %v5301_v16, %v16887_v37  ;;  %v15061_v19 = vsel %vm1556_vm3, %v5315_v7, %v5321_v18  ;;  %v15064_v58 = vmax.f32 %v16888_v30, %v4942_v46  ;;  %v11663_v33 = vunpack.i.h.bf16 %v15049_v32 }
 0x756   : > { %16886 = vst [vmem:[#allocation54_spill] sm:$0xff] %v15053_v15  ;;  %v5507_v23 = vmax.f32 %v14940_v43, %v5308_v8  ;;  %5894 = vmatmul.mubr.bf16.gmra.mrb[80].mxu0 %v5563_v56  ;;  %v5327_v48 = vrot.slane %v15053_v15, 1  ;;  %v11658_v47 = vunpack.i.h.bf16 %v11656_v13  ;;  %v11657_v37 = vunpack.i.l.bf16 %v11656_v13  ;;  %v11671_v13 = vpop.permute.xlu1 %11670 }
 0x757   : > { %v16889_v46 = vrot.slane %v14967_v38, 1  ;;  %v16890_v30 = vrot.slane %v14901_v28, 1  ;;  %v4943_v59 = vsel %vm4902_vm5, %v11662_v9, %v11653_v51  ;;  %v16891_v32 = vrot.slane %v14964_v60, 1 }
 0x758   : > { %v5567_v7 = vpack.c.bf16 %v5507_v23, %v5504_v55  ;;  %v15078_v43 = vsel %vm1556_vm3, %v5321_v18, %v5327_v48  ;;  %v4941_v56 = vsel %vm4902_vm5, %v11658_v47, %v11648_v52  ;;  %v16893_v23 = vld [vmem:[#allocation44_spill] sm:$0xff]  ;;  %v4944_v18 = vsel %vm4902_vm5, %v11653_v51, %v11657_v37  ;;  %v16897_v52 = vld [vmem:[#allocation74_spill] sm:$0xff] }
 0x759   : > { %v5300_v27 = vsel %vm1556_vm3, %v16890_v30, %v16889_v46  ;;  %v16892_v8 = vmov %v16889_v46  ;;  %v15088_v16 = vmax.f32 %v16893_v23, %v4943_v59  ;;  %v15091_v46 = vmax.f32 %v16894_v29, %v4941_v56  ;;  %v16895_v30 = vld [vmem:[#allocation43_spill] sm:$0xff]  ;;  %v15105_v23 = vpop.permute.xlu0 %11675 }
 0x75a   : > { %v5306_v55 = vsel %vm1556_vm3, %v16892_v8, %v16891_v32  ;;  %5901 = vmatprep.mubr.bf16.mxu0 %v5567_v7  ;;  %v15095_v9 = vmax.f32 %v16895_v30, %v11657_v37  ;;  %v15098_v47 = vmax.f32 %v16897_v52, %v4944_v18  ;;  %v5503_v20 = vmax.f32 %v14901_v28, %v5300_v27 }
 0x75b   : > { %v5506_v32 = vmax.f32 %v14967_v38, %v5306_v55  ;;  %v11668_v8 = vunpack.i.h.bf16 %v11666_v49  ;;  %v11667_v56 = vunpack.i.l.bf16 %v11666_v49  ;;  %v16898_v18 = vrot.slane %v15003_v54, 1 }
 0x75c   : > { %16896 = vst [vmem:[#allocation55_spill] sm:$0xff] %v15095_v9  ;;  %v5333_v29 = vrot.slane %v15095_v9, 1  ;;  %v16899_v30 = vrot.slane %v14974_v14, 1  ;;  %v16900_v38 = vrot.slane %v15033_v3, 1  ;;  %v11673_v51 = vunpack.i.h.bf16 %v11671_v13 }
 0x75d   : > { %v5566_v37 = vpack.c.bf16 %v5506_v32, %v5503_v20  ;;  %v16901_v27 = vmov %v16898_v18  ;;  %v4946_v49 = vsel %vm4902_vm5, %v11663_v33, %v11667_v56  ;;  %v15123_v7 = vmax.f32 %v14419_v0, %v11667_v56  ;;  %v16904_v32 = vld [vmem:[#allocation75_spill] sm:$0xff] }
 0x75e   : > { %v5314_v28 = vsel %vm1556_vm3, %v16899_v30, %v16898_v18  ;;  %v5320_v55 = vsel %vm1556_vm3, %v16901_v27, %v16900_v38  ;;  %v15119_v52 = vsel %vm1556_vm3, %v5327_v48, %v5333_v29  ;;  %v15127_v59 = vmax.f32 %v16904_v32, %v4946_v49  ;;  %v11681_v27 = vpop.permute.xlu1 %11680  ;;  %v11686_v32 = vpop.permute.xlu0 %11685 }
 0x75f   : > { %16902 = vst [vmem:[#allocation56_spill] sm:$0xff] %v15119_v52  ;;  %16903 = vst [vmem:[#allocation57_spill] sm:$0xff] %v15123_v7  ;;  %v5510_v20 = vmax.f32 %v14974_v14, %v5314_v28  ;;  %5902 = vmatmul.mubr.bf16.gmra.mrb[84].mxu0 %v5566_v37  ;;  %v5513_v18 = vmax.f32 %v15003_v54, %v5320_v55  ;;  %v11678_v30 = vunpack.i.h.bf16 %v15105_v23  ;;  %v11677_v38 = vunpack.i.l.bf16 %v15105_v23  ;;  %v16913_v52 = vld [vmem:[#allocation46_spill] sm:$0xff] }
 0x760   : > { %v5339_v48 = vrot.slane %v15123_v7, 1  ;;  %v11672_v9 = vunpack.i.l.bf16 %v11671_v13  ;;  %v16905_v0 = vrot.slane %v15030_v57, 1  ;;  %v16906_v56 = vrot.slane %v14964_v60, 1  ;;  %v16910_v7 = vld [vmem:[#allocation78_spill] sm:$0xff] }
 0x761   : > { %v5570_v28 = vpack.c.bf16 %v5513_v18, %v5510_v20  ;;  %v4947_v54 = vsel %vm4902_vm5, %v11677_v38, %v11668_v8  ;;  %v16907_v55 = vrot.slane %v15025_v39, 1  ;;  %v16911_v20 = vld [vmem:[#allocation50_spill] sm:$0xff]  ;;  %v16912_v38 = vld [vmem:[#allocation77_spill] sm:$0xff] }
 0x762   : > { %v5312_v14 = vsel %vm1556_vm3, %v16906_v56, %v16905_v0  ;;  %v16908_v23 = vmov %v16905_v0  ;;  %v15146_v13 = vsel %vm1556_vm3, %v5333_v29, %v5339_v48  ;;  %v15149_v15 = vmax.f32 %v16910_v7, %v4947_v54 }
 0x763   : > { %v5318_v49 = vsel %vm1556_vm3, %v16908_v23, %v16907_v55  ;;  %16909 = vst [vmem:[#allocation58_spill] sm:$0xff] %v15146_v13  ;;  %v4945_v0 = vsel %vm4902_vm5, %v11673_v51, %v11663_v33  ;;  %v4948_v56 = vsel %vm4902_vm5, %v11668_v8, %v11672_v9  ;;  %5909 = vmatprep.mubr.bf16.mxu0 %v5570_v28  ;;  %v11683_v54 = vunpack.i.h.bf16 %v11681_v27  ;;  %v16922_v8 = vld [vmem:[#allocation48_spill] sm:$0xff] }
 0x764   : > { %v15154_v18 = vmax.f32 %v16911_v20, %v4945_v0  ;;  %v15157_v37 = vmax.f32 %v16912_v38, %v4948_v56  ;;  %v15160_v55 = vmax.f32 %v16913_v52, %v11672_v9  ;;  %v5509_v29 = vmax.f32 %v14964_v60, %v5312_v14  ;;  %v11691_v52 = vpop.permute.xlu1 %11690  ;;  %v16917_v20 = vld [vmem:[#allocation45_spill] sm:$0xff] }
 0x765   : > { %v5512_v7 = vmax.f32 %v15030_v57, %v5318_v49  ;;  %v11682_v33 = vunpack.i.l.bf16 %v11681_v27  ;;  %v16915_v0 = vrot.slane %v15064_v58, 1  ;;  %v16916_v56 = vrot.slane %v15033_v3, 1 }
 0x766   : > { %16914 = vst [vmem:[#allocation61_spill] sm:$0xff] %v15160_v55  ;;  %v5345_v28 = vrot.slane %v15160_v55, 1  ;;  %v16919_v27 = vrot.slane %v15098_v47, 1  ;;  %v11688_v55 = vunpack.i.h.bf16 %v11686_v32  ;;  %v16943_v24 = vrot.slane %v15154_v18, 1 }
 0x767   : > { %v5326_v9 = vsel %vm1556_vm3, %v16916_v56, %v16915_v0  ;;  %v5569_v60 = vpack.c.bf16 %v5512_v7, %v5509_v29  ;;  %v4950_v14 = vsel %vm4902_vm5, %v11678_v30, %v11682_v33  ;;  %v15175_v57 = vmax.f32 %v16917_v20, %v11682_v33  ;;  %v11696_v7 = vpop.permute.xlu0 %11695 }
 0x768   : > { %v16920_v49 = vmov %v16915_v0  ;;  %v15183_v23 = vsel %vm1556_vm3, %v5339_v48, %v5345_v28  ;;  %v15186_v51 = vmax.f32 %v16922_v8, %v4950_v14  ;;  %v5516_v0 = vmax.f32 %v15033_v3, %v5326_v9 }
 0x769   : > { %16918 = vst [vmem:[#allocation59_spill] sm:$0xff] %v15175_v57  ;;  %v5332_v38 = vsel %vm1556_vm3, %v16920_v49, %v16919_v27  ;;  %16921 = vst [vmem:[#allocation60_spill] sm:$0xff] %v15183_v23  ;;  %5910 = vmatmul.mubr.bf16.gmra.mrb[88].mxu0 %v5569_v60  ;;  %v5351_v33 = vrot.slane %v15175_v57, 1  ;;  %v11693_v56 = vunpack.i.h.bf16 %v11691_v52  ;;  %v11692_v20 = vunpack.i.l.bf16 %v11691_v52 }
 0x76a   : > { %v5519_v29 = vmax.f32 %v15064_v58, %v5332_v38  ;;  %v11687_v49 = vunpack.i.l.bf16 %v11686_v32  ;;  %v16923_v48 = vrot.slane %v15091_v46, 1  ;;  %v16924_v8 = vrot.slane %v15025_v39, 1  ;;  %v16928_v32 = vld [vmem:[#allocation47_spill] sm:$0xff] }
 0x76b   : > { %v15198_v3 = vsel %vm1556_vm3, %v5345_v28, %v5351_v33  ;;  %v4951_v58 = vsel %vm4902_vm5, %v11692_v20, %v11683_v54  ;;  %v4949_v9 = vsel %vm4902_vm5, %v11688_v55, %v11678_v30  ;;  %v16926_v52 = vrot.slane %v15088_v16, 1  ;;  %v16932_v20 = vld [vmem:[#allocation79_spill] sm:$0xff] }
 0x76c   : > { %v5573_v27 = vpack.c.bf16 %v5519_v29, %v5516_v0  ;;  %v5324_v14 = vsel %vm1556_vm3, %v16924_v8, %v16923_v48  ;;  %16925 = vst [vmem:[#allocation63_spill] sm:$0xff] %v15198_v3  ;;  %v16927_v60 = vmov %v16923_v48  ;;  %v15208_v0 = vmax.f32 %v16928_v32, %v4951_v58  ;;  %v16929_v29 = vld [vmem:[#allocation80_spill] sm:$0xff]  ;;  %v16930_v48 = vld [vmem:[#allocation81_spill] sm:$0xff] }
 0x76d   : > { %v5330_v38 = vsel %vm1556_vm3, %v16927_v60, %v16926_v52  ;;  %v15211_v13 = vmax.f32 %v16929_v29, %v4949_v9  ;;  %v4952_v28 = vsel %vm4902_vm5, %v11683_v54, %v11687_v49  ;;  %v15215_v8 = vmax.f32 %v16930_v48, %v11687_v49  ;;  %v4891_v54 = vpop.permute.xlu0 %4890  ;;  %v16938_v58 = vld [vmem:[#allocation49_spill] sm:$0xff] }
 0x76e   : > { %5917 = vmatprep.mubr.bf16.mxu0 %v5573_v27  ;;  %v15218_v30 = vmax.f32 %v16932_v20, %v4952_v28  ;;  %v5515_v55 = vmax.f32 %v15025_v39, %v5324_v14  ;;  %v5518_v57 = vmax.f32 %v15091_v46, %v5330_v38  ;;  %v11698_v52 = vunpack.i.h.bf16 %v11696_v7  ;;  %v11701_v27 = vpop.permute.xlu1 %11700 }
 0x76f   : > { %16931 = vst [vmem:[#allocation62_spill] sm:$0xff] %v15215_v8  ;;  %v5347_v60 = vrot.slane %v15211_v13, 1  ;;  %v5357_v9 = vrot.slane %v15215_v8, 1  ;;  %v11697_v32 = vunpack.i.l.bf16 %v11696_v7  ;;  %v16933_v28 = vrot.slane %v15127_v59, 1 }
 0x770   : > { %v5355_v49 = vrot.slane %v15218_v30, 1  ;;  %v5572_v29 = vpack.c.bf16 %v5518_v57, %v5515_v55  ;;  %v16934_v48 = vrot.slane %v15098_v47, 1  ;;  %v16935_v46 = vrot.slane %v15157_v37, 1  ;;  %v16940_v55 = vld [vmem:[#allocation51_spill] sm:$0xff] }
 0x771   : > { %v16936_v14 = vmov %v16933_v28  ;;  %v15237_v20 = vsel %vm1556_vm3, %v5351_v33, %v5357_v9  ;;  %v4954_v7 = vsel %vm4902_vm5, %v11693_v56, %v11697_v32  ;;  %v15241_v8 = vmax.f32 %v16938_v58, %v11697_v32 }
 0x772   : > { %v5338_v39 = vsel %vm1556_vm3, %v16934_v48, %v16933_v28  ;;  %v5344_v38 = vsel %vm1556_vm3, %v16936_v14, %v16935_v46  ;;  %16937 = vst [vmem:[#allocation64_spill] sm:$0xff] %v15237_v20  ;;  %5918 = vmatmul.mubr.bf16.gmra.mrb[92].mxu0 %v5572_v29  ;;  %v5119_v3 = vmax.f32 %v16940_v55, %v4954_v7  ;;  %v11703_v23 = vunpack.i.h.bf16 %v11701_v27  ;;  %v16941_v14 = vld [vmem:[#allocation84_spill] sm:$0xff]  ;;  %v11706_v7 = vpop.permute.xlu1 %11705 }
 0x773   : > { %16939 = vst [vmem:[#allocation65_spill] sm:$0xff] %v15241_v8  ;;  %v5522_v57 = vmax.f32 %v15098_v47, %v5338_v39  ;;  %v5525_v28 = vmax.f32 %v15127_v59, %v5344_v38  ;;  %v4955_v48 = vsel %vm4902_vm5, %v4891_v54, %v11698_v52  ;;  %v5363_v46 = vrot.slane %v15241_v8, 1 }
 0x774   : > { %v15249_v33 = vmax.f32 %v16941_v14, %v4955_v48  ;;  %v11702_v20 = vunpack.i.l.bf16 %v11701_v27  ;;  %v16944_v58 = vrot.slane %v15088_v16, 1  ;;  %v5361_v32 = vrot.slane %v5119_v3, 1  ;;  %v16948_v48 = vld [vmem:[#allocation53_spill] sm:$0xff] }
 0x775   : > { %v5576_v29 = vpack.c.bf16 %v5525_v28, %v5522_v57  ;;  %v4953_v39 = vsel %vm4902_vm5, %v11703_v23, %v11693_v56  ;;  %v16945_v59 = vrot.slane %v15149_v15, 1  ;;  %v16946_v54 = vmov %v16943_v24  ;;  %v16949_v57 = vld [vmem:[#allocation82_spill] sm:$0xff]  ;;  %v16950_v23 = vld [vmem:[#allocation52_spill] sm:$0xff] }
 0x776   : > { %16942 = vst [vmem:[#allocation67_spill] sm:$0xff] %v15249_v33  ;;  %v5336_v47 = vsel %vm1556_vm3, %v16944_v58, %v16943_v24  ;;  %v15263_v55 = vsel %vm1556_vm3, %v5357_v9, %v5363_v46  ;;  %v5365_v27 = vrot.slane %v15249_v33, 1  ;;  %v5118_v14 = vmax.f32 %v16948_v48, %v4953_v39 }
 0x777   : > { %v5342_v38 = vsel %vm1556_vm3, %v16946_v54, %v16945_v59  ;;  %16947 = vst [vmem:[#allocation66_spill] sm:$0xff] %v15263_v55  ;;  %v4956_v24 = vsel %vm4902_vm5, %v11698_v52, %v11702_v20  ;;  %5925 = vmatprep.mubr.bf16.mxu0 %v5576_v29  ;;  %v15270_v56 = vmax.f32 %v16950_v23, %v11702_v20  ;;  %v11708_v8 = vunpack.i.h.bf16 %v11706_v7 }
 0x778   : > { %v5122_v28 = vmax.f32 %v16949_v57, %v4956_v24  ;;  %v5521_v58 = vmax.f32 %v15088_v16, %v5336_v47  ;;  %v5524_v59 = vmax.f32 %v15154_v18, %v5342_v38  ;;  %v5359_v54 = vrot.slane %v5118_v14, 1  ;;  %v4897_v24 = vpop.permute.xlu0 %4896  ;;  %v16955_v47 = vld [vmem:[#allocation83_spill] sm:$0xff] }
 0x779   : > { %16951 = vst [vmem:[#allocation68_spill] sm:$0xff] %v15270_v56  ;;  %v11707_v9 = vunpack.i.l.bf16 %v11706_v7  ;;  %v16952_v55 = vrot.slane %v15186_v51, 1  ;;  %v16953_v33 = vrot.slane %v15157_v37, 1  ;;  %v5369_v29 = vrot.slane %v15270_v56, 1 }
 0x77a   : > { %v5367_v52 = vrot.slane %v5122_v28, 1  ;;  %v5575_v48 = vpack.c.bf16 %v5524_v59, %v5521_v58  ;;  %v5126_v18 = vmax.f32 %v16955_v47, %v11708_v8  ;;  %v16957_v58 = vld [vmem:[#allocation85_spill] sm:$0xff]  ;;  %v16958_v47 = vrot.slane %v15149_v15, 1 }
 0x77b   : > { %v5350_v39 = vsel %vm1556_vm3, %v16953_v33, %v16952_v55  ;;  %v16954_v20 = vmov %v16952_v55  ;;  %v4957_v38 = vsel %vm4902_vm5, %v4897_v24, %v11707_v9  ;;  %v4958_v7 = vsel %vm4902_vm5, %v11707_v9, %v11708_v8  ;;  %v16956_v33 = vld [vmem:[#allocation86_spill] sm:$0xff] }
 0x77c   : > { %v5356_v16 = vsel %vm1556_vm3, %v16954_v20, %v5355_v49  ;;  %v5528_v57 = vmax.f32 %v15157_v37, %v5350_v39  ;;  %v15288_v23 = vsel %vm1556_vm3, %v5363_v46, %v5369_v29  ;;  %5926 = vmatmul.mubr.bf16.gmra.mrb[96].mxu0 %v5575_v48  ;;  %v15291_v55 = vmax.f32 %v16956_v33, %v4957_v38 }
 0x77d   : > { %v5125_v59 = vmax.f32 %v16957_v58, %v4958_v7  ;;  %v5531_v56 = vmax.f32 %v15186_v51, %v5356_v16  ;;  %v5375_v20 = vrot.slane %v5126_v18, 1  ;;  %v5348_v24 = vsel %vm1556_vm3, %v16958_v47, %v5347_v60 }
 0x77e   : > { %v16959_v8 = vrot.slane %v15208_v0, 1  ;;  %v5362_v46 = vsel %vm1556_vm3, %v5355_v49, %v5361_v32  ;;  %v5527_v39 = vmax.f32 %v15149_v15, %v5348_v24  ;;  %v5368_v38 = vsel %vm1556_vm3, %v5361_v32, %v5367_v52 }
 0x77f   : > { %v5579_v9 = vpack.c.bf16 %v5531_v56, %v5528_v57  ;;  %v5376_v51 = vsel %vm1556_vm3, %v5369_v29, %v5375_v20  ;;  %v5534_v16 = vmax.f32 %v15218_v30, %v5362_v46  ;;  %v5537_v7 = vmax.f32 %v5119_v3, %v5368_v38  ;;  %v16970_v46 = vld [vmem:[#allocation64_spill] sm:$0xff]  ;;  %v16974_v38 = vld [vmem:[#allocation65_spill] sm:$0xff] }
 0x780   : > { %v5354_v37 = vsel %vm1556_vm3, %v5347_v60, %v16959_v8  ;;  %v16960_v58 = vmov %v16959_v8  ;;  %v5366_v49 = vsel %vm1556_vm3, %v5359_v54, %v5365_v27  ;;  %v5373_v56 = vrot.slane %v5125_v59, 1 }
 0x781   : > { %v5530_v48 = vmax.f32 %v15211_v13, %v5354_v37  ;;  %5933 = vmatprep.mubr.bf16.mxu0 %v5579_v9  ;;  %v5360_v60 = vsel %vm1556_vm3, %v16960_v58, %v5359_v54  ;;  %v5582_v57 = vpack.c.bf16 %v5537_v7, %v5534_v16  ;;  %v5536_v13 = vmax.f32 %v5118_v14, %v5366_v49  ;;  %v16975_v7 = vld [vmem:[#allocation68_spill] sm:$0xff] }
 0x782   : > { %v5533_v15 = vmax.f32 %v15208_v0, %v5360_v60  ;;  %v5371_v32 = vrot.slane %v15291_v55, 1  ;;  %v5374_v29 = vsel %vm1556_vm3, %v5367_v52, %v5373_v56  ;;  %v5543_v47 = vmax.f32 %v5125_v59, %v5373_v56 }
 0x783   : > { %v5578_v33 = vpack.c.bf16 %v5530_v48, %v5527_v39  ;;  %v5475_v3 = vmax.f32 %v14603_v6, %v14643_v10  ;;  %v5478_v30 = vmax.f32 %v14621_v36, %v14682_v4  ;;  %v5544_v24 = vmax.f32 %v5126_v18, %v5375_v20  ;;  %v16968_v20 = vld [vmem:[#allocation63_spill] sm:$0xff]  ;;  %v16973_v39 = vld [vmem:[#allocation62_spill] sm:$0xff] }
 0x784   : > { %v5540_v8 = vmax.f32 %v5122_v28, %v5374_v29  ;;  %v5581_v54 = vpack.c.bf16 %v5536_v13, %v5533_v15  ;;  %v5481_v0 = vmax.f32 %v14653_v22, %v14685_v41  ;;  %v5484_v14 = vmax.f32 %v14657_v26, %v14737_v34 }
 0x785   : > { %5934 = vmatmul.mubr.bf16.gmra.mrb[100].mxu0 %v5578_v33  ;;  %v5553_v37 = vpack.c.bf16 %v5478_v30, %v5475_v3  ;;  %v5372_v52 = vsel %vm1556_vm3, %v5365_v27, %v5371_v32  ;;  %v5487_v6 = vmax.f32 %v14710_v1, %v14769_v17  ;;  %v5490_v36 = vmax.f32 %v14743_v42, %v14813_v12  ;;  %v16961_v12 = vld [vmem:[#allocation42_spill] sm:$0xff]  ;;  %v16978_v3 = vld [vmem:[#allocation41_spill] sm:$0xff] }
 0x786   : > { %5941 = vmatprep.mubr.bf16.mxu0 %v5582_v57  ;;  %v5493_v10 = vmax.f32 %v14785_v61, %v14830_v25  ;;  %v5585_v4 = vpack.c.bf16 %v5543_v47, %v5540_v8  ;;  %v5556_v28 = vpack.c.bf16 %v5484_v14, %v5481_v0  ;;  %v5496_v22 = vmax.f32 %v14802_v35, %v14871_v53  ;;  %v16964_v27 = vld [vmem:[#allocation58_spill] sm:$0xff]  ;;  %v16976_v57 = vld [vmem:[#allocation67_spill] sm:$0xff]  ;;  %v16977_v47 = vld [vmem:[#allocation40_spill] sm:$0xff] }
 0x787   : > { %v5499_v26 = vmax.f32 %v14847_v63, %v14898_v40  ;;  %v5559_v41 = vpack.c.bf16 %v5490_v36, %v5487_v6  ;;  %v5502_v34 = vmax.f32 %v14875_v50, %v14937_v62  ;;  %v5505_v1 = vmax.f32 %v14912_v21, %v14954_v31  ;;  %v16962_v40 = vld [vmem:[#allocation56_spill] sm:$0xff]  ;;  %v16963_v50 = vld [vmem:[#allocation54_spill] sm:$0xff]  ;;  %v16965_v21 = vld [vmem:[#allocation55_spill] sm:$0xff] }
 0x788   : > { %v5508_v42 = vmax.f32 %v14929_v5, %v14995_v44  ;;  %v5562_v17 = vpack.c.bf16 %v5496_v22, %v5493_v10  ;;  %v5511_v61 = vmax.f32 %v14971_v45, %v15022_v11  ;;  %v5514_v35 = vmax.f32 %v14999_v2, %v15061_v19  ;;  %v16966_v5 = vld [vmem:[#allocation60_spill] sm:$0xff]  ;;  %v16967_v44 = vld [vmem:[#allocation57_spill] sm:$0xff]  ;;  %v16971_v2 = vld [vmem:[#allocation59_spill] sm:$0xff] }
 0x789   : > { %v5517_v25 = vmax.f32 %v16961_v12, %v15078_v43  ;;  %v5565_v63 = vpack.c.bf16 %v5502_v34, %v5499_v26  ;;  %v5520_v62 = vmax.f32 %v16963_v50, %v16962_v40  ;;  %v5523_v31 = vmax.f32 %v16965_v21, %v16964_v27  ;;  %v16969_v45 = vld [vmem:[#allocation61_spill] sm:$0xff]  ;;  %v16972_v43 = vld [vmem:[#allocation66_spill] sm:$0xff] }
 0x78a   : > { %v5568_v53 = vpack.c.bf16 %v5508_v42, %v5505_v1  ;;  %v5571_v18 = vpack.c.bf16 %v5514_v35, %v5511_v61  ;;  %v5526_v59 = vmax.f32 %v16967_v44, %v16966_v5  ;;  %v5529_v11 = vmax.f32 %v16969_v45, %v16968_v20  ;;  %v11910_v14 = vld [vmem:[#allocation13 + $0x50] sm:$0xff]   ;;  %v11911_v22 = vld [vmem:[#allocation13 + $0x58] sm:$0xff]   ;;  %v15390_v61 = vld [vmem:[#allocation13] sm:$0xff]  }
 0x78b   : > { %v5532_v19 = vmax.f32 %v16971_v2, %v16970_v46  ;;  %v5574_v9 = vpack.c.bf16 %v5520_v62, %v5517_v25  ;;  %v5535_v48 = vmax.f32 %v16973_v39, %v16972_v43  ;;  %v5538_v16 = vmax.f32 %v16974_v38, %v15288_v23  ;;  %v11906_v23 = vld [vmem:[#allocation13 + $0x30] sm:$0xff]  }
 0x78c   : > { %v5541_v33 = vmax.f32 %v16975_v7, %v5376_v51  ;;  %v5577_v58 = vpack.c.bf16 %v5526_v59, %v5523_v31  ;;  %v5539_v15 = vmax.f32 %v16976_v57, %v5372_v52  ;;  %v5542_v13 = vmax.f32 %v15291_v55, %v5371_v32  ;;  %10288 = vmatprep.subr.bf16.mxu0 %v11906_v23  ;;  %v11907_v55 = vld [vmem:[#allocation13 + $0x38] sm:$0xff]   ;;  %v11908_v51 = vld [vmem:[#allocation13 + $0x40] sm:$0xff]   ;;  %v11909_v32 = vld [vmem:[#allocation13 + $0x48] sm:$0xff]  }
 0x78d   : > { %5942 = vmatmul.mubr.bf16.gmra.mrb[104].mxu0 %v5581_v54  ;;  %v5580_v60 = vpack.c.bf16 %v5532_v19, %v5529_v11  ;;  %v5583_v49 = vpack.c.bf16 %v5538_v16, %v5535_v48 }
 0x78e   : > { %5949 = vmatprep.mubr.bf16.mxu0 %v5585_v4  ;;  %v5586_v56 = vpack.c.bf16 %v5544_v24, %v5541_v33  ;;  %v5584_v29 = vpack.c.bf16 %v5542_v13, %v5539_v15 }
 0x795   : > { %5950 = vmatmul.mubr.bf16.gmra.mrb[108].mxu0 %v5584_v29 }
 0x796   : > { %10260 = vmatprep.mubr.msk.bf16.mxu0 %vm4902_vm5, %v16977_v47 }
 0x79d   : > { %10261 = vmatmul.mubr.msk.bf16.vlgmr.msra.gmra.mrb[112].mxu0 %vm4902_vm5, %v16978_v3 }
 0x79e   : > { %10264 = vmatprep.mubr.msk.bf16.mxu0 %vm4902_vm5, %v5553_v37  ;;  %10289 = vmatpush3.bf16.msra.mxu0 %v11906_v23 }
 0x79f   : > { %10290 = vmatprep.subr.bf16.mxu0 %v11907_v55 }
 0x7a2   : > { %10291 = vmatpush3.bf16.msra.mxu0 %v11907_v55 }
 0x7a3   : > { %10292 = vmatprep.subr.bf16.mxu0 %v11908_v51 }
 0x7a5   : > { %10265 = vmatmul.mubr.msk.bf16.gmra.mrb[116].mxu0 %vm4902_vm5, %v5556_v28 }
 0x7a6   : > { %10268 = vmatprep.mubr.msk.bf16.mxu0 %vm4902_vm5, %v5559_v41  ;;  %10293 = vmatpush3.bf16.msra.mxu0 %v11908_v51 }
 0x7a7   : > { %10294 = vmatprep.subr.bf16.mxu0 %v11909_v32 }
 0x7aa   : > { %10295 = vmatpush3.bf16.msra.mxu0 %v11909_v32 }
 0x7ab   : > { %10296 = vmatprep.subr.bf16.mxu0 %v11910_v14 }
 0x7ad   : > { %10269 = vmatmul.mubr.msk.bf16.gmra.mrb[120].mxu0 %vm4902_vm5, %v5562_v17 }
 0x7ae   : > { %10272 = vmatprep.mubr.msk.bf16.mxu0 %vm4902_vm5, %v5565_v63  ;;  %10297 = vmatpush3.bf16.msra.mxu0 %v11910_v14 }
 0x7af   : > { %10298 = vmatprep.subr.bf16.mxu0 %v11911_v22 }
 0x7b2   : > { %10299 = vmatpush3.bf16.msra.mxu0 %v11911_v22 }
 0x7b3   : > { %10328 = vmatprep.subr.bf16.mxu0 %v15390_v61 }
 0x7b5   : > { %10273 = vmatmul.mubr.msk.bf16.gmra.mrb[124].mxu0 %vm4902_vm5, %v5568_v53 }
 0x7b6   : > { %10276 = vmatprep.mubr.msk.bf16.mxu0 %vm4902_vm5, %v5571_v18 }
 0x7bd   : > { %10277 = vmatmul.mubr.msk.bf16.gmra.mrb[128].mxu0 %vm4902_vm5, %v5574_v9 }
 0x7be   : > { %10280 = vmatprep.mubr.msk.bf16.mxu0 %vm4902_vm5, %v5577_v58 }
 0x7c5   : > { %10281 = vmatmul.mubr.msk.bf16.gmra.mrb[132].mxu0 %vm4902_vm5, %v5580_v60 }
 0x7c6   : > { %10284 = vmatprep.mubr.msk.bf16.mxu0 %vm4902_vm5, %v5583_v49 }
 0x7cd   : > { %10285 = vmatmul.mubr.msk.bf16.gmra.mrb[136].mxu0 %vm4902_vm5, %v5586_v56 }
 0x7ee   : > { %v9941_v30 = vpop.f32.mrb[56].mxu0 }
 0x7ef   : > { %v9942_v24 = vpop.f32.mrb[57].mxu0 }
 0x7f0   : > { %v15378_v8 = vadd.f32 %v9942_v24, %v9941_v30  ;;  %v9944_v54 = vpop.f32.mrb[58].mxu0 }
 0x7f1   : > { %v9945_v37 = vpop.f32.mrb[59].mxu0 }
 0x7f2   : > { %v15380_v0 = vadd.f32 %v9945_v37, %v9944_v54 }
 0x7fb   : > { %v9947_v52 = vpop.f32.mrb[60].mxu0 }
 0x7fc   : > { %v9948_v6 = vpop.f32.mrb[61].mxu0 }
 0x7fd   : > { %v15382_v36 = vadd.f32 %v9948_v6, %v9947_v52  ;;  %v9950_v10 = vpop.f32.mrb[62].mxu0 }
 0x7fe   : > { %v9951_v4 = vpop.f32.mrb[63].mxu0 }
 0x7ff   : > { %v15384_v28 = vadd.f32 %v9951_v4, %v9950_v10 }
 0x804   : > { %v9953_v26 = vpop.f32.mrb[64].mxu0 }
 0x805   : > { %v9954_v41 = vpop.f32.mrb[65].mxu0 }
 0x806   : > { %v15386_v34 = vadd.f32 %v9954_v41, %v9953_v26  ;;  %v9956_v1 = vpop.f32.mrb[66].mxu0 }
 0x807   : > { %v9957_v42 = vpop.f32.mrb[67].mxu0 }
 0x808   : > { %v15388_v17 = vadd.f32 %v9957_v42, %v9956_v1 }
 0x80d   : > { %v9959_v35 = vpop.f32.mrb[68].mxu0 }
 0x80e   : > { %v9960_v12 = vpop.f32.mrb[69].mxu0 }
 0x80f   : > { %v15393_v25 = vadd.f32 %v9960_v12, %v9959_v35  ;;  %v9962_v63 = vpop.f32.mrb[70].mxu0 }
 0x810   : > { %v9963_v53 = vpop.f32.mrb[71].mxu0 }
 0x811   : > { %v15395_v40 = vadd.f32 %v9963_v53, %v9962_v63 }
 0x817   : > { %v9965_v50 = vpop.f32.mrb[72].mxu0 }
 0x818   : > { %v9966_v62 = vpop.f32.mrb[73].mxu0 }
 0x819   : > { %v15397_v27 = vadd.f32 %v9966_v62, %v9965_v50  ;;  %v9968_v21 = vpop.f32.mrb[74].mxu0 }
 0x81a   : > { %v9969_v31 = vpop.f32.mrb[75].mxu0 }
 0x81b   : > { %v15399_v18 = vadd.f32 %v9969_v31, %v9968_v21 }
 0x821   : > { %v9971_v5 = vpop.f32.mrb[76].mxu0 }
 0x822   : > { %v9972_v44 = vpop.f32.mrb[77].mxu0 }
 0x823   : > { %v15401_v59 = vadd.f32 %v9972_v44, %v9971_v5  ;;  %v9974_v20 = vpop.f32.mrb[78].mxu0 }
 0x824   : > { %v9975_v45 = vpop.f32.mrb[79].mxu0 }
 0x825   : > { %v15403_v11 = vadd.f32 %v9975_v45, %v9974_v20 }
 0x829   : > { %v9977_v46 = vpop.f32.mrb[80].mxu0 }
 0x82a   : > { %v9978_v2 = vpop.f32.mrb[81].mxu0 }
 0x82b   : > { %v15405_v19 = vadd.f32 %v9978_v2, %v9977_v46  ;;  %v9980_v9 = vpop.f32.mrb[82].mxu0  ;;  %v15441_v46 = vld [vmem:[%s16979_s27] ss:$0 sm:$0xff]  ;;  %s16981_s27 = sld [smem:[#allocation101_spill]] }
 0x82c   : > { %v9981_v43 = vpop.f32.mrb[83].mxu0 }
 0x82d   : > { %v15407_v39 = vadd.f32 %v9981_v43, %v9980_v9 }
 0x832   : > { %v9983_v48 = vpop.f32.mrb[84].mxu0 }
 0x833   : > { %v9984_v38 = vpop.f32.mrb[85].mxu0 }
 0x834   : > { %v15409_v16 = vadd.f32 %v9984_v38, %v9983_v48  ;;  %v9986_v7 = vpop.f32.mrb[86].mxu0 }
 0x835   : > { %v9987_v33 = vpop.f32.mrb[87].mxu0 }
 0x836   : > { %v15411_v58 = vadd.f32 %v9987_v33, %v9986_v7 }
 0x83c   : > { %v9989_v60 = vpop.f32.mrb[88].mxu0 }
 0x83d   : > { %v9990_v49 = vpop.f32.mrb[89].mxu0 }
 0x83e   : > { %v15413_v56 = vadd.f32 %v9990_v49, %v9989_v60  ;;  %v9992_v57 = vpop.f32.mrb[90].mxu0 }
 0x83f   : > { %v9993_v15 = vpop.f32.mrb[91].mxu0 }
 0x840   : > { %v15415_v13 = vadd.f32 %v9993_v15, %v9992_v57 }
 0x845   : > { %v9995_v29 = vpop.f32.mrb[92].mxu0 }
 0x846   : > { %v9996_v47 = vpop.f32.mrb[93].mxu0 }
 0x847   : > { %v15417_v3 = vadd.f32 %v9996_v47, %v9995_v29  ;;  %v9998_v23 = vpop.f32.mrb[94].mxu0 }
 0x848   : > { %v9999_v55 = vpop.f32.mrb[95].mxu0 }
 0x849   : > { %v15419_v51 = vadd.f32 %v9999_v55, %v9998_v23 }
 0x84f   : > { %v10001_v32 = vpop.f32.mrb[96].mxu0 }
 0x850   : > { %v10002_v30 = vpop.f32.mrb[97].mxu0 }
 0x851   : > { %v15421_v24 = vadd.f32 %v10002_v30, %v10001_v32  ;;  %v10004_v54 = vpop.f32.mrb[98].mxu0 }
 0x852   : > { %v10005_v37 = vpop.f32.mrb[99].mxu0 }
 0x853   : > { %v15423_v14 = vadd.f32 %v10005_v37, %v10004_v54 }
 0x858   : > { %v10007_v52 = vpop.f32.mrb[100].mxu0 }
 0x859   : > { %v10008_v6 = vpop.f32.mrb[101].mxu0 }
 0x85a   : > { %v15425_v10 = vadd.f32 %v10008_v6, %v10007_v52  ;;  %v10010_v4 = vpop.f32.mrb[102].mxu0 }
 0x85b   : > { %v10011_v22 = vpop.f32.mrb[103].mxu0 }
 0x85c   : > { %v15427_v26 = vadd.f32 %v10011_v22, %v10010_v4 }
 0x860   : > { %v10013_v41 = vpop.f32.mrb[104].mxu0 }
 0x861   : > { %v10014_v1 = vpop.f32.mrb[105].mxu0 }
 0x862   : > { %v15429_v42 = vadd.f32 %v10014_v1, %v10013_v41  ;;  %v10016_v35 = vpop.f32.mrb[106].mxu0 }
 0x863   : > { %v10017_v12 = vpop.f32.mrb[107].mxu0 }
 0x864   : > { %v15431_v63 = vadd.f32 %v10017_v12, %v10016_v35 }
 0x868   : > { %v10019_v53 = vpop.f32.mrb[108].mxu0 }
 0x869   : > { %v10020_v50 = vpop.f32.mrb[109].mxu0 }
 0x86a   : > { %v15433_v62 = vadd.f32 %v10020_v50, %v10019_v53  ;;  %v10022_v21 = vpop.f32.mrb[110].mxu0 }
 0x86b   : > { %v10023_v31 = vpop.f32.mrb[111].mxu0 }
 0x86c   : > { %v15435_v5 = vadd.f32 %v10023_v31, %v10022_v21 }
 0x870   : > { %v10262_v44 = vpop.f32.mrb[112].mxu0 }
 0x871   : > { %v6001_v20 = vadd.f32 %v10262_v44, %v15382_v36  ;;  %v5992_v45 = vpop.f32.mrb[113].mxu0  ;;  %v15450_v36 = vld [vmem:[%s16553_s9] ss:$0 sm:$0xff] }
 0x872   : > { %v5993_v2 = vadd.f32 %v15378_v8, %v5992_v45  ;;  %v10263_v9 = vpop.f32.mrb[114].mxu0 }
 0x873   : > { %v6105_v43 = vmax.f32 %v6001_v20, 0.0  ;;  %v6004_v48 = vadd.f32 %v10263_v9, %v15384_v28  ;;  %v5995_v38 = vpop.f32.mrb[115].mxu0 }
 0x874   : > { %v6103_v7 = vmax.f32 %v5993_v2, 0.0  ;;  %v5996_v33 = vadd.f32 %v15380_v0, %v5995_v38 }
 0x875   : > { %v6140_v60 = vmul.f32 %v15441_v46, %v6105_v43  ;;  %v6106_v49 = vmax.f32 %v6004_v48, 0.0 }
 0x876   : > { %v6138_v57 = vmul.f32 %v15441_v46, %v6103_v7  ;;  %v6104_v15 = vmax.f32 %v5996_v33, 0.0 }
 0x877   : > { %v6141_v8 = vmul.f32 %v15441_v46, %v6106_v49  ;;  %v6175_v47 = vadd.f32 %v15450_v36, %v6140_v60 }
 0x878   : > { %v6139_v29 = vmul.f32 %v15441_v46, %v6104_v15  ;;  %v10266_v28 = vpop.f32.mrb[116].mxu0  ;;  %v6173_v32 = vadd.f32 %v15450_v36, %v6138_v57 }
 0x879   : > { %v6176_v0 = vadd.f32 %v15450_v36, %v6141_v8  ;;  %v6017_v23 = vadd.f32 %v10266_v28, %v15393_v25  ;;  %v6008_v55 = vpop.f32.mrb[117].mxu0 }
 0x87a   : > { %v6174_v30 = vadd.f32 %v15450_v36, %v6139_v29  ;;  %v6009_v54 = vadd.f32 %v15386_v34, %v6008_v55  ;;  %v10267_v37 = vpop.f32.mrb[118].mxu0 }
 0x87b   : > { %v15461_v52 = vpack.c.bf16 %v6176_v0, %v6175_v47  ;;  %v6109_v6 = vmax.f32 %v6017_v23, 0.0  ;;  %v6020_v4 = vadd.f32 %v10267_v37, %v15395_v40  ;;  %v6011_v22 = vpop.f32.mrb[119].mxu0 }
 0x87c   : > { %v15464_v41 = vpack.c.bf16 %v6174_v30, %v6173_v32  ;;  %v6107_v1 = vmax.f32 %v6009_v54, 0.0  ;;  %v6012_v35 = vadd.f32 %v15388_v17, %v6011_v22  ;;  %v11913_v32 = vld [vmem:[#allocation13 + $0x8] sm:$0xff]  }
 0x87d   : > { %v6144_v25 = vmul.f32 %v15441_v46, %v6109_v6  ;;  %v6110_v12 = vmax.f32 %v6020_v4, 0.0  ;;  %v6256_v53 = vrot.slane %v15461_v52, 1 }
 0x87e   : > { %v6142_v50 = vmul.f32 %v15441_v46, %v6107_v1  ;;  %v6108_v34 = vmax.f32 %v6012_v35, 0.0  ;;  %v6255_v21 = vrot.slane %v15464_v41, 1 }
 0x87f   : > { %v6145_v31 = vmul.f32 %v15441_v46, %v6110_v12  ;;  %v6179_v17 = vadd.f32 %v15450_v36, %v6144_v25 }
 0x880   : > { %v6143_v40 = vmul.f32 %v15441_v46, %v6108_v34  ;;  %v10270_v44 = vpop.f32.mrb[120].mxu0  ;;  %v6257_v20 = vsel %vm1556_vm3, %v6255_v21, %v6256_v53  ;;  %v6177_v43 = vadd.f32 %v15450_v36, %v6142_v50  ;;  %v11914_v21 = vld [vmem:[#allocation13 + $0x10] sm:$0xff]  }
 0x881   : > { %v6180_v45 = vadd.f32 %v15450_v36, %v6145_v31  ;;  %v6033_v2 = vadd.f32 %v10270_v44, %v15401_v59  ;;  %v6024_v9 = vpop.f32.mrb[121].mxu0  ;;  %10300 = vmatprep.mubr.msk.bf16.mxu0 %vm6318_vm6, %v6257_v20 }
 0x882   : > { %v6178_v48 = vadd.f32 %v15450_v36, %v6143_v40  ;;  %v6025_v38 = vadd.f32 %v15397_v27, %v6024_v9  ;;  %v10271_v7 = vpop.f32.mrb[122].mxu0  ;;  %v11915_v9 = vld [vmem:[#allocation13 + $0x18] sm:$0xff]  }
 0x883   : > { %v15481_v33 = vpack.c.bf16 %v6180_v45, %v6179_v17  ;;  %v6113_v60 = vmax.f32 %v6033_v2, 0.0  ;;  %v6036_v49 = vadd.f32 %v10271_v7, %v15403_v11  ;;  %v6027_v57 = vpop.f32.mrb[123].mxu0 }
 0x884   : > { %v15484_v15 = vpack.c.bf16 %v6178_v48, %v6177_v43  ;;  %v6111_v8 = vmax.f32 %v6025_v38, 0.0  ;;  %v6028_v59 = vadd.f32 %v15399_v18, %v6027_v57 }
 0x885   : > { %v6148_v29 = vmul.f32 %v15441_v46, %v6113_v60  ;;  %v6114_v28 = vmax.f32 %v6036_v49, 0.0  ;;  %v6260_v47 = vrot.slane %v15481_v33, 1 }
 0x886   : > { %v6258_v0 = vrot.slane %v15484_v15, 1  ;;  %v6146_v27 = vmul.f32 %v15441_v46, %v6111_v8  ;;  %v6112_v23 = vmax.f32 %v6028_v59, 0.0 }
 0x887   : > { %v6149_v55 = vmul.f32 %v15441_v46, %v6114_v28  ;;  %v6183_v37 = vadd.f32 %v15450_v36, %v6148_v29 }
 0x888   : > { %v6147_v11 = vmul.f32 %v15441_v46, %v6112_v23  ;;  %v10274_v30 = vpop.f32.mrb[124].mxu0  ;;  %v6259_v54 = vsel %vm1556_vm3, %v6256_v53, %v6258_v0  ;;  %v6261_v18 = vsel %vm1556_vm3, %v6258_v0, %v6260_v47  ;;  %v6181_v1 = vadd.f32 %v15450_v36, %v6146_v27 }
 0x889   : > { %v6184_v6 = vadd.f32 %v15450_v36, %v6149_v55  ;;  %v6049_v4 = vadd.f32 %v10274_v30, %v15409_v16  ;;  %v6040_v22 = vpop.f32.mrb[125].mxu0  ;;  %10301 = vmatmul.mubr.msk.bf16.vlgmr.msra.gmra.mrb[140].mxu0 %vm6318_vm6, %v6259_v54 }
 0x88a   : > { %v6182_v35 = vadd.f32 %v15450_v36, %v6147_v11  ;;  %v6041_v25 = vadd.f32 %v15405_v19, %v6040_v22  ;;  %v10275_v12 = vpop.f32.mrb[126].mxu0  ;;  %10304 = vmatprep.mubr.msk.bf16.mxu0 %vm6318_vm6, %v6261_v18  ;;  %10329 = vmatpush3.bf16.msra.mxu0 %v15390_v61 }
 0x88b   : > { %v15504_v53 = vpack.c.bf16 %v6184_v6, %v6183_v37  ;;  %v6117_v50 = vmax.f32 %v6049_v4, 0.0  ;;  %v6052_v34 = vadd.f32 %v10275_v12, %v15411_v58  ;;  %v6043_v16 = vpop.f32.mrb[127].mxu0  ;;  %10330 = vmatprep.subr.bf16.mxu0 %v11913_v32  ;;  %v11917_v4 = vld [vmem:[#allocation13 + $0x28] sm:$0xff]  }
 0x88c   : > { %v15507_v31 = vpack.c.bf16 %v6182_v35, %v6181_v1  ;;  %v6115_v40 = vmax.f32 %v6041_v25, 0.0  ;;  %v6044_v44 = vadd.f32 %v15407_v39, %v6043_v16 }
 0x88d   : > { %v6152_v19 = vmul.f32 %v15441_v46, %v6117_v50  ;;  %v6118_v20 = vmax.f32 %v6052_v34, 0.0  ;;  %v6264_v17 = vrot.slane %v15504_v53, 1 }
 0x88e   : > { %v6150_v61 = vmul.f32 %v15441_v46, %v6115_v40  ;;  %v6116_v45 = vmax.f32 %v6044_v44, 0.0  ;;  %v6262_v2 = vrot.slane %v15507_v31, 1  ;;  %10331 = vmatpush3.bf16.msra.mxu0 %v11913_v32 }
 0x88f   : > { %v6153_v58 = vmul.f32 %v15441_v46, %v6118_v20  ;;  %10332 = vmatprep.subr.bf16.mxu0 %v11914_v21  ;;  %v6187_v7 = vadd.f32 %v15450_v36, %v6152_v19 }
 0x890   : > { %v6151_v43 = vmul.f32 %v15441_v46, %v6116_v45  ;;  %v10278_v48 = vpop.f32.mrb[128].mxu0  ;;  %v6263_v39 = vsel %vm1556_vm3, %v6260_v47, %v6262_v2  ;;  %v6265_v38 = vsel %vm1556_vm3, %v6262_v2, %v6264_v17  ;;  %v6185_v8 = vadd.f32 %v15450_v36, %v6150_v61 }
 0x891   : > { %v6188_v60 = vadd.f32 %v15450_v36, %v6153_v58  ;;  %v6065_v49 = vadd.f32 %v10278_v48, %v15417_v3  ;;  %v6056_v57 = vpop.f32.mrb[129].mxu0  ;;  %10305 = vmatmul.mubr.msk.bf16.gmra.mrb[144].mxu0 %vm6318_vm6, %v6263_v39  ;;  %v11916_v3 = vld [vmem:[#allocation13 + $0x20] sm:$0xff]  }
 0x892   : > { %v6186_v59 = vadd.f32 %v15450_v36, %v6151_v43  ;;  %v6057_v29 = vadd.f32 %v15413_v56, %v6056_v57  ;;  %v10279_v28 = vpop.f32.mrb[130].mxu0  ;;  %10308 = vmatprep.mubr.msk.bf16.mxu0 %vm6318_vm6, %v6265_v38  ;;  %10333 = vmatpush3.bf16.msra.mxu0 %v11914_v21 }
 0x893   : > { %v15526_v47 = vpack.c.bf16 %v6188_v60, %v6187_v7  ;;  %v6121_v0 = vmax.f32 %v6065_v49, 0.0  ;;  %v6068_v27 = vadd.f32 %v10279_v28, %v15419_v51  ;;  %v6059_v23 = vpop.f32.mrb[131].mxu0  ;;  %10334 = vmatprep.subr.bf16.mxu0 %v11915_v9 }
 0x894   : > { %v15529_v55 = vpack.c.bf16 %v6186_v59, %v6185_v8  ;;  %v6119_v32 = vmax.f32 %v6057_v29, 0.0  ;;  %v6060_v11 = vadd.f32 %v15415_v13, %v6059_v23 }
 0x895   : > { %v6156_v30 = vmul.f32 %v15441_v46, %v6121_v0  ;;  %v6122_v56 = vmax.f32 %v6068_v27, 0.0  ;;  %v6268_v54 = vrot.slane %v15526_v47, 1 }
 0x896   : > { %v6154_v18 = vmul.f32 %v15441_v46, %v6119_v32  ;;  %v6120_v37 = vmax.f32 %v6060_v11, 0.0  ;;  %v6266_v6 = vrot.slane %v15529_v55, 1  ;;  %10335 = vmatpush3.bf16.msra.mxu0 %v11915_v9 }
 0x897   : > { %v6157_v51 = vmul.f32 %v15441_v46, %v6122_v56  ;;  %10336 = vmatprep.subr.bf16.mxu0 %v11916_v3  ;;  %v6191_v25 = vadd.f32 %v15450_v36, %v6156_v30 }
 0x898   : > { %v6155_v22 = vmul.f32 %v15441_v46, %v6120_v37  ;;  %v10282_v1 = vpop.f32.mrb[132].mxu0  ;;  %v6267_v13 = vsel %vm1556_vm3, %v6264_v17, %v6266_v6  ;;  %v6269_v35 = vsel %vm1556_vm3, %v6266_v6, %v6268_v54  ;;  %v6189_v16 = vadd.f32 %v15450_v36, %v6154_v18 }
 0x899   : > { %v6192_v12 = vadd.f32 %v15450_v36, %v6157_v51  ;;  %v6081_v50 = vadd.f32 %v10282_v1, %v15425_v10  ;;  %v6072_v34 = vpop.f32.mrb[133].mxu0  ;;  %10309 = vmatmul.mubr.msk.bf16.gmra.mrb[148].mxu0 %vm6318_vm6, %v6267_v13  ;;  %v15551_v10 = vld [vmem:[#allocation13 + $0x60] sm:$0xff]  }
 0x89a   : > { %v6190_v21 = vadd.f32 %v15450_v36, %v6155_v22  ;;  %v6073_v40 = vadd.f32 %v15421_v24, %v6072_v34  ;;  %v10283_v44 = vpop.f32.mrb[134].mxu0  ;;  %10312 = vmatprep.mubr.msk.bf16.mxu0 %vm6318_vm6, %v6269_v35  ;;  %10337 = vmatpush3.bf16.msra.mxu0 %v11916_v3 }
 0x89b   : > { %v15548_v19 = vpack.c.bf16 %v6192_v12, %v6191_v25  ;;  %v6125_v20 = vmax.f32 %v6081_v50, 0.0  ;;  %v6084_v17 = vadd.f32 %v10283_v44, %v15427_v26  ;;  %v6075_v61 = vpop.f32.mrb[135].mxu0  ;;  %10338 = vmatprep.subr.bf16.mxu0 %v11917_v4 }
 0x89c   : > { %v15553_v45 = vpack.c.bf16 %v6190_v21, %v6189_v16  ;;  %v6123_v2 = vmax.f32 %v6073_v40, 0.0  ;;  %v6076_v58 = vadd.f32 %v15423_v14, %v6075_v61  ;;  %v11920_v61 = vld [vmem:[#allocation13 + $0x70] sm:$0xff]  }
 0x89d   : > { %v6160_v24 = vmul.f32 %v15441_v46, %v6125_v20  ;;  %v6126_v9 = vmax.f32 %v6084_v17, 0.0  ;;  %v6272_v43 = vrot.slane %v15548_v19, 1  ;;  %v11919_v17 = vld [vmem:[#allocation13 + $0x68] sm:$0xff]  }
 0x89e   : > { %v6158_v48 = vmul.f32 %v15441_v46, %v6123_v2  ;;  %v6124_v39 = vmax.f32 %v6076_v58, 0.0  ;;  %v6270_v38 = vrot.slane %v15553_v45, 1  ;;  %10339 = vmatpush3.bf16.msra.mxu0 %v11917_v4  ;;  %v11921_v2 = vld [vmem:[#allocation13 + $0x78] sm:$0xff]   ;;  %v11922_v58 = vld [vmem:[#allocation13 + $0x80] sm:$0xff]  }
 0x89f   : > { %v6161_v26 = vmul.f32 %v15441_v46, %v6126_v9  ;;  %10368 = vmatprep.subr.bf16.mxu0 %v15551_v10  ;;  %v6195_v57 = vadd.f32 %v15450_v36, %v6160_v24  ;;  %v11923_v24 = vld [vmem:[#allocation13 + $0x88] sm:$0xff]   ;;  %v6741_v9 = vrot.slane %v15464_v41, 2 }
 0x8a0   : > { %v6159_v7 = vmul.f32 %v15441_v46, %v6124_v39  ;;  %v10286_v60 = vpop.f32.mrb[136].mxu0  ;;  %v6271_v14 = vsel %vm1556_vm3, %v6268_v54, %v6270_v38  ;;  %v6273_v49 = vsel %vm1556_vm3, %v6270_v38, %v6272_v43  ;;  %v6193_v28 = vadd.f32 %v15450_v36, %v6158_v48 }
 0x8a1   : > { %v6196_v8 = vadd.f32 %v15450_v36, %v6161_v26  ;;  %v6097_v59 = vadd.f32 %v10286_v60, %v15433_v62  ;;  %v6088_v29 = vpop.f32.mrb[137].mxu0  ;;  %10313 = vmatmul.mubr.msk.bf16.gmra.mrb[152].mxu0 %vm6318_vm6, %v6271_v14  ;;  %v6744_v38 = vrot.slane %v15484_v15, 2  ;;  %v6746_v26 = vrot.slane %v15481_v33, 2  ;;  %v11927_v14 = vld [vmem:[%s16557_s13 + $0x54] sm:$0xff]  }
 0x8a2   : > { %v6194_v0 = vadd.f32 %v15450_v36, %v6159_v7  ;;  %v6089_v27 = vadd.f32 %v15429_v42, %v6088_v29  ;;  %v10287_v23 = vpop.f32.mrb[138].mxu0  ;;  %10316 = vmatprep.mubr.msk.bf16.mxu0 %vm6318_vm6, %v6273_v49  ;;  %v11925_v7 = vld [vmem:[%s16557_s13 + $0x44] sm:$0xff]  }
 0x8a3   : > { %v15573_v3 = vpack.c.bf16 %v6196_v8, %v6195_v57  ;;  %v6129_v32 = vmax.f32 %v6097_v59, 0.0  ;;  %v6100_v11 = vadd.f32 %v10287_v23, %v15435_v5  ;;  %v6091_v30 = vpop.f32.mrb[139].mxu0  ;;  %v6754_v8 = vrot.slane %v15526_v47, 2 }
 0x8a4   : > { %v15576_v56 = vpack.c.bf16 %v6194_v0, %v6193_v28  ;;  %v6127_v62 = vmax.f32 %v6089_v27, 0.0  ;;  %v6092_v54 = vadd.f32 %v15431_v63, %v6091_v30  ;;  %v6756_v28 = vrot.slane %v15553_v45, 2  ;;  %v11931_v30 = vld [vmem:[%s16557_s13 + $0x74] ss:$0 sps:$4 sm:$0xff]  }
 0x8a5   : > { %v6164_v18 = vmul.f32 %v15441_v46, %v6129_v32  ;;  %v6130_v37 = vmax.f32 %v6100_v11, 0.0  ;;  %v6276_v6 = vrot.slane %v15573_v3, 1  ;;  %v6758_v0 = vrot.slane %v15548_v19, 2  ;;  %v11930_v11 = vld [vmem:[%s16557_s13 + $0x6c] sm:$0xff]  }
 0x8a6   : > { %v6162_v42 = vmul.f32 %v15441_v46, %v6127_v62  ;;  %v6128_v51 = vmax.f32 %v6092_v54, 0.0  ;;  %v6274_v4 = vrot.slane %v15576_v56, 1  ;;  %v6757_v27 = vsel %vm1132_vm0, %v6754_v8, %v6756_v28  ;;  %v15713_v62 = vld [vmem:[%s16557_s13] sm:$0xff]  }
 0x8a7   : > { %v6165_v22 = vmul.f32 %v15441_v46, %v6130_v37  ;;  %v6199_v63 = vadd.f32 %v15450_v36, %v6164_v18  ;;  %v6762_v23 = vrot.slane %v15573_v3, 2  ;;  %v15716_v18 = vld [vmem:[#allocation14] ss:$0 sm:$0xff] }
 0x8a8   : > { %v6163_v5 = vmul.f32 %v15441_v46, %v6128_v51  ;;  %v6275_v1 = vsel %vm1556_vm3, %v6272_v43, %v6274_v4  ;;  %v6277_v13 = vsel %vm1556_vm3, %v6274_v4, %v6276_v6  ;;  %v6197_v25 = vadd.f32 %v15450_v36, %v6162_v42 }
 0x8a9   : > { %v6200_v35 = vadd.f32 %v15450_v36, %v6165_v22  ;;  %10317 = vmatmul.mubr.msk.bf16.gmra.mrb[156].mxu0 %vm6318_vm6, %v6275_v1  ;;  %v6742_v43 = vrot.slane %v15461_v52, 2  ;;  %v6214_v48 = vpack.c.bf16 %v6199_v63, %v6199_v63  ;;  %v15719_v1 = vld [vmem:[#allocation16] ss:$0 sm:$0xff] }
 0x8aa   : > { %v6198_v12 = vadd.f32 %v15450_v36, %v6163_v5  ;;  %10320 = vmatprep.mubr.msk.bf16.mxu0 %vm6318_vm6, %v6277_v13 }
 0x8ab   : > { %v15593_v50 = vpack.c.bf16 %v6200_v35, %v6199_v63  ;;  %v6743_v39 = vsel %vm1132_vm0, %v6741_v9, %v6742_v43  ;;  %v6745_v60 = vsel %vm1132_vm0, %v6742_v43, %v6744_v38 }
 0x8ac   : > { %v15595_v34 = vpack.c.bf16 %v6198_v12, %v6197_v25 }
 0x8ad   : > { %v6280_v46 = vrot.slane %v15593_v50, 1  ;;  %v6766_v16 = vrot.slane %v15593_v50, 2 }
 0x8ae   : > { %v6278_v21 = vrot.slane %v15595_v34, 1  ;;  %v6764_v40 = vrot.slane %v15595_v34, 2 }
 0x8b0   : > { %v6279_v44 = vsel %vm1556_vm3, %v6276_v6, %v6278_v21  ;;  %v6281_v20 = vsel %vm1556_vm3, %v6278_v21, %v6280_v46  ;;  %v15608_v36 = vsel %vm1132_vm0, %v6764_v40, %v6766_v16 }
 0x8b1   : > { %10321 = vmatmul.mubr.msk.bf16.gmra.mrb[160].mxu0 %vm6318_vm6, %v6279_v44 }
 0x8b2   : > { %10324 = vmatprep.mubr.msk.bf16.mxu0 %vm6318_vm6, %v6281_v20 }
 0x8b9   : > { %10325 = vmatmul.mubr.msk.bf16.gmra.mrb[164].mxu0 %vm6318_vm6, %v6280_v46 }
 0x8ba   : > { %10340 = vmatprep.mubr.msk.bf16.mxu0 %vm6318_vm6, %v15464_v41  ;;  %v11926_v41 = vld [vmem:[%s16557_s13 + $0x4c] sm:$0xff]  }
 0x8c1   : > { %10341 = vmatmul.mubr.msk.bf16.vlgmr.msra.gmra.mrb[140].mxu0 %vm6318_vm6, %v15461_v52  ;;  %v6747_v52 = vsel %vm1132_vm0, %v6744_v38, %v6746_v26 }
 0x8c2   : > { %10344 = vmatprep.mubr.msk.bf16.mxu0 %vm6318_vm6, %v15484_v15  ;;  %10369 = vmatpush3.bf16.msra.mxu0 %v15551_v10  ;;  %v11924_v10 = vld [vmem:[%s16557_s13 + $0x3c] sm:$0xff]   ;;  %v6750_v15 = vrot.slane %v15504_v53, 2 }
 0x8c3   : > { %10370 = vmatprep.subr.bf16.mxu0 %v11919_v17 }
 0x8c6   : > { %10371 = vmatpush3.bf16.msra.mxu0 %v11919_v17 }
 0x8c7   : > { %10372 = vmatprep.subr.bf16.mxu0 %v11920_v61 }
 0x8c9   : > { %10345 = vmatmul.mubr.msk.bf16.gmra.mrb[144].mxu0 %vm6318_vm6, %v15481_v33  ;;  %v6748_v33 = vrot.slane %v15507_v31, 2 }
 0x8ca   : > { %10348 = vmatprep.mubr.msk.bf16.mxu0 %vm6318_vm6, %v15507_v31  ;;  %10373 = vmatpush3.bf16.msra.mxu0 %v11920_v61  ;;  %v6752_v31 = vrot.slane %v15529_v55, 2 }
 0x8cb   : > { %10374 = vmatprep.subr.bf16.mxu0 %v11921_v2  ;;  %v6749_v49 = vsel %vm1132_vm0, %v6746_v26, %v6748_v33  ;;  %v6751_v57 = vsel %vm1132_vm0, %v6748_v33, %v6750_v15 }
 0x8cc   : > { %v6753_v59 = vsel %vm1132_vm0, %v6750_v15, %v6752_v31  ;;  %v6755_v29 = vsel %vm1132_vm0, %v6752_v31, %v6754_v8 }
 0x8ce   : > { %10375 = vmatpush3.bf16.msra.mxu0 %v11921_v2 }
 0x8cf   : > { %10376 = vmatprep.subr.bf16.mxu0 %v11922_v58 }
 0x8d1   : > { %10349 = vmatmul.mubr.msk.bf16.gmra.mrb[148].mxu0 %vm6318_vm6, %v15504_v53  ;;  %v11928_v53 = vld [vmem:[%s16557_s13 + $0x5c] sm:$0xff]  }
 0x8d2   : > { %10352 = vmatprep.mubr.msk.bf16.mxu0 %vm6318_vm6, %v15529_v55  ;;  %10377 = vmatpush3.bf16.msra.mxu0 %v11922_v58  ;;  %v6760_v55 = vrot.slane %v15576_v56, 2 }
 0x8d3   : > { %10378 = vmatprep.subr.bf16.mxu0 %v11923_v24 }
 0x8d4   : > { %v6761_v32 = vsel %vm1132_vm0, %v6758_v0, %v6760_v55 }
 0x8d6   : > { %10379 = vmatpush3.bf16.msra.mxu0 %v11923_v24 }
 0x8d7   : > { %10408 = vmatprep.subr.bf16.mxu0 %v11924_v10 }
 0x8d9   : > { %10353 = vmatmul.mubr.msk.bf16.gmra.mrb[152].mxu0 %vm6318_vm6, %v15526_v47  ;;  %v6759_v47 = vsel %vm1132_vm0, %v6756_v28, %v6758_v0 }
 0x8da   : > { %10356 = vmatprep.mubr.msk.bf16.mxu0 %vm6318_vm6, %v15553_v45  ;;  %v6763_v45 = vsel %vm1132_vm0, %v6760_v55, %v6762_v23  ;;  %v11933_v55 = vld [vmem:[%s16557_s13 + $0x8] sm:$0xff]  }
 0x8e1   : > { %10357 = vmatmul.mubr.msk.bf16.gmra.mrb[156].mxu0 %vm6318_vm6, %v15548_v19  ;;  %v6765_v19 = vsel %vm1132_vm0, %v6762_v23, %v6764_v40 }
 0x8e2   : > { %10360 = vmatprep.mubr.msk.bf16.mxu0 %vm6318_vm6, %v15576_v56  ;;  %v7288_v56 = vsel %vm7286_vm7, %v11931_v30, 0 }
 0x8e9   : > { %10361 = vmatmul.mubr.msk.bf16.gmra.mrb[160].mxu0 %vm6318_vm6, %v15573_v3  ;;  %v11929_v3 = vld [vmem:[%s16557_s13 + $0x64] sm:$0xff]  }
 0x8ea   : > { %10364 = vmatprep.mubr.msk.bf16.mxu0 %vm6318_vm6, %v15595_v34 }
 0x8f1   : > { %10365 = vmatmul.mubr.msk.bf16.gmra.mrb[164].mxu0 %vm6318_vm6, %v6214_v48 }
 0x8f2   : > { %10380 = vmatprep.mubr.msk.bf16.mxu0 %vm6318_vm6, %v6743_v39 }
 0x8f9   : > { %10381 = vmatmul.mubr.msk.bf16.vlgmr.msra.gmra.mrb[140].mxu0 %vm6318_vm6, %v6745_v60 }
 0x8fa   : > { %10384 = vmatprep.mubr.msk.bf16.mxu0 %vm6318_vm6, %v6747_v52  ;;  %10409 = vmatpush3.bf16.msra.mxu0 %v11924_v10 }
 0x8fb   : > { %10410 = vmatprep.subr.bf16.mxu0 %v11925_v7 }
 0x8fe   : > { %10411 = vmatpush3.bf16.msra.mxu0 %v11925_v7 }
 0x8ff   : > { %10412 = vmatprep.subr.bf16.mxu0 %v11926_v41 }
 0x901   : > { %10385 = vmatmul.mubr.msk.bf16.gmra.mrb[144].mxu0 %vm6318_vm6, %v6749_v49 }
 0x902   : > { %10388 = vmatprep.mubr.msk.bf16.mxu0 %vm6318_vm6, %v6751_v57  ;;  %10413 = vmatpush3.bf16.msra.mxu0 %v11926_v41 }
 0x903   : > { %10414 = vmatprep.subr.bf16.mxu0 %v11927_v14 }
 0x906   : > { %10415 = vmatpush3.bf16.msra.mxu0 %v11927_v14 }
 0x907   : > { %10416 = vmatprep.subr.bf16.mxu0 %v11928_v53 }
 0x909   : > { %10389 = vmatmul.mubr.msk.bf16.gmra.mrb[148].mxu0 %vm6318_vm6, %v6753_v59 }
 0x90a   : > { %10392 = vmatprep.mubr.msk.bf16.mxu0 %vm6318_vm6, %v6755_v29  ;;  %10417 = vmatpush3.bf16.msra.mxu0 %v11928_v53 }
 0x90b   : > { %10418 = vmatprep.subr.bf16.mxu0 %v11929_v3 }
 0x90e   : > { %10419 = vmatpush3.bf16.msra.mxu0 %v11929_v3 }
 0x90f   : > { %10420 = vmatprep.subr.bf16.mxu0 %v11930_v11 }
 0x911   : > { %10393 = vmatmul.mubr.msk.bf16.gmra.mrb[152].mxu0 %vm6318_vm6, %v6757_v27 }
 0x912   : > { %10396 = vmatprep.mubr.msk.bf16.mxu0 %vm6318_vm6, %v6759_v47  ;;  %10421 = vmatpush3.bf16.msra.mxu0 %v11930_v11 }
 0x913   : > { %11320 = vmatprep.subr.msk.bf16.mxu0 %vm7286_vm7, %v11931_v30 }
 0x916   : > { %10423 = vmatpush3.bf16.msra.mxu0 %v7288_v56 }
 0x917   : > { %10452 = vmatprep.subr.bf16.mxu0 %v15713_v62 }
 0x919   : > { %10397 = vmatmul.mubr.msk.bf16.gmra.mrb[156].mxu0 %vm6318_vm6, %v6761_v32 }
 0x91a   : > { %10400 = vmatprep.mubr.msk.bf16.mxu0 %vm6318_vm6, %v6763_v45 }
 0x921   : > { %10401 = vmatmul.mubr.msk.bf16.gmra.mrb[160].mxu0 %vm6318_vm6, %v6765_v19 }
 0x922   : > { %10404 = vmatprep.mubr.msk.bf16.mxu0 %vm6318_vm6, %v15608_v36 }
 0x929   : > { %10405 = vmatmul.mubr.msk.bf16.gmra.mrb[164].mxu0 %vm6318_vm6, %v6766_v16 }
 0x9cc   : > { %v10382_v54 = vpop.f32.mrb[140].mxu0 }
 0x9cd   : > { %v7019_v37 = vmax.f32 %v10382_v54, 0.0  ;;  %v6880_v6 = vpop.f32.mrb[141].mxu0 }
 0x9ce   : > { %v7017_v42 = vmax.f32 %v6880_v6, 0.0  ;;  %v10383_v51 = vpop.f32.mrb[142].mxu0 }
 0x9cf   : > { %v7053_v4 = vmul.f32 %v15716_v18, %v7019_v37  ;;  %v7020_v22 = vmax.f32 %v10383_v51, 0.0  ;;  %v6883_v5 = vpop.f32.mrb[143].mxu0 }
 0x9d0   : > { %v7051_v13 = vmul.f32 %v15716_v18, %v7017_v42  ;;  %v7018_v63 = vmax.f32 %v6883_v5, 0.0  ;;  %v11934_v42 = vld [vmem:[%s16557_s13 + $0x10] sm:$0xff]  }
 0x9d1   : > { %v7054_v35 = vmul.f32 %v15716_v18, %v7020_v22  ;;  %v7087_v12 = vadd.f32 %v15719_v1, %v7053_v4 }
 0x9d2   : > { %v7052_v25 = vmul.f32 %v15716_v18, %v7018_v63  ;;  %v7085_v34 = vadd.f32 %v15719_v1, %v7051_v13 }
 0x9d3   : > { %v7088_v50 = vadd.f32 %v15719_v1, %v7054_v35 }
 0x9d4   : > { %v7086_v46 = vadd.f32 %v15719_v1, %v7052_v25  ;;  %v10386_v16 = vpop.f32.mrb[144].mxu0 }
 0x9d5   : > { %v15728_v21 = vpack.c.bf16 %v7088_v50, %v7087_v12  ;;  %v7023_v40 = vmax.f32 %v10386_v16, 0.0  ;;  %v6896_v44 = vpop.f32.mrb[145].mxu0 }
 0x9d6   : > { %v15730_v20 = vpack.c.bf16 %v7086_v46, %v7085_v34  ;;  %v7021_v36 = vmax.f32 %v6896_v44, 0.0  ;;  %v10387_v17 = vpop.f32.mrb[146].mxu0  ;;  %v11935_v34 = vld [vmem:[%s16557_s13 + $0x18] sm:$0xff]  }
 0x9d7   : > { %v7057_v61 = vmul.f32 %v15716_v18, %v7023_v40  ;;  %v7024_v2 = vmax.f32 %v10387_v17, 0.0  ;;  %v6899_v58 = vpop.f32.mrb[147].mxu0  ;;  %v7172_v24 = vrot.slane %v15728_v21, 1 }
 0x9d8   : > { %v7055_v10 = vmul.f32 %v15716_v18, %v7021_v36  ;;  %v7022_v9 = vmax.f32 %v6899_v58, 0.0  ;;  %v7171_v43 = vrot.slane %v15730_v20, 1 }
 0x9d9   : > { %v7058_v48 = vmul.f32 %v15716_v18, %v7024_v2  ;;  %v7091_v26 = vadd.f32 %v15719_v1, %v7057_v61 }
 0x9da   : > { %v7056_v39 = vmul.f32 %v15716_v18, %v7022_v9  ;;  %v7173_v38 = vsel %vm1556_vm3, %v7171_v43, %v7172_v24  ;;  %v7089_v60 = vadd.f32 %v15719_v1, %v7055_v10  ;;  %v11936_v9 = vld [vmem:[%s16557_s13 + $0x20] sm:$0xff]  }
 0x9db   : > { %v7092_v7 = vadd.f32 %v15719_v1, %v7058_v48  ;;  %10424 = vmatprep.mubr.msk.bf16.mxu0 %vm7243_vm8, %v7173_v38 }
 0x9dc   : > { %v7090_v52 = vadd.f32 %v15719_v1, %v7056_v39  ;;  %v10390_v41 = vpop.f32.mrb[148].mxu0 }
 0x9dd   : > { %v15744_v33 = vpack.c.bf16 %v7092_v7, %v7091_v26  ;;  %v7027_v15 = vmax.f32 %v10390_v41, 0.0  ;;  %v6912_v14 = vpop.f32.mrb[149].mxu0 }
 0x9de   : > { %v15746_v49 = vpack.c.bf16 %v7090_v52, %v7089_v60  ;;  %v7025_v57 = vmax.f32 %v6912_v14, 0.0  ;;  %v10391_v53 = vpop.f32.mrb[150].mxu0 }
 0x9df   : > { %v7061_v31 = vmul.f32 %v15716_v18, %v7027_v15  ;;  %v7028_v8 = vmax.f32 %v10391_v53, 0.0  ;;  %v6915_v59 = vpop.f32.mrb[151].mxu0  ;;  %v7176_v29 = vrot.slane %v15744_v33, 1 }
 0x9e0   : > { %v7174_v28 = vrot.slane %v15746_v49, 1  ;;  %v7059_v0 = vmul.f32 %v15716_v18, %v7025_v57  ;;  %v7026_v27 = vmax.f32 %v6915_v59, 0.0  ;;  %v11937_v57 = vld [vmem:[%s16557_s13 + $0x28] sm:$0xff]  }
 0x9e1   : > { %v7062_v47 = vmul.f32 %v15716_v18, %v7028_v8  ;;  %v7095_v19 = vadd.f32 %v15719_v1, %v7061_v31 }
 0x9e2   : > { %v7060_v23 = vmul.f32 %v15716_v18, %v7026_v27  ;;  %v7175_v32 = vsel %vm1556_vm3, %v7172_v24, %v7174_v28  ;;  %v7177_v45 = vsel %vm1556_vm3, %v7174_v28, %v7176_v29  ;;  %v7093_v11 = vadd.f32 %v15719_v1, %v7059_v0 }
 0x9e3   : > { %v7096_v3 = vadd.f32 %v15719_v1, %v7062_v47  ;;  %10425 = vmatmul.mubr.msk.bf16.vlgmr.msra.gmra.mrb[168].mxu0 %vm7243_vm8, %v7175_v32  ;;  %v11938_v32 = vld [vmem:[%s16557_s13 + $0x30] sm:$0xff]  }
 0x9e4   : > { %v7094_v30 = vadd.f32 %v15719_v1, %v7060_v23  ;;  %v10394_v56 = vpop.f32.mrb[152].mxu0  ;;  %10428 = vmatprep.mubr.msk.bf16.mxu0 %vm7243_vm8, %v7177_v45  ;;  %10453 = vmatpush3.bf16.msra.mxu0 %v15713_v62 }
 0x9e5   : > { %v15766_v54 = vpack.c.bf16 %v7096_v3, %v7095_v19  ;;  %v7031_v37 = vmax.f32 %v10394_v56, 0.0  ;;  %v6928_v6 = vpop.f32.mrb[153].mxu0  ;;  %10454 = vmatprep.subr.bf16.mxu0 %v11933_v55 }
 0x9e6   : > { %v15771_v51 = vpack.c.bf16 %v7094_v30, %v7093_v11  ;;  %v7029_v4 = vmax.f32 %v6928_v6, 0.0  ;;  %v10395_v22 = vpop.f32.mrb[154].mxu0 }
 0x9e7   : > { %v7065_v5 = vmul.f32 %v15716_v18, %v7031_v37  ;;  %v7032_v13 = vmax.f32 %v10395_v22, 0.0  ;;  %v6931_v63 = vpop.f32.mrb[155].mxu0  ;;  %v7180_v35 = vrot.slane %v15766_v54, 1 }
 0x9e8   : > { %v7063_v62 = vmul.f32 %v15716_v18, %v7029_v4  ;;  %v7030_v25 = vmax.f32 %v6931_v63, 0.0  ;;  %v7178_v12 = vrot.slane %v15771_v51, 1  ;;  %10455 = vmatpush3.bf16.msra.mxu0 %v11933_v55 }
 0x9e9   : > { %v7066_v50 = vmul.f32 %v15716_v18, %v7032_v13  ;;  %10456 = vmatprep.subr.bf16.mxu0 %v11934_v42  ;;  %v7099_v44 = vadd.f32 %v15719_v1, %v7065_v5  ;;  %v11939_v5 = vld [vmem:[%s16557_s13 + $0x38] ss:$0 sps:$4 sm:$0xff]  }
 0x9ea   : > { %v7064_v46 = vmul.f32 %v15716_v18, %v7030_v25  ;;  %v7179_v16 = vsel %vm1556_vm3, %v7176_v29, %v7178_v12  ;;  %v7181_v40 = vsel %vm1556_vm3, %v7178_v12, %v7180_v35  ;;  %v7097_v17 = vadd.f32 %v15719_v1, %v7063_v62 }
 0x9eb   : > { %v7100_v36 = vadd.f32 %v15719_v1, %v7066_v50  ;;  %10429 = vmatmul.mubr.msk.bf16.gmra.mrb[172].mxu0 %vm7243_vm8, %v7179_v16 }
 0x9ec   : > { %v7098_v61 = vadd.f32 %v15719_v1, %v7064_v46  ;;  %v10398_v2 = vpop.f32.mrb[156].mxu0  ;;  %10432 = vmatprep.mubr.msk.bf16.mxu0 %vm7243_vm8, %v7181_v40  ;;  %10457 = vmatpush3.bf16.msra.mxu0 %v11934_v42 }
 0x9ed   : > { %v15790_v58 = vpack.c.bf16 %v7100_v36, %v7099_v44  ;;  %v7035_v24 = vmax.f32 %v10398_v2, 0.0  ;;  %v6944_v10 = vpop.f32.mrb[157].mxu0  ;;  %10458 = vmatprep.subr.bf16.mxu0 %v11935_v34  ;;  %v7522_v44 = vsel %vm7286_vm7, %v11939_v5, 0  ;;  %v11940_v36 = vld [vmem:[%s16557_s13 + $0x78] sm:$0xff]  }
 0x9ee   : > { %v15795_v43 = vpack.c.bf16 %v7098_v61, %v7097_v17  ;;  %v7033_v48 = vmax.f32 %v6944_v10, 0.0  ;;  %v10399_v39 = vpop.f32.mrb[158].mxu0 }
 0x9ef   : > { %v7069_v38 = vmul.f32 %v15716_v18, %v7035_v24  ;;  %v7036_v26 = vmax.f32 %v10399_v39, 0.0  ;;  %v6947_v7 = vpop.f32.mrb[159].mxu0  ;;  %v7184_v60 = vrot.slane %v15790_v58, 1 }
 0x9f0   : > { %v7067_v52 = vmul.f32 %v15716_v18, %v7033_v48  ;;  %v7034_v41 = vmax.f32 %v6947_v7, 0.0  ;;  %v7182_v15 = vrot.slane %v15795_v43, 1  ;;  %10459 = vmatpush3.bf16.msra.mxu0 %v11935_v34 }
 0x9f1   : > { %v7070_v14 = vmul.f32 %v15716_v18, %v7036_v26  ;;  %10460 = vmatprep.subr.bf16.mxu0 %v11936_v9  ;;  %v7103_v59 = vadd.f32 %v15719_v1, %v7069_v38 }
 0x9f2   : > { %v7068_v53 = vmul.f32 %v15716_v18, %v7034_v41  ;;  %v7183_v31 = vsel %vm1556_vm3, %v7180_v35, %v7182_v15  ;;  %v7185_v8 = vsel %vm1556_vm3, %v7182_v15, %v7184_v60  ;;  %v7101_v28 = vadd.f32 %v15719_v1, %v7067_v52  ;;  %v15859_v41 = vld [vmem:[%s16560_s16 + $0x40] sm:$0xff]  }
 0x9f3   : > { %v7104_v29 = vadd.f32 %v15719_v1, %v7070_v14  ;;  %10433 = vmatmul.mubr.msk.bf16.gmra.mrb[176].mxu0 %vm7243_vm8, %v7183_v31  ;;  %v15874_v31 = vld [vmem:[%s16560_s16 + $0x48] sm:$0xff]  }
 0x9f4   : > { %v7102_v0 = vadd.f32 %v15719_v1, %v7068_v53  ;;  %v10402_v27 = vpop.f32.mrb[160].mxu0  ;;  %10436 = vmatprep.mubr.msk.bf16.mxu0 %vm7243_vm8, %v7185_v8  ;;  %10461 = vmatpush3.bf16.msra.mxu0 %v11936_v9 }
 0x9f5   : > { %v15814_v47 = vpack.c.bf16 %v7104_v29, %v7103_v59  ;;  %v7039_v55 = vmax.f32 %v10402_v27, 0.0  ;;  %v6960_v23 = vpop.f32.mrb[161].mxu0  ;;  %10462 = vmatprep.subr.bf16.mxu0 %v11937_v57  ;;  %v11941_v27 = vld [vmem:[%s16557_s13 + $0x80] sm:$0xff]  }
 0x9f6   : > { %v15819_v45 = vpack.c.bf16 %v7102_v0, %v7101_v28  ;;  %v7037_v19 = vmax.f32 %v6960_v23, 0.0  ;;  %v10403_v3 = vpop.f32.mrb[162].mxu0  ;;  %v15886_v28 = vld [vmem:[%s16560_s16 + $0x50] sm:$0xff]   ;;  %v15894_v0 = vld [vmem:[%s16560_s16 + $0x58] sm:$0xff]  }
 0x9f7   : > { %v7073_v11 = vmul.f32 %v15716_v18, %v7039_v55  ;;  %v7040_v30 = vmax.f32 %v10403_v3, 0.0  ;;  %v6963_v56 = vpop.f32.mrb[163].mxu0  ;;  %v7188_v37 = vrot.slane %v15814_v47, 1  ;;  %v11942_v55 = vld [vmem:[%s16557_s13 + $0x88] sm:$0xff]   ;;  %v11943_v23 = vld [vmem:[%s16557_s13 + $0x90] sm:$0xff]  }
 0x9f8   : > { %v7071_v6 = vmul.f32 %v15716_v18, %v7037_v19  ;;  %v7038_v42 = vmax.f32 %v6963_v56, 0.0  ;;  %v7186_v4 = vrot.slane %v15819_v45, 1  ;;  %10463 = vmatpush3.bf16.msra.mxu0 %v11937_v57  ;;  %v11945_v19 = vld [vmem:[%s16557_s13 + $0xa0] sm:$0xff]   ;;  %v11946_v3 = vld [vmem:[%s16557_s13 + $0xa8] sm:$0xff]   ;;  %v7684_v56 = vrot.slane %v15730_v20, 2 }
 0x9f9   : > { %v7074_v22 = vmul.f32 %v15716_v18, %v7040_v30  ;;  %10464 = vmatprep.subr.bf16.mxu0 %v11938_v32  ;;  %v7107_v62 = vadd.f32 %v15719_v1, %v7073_v11  ;;  %v11947_v11 = vld [vmem:[%s16557_s13 + $0xb0] ss:$0 sps:$4 sm:$0xff]  }
 0x9fa   : > { %v7072_v13 = vmul.f32 %v15716_v18, %v7038_v42  ;;  %v7187_v63 = vsel %vm1556_vm3, %v7184_v60, %v7186_v4  ;;  %v7189_v35 = vsel %vm1556_vm3, %v7186_v4, %v7188_v37  ;;  %v7105_v12 = vadd.f32 %v15719_v1, %v7071_v6 }
 0x9fb   : > { %v7108_v25 = vadd.f32 %v15719_v1, %v7074_v22  ;;  %10437 = vmatmul.mubr.msk.bf16.gmra.mrb[180].mxu0 %vm7243_vm8, %v7187_v63  ;;  %v7799_v30 = vsel %vm7286_vm7, %v11947_v11, 0  ;;  %v7687_v42 = vrot.slane %v15746_v49, 2  ;;  %v7689_v4 = vrot.slane %v15744_v33, 2 }
 0x9fc   : > { %v7106_v50 = vadd.f32 %v15719_v1, %v7072_v13  ;;  %v10406_v34 = vpop.f32.mrb[164].mxu0  ;;  %10440 = vmatprep.mubr.msk.bf16.mxu0 %vm7243_vm8, %v7189_v35  ;;  %10465 = vmatpush3.bf16.msra.mxu0 %v11938_v32  ;;  %v11944_v32 = vld [vmem:[%s16557_s13 + $0x98] sm:$0xff]   ;;  %v7699_v35 = vrot.slane %v15819_v45, 2 }
 0x9fd   : > { %v15838_v46 = vpack.c.bf16 %v7108_v25, %v7107_v62  ;;  %v7043_v16 = vmax.f32 %v10406_v34, 0.0  ;;  %v6976_v40 = vpop.f32.mrb[165].mxu0  ;;  %11321 = vmatprep.subr.msk.bf16.mxu0 %vm7286_vm7, %v11939_v5  ;;  %v7690_v5 = vsel %vm1132_vm0, %v7687_v42, %v7689_v4  ;;  %v7701_v62 = vrot.slane %v15814_v47, 2 }
 0x9fe   : > { %v15845_v17 = vpack.c.bf16 %v7106_v50, %v7105_v12  ;;  %v7041_v61 = vmax.f32 %v6976_v40, 0.0  ;;  %v10407_v2 = vpop.f32.mrb[166].mxu0 }
 0x9ff   : > { %v7077_v24 = vmul.f32 %v15716_v18, %v7043_v16  ;;  %v6979_v10 = vpop.f32.mrb[167].mxu0  ;;  %v7192_v9 = vrot.slane %v15838_v46, 1  ;;  %v7705_v12 = vrot.slane %v15838_v46, 2 }
 0xa00   : > { %v7075_v48 = vmul.f32 %v15716_v18, %v7041_v61  ;;  %v7042_v39 = vmax.f32 %v6979_v10, 0.0  ;;  %v7190_v38 = vrot.slane %v15845_v17, 1  ;;  %10467 = vmatpush3.bf16.msra.mxu0 %v7522_v44  ;;  %v7703_v25 = vrot.slane %v15845_v17, 2  ;;  %v11953_v44 = vld [vmem:[%s16560_s16 + $0x68] sm:$0xff]  }
 0xa01   : > { %v7111_v26 = vadd.f32 %v15719_v1, %v7077_v24  ;;  %10496 = vmatprep.subr.bf16.mxu0 %v11940_v36  ;;  %v16980_v61 = vmov 0   ;;  %v16024_v24 = vld [vmem:[#allocation17] ss:$0 sm:$0xff] }
 0xa02   : > { %v7076_v7 = vmul.f32 %v15716_v18, %v7042_v39  ;;  %v7191_v60 = vsel %vm1556_vm3, %v7188_v37, %v7190_v38  ;;  %v7193_v52 = vsel %vm1556_vm3, %v7190_v38, %v7192_v9  ;;  %v7109_v14 = vadd.f32 %v15719_v1, %v7075_v48 }
 0xa03   : > { %10441 = vmatmul.mubr.msk.bf16.gmra.mrb[184].mxu0 %vm7243_vm8, %v7191_v60  ;;  %v15861_v15 = vpack.c.bf16 %v7111_v26, %v7111_v26  ;;  %v12464_v18 = vmov 0.0   ;;  %v7685_v37 = vrot.slane %v15728_v21, 2  ;;  %v7704_v50 = vsel %vm1132_vm0, %v7701_v62, %v7703_v25  ;;  %v16027_v60 = vld [vmem:[#allocation19] ss:$0 sm:$0xff] }
 0xa04   : > { %v7110_v57 = vadd.f32 %v15719_v1, %v7076_v7  ;;  %10444 = vmatprep.mubr.msk.bf16.mxu0 %vm7243_vm8, %v7193_v52  ;;  %10770 = vmatprep.subr.bf16.mxu1 %v12464_v18 }
 0xa05   : > { %10778 = vmatpush3.bf16.msra.mxu1 %v15859_v41  ;;  %v7196_v1 = vrot.slane %v15861_v15, 1  ;;  %v7686_v6 = vsel %vm1132_vm0, %v7684_v56, %v7685_v37  ;;  %v7688_v22 = vsel %vm1132_vm0, %v7685_v37, %v7687_v42  ;;  %v7709_v34 = vrot.slane %v15861_v15, 2  ;;  %10592 = vmatprep.mubr.msk.bf16.mxu1 %vm12465_vm9, %v12464_v18 }
 0xa06   : > { %v15868_v53 = vpack.c.bf16 %v7110_v57, %v7109_v14  ;;  %10771 = vmatprep.subr.bf16.mxu1 %v12464_v18 }
 0xa08   : > { %v7194_v8 = vrot.slane %v15868_v53, 1 }
 0xa09   : > { %10779 = vmatpush3.bf16.msra.mxu1 %v15874_v31 }
 0xa0a   : > { %v7195_v59 = vsel %vm1556_vm3, %v7192_v9, %v7194_v8  ;;  %v7197_v29 = vsel %vm1556_vm3, %v7194_v8, %v7196_v1  ;;  %10772 = vmatprep.subr.bf16.mxu1 %v12464_v18 }
 0xa0b   : > { %10445 = vmatmul.mubr.msk.bf16.gmra.mrb[188].mxu0 %vm7243_vm8, %v7195_v59 }
 0xa0c   : > { %10448 = vmatprep.mubr.msk.bf16.mxu0 %vm7243_vm8, %v7197_v29 }
 0xa0d   : > { %10780 = vmatpush3.bf16.msra.mxu1 %v15886_v28 }
 0xa0e   : > { %10773 = vmatprep.subr.bf16.mxu1 %v12464_v18 }
 0xa11   : > { %10781 = vmatpush3.bf16.msra.mxu1 %v15894_v0 }
 0xa12   : > { %10774 = vmatprep.subr.bf16.mxu1 %v12464_v18 }
 0xa13   : > { %10449 = vmatmul.mubr.msk.bf16.gmra.mrb[192].mxu0 %vm7243_vm8, %v7196_v1 }
 0xa14   : > { %10468 = vmatprep.mubr.msk.bf16.mxu0 %vm7243_vm8, %v15730_v20  ;;  %v7693_v20 = vrot.slane %v15766_v54, 2 }
 0xa1b   : > { %10469 = vmatmul.mubr.msk.bf16.vlgmr.msra.gmra.mrb[168].mxu0 %vm7243_vm8, %v15728_v21  ;;  %v7691_v21 = vrot.slane %v15771_v51, 2 }
 0xa1c   : > { %10472 = vmatprep.mubr.msk.bf16.mxu0 %vm7243_vm8, %v15746_v49  ;;  %10497 = vmatpush3.bf16.msra.mxu0 %v11940_v36  ;;  %v11954_v36 = vld [vmem:[%s16560_s16 + $0x70] sm:$0xff]  }
 0xa1d   : > { %10498 = vmatprep.subr.bf16.mxu0 %v11941_v27  ;;  %v7694_v49 = vsel %vm1132_vm0, %v7691_v21, %v7693_v20 }
 0xa20   : > { %10499 = vmatpush3.bf16.msra.mxu0 %v11941_v27 }
 0xa21   : > { %10500 = vmatprep.subr.bf16.mxu0 %v11942_v55 }
 0xa23   : > { %10473 = vmatmul.mubr.msk.bf16.gmra.mrb[172].mxu0 %vm7243_vm8, %v15744_v33  ;;  %v7692_v33 = vsel %vm1132_vm0, %v7689_v4, %v7691_v21 }
 0xa24   : > { %10476 = vmatprep.mubr.msk.bf16.mxu0 %vm7243_vm8, %v15771_v51  ;;  %10501 = vmatpush3.bf16.msra.mxu0 %v11942_v55  ;;  %v7695_v51 = vrot.slane %v15795_v43, 2 }
 0xa25   : > { %10502 = vmatprep.subr.bf16.mxu0 %v11943_v23 }
 0xa26   : > { %v7696_v13 = vsel %vm1132_vm0, %v7693_v20, %v7695_v51 }
 0xa28   : > { %10503 = vmatpush3.bf16.msra.mxu0 %v11943_v23 }
 0xa29   : > { %10504 = vmatprep.subr.bf16.mxu0 %v11944_v32 }
 0xa2b   : > { %10477 = vmatmul.mubr.msk.bf16.gmra.mrb[176].mxu0 %vm7243_vm8, %v15766_v54  ;;  %v7697_v54 = vrot.slane %v15790_v58, 2 }
 0xa2c   : > { %10480 = vmatprep.mubr.msk.bf16.mxu0 %vm7243_vm8, %v15795_v43  ;;  %10505 = vmatpush3.bf16.msra.mxu0 %v11944_v32 }
 0xa2d   : > { %10506 = vmatprep.subr.bf16.mxu0 %v11945_v19  ;;  %v7698_v63 = vsel %vm1132_vm0, %v7695_v51, %v7697_v54  ;;  %v7700_v43 = vsel %vm1132_vm0, %v7697_v54, %v7699_v35 }
 0xa30   : > { %10507 = vmatpush3.bf16.msra.mxu0 %v11945_v19 }
 0xa31   : > { %10508 = vmatprep.subr.bf16.mxu0 %v11946_v3 }
 0xa33   : > { %10481 = vmatmul.mubr.msk.bf16.gmra.mrb[180].mxu0 %vm7243_vm8, %v15790_v58  ;;  %v7702_v58 = vsel %vm1132_vm0, %v7699_v35, %v7701_v62 }
 0xa34   : > { %10484 = vmatprep.mubr.msk.bf16.mxu0 %vm7243_vm8, %v15819_v45  ;;  %10509 = vmatpush3.bf16.msra.mxu0 %v11946_v3  ;;  %v7706_v45 = vsel %vm1132_vm0, %v7703_v25, %v7705_v12 }
 0xa35   : > { %11322 = vmatprep.subr.msk.bf16.mxu0 %vm7286_vm7, %v11947_v11 }
 0xa38   : > { %10511 = vmatpush3.bf16.msra.mxu0 %v7799_v30 }
 0xa39   : > { %10540 = vmatprep.subr.bf16.mxu0 %v12464_v18 }
 0xa3b   : > { %10485 = vmatmul.mubr.msk.bf16.gmra.mrb[184].mxu0 %vm7243_vm8, %v15814_v47  ;;  %v7707_v47 = vrot.slane %v15868_v53, 2 }
 0xa3c   : > { %10488 = vmatprep.mubr.msk.bf16.mxu0 %vm7243_vm8, %v15845_v17  ;;  %v11955_v17 = vld [vmem:[%s16560_s16 + $0x78] sm:$0xff]  }
 0xa3d   : > { %v7708_v16 = vsel %vm1132_vm0, %v7705_v12, %v7707_v47  ;;  %v7710_v40 = vsel %vm1132_vm0, %v7707_v47, %v7709_v34 }
 0xa43   : > { %10489 = vmatmul.mubr.msk.bf16.gmra.mrb[188].mxu0 %vm7243_vm8, %v15838_v46  ;;  %v11952_v46 = vld [vmem:[%s16560_s16 + $0x60] sm:$0xff]  }
 0xa44   : > { %10492 = vmatprep.mubr.msk.bf16.mxu0 %vm7243_vm8, %v15868_v53  ;;  %10782 = vmatpush3.bf16.msra.mxu1 %v11952_v46 }
 0xa45   : > { %10775 = vmatprep.subr.bf16.mxu1 %v12464_v18 }
 0xa48   : > { %10783 = vmatpush3.bf16.msra.mxu1 %v11953_v44 }
 0xa49   : > { %10776 = vmatprep.subr.bf16.mxu1 %v12464_v18 }
 0xa4b   : > { %10493 = vmatmul.mubr.msk.bf16.gmra.mrb[192].mxu0 %vm7243_vm8, %v15861_v15 }
 0xa4c   : > { %10512 = vmatprep.mubr.msk.bf16.mxu0 %vm7243_vm8, %v7686_v6  ;;  %10784 = vmatpush3.bf16.msra.mxu1 %v11954_v36 }
 0xa4d   : > { %10777 = vmatprep.subr.bf16.mxu1 %v12464_v18 }
 0xa50   : > { %10785 = vmatpush3.bf16.msra.mxu1 %v11955_v17 }
 0xa51   : > { %10608 = vmatprep.subr.bf16.mxu1 %v12464_v18 }
 0xa53   : > { %10513 = vmatmul.mubr.msk.bf16.vlgmr.msra.gmra.mrb[168].mxu0 %vm7243_vm8, %v7688_v22 }
 0xa54   : > { %10516 = vmatprep.mubr.msk.bf16.mxu0 %vm7243_vm8, %v7690_v5  ;;  %10541 = vmatpush3.bf16.msra.mxu0 %v15859_v41 }
 0xa55   : > { %10542 = vmatprep.subr.bf16.mxu0 %v12464_v18 }
 0xa58   : > { %10543 = vmatpush3.bf16.msra.mxu0 %v15874_v31 }
 0xa59   : > { %10544 = vmatprep.subr.bf16.mxu0 %v12464_v18 }
 0xa5b   : > { %10517 = vmatmul.mubr.msk.bf16.gmra.mrb[172].mxu0 %vm7243_vm8, %v7692_v33 }
 0xa5c   : > { %10520 = vmatprep.mubr.msk.bf16.mxu0 %vm7243_vm8, %v7694_v49  ;;  %10545 = vmatpush3.bf16.msra.mxu0 %v15886_v28 }
 0xa5d   : > { %10546 = vmatprep.subr.bf16.mxu0 %v12464_v18 }
 0xa60   : > { %10547 = vmatpush3.bf16.msra.mxu0 %v15894_v0 }
 0xa61   : > { %10548 = vmatprep.subr.bf16.mxu0 %v12464_v18 }
 0xa63   : > { %10521 = vmatmul.mubr.msk.bf16.gmra.mrb[176].mxu0 %vm7243_vm8, %v7696_v13 }
 0xa64   : > { %10524 = vmatprep.mubr.msk.bf16.mxu0 %vm7243_vm8, %v7698_v63  ;;  %10549 = vmatpush3.bf16.msra.mxu0 %v11952_v46 }
 0xa65   : > { %10550 = vmatprep.subr.bf16.mxu0 %v12464_v18 }
 0xa68   : > { %10551 = vmatpush3.bf16.msra.mxu0 %v11953_v44 }
 0xa69   : > { %10552 = vmatprep.subr.bf16.mxu0 %v12464_v18 }
 0xa6b   : > { %10525 = vmatmul.mubr.msk.bf16.gmra.mrb[180].mxu0 %vm7243_vm8, %v7700_v43 }
 0xa6c   : > { %10528 = vmatprep.mubr.msk.bf16.mxu0 %vm7243_vm8, %v7702_v58  ;;  %10553 = vmatpush3.bf16.msra.mxu0 %v11954_v36 }
 0xa6d   : > { %10554 = vmatprep.subr.bf16.mxu0 %v12464_v18 }
 0xa70   : > { %10555 = vmatpush3.bf16.msra.mxu0 %v11955_v17 }
 0xa71   : > { %8928 = vmatprep.subr.bf16.mxu0 %v16980_v61 }
 0xa73   : > { %10529 = vmatmul.mubr.msk.bf16.gmra.mrb[184].mxu0 %vm7243_vm8, %v7704_v50 }
 0xa74   : > { %10532 = vmatprep.mubr.msk.bf16.mxu0 %vm7243_vm8, %v7706_v45 }
 0xa7b   : > { %10533 = vmatmul.mubr.msk.bf16.gmra.mrb[188].mxu0 %vm7243_vm8, %v7708_v16 }
 0xa7c   : > { %10536 = vmatprep.mubr.msk.bf16.mxu0 %vm7243_vm8, %v7710_v40 }
 0xa83   : > { %10537 = vmatmul.mubr.msk.bf16.gmra.mrb[192].mxu0 %vm7243_vm8, %v7709_v34 }
 0xa84   : > { %10556 = vmatprep.mubr.msk.bf16.mxu0 %vm12465_vm9, %v12464_v18 }
 0xb26   : > { %v10514_v2 = vpop.f32.mrb[168].mxu0 }
 0xb27   : > { %v7974_v10 = vmax.f32 %v10514_v2, 0.0  ;;  %v7835_v9 = vpop.f32.mrb[169].mxu0 }
 0xb28   : > { %v7972_v48 = vmax.f32 %v7835_v9, 0.0  ;;  %v10515_v39 = vpop.f32.mrb[170].mxu0 }
 0xb29   : > { %v8008_v38 = vmul.f32 %v16024_v24, %v7974_v10  ;;  %v7975_v26 = vmax.f32 %v10515_v39, 0.0  ;;  %v7838_v7 = vpop.f32.mrb[171].mxu0 }
 0xb2a   : > { %v8006_v52 = vmul.f32 %v16024_v24, %v7972_v48  ;;  %v7973_v41 = vmax.f32 %v7838_v7, 0.0 }
 0xb2b   : > { %v8009_v15 = vmul.f32 %v16024_v24, %v7975_v26  ;;  %v8042_v57 = vadd.f32 %v16027_v60, %v8008_v38 }
 0xb2c   : > { %v8007_v14 = vmul.f32 %v16024_v24, %v7973_v41  ;;  %v8040_v31 = vadd.f32 %v16027_v60, %v8006_v52 }
 0xb2d   : > { %v8043_v53 = vadd.f32 %v16027_v60, %v8009_v15 }
 0xb2e   : > { %v8041_v8 = vadd.f32 %v16027_v60, %v8007_v14  ;;  %v10518_v1 = vpop.f32.mrb[172].mxu0 }
 0xb2f   : > { %v16036_v59 = vpack.c.bf16 %v8043_v53, %v8042_v57  ;;  %v7978_v29 = vmax.f32 %v10518_v1, 0.0  ;;  %v7851_v28 = vpop.f32.mrb[173].mxu0 }
 0xb30   : > { %v16038_v0 = vpack.c.bf16 %v8041_v8, %v8040_v31  ;;  %v7976_v27 = vmax.f32 %v7851_v28, 0.0  ;;  %v10519_v55 = vpop.f32.mrb[174].mxu0 }
 0xb31   : > { %v8012_v23 = vmul.f32 %v16024_v24, %v7978_v29  ;;  %v7979_v32 = vmax.f32 %v10519_v55, 0.0  ;;  %v7854_v19 = vpop.f32.mrb[175].mxu0  ;;  %v8129_v3 = vrot.slane %v16036_v59, 1 }
 0xb32   : > { %v8010_v11 = vmul.f32 %v16024_v24, %v7976_v27  ;;  %v7977_v30 = vmax.f32 %v7854_v19, 0.0  ;;  %v8128_v56 = vrot.slane %v16038_v0, 1 }
 0xb33   : > { %v8013_v37 = vmul.f32 %v16024_v24, %v7979_v32  ;;  %v8046_v4 = vadd.f32 %v16027_v60, %v8012_v23 }
 0xb34   : > { %v8011_v6 = vmul.f32 %v16024_v24, %v7977_v30  ;;  %v8130_v42 = vsel %vm1556_vm3, %v8128_v56, %v8129_v3  ;;  %v8044_v5 = vadd.f32 %v16027_v60, %v8010_v11 }
 0xb35   : > { %v8047_v22 = vadd.f32 %v16027_v60, %v8013_v37  ;;  %10557 = vmatmul.mubr.bf16.vlgmr.msra.gmra.mrb[196].mxu0 %v8130_v42 }
 0xb36   : > { %v8045_v21 = vadd.f32 %v16027_v60, %v8011_v6  ;;  %v10522_v20 = vpop.f32.mrb[176].mxu0  ;;  %10560 = vmatprep.mubr.msk.bf16.mxu0 %vm12465_vm9, %v12464_v18 }
 0xb37   : > { %v16053_v33 = vpack.c.bf16 %v8047_v22, %v8046_v4  ;;  %v7982_v49 = vmax.f32 %v10522_v20, 0.0  ;;  %v7867_v51 = vpop.f32.mrb[177].mxu0 }
 0xb38   : > { %v16055_v54 = vpack.c.bf16 %v8045_v21, %v8044_v5  ;;  %v7980_v13 = vmax.f32 %v7867_v51, 0.0  ;;  %v10523_v63 = vpop.f32.mrb[178].mxu0 }
 0xb39   : > { %v8016_v35 = vmul.f32 %v16024_v24, %v7982_v49  ;;  %v7983_v62 = vmax.f32 %v10523_v63, 0.0  ;;  %v7870_v43 = vpop.f32.mrb[179].mxu0  ;;  %v8133_v39 = vrot.slane %v16053_v33, 1 }
 0xb3a   : > { %v8014_v58 = vmul.f32 %v16024_v24, %v7980_v13  ;;  %v7981_v25 = vmax.f32 %v7870_v43, 0.0  ;;  %v8131_v12 = vrot.slane %v16055_v54, 1 }
 0xb3b   : > { %v8017_v50 = vmul.f32 %v16024_v24, %v7983_v62  ;;  %v8050_v34 = vadd.f32 %v16027_v60, %v8016_v35 }
 0xb3c   : > { %v8015_v45 = vmul.f32 %v16024_v24, %v7981_v25  ;;  %v8132_v47 = vsel %vm1556_vm3, %v8129_v3, %v8131_v12  ;;  %v8048_v40 = vadd.f32 %v16027_v60, %v8014_v58  ;;  %v8134_v57 = vsel %vm1556_vm3, %v8131_v12, %v8133_v39 }
 0xb3d   : > { %v8051_v16 = vadd.f32 %v16027_v60, %v8017_v50  ;;  %10561 = vmatmul.mubr.bf16.gmra.mrb[200].mxu0 %v8132_v47 }
 0xb3e   : > { %v8049_v46 = vadd.f32 %v16027_v60, %v8015_v45  ;;  %v10526_v44 = vpop.f32.mrb[180].mxu0  ;;  %10564 = vmatprep.mubr.msk.bf16.mxu0 %vm12465_vm9, %v12464_v18 }
 0xb3f   : > { %v16069_v36 = vpack.c.bf16 %v8051_v16, %v8050_v34  ;;  %v7986_v17 = vmax.f32 %v10526_v44, 0.0  ;;  %v7883_v2 = vpop.f32.mrb[181].mxu0 }
 0xb40   : > { %v16071_v10 = vpack.c.bf16 %v8049_v46, %v8048_v40  ;;  %v7984_v9 = vmax.f32 %v7883_v2, 0.0  ;;  %v10527_v48 = vpop.f32.mrb[182].mxu0 }
 0xb41   : > { %v8020_v38 = vmul.f32 %v16024_v24, %v7986_v17  ;;  %v7987_v26 = vmax.f32 %v10527_v48, 0.0  ;;  %v7886_v7 = vpop.f32.mrb[183].mxu0  ;;  %v8137_v25 = vrot.slane %v16069_v36, 1 }
 0xb42   : > { %v8018_v52 = vmul.f32 %v16024_v24, %v7984_v9  ;;  %v7985_v41 = vmax.f32 %v7886_v7, 0.0  ;;  %v8135_v3 = vrot.slane %v16071_v10, 1 }
 0xb43   : > { %v8021_v15 = vmul.f32 %v16024_v24, %v7987_v26  ;;  %v8054_v53 = vadd.f32 %v16027_v60, %v8020_v38 }
 0xb44   : > { %v8019_v14 = vmul.f32 %v16024_v24, %v7985_v41  ;;  %v8052_v8 = vadd.f32 %v16027_v60, %v8018_v52  ;;  %v8136_v22 = vsel %vm1556_vm3, %v8133_v39, %v8135_v3  ;;  %v8138_v46 = vsel %vm1556_vm3, %v8135_v3, %v8137_v25 }
 0xb45   : > { %v8055_v31 = vadd.f32 %v16027_v60, %v8021_v15  ;;  %10565 = vmatmul.mubr.bf16.gmra.mrb[204].mxu0 %v8134_v57 }
 0xb46   : > { %v8053_v1 = vadd.f32 %v16027_v60, %v8019_v14  ;;  %v10530_v29 = vpop.f32.mrb[184].mxu0  ;;  %10568 = vmatprep.mubr.msk.bf16.mxu0 %vm12465_vm9, %v12464_v18 }
 0xb47   : > { %v16085_v28 = vpack.c.bf16 %v8055_v31, %v8054_v53  ;;  %v7990_v27 = vmax.f32 %v10530_v29, 0.0  ;;  %v7899_v55 = vpop.f32.mrb[185].mxu0  ;;  %v11956_v29 = vld [vmem:[%s16560_s16] sm:$0xff]  }
 0xb48   : > { %v16087_v23 = vpack.c.bf16 %v8053_v1, %v8052_v8  ;;  %v7988_v32 = vmax.f32 %v7899_v55, 0.0  ;;  %v10531_v19 = vpop.f32.mrb[186].mxu0 }
 0xb49   : > { %v8024_v11 = vmul.f32 %v16024_v24, %v7990_v27  ;;  %v7991_v30 = vmax.f32 %v10531_v19, 0.0  ;;  %v7902_v56 = vpop.f32.mrb[187].mxu0 }
 0xb4a   : > { %v8022_v37 = vmul.f32 %v16024_v24, %v7988_v32  ;;  %v7989_v6 = vmax.f32 %v7902_v56, 0.0  ;;  %v8139_v15 = vrot.slane %v16087_v23, 1  ;;  %v8141_v56 = vrot.slane %v16085_v28, 1 }
 0xb4b   : > { %v8025_v42 = vmul.f32 %v16024_v24, %v7991_v30  ;;  %v8058_v5 = vadd.f32 %v16027_v60, %v8024_v11  ;;  %v11957_v30 = vld [vmem:[%s16560_s16 + $0x8] sm:$0xff]  }
 0xb4c   : > { %v8023_v4 = vmul.f32 %v16024_v24, %v7989_v6  ;;  %v8056_v20 = vadd.f32 %v16027_v60, %v8022_v37  ;;  %v8140_v32 = vsel %vm1556_vm3, %v8137_v25, %v8139_v15  ;;  %v8142_v6 = vsel %vm1556_vm3, %v8139_v15, %v8141_v56 }
 0xb4d   : > { %v8059_v21 = vadd.f32 %v16027_v60, %v8025_v42  ;;  %10569 = vmatmul.mubr.bf16.gmra.mrb[208].mxu0 %v8136_v22  ;;  %v8566_v15 = vrot.slane %v16087_v23, 2 }
 0xb4e   : > { %v8057_v49 = vadd.f32 %v16027_v60, %v8023_v4  ;;  %v10534_v51 = vpop.f32.mrb[188].mxu0  ;;  %10572 = vmatprep.mubr.msk.bf16.mxu0 %vm12465_vm9, %v12464_v18  ;;  %v11959_v4 = vld [vmem:[%s16560_s16 + $0x18] sm:$0xff]  }
 0xb4f   : > { %v16101_v13 = vpack.c.bf16 %v8059_v21, %v8058_v5  ;;  %v7994_v63 = vmax.f32 %v10534_v51, 0.0  ;;  %v7915_v35 = vpop.f32.mrb[189].mxu0  ;;  %v11960_v21 = vld [vmem:[%s16560_s16 + $0x20] sm:$0xff]  }
 0xb50   : > { %v16103_v62 = vpack.c.bf16 %v8057_v49, %v8056_v20  ;;  %v7992_v43 = vmax.f32 %v7915_v35, 0.0  ;;  %v10535_v58 = vpop.f32.mrb[190].mxu0 }
 0xb51   : > { %v8028_v12 = vmul.f32 %v16024_v24, %v7994_v63  ;;  %v7995_v50 = vmax.f32 %v10535_v58, 0.0  ;;  %v7918_v45 = vpop.f32.mrb[191].mxu0  ;;  %v8145_v8 = vrot.slane %v16101_v13, 1  ;;  %v11961_v63 = vld [vmem:[%s16560_s16 + $0x28] sm:$0xff]  }
 0xb52   : > { %v8026_v47 = vmul.f32 %v16024_v24, %v7992_v43  ;;  %v7993_v34 = vmax.f32 %v7918_v45, 0.0  ;;  %v8143_v22 = vrot.slane %v16103_v62, 1  ;;  %v11962_v43 = vld [vmem:[%s16560_s16 + $0x30] sm:$0xff]   ;;  %v11965_v45 = vld [vmem:[%s16560_s16 + $0x88] sm:$0xff]  }
 0xb53   : > { %v8029_v16 = vmul.f32 %v16024_v24, %v7995_v50  ;;  %v8062_v44 = vadd.f32 %v16027_v60, %v8028_v12  ;;  %v11963_v12 = vld [vmem:[%s16560_s16 + $0x38] sm:$0xff]   ;;  %v11964_v50 = vld [vmem:[%s16560_s16 + $0x80] sm:$0xff]  }
 0xb54   : > { %v8027_v40 = vmul.f32 %v16024_v24, %v7993_v34  ;;  %v8060_v2 = vadd.f32 %v16027_v60, %v8026_v47  ;;  %v8144_v20 = vsel %vm1556_vm3, %v8141_v56, %v8143_v22  ;;  %v8146_v58 = vsel %vm1556_vm3, %v8143_v22, %v8145_v8  ;;  %v11966_v47 = vld [vmem:[%s16560_s16 + $0x90] sm:$0xff]   ;;  %v11967_v34 = vld [vmem:[%s16560_s16 + $0x98] sm:$0xff]  }
 0xb55   : > { %v8063_v17 = vadd.f32 %v16027_v60, %v8029_v16  ;;  %10573 = vmatmul.mubr.bf16.gmra.mrb[212].mxu0 %v8138_v46  ;;  %v11968_v16 = vld [vmem:[%s16560_s16 + $0xa0] sm:$0xff]   ;;  %v11970_v46 = vld [vmem:[%s16560_s16 + $0xb0] sm:$0xff]  }
 0xb56   : > { %v8061_v9 = vadd.f32 %v16027_v60, %v8027_v40  ;;  %v10538_v48 = vpop.f32.mrb[192].mxu0  ;;  %10576 = vmatprep.mubr.msk.bf16.mxu0 %vm12465_vm9, %v12464_v18  ;;  %v11969_v40 = vld [vmem:[%s16560_s16 + $0xa8] sm:$0xff]  }
 0xb57   : > { %v16117_v39 = vpack.c.bf16 %v8063_v17, %v8062_v44  ;;  %v7998_v38 = vmax.f32 %v10538_v48, 0.0  ;;  %v7931_v26 = vpop.f32.mrb[193].mxu0  ;;  %v11971_v44 = vld [vmem:[%s16560_s16 + $0xb8] sm:$0xff]   ;;  %v8555_v17 = vrot.slane %v16038_v0, 2  ;;  %v8558_v48 = vrot.slane %v16055_v54, 2 }
 0xb58   : > { %v16119_v7 = vpack.c.bf16 %v8061_v9, %v8060_v2  ;;  %v7996_v52 = vmax.f32 %v7931_v26, 0.0  ;;  %v10539_v41 = vpop.f32.mrb[194].mxu0  ;;  %v8556_v2 = vrot.slane %v16036_v59, 2  ;;  %v8560_v26 = vrot.slane %v16053_v33, 2 }
 0xb59   : > { %v8032_v14 = vmul.f32 %v16024_v24, %v7998_v38  ;;  %v7934_v57 = vpop.f32.mrb[195].mxu0  ;;  %v8149_v37 = vrot.slane %v16117_v39, 1 }
 0xb5a   : > { %v8030_v53 = vmul.f32 %v16024_v24, %v7996_v52  ;;  %v7997_v31 = vmax.f32 %v7934_v57, 0.0  ;;  %v8147_v1 = vrot.slane %v16119_v7, 1  ;;  %v8557_v9 = vsel %vm1132_vm0, %v8555_v17, %v8556_v2 }
 0xb5b   : > { %v8066_v27 = vadd.f32 %v16027_v60, %v8032_v14  ;;  %v8559_v38 = vsel %vm1132_vm0, %v8556_v2, %v8558_v48 }
 0xb5c   : > { %v8031_v55 = vmul.f32 %v16024_v24, %v7997_v31  ;;  %v8148_v19 = vsel %vm1556_vm3, %v8145_v8, %v8147_v1  ;;  %v8064_v3 = vadd.f32 %v16027_v60, %v8030_v53  ;;  %v8150_v42 = vsel %vm1556_vm3, %v8147_v1, %v8149_v37 }
 0xb5d   : > { %10577 = vmatmul.mubr.bf16.gmra.mrb[216].mxu0 %v8140_v32  ;;  %10593 = vmatmul.mubr.bf16.vlgmr.msra.gmra.mrb[112].mxu1 %v8148_v19  ;;  %v16169_v51 = vpack.c.bf16 %v8066_v27, %v8066_v27  ;;  %v8568_v31 = vrot.slane %v16085_v28, 2 }
 0xb5e   : > { %v8065_v11 = vadd.f32 %v16027_v60, %v8031_v55  ;;  %10609 = vmatpush3.bf16.msra.mxu1 %v11956_v29  ;;  %10580 = vmatprep.mubr.msk.bf16.mxu0 %vm12465_vm9, %v12464_v18  ;;  %v11958_v60 = vld [vmem:[%s16560_s16 + $0x10] sm:$0xff]   ;;  %v8570_v55 = vrot.slane %v16103_v62, 2 }
 0xb5f   : > { %10610 = vmatprep.subr.bf16.mxu1 %v12464_v18  ;;  %10596 = vmatprep.mubr.msk.bf16.mxu1 %vm12465_vm9, %v12464_v18  ;;  %v8153_v35 = vrot.slane %v16169_v51, 1 }
 0xb60   : > { %v16143_v24 = vpack.c.bf16 %v8065_v11, %v8064_v3 }
 0xb62   : > { %10611 = vmatpush3.bf16.msra.mxu1 %v11957_v30  ;;  %v8151_v5 = vrot.slane %v16143_v24, 1  ;;  %v8572_v30 = vrot.slane %v16101_v13, 2 }
 0xb63   : > { %10612 = vmatprep.subr.bf16.mxu1 %v12464_v18 }
 0xb64   : > { %v8152_v49 = vsel %vm1556_vm3, %v8149_v37, %v8151_v5  ;;  %v8154_v25 = vsel %vm1556_vm3, %v8151_v5, %v8153_v35 }
 0xb65   : > { %10581 = vmatmul.mubr.bf16.gmra.mrb[220].mxu0 %v8142_v6  ;;  %10597 = vmatmul.mubr.bf16.gmra.mrb[116].mxu1 %v8150_v42  ;;  %v8574_v42 = vrot.slane %v16119_v7, 2 }
 0xb66   : > { %10613 = vmatpush3.bf16.msra.mxu1 %v11958_v60  ;;  %10584 = vmatprep.mubr.msk.bf16.mxu0 %vm12465_vm9, %v12464_v18 }
 0xb67   : > { %10614 = vmatprep.subr.bf16.mxu1 %v12464_v18  ;;  %10600 = vmatprep.mubr.msk.bf16.mxu1 %vm12465_vm9, %v12464_v18 }
 0xb6a   : > { %10615 = vmatpush3.bf16.msra.mxu1 %v11959_v4 }
 0xb6b   : > { %10616 = vmatprep.subr.bf16.mxu1 %v12464_v18 }
 0xb6d   : > { %10585 = vmatmul.mubr.bf16.gmra.mrb[224].mxu0 %v8144_v20  ;;  %10601 = vmatmul.mubr.bf16.gmra.mrb[120].mxu1 %v8152_v49  ;;  %v8576_v20 = vrot.slane %v16117_v39, 2 }
 0xb6e   : > { %10617 = vmatpush3.bf16.msra.mxu1 %v11960_v21  ;;  %10588 = vmatprep.mubr.msk.bf16.mxu0 %vm12465_vm9, %v12464_v18 }
 0xb6f   : > { %10618 = vmatprep.subr.bf16.mxu1 %v12464_v18  ;;  %10604 = vmatprep.mubr.msk.bf16.mxu1 %vm12465_vm9, %v12464_v18 }
 0xb72   : > { %10619 = vmatpush3.bf16.msra.mxu1 %v11961_v63 }
 0xb73   : > { %10620 = vmatprep.subr.bf16.mxu1 %v12464_v18 }
 0xb75   : > { %10589 = vmatmul.mubr.bf16.gmra.mrb[228].mxu0 %v8146_v58  ;;  %10605 = vmatmul.mubr.bf16.gmra.mrb[124].mxu1 %v8154_v25  ;;  %v8578_v58 = vrot.slane %v16143_v24, 2 }
 0xb76   : > { %10621 = vmatpush3.bf16.msra.mxu1 %v11962_v43  ;;  %10624 = vmatprep.mubr.msk.bf16.mxu1 %vm12465_vm9, %v12464_v18 }
 0xb77   : > { %10622 = vmatprep.subr.bf16.mxu1 %v12464_v18 }
 0xb7a   : > { %10623 = vmatpush3.bf16.msra.mxu1 %v11963_v12 }
 0xb7b   : > { %10676 = vmatprep.subr.bf16.mxu1 %v12464_v18 }
 0xb7d   : > { %10625 = vmatmul.mubr.bf16.vlgmr.msra.gmra.mrb[128].mxu1 %v16038_v0  ;;  %v8561_v0 = vsel %vm1132_vm0, %v8558_v48, %v8560_v26 }
 0xb7e   : > { %10677 = vmatpush3.bf16.msra.mxu1 %v11964_v50  ;;  %10628 = vmatprep.mubr.msk.bf16.mxu1 %vm12465_vm9, %v12464_v18 }
 0xb7f   : > { %10678 = vmatprep.subr.bf16.mxu1 %v12464_v18 }
 0xb82   : > { %10679 = vmatpush3.bf16.msra.mxu1 %v11965_v45 }
 0xb83   : > { %10680 = vmatprep.subr.bf16.mxu1 %v12464_v18 }
 0xb85   : > { %10629 = vmatmul.mubr.bf16.gmra.mrb[132].mxu1 %v16036_v59  ;;  %v8562_v59 = vrot.slane %v16071_v10, 2 }
 0xb86   : > { %10632 = vmatprep.mubr.msk.bf16.mxu1 %vm12465_vm9, %v12464_v18  ;;  %10681 = vmatpush3.bf16.msra.mxu1 %v11966_v47 }
 0xb87   : > { %10682 = vmatprep.subr.bf16.mxu1 %v12464_v18  ;;  %v8563_v52 = vsel %vm1132_vm0, %v8560_v26, %v8562_v59 }
 0xb8a   : > { %10683 = vmatpush3.bf16.msra.mxu1 %v11967_v34 }
 0xb8b   : > { %10684 = vmatprep.subr.bf16.mxu1 %v12464_v18 }
 0xb8d   : > { %10633 = vmatmul.mubr.bf16.gmra.mrb[136].mxu1 %v16055_v54  ;;  %v8564_v54 = vrot.slane %v16069_v36, 2 }
 0xb8e   : > { %10636 = vmatprep.mubr.msk.bf16.mxu1 %vm12465_vm9, %v12464_v18  ;;  %10685 = vmatpush3.bf16.msra.mxu1 %v11968_v16  ;;  %v8580_v16 = vrot.slane %v16169_v51, 2 }
 0xb8f   : > { %10686 = vmatprep.subr.bf16.mxu1 %v12464_v18  ;;  %v8565_v41 = vsel %vm1132_vm0, %v8562_v59, %v8564_v54  ;;  %v8567_v53 = vsel %vm1132_vm0, %v8564_v54, %v8566_v15 }
 0xb92   : > { %10687 = vmatpush3.bf16.msra.mxu1 %v11969_v40 }
 0xb93   : > { %10688 = vmatprep.subr.bf16.mxu1 %v12464_v18 }
 0xb95   : > { %10637 = vmatmul.mubr.bf16.gmra.mrb[140].mxu1 %v16053_v33 }
 0xb96   : > { %10640 = vmatprep.mubr.msk.bf16.mxu1 %vm12465_vm9, %v12464_v18  ;;  %10689 = vmatpush3.bf16.msra.mxu1 %v11970_v46 }
 0xb97   : > { %10690 = vmatprep.subr.bf16.mxu1 %v12464_v18 }
 0xb9a   : > { %10691 = vmatpush3.bf16.msra.mxu1 %v11971_v44 }
 0xb9d   : > { %10641 = vmatmul.mubr.bf16.gmra.mrb[144].mxu1 %v16071_v10 }
 0xb9e   : > { %10644 = vmatprep.mubr.msk.bf16.mxu1 %vm12465_vm9, %v12464_v18 }
 0xba5   : > { %10645 = vmatmul.mubr.bf16.gmra.mrb[148].mxu1 %v16069_v36 }
 0xba6   : > { %10648 = vmatprep.mubr.msk.bf16.mxu1 %vm12465_vm9, %v12464_v18 }
 0xbad   : > { %10649 = vmatmul.mubr.bf16.gmra.mrb[152].mxu1 %v16087_v23  ;;  %v8569_v23 = vsel %vm1132_vm0, %v8566_v15, %v8568_v31 }
 0xbae   : > { %10652 = vmatprep.mubr.msk.bf16.mxu1 %vm12465_vm9, %v12464_v18 }
 0xbb5   : > { %10653 = vmatmul.mubr.bf16.gmra.mrb[156].mxu1 %v16085_v28  ;;  %v8571_v28 = vsel %vm1132_vm0, %v8568_v31, %v8570_v55 }
 0xbb6   : > { %10656 = vmatprep.mubr.msk.bf16.mxu1 %vm12465_vm9, %v12464_v18 }
 0xbbd   : > { %10657 = vmatmul.mubr.bf16.gmra.mrb[160].mxu1 %v16103_v62  ;;  %v8573_v62 = vsel %vm1132_vm0, %v8570_v55, %v8572_v30 }
 0xbbe   : > { %10660 = vmatprep.mubr.msk.bf16.mxu1 %vm12465_vm9, %v12464_v18 }
 0xbc5   : > { %10661 = vmatmul.mubr.bf16.gmra.mrb[112].mxu1 %v16101_v13  ;;  %v8575_v13 = vsel %vm1132_vm0, %v8572_v30, %v8574_v42 }
 0xbc6   : > { %10664 = vmatprep.mubr.msk.bf16.mxu1 %vm12465_vm9, %v12464_v18 }
 0xbcd   : > { %10665 = vmatmul.mubr.bf16.gmra.mrb[116].mxu1 %v16119_v7  ;;  %v8577_v7 = vsel %vm1132_vm0, %v8574_v42, %v8576_v20 }
 0xbce   : > { %10668 = vmatprep.mubr.msk.bf16.mxu1 %vm12465_vm9, %v12464_v18 }
 0xbd5   : > { %10669 = vmatmul.mubr.bf16.gmra.mrb[120].mxu1 %v16117_v39  ;;  %v8579_v39 = vsel %vm1132_vm0, %v8576_v20, %v8578_v58 }
 0xbd6   : > { %10672 = vmatprep.mubr.msk.bf16.mxu1 %vm12465_vm9, %v12464_v18 }
 0xbdd   : > { %10673 = vmatmul.mubr.bf16.gmra.mrb[124].mxu1 %v16143_v24  ;;  %v8581_v24 = vsel %vm1132_vm0, %v8578_v58, %v8580_v16 }
 0xbde   : > { %10692 = vmatprep.mubr.msk.bf16.mxu1 %vm12465_vm9, %v12464_v18 }
 0xbe5   : > { %10693 = vmatmul.mubr.bf16.vlgmr.msra.gmra.mrb[128].mxu1 %v8557_v9  ;;  %v16353_v9 = vld [vmem:[%s16563_s19] sm:$0xff] }
 0xbe6   : > { %10696 = vmatprep.mubr.msk.bf16.mxu1 %vm12465_vm9, %v12464_v18  ;;  %v9906_v48 = vcombine.high %v16353_v9, %v16353_v9 }
 0xbe8   : > { %9907 = vmatprep.mubr.msk.bf16.mxu0 %vm8918_vm10, %v9906_v48 }
 0xbed   : > { %10697 = vmatmul.mubr.bf16.gmra.mrb[132].mxu1 %v8559_v38 }
 0xbee   : > { %10700 = vmatprep.mubr.msk.bf16.mxu1 %vm12465_vm9, %v12464_v18 }
 0xbf5   : > { %10701 = vmatmul.mubr.bf16.gmra.mrb[136].mxu1 %v8561_v0  ;;  %v16358_v0 = vld [vmem:[#allocation20] ss:$0 sm:$0xff] }
 0xbf6   : > { %10704 = vmatprep.mubr.msk.bf16.mxu1 %vm12465_vm9, %v12464_v18 }
 0xbfd   : > { %10705 = vmatmul.mubr.bf16.gmra.mrb[140].mxu1 %v8563_v52 }
 0xbfe   : > { %10708 = vmatprep.mubr.msk.bf16.mxu1 %vm12465_vm9, %v12464_v18 }
 0xc05   : > { %10709 = vmatmul.mubr.bf16.gmra.mrb[144].mxu1 %v8565_v41 }
 0xc06   : > { %10712 = vmatprep.mubr.msk.bf16.mxu1 %vm12465_vm9, %v12464_v18 }
 0xc08   : > { %v16284_v33 = vpop.f32.mrb[196].mxu0 }
 0xc09   : > { %v10558_v14 = vpop.f32.mrb[197].mxu0 }
 0xc0a   : > { %v16287_v10 = vpop.f32.mrb[198].mxu0 }
 0xc0b   : > { %v10559_v57 = vpop.f32.mrb[199].mxu0 }
 0xc0c   : > { %v16362_v57 = vld [vmem:[#allocation22] ss:$0 sm:$0xff] }
 0xc0d   : > { %10713 = vmatmul.mubr.bf16.gmra.mrb[148].mxu1 %v8567_v53 }
 0xc0e   : > { %10716 = vmatprep.mubr.msk.bf16.mxu1 %vm12465_vm9, %v12464_v18 }
 0xc10   : > { %v16292_v36 = vpop.f32.mrb[200].mxu0 }
 0xc11   : > { %v10562_v8 = vpop.f32.mrb[201].mxu0 }
 0xc12   : > { %v16295_v1 = vpop.f32.mrb[202].mxu0 }
 0xc13   : > { %v10563_v29 = vpop.f32.mrb[203].mxu0 }
 0xc15   : > { %10717 = vmatmul.mubr.bf16.gmra.mrb[152].mxu1 %v8569_v23 }
 0xc16   : > { %10720 = vmatprep.mubr.msk.bf16.mxu1 %vm12465_vm9, %v12464_v18 }
 0xc18   : > { %v16300_v27 = vpop.f32.mrb[204].mxu0 }
 0xc19   : > { %v10566_v32 = vpop.f32.mrb[205].mxu0 }
 0xc1a   : > { %v16303_v19 = vpop.f32.mrb[206].mxu0 }
 0xc1b   : > { %v10567_v3 = vpop.f32.mrb[207].mxu0 }
 0xc1d   : > { %10721 = vmatmul.mubr.bf16.gmra.mrb[156].mxu1 %v8571_v28 }
 0xc1e   : > { %10724 = vmatprep.mubr.msk.bf16.mxu1 %vm12465_vm9, %v12464_v18 }
 0xc20   : > { %v16308_v11 = vpop.f32.mrb[208].mxu0 }
 0xc21   : > { %v10570_v56 = vpop.f32.mrb[209].mxu0 }
 0xc22   : > { %v16311_v37 = vpop.f32.mrb[210].mxu0 }
 0xc23   : > { %v10571_v60 = vpop.f32.mrb[211].mxu0 }
 0xc25   : > { %10725 = vmatmul.mubr.bf16.gmra.mrb[160].mxu1 %v8573_v62 }
 0xc26   : > { %10728 = vmatprep.mubr.msk.bf16.mxu1 %vm12465_vm9, %v12464_v18 }
 0xc28   : > { %v16316_v6 = vpop.f32.mrb[212].mxu0 }
 0xc29   : > { %v10574_v4 = vpop.f32.mrb[213].mxu0 }
 0xc2a   : > { %v16319_v22 = vpop.f32.mrb[214].mxu0 }
 0xc2b   : > { %v10575_v5 = vpop.f32.mrb[215].mxu0 }
 0xc2d   : > { %10729 = vmatmul.mubr.bf16.gmra.mrb[112].mxu1 %v8575_v13 }
 0xc2e   : > { %10732 = vmatprep.mubr.msk.bf16.mxu1 %vm12465_vm9, %v12464_v18 }
 0xc30   : > { %v16324_v21 = vpop.f32.mrb[216].mxu0 }
 0xc31   : > { %v10578_v49 = vpop.f32.mrb[217].mxu0 }
 0xc32   : > { %v16327_v63 = vpop.f32.mrb[218].mxu0 }
 0xc33   : > { %v10579_v35 = vpop.f32.mrb[219].mxu0 }
 0xc35   : > { %10733 = vmatmul.mubr.bf16.gmra.mrb[116].mxu1 %v8577_v7 }
 0xc36   : > { %10736 = vmatprep.mubr.msk.bf16.mxu1 %vm12465_vm9, %v12464_v18 }
 0xc38   : > { %v16332_v43 = vpop.f32.mrb[220].mxu0 }
 0xc39   : > { %v10582_v25 = vpop.f32.mrb[221].mxu0 }
 0xc3a   : > { %v16335_v12 = vpop.f32.mrb[222].mxu0 }
 0xc3b   : > { %v10583_v50 = vpop.f32.mrb[223].mxu0 }
 0xc3d   : > { %10737 = vmatmul.mubr.bf16.gmra.mrb[120].mxu1 %v8579_v39 }
 0xc3e   : > { %10740 = vmatprep.mubr.msk.bf16.mxu1 %vm12465_vm9, %v12464_v18 }
 0xc40   : > { %v16340_v45 = vpop.f32.mrb[224].mxu0 }
 0xc41   : > { %v10586_v47 = vpop.f32.mrb[225].mxu0 }
 0xc42   : > { %v16342_v34 = vpop.f32.mrb[226].mxu0 }
 0xc43   : > { %v10587_v40 = vpop.f32.mrb[227].mxu0 }
 0xc45   : > { %10741 = vmatmul.mubr.bf16.gmra.mrb[124].mxu1 %v8581_v24 }
 0xc48   : > { %v16346_v46 = vpop.f32.mrb[228].mxu0 }
 0xc49   : > { %v10590_v44 = vpop.f32.mrb[229].mxu0 }
 0xc4a   : > { %v16348_v17 = vpop.f32.mrb[230].mxu0 }
 0xc4b   : > { %v10591_v2 = vpop.f32.mrb[231].mxu0 }
 0xcb8   : > { %v8677_v51 = vpop.f32.mrb[128].mxu1 }
 0xcb9   : > { %v10786_v38 = vadd.f32 %v8677_v51, %v16284_v33  ;;  %v10694_v26 = vpop.f32.mrb[129].mxu1 }
 0xcba   : > { %v8680_v59 = vpop.f32.mrb[130].mxu1 }
 0xcbb   : > { %v8806_v52 = vmax.f32 %v10786_v38, 0.0  ;;  %v10787_v54 = vadd.f32 %v8680_v59, %v16287_v10  ;;  %v10695_v41 = vpop.f32.mrb[131].mxu1 }
 0xcbd   : > { %v8839_v15 = vmul.f32 %v16358_v0, %v8806_v52  ;;  %v8807_v14 = vmax.f32 %v10787_v54, 0.0 }
 0xcbf   : > { %v8840_v53 = vmul.f32 %v16358_v0, %v8807_v14  ;;  %v8872_v8 = vadd.f32 %v16362_v57, %v8839_v15 }
 0xcc0   : > { %v8685_v31 = vpop.f32.mrb[132].mxu1 }
 0xcc1   : > { %v8873_v33 = vadd.f32 %v16362_v57, %v8840_v53  ;;  %v10788_v29 = vadd.f32 %v8685_v31, %v16292_v36  ;;  %v10698_v23 = vpop.f32.mrb[133].mxu1 }
 0xcc2   : > { %v8688_v55 = vpop.f32.mrb[134].mxu1 }
 0xcc3   : > { %v8899_v32 = vpack.c.bf16 %v8873_v33, %v8872_v8  ;;  %v8808_v3 = vmax.f32 %v10788_v29, 0.0  ;;  %v10789_v10 = vadd.f32 %v8688_v55, %v16295_v1  ;;  %v10699_v28 = vpop.f32.mrb[135].mxu1 }
 0xcc5   : > { %v8841_v30 = vmul.f32 %v16358_v0, %v8808_v3  ;;  %v8809_v56 = vmax.f32 %v10789_v10, 0.0  ;;  %8929 = vmatpush1.bf16.msra.mxu0 %v8899_v32 }
 0xcc6   : > { %8930 = vmatprep.subr.bf16.mxu0 %v16980_v61 }
 0xcc7   : > { %v8842_v60 = vmul.f32 %v16358_v0, %v8809_v56  ;;  %v8874_v42 = vadd.f32 %v16362_v57, %v8841_v30 }
 0xcc8   : > { %v8693_v62 = vpop.f32.mrb[136].mxu1 }
 0xcc9   : > { %v8875_v36 = vadd.f32 %v16362_v57, %v8842_v60  ;;  %v10790_v4 = vadd.f32 %v8693_v62, %v16300_v27  ;;  %v10702_v5 = vpop.f32.mrb[137].mxu1 }
 0xcca   : > { %v8696_v13 = vpop.f32.mrb[138].mxu1 }
 0xccb   : > { %v8900_v20 = vpack.c.bf16 %v8875_v36, %v8874_v42  ;;  %v8810_v1 = vmax.f32 %v10790_v4, 0.0  ;;  %v10791_v49 = vadd.f32 %v8696_v13, %v16303_v19  ;;  %v10703_v35 = vpop.f32.mrb[139].mxu1 }
 0xccd   : > { %v8843_v7 = vmul.f32 %v16358_v0, %v8810_v1  ;;  %v8811_v58 = vmax.f32 %v10791_v49, 0.0  ;;  %8931 = vmatpush1.bf16.msra.mxu0 %v8900_v20 }
 0xcce   : > { %8932 = vmatprep.subr.bf16.mxu0 %v16980_v61 }
 0xccf   : > { %v8844_v25 = vmul.f32 %v16358_v0, %v8811_v58  ;;  %v8876_v39 = vadd.f32 %v16362_v57, %v8843_v7 }
 0xcd0   : > { %v8701_v50 = vpop.f32.mrb[140].mxu1 }
 0xcd1   : > { %v8877_v27 = vadd.f32 %v16362_v57, %v8844_v25  ;;  %v10792_v47 = vadd.f32 %v8701_v50, %v16308_v11  ;;  %v10706_v16 = vpop.f32.mrb[141].mxu1 }
 0xcd2   : > { %v8704_v40 = vpop.f32.mrb[142].mxu1 }
 0xcd3   : > { %v8901_v24 = vpack.c.bf16 %v8877_v27, %v8876_v39  ;;  %v8812_v19 = vmax.f32 %v10792_v47, 0.0  ;;  %v10793_v44 = vadd.f32 %v8704_v40, %v16311_v37  ;;  %v10707_v2 = vpop.f32.mrb[143].mxu1 }
 0xcd5   : > { %v8845_v48 = vmul.f32 %v16358_v0, %v8812_v19  ;;  %v8813_v51 = vmax.f32 %v10793_v44, 0.0  ;;  %8933 = vmatpush1.bf16.msra.mxu0 %v8901_v24 }
 0xcd6   : > { %8934 = vmatprep.subr.bf16.mxu0 %v16980_v61 }
 0xcd7   : > { %v8846_v38 = vmul.f32 %v16358_v0, %v8813_v51  ;;  %v8878_v59 = vadd.f32 %v16362_v57, %v8845_v48 }
 0xcd8   : > { %v8709_v26 = vpop.f32.mrb[144].mxu1 }
 0xcd9   : > { %v8879_v11 = vadd.f32 %v16362_v57, %v8846_v38  ;;  %v10794_v52 = vadd.f32 %v8709_v26, %v16316_v6  ;;  %v10710_v54 = vpop.f32.mrb[145].mxu1 }
 0xcda   : > { %v8712_v41 = vpop.f32.mrb[146].mxu1 }
 0xcdb   : > { %v8902_v15 = vpack.c.bf16 %v8879_v11, %v8878_v59  ;;  %v8814_v37 = vmax.f32 %v10794_v52, 0.0  ;;  %v10795_v14 = vadd.f32 %v8712_v41, %v16319_v22  ;;  %v10711_v53 = vpop.f32.mrb[147].mxu1 }
 0xcdd   : > { %v8847_v31 = vmul.f32 %v16358_v0, %v8814_v37  ;;  %v8815_v8 = vmax.f32 %v10795_v14, 0.0  ;;  %8935 = vmatpush1.bf16.msra.mxu0 %v8902_v15 }
 0xcde   : > { %8936 = vmatprep.subr.bf16.mxu0 %v16980_v61 }
 0xcdf   : > { %v8848_v33 = vmul.f32 %v16358_v0, %v8815_v8  ;;  %v8880_v23 = vadd.f32 %v16362_v57, %v8847_v31 }
 0xce0   : > { %v8717_v29 = vpop.f32.mrb[148].mxu1 }
 0xce1   : > { %v8881_v6 = vadd.f32 %v16362_v57, %v8848_v33  ;;  %v10796_v55 = vadd.f32 %v8717_v29, %v16324_v21  ;;  %v10714_v32 = vpop.f32.mrb[149].mxu1 }
 0xce2   : > { %v8720_v3 = vpop.f32.mrb[150].mxu1 }
 0xce3   : > { %v8903_v10 = vpack.c.bf16 %v8881_v6, %v8880_v23  ;;  %v8816_v22 = vmax.f32 %v10796_v55, 0.0  ;;  %v10797_v28 = vadd.f32 %v8720_v3, %v16327_v63  ;;  %v10715_v30 = vpop.f32.mrb[151].mxu1 }
 0xce5   : > { %v8849_v56 = vmul.f32 %v16358_v0, %v8816_v22  ;;  %v8817_v60 = vmax.f32 %v10797_v28, 0.0  ;;  %8937 = vmatpush1.bf16.msra.mxu0 %v8903_v10 }
 0xce6   : > { %8938 = vmatprep.subr.bf16.mxu0 %v16980_v61 }
 0xce7   : > { %v8850_v62 = vmul.f32 %v16358_v0, %v8817_v60  ;;  %v8882_v36 = vadd.f32 %v16362_v57, %v8849_v56 }
 0xce8   : > { %v8725_v42 = vpop.f32.mrb[152].mxu1 }
 0xce9   : > { %v8883_v21 = vadd.f32 %v16362_v57, %v8850_v62  ;;  %v10798_v4 = vadd.f32 %v8725_v42, %v16332_v43  ;;  %v10718_v5 = vpop.f32.mrb[153].mxu1 }
 0xcea   : > { %v8728_v13 = vpop.f32.mrb[154].mxu1 }
 0xceb   : > { %v8904_v20 = vpack.c.bf16 %v8883_v21, %v8882_v36  ;;  %v8818_v63 = vmax.f32 %v10798_v4, 0.0  ;;  %v10799_v1 = vadd.f32 %v8728_v13, %v16335_v12  ;;  %v10719_v49 = vpop.f32.mrb[155].mxu1 }
 0xced   : > { %v8851_v35 = vmul.f32 %v16358_v0, %v8818_v63  ;;  %v8819_v7 = vmax.f32 %v10799_v1, 0.0  ;;  %8939 = vmatpush1.bf16.msra.mxu0 %v8904_v20 }
 0xcee   : > { %8940 = vmatprep.subr.bf16.mxu0 %v16980_v61 }
 0xcef   : > { %v8852_v58 = vmul.f32 %v16358_v0, %v8819_v7  ;;  %v8884_v50 = vadd.f32 %v16362_v57, %v8851_v35 }
 0xcf0   : > { %v8733_v25 = vpop.f32.mrb[156].mxu1 }
 0xcf1   : > { %v8885_v43 = vadd.f32 %v16362_v57, %v8852_v58  ;;  %v10800_v39 = vadd.f32 %v8733_v25, %v16340_v45  ;;  %v10722_v27 = vpop.f32.mrb[157].mxu1 }
 0xcf2   : > { %v8736_v47 = vpop.f32.mrb[158].mxu1 }
 0xcf3   : > { %v8905_v16 = vpack.c.bf16 %v8885_v43, %v8884_v50  ;;  %v8820_v12 = vmax.f32 %v10800_v39, 0.0  ;;  %v10801_v40 = vadd.f32 %v8736_v47, %v16342_v34  ;;  %v10723_v24 = vpop.f32.mrb[159].mxu1 }
 0xcf5   : > { %v8853_v19 = vmul.f32 %v16358_v0, %v8820_v12  ;;  %v8821_v44 = vmax.f32 %v10801_v40, 0.0  ;;  %8941 = vmatpush1.bf16.msra.mxu0 %v8905_v16 }
 0xcf6   : > { %8942 = vmatprep.subr.bf16.mxu0 %v16980_v61 }
 0xcf7   : > { %v8854_v2 = vmul.f32 %v16358_v0, %v8821_v44  ;;  %v8886_v51 = vadd.f32 %v16362_v57, %v8853_v19  ;;  %v12466_v44 = vmov 65535  }
 0xcf8   : > { %v8741_v48 = vpop.f32.mrb[160].mxu1 }
 0xcf9   : > { %v8887_v45 = vadd.f32 %v16362_v57, %v8854_v2  ;;  %v10802_v38 = vadd.f32 %v8741_v48, %v16346_v46  ;;  %v10726_v26 = vpop.f32.mrb[161].mxu1  ;;  %v8923_v2 = vsel %vm1556_vm3, 4294967295, %v12466_v44 }
 0xcfa   : > { %v8744_v59 = vpop.f32.mrb[162].mxu1 }
 0xcfb   : > { %v8906_v11 = vpack.c.bf16 %v8887_v45, %v8886_v51  ;;  %v8822_v34 = vmax.f32 %v10802_v38, 0.0  ;;  %v10803_v52 = vadd.f32 %v8744_v59, %v16348_v17  ;;  %v10727_v54 = vpop.f32.mrb[163].mxu1  ;;  %v8924_v45 = vsel %vm8922_vm11, %v8923_v2, 0 }
 0xcfc   : > { %v9905_v59 = vcombine.low %v16353_v9, %v16353_v9  ;;  %v11976_v9 = vld [vmem:[%s16564_s20 + $0x10] sm:$0xff]   ;;  %v11981_v54 = vld [vmem:[%s16564_s20 + $0x38] ss:$0 sps:$4 sm:$0xff]  }
 0xcfd   : > { %v8855_v41 = vmul.f32 %v16358_v0, %v8822_v34  ;;  %v8823_v15 = vmax.f32 %v10803_v52, 0.0  ;;  %8943 = vmatpush1.bf16.msra.mxu0 %v8906_v11  ;;  %v11978_v11 = vld [vmem:[%s16564_s20 + $0x20] sm:$0xff]   ;;  %v11979_v34 = vld [vmem:[%s16564_s20 + $0x28] sm:$0xff]   ;;  %v11980_v52 = vld [vmem:[%s16564_s20 + $0x30] sm:$0xff]  }
 0xcfe   : > { %8944 = vmatprep.subr.bf16.mxu0 %v16980_v61 }
 0xcff   : > { %v8856_v37 = vmul.f32 %v16358_v0, %v8823_v15  ;;  %v8888_v53 = vadd.f32 %v16362_v57, %v8855_v41  ;;  %v9033_v41 = vsel %vm7286_vm7, %v11981_v54, 0 }
 0xd00   : > { %v8749_v14 = vpop.f32.mrb[112].mxu1 }
 0xd01   : > { %v8889_v46 = vadd.f32 %v16362_v57, %v8856_v37  ;;  %v8824_v31 = vmax.f32 %v8749_v14, 0.0  ;;  %v10730_v8 = vpop.f32.mrb[113].mxu1 }
 0xd02   : > { %v8752_v33 = vpop.f32.mrb[114].mxu1 }
 0xd03   : > { %v8907_v29 = vpack.c.bf16 %v8889_v46, %v8888_v53  ;;  %v8857_v17 = vmul.f32 %v16358_v0, %v8824_v31  ;;  %v8825_v23 = vmax.f32 %v8752_v33, 0.0  ;;  %v10731_v6 = vpop.f32.mrb[115].mxu1  ;;  %v11982_v31 = vld [vmem:[%s16981_s27] sm:$0xff]   ;;  %s16501_s27 = scalar_lea.hbm %s16986_s28, %s9922_s24 }
 0xd04   : > { %v9917_v33 = vld [vmem:[%s16982_s26] ss:$0 sm:$0xff]  ;;  %s12351_s26 = scalar_lea.vmem %s16503_s7, 128 }
 0xd05   : > { %v8858_v55 = vmul.f32 %v16358_v0, %v8825_v23  ;;  %8945 = vmatpush1.bf16.msra.mxu0 %v8907_v29  ;;  %v8890_v32 = vadd.f32 %v16362_v57, %v8857_v17  ;;  %v9918_v23 = vld [vmem:[%s16983_s29] ss:$0 sm:$0xff]  ;;  %p12352_p0 = scmp.ne.s32.totalorder %s16503_s7, %s12351_s26  ;;  %p12359_p10 = scmp.lt.s32.totalorder %s12357_s3, %s12351_s26 }
 0xd06   : > { %8946 = vmatprep.subr.bf16.mxu0 %v16980_v61 }
 0xd07   : > { %v8891_v3 = vadd.f32 %v16362_v57, %v8858_v55  ;;  %p12353_p5 = pnand %p12352_p0, %p16988_p6  ;;  %p12360_p2 = por %p12359_p10, %p12358_p12 }
 0xd08   : > { %v8757_v10 = vpop.f32.mrb[116].mxu1 }
 0xd09   : > { %v8908_v22 = vpack.c.bf16 %v8891_v3, %v8890_v32  ;;  %v8826_v28 = vmax.f32 %v8757_v10, 0.0  ;;  %v10734_v30 = vpop.f32.mrb[117].mxu1  ;;  %p12354_p9 = pneg %p12353_p5 }
 0xd0a   : > { %v8760_v56 = vpop.f32.mrb[118].mxu1 }
 0xd0b   : > { %v8859_v60 = vmul.f32 %v16358_v0, %v8826_v28  ;;  %v8827_v62 = vmax.f32 %v8760_v56, 0.0  ;;  %v10735_v42 = vpop.f32.mrb[119].mxu1  ;;  %8947 = vmatpush1.bf16.msra.mxu0 %v8908_v22  ;;  %p12361_p3 = pnand %p12360_p2, %p12354_p9 }
 0xd0c   : > { %8948 = vmatprep.subr.bf16.mxu0 %v16980_v61 }
 0xd0d   : > { %v8860_v36 = vmul.f32 %v16358_v0, %v8827_v62  ;;  %v8892_v21 = vadd.f32 %v16362_v57, %v8859_v60 }
 0xd0f   : > { %v8893_v4 = vadd.f32 %v16362_v57, %v8860_v36 }
 0xd10   : > { %v8765_v5 = vpop.f32.mrb[120].mxu1 }
 0xd11   : > { %v8909_v13 = vpack.c.bf16 %v8893_v4, %v8892_v21  ;;  %v8828_v20 = vmax.f32 %v8765_v5, 0.0  ;;  %v10738_v63 = vpop.f32.mrb[121].mxu1 }
 0xd12   : > { %v8768_v1 = vpop.f32.mrb[122].mxu1 }
 0xd13   : > { %v8861_v49 = vmul.f32 %v16358_v0, %v8828_v20  ;;  %v8829_v35 = vmax.f32 %v8768_v1, 0.0  ;;  %v10739_v7 = vpop.f32.mrb[123].mxu1  ;;  %8949 = vmatpush1.bf16.msra.mxu0 %v8909_v13 }
 0xd14   : > { %8950 = vmatprep.subr.bf16.mxu0 %v16980_v61 }
 0xd15   : > { %v8862_v58 = vmul.f32 %v16358_v0, %v8829_v35  ;;  %v8894_v25 = vadd.f32 %v16362_v57, %v8861_v49 }
 0xd17   : > { %v8895_v50 = vadd.f32 %v16362_v57, %v8862_v58 }
 0xd18   : > { %v8773_v43 = vpop.f32.mrb[124].mxu1 }
 0xd19   : > { %v8910_v39 = vpack.c.bf16 %v8895_v50, %v8894_v25  ;;  %v8830_v27 = vmax.f32 %v8773_v43, 0.0  ;;  %v10742_v47 = vpop.f32.mrb[125].mxu1 }
 0xd1a   : > { %v8776_v16 = vpop.f32.mrb[126].mxu1 }
 0xd1b   : > { %v8863_v12 = vmul.f32 %v16358_v0, %v8830_v27  ;;  %v8831_v40 = vmax.f32 %v8776_v16, 0.0  ;;  %v10743_v24 = vpop.f32.mrb[127].mxu1  ;;  %8951 = vmatpush1.bf16.msra.mxu0 %v8910_v39 }
 0xd1c   : > { %8952 = vmatprep.subr.bf16.mxu0 %v16980_v61  ;;  %v11974_v61 = vld [vmem:[%s16564_s20] sm:$0xff]  }
 0xd1d   : > { %v8864_v19 = vmul.f32 %v16358_v0, %v8831_v40  ;;  %v8896_v48 = vadd.f32 %v16362_v57, %v8863_v12  ;;  %v11975_v0 = vld [vmem:[%s16564_s20 + $0x8] sm:$0xff]  }
 0xd1f   : > { %v8897_v51 = vadd.f32 %v16362_v57, %v8864_v19  ;;  %v11977_v57 = vld [vmem:[%s16564_s20 + $0x18] sm:$0xff]  }
 0xd21   : > { %v8911_v38 = vpack.c.bf16 %v8897_v51, %v8896_v48 }
 0xd23   : > { %v8926_v26 = vand.u32 %v8924_v45, %v8911_v38 }
 0xd25   : > { %8953 = vmatpush1.bf16.msra.mxu0 %v8926_v26 }
 0xd26   : > { %10744 = vmatprep.subr.bf16.mxu0 %v12464_v18 }
 0xd28   : > { %8961 = vmatmul.mubr.bf16.vlgmr.msra.gmra.mrb[232].mxu0 %v9905_v59 }
 0xd29   : > { %10745 = vmatpush3.bf16.msra.mxu0 %v11974_v61  ;;  %10760 = vmatprep.mubr.msk.bf16.mxu0 %vm12465_vm9, %v12464_v18 }
 0xd2a   : > { %10746 = vmatprep.subr.bf16.mxu0 %v12464_v18 }
 0xd2d   : > { %10747 = vmatpush3.bf16.msra.mxu0 %v11975_v0 }
 0xd2e   : > { %10748 = vmatprep.subr.bf16.mxu0 %v12464_v18 }
 0xd31   : > { %10749 = vmatpush3.bf16.msra.mxu0 %v11976_v9 }
 0xd32   : > { %10750 = vmatprep.subr.bf16.mxu0 %v12464_v18 }
 0xd35   : > { %10751 = vmatpush3.bf16.msra.mxu0 %v11977_v57 }
 0xd36   : > { %10752 = vmatprep.subr.bf16.mxu0 %v12464_v18 }
 0xd39   : > { %10753 = vmatpush3.bf16.msra.mxu0 %v11978_v11 }
 0xd3a   : > { %10754 = vmatprep.subr.bf16.mxu0 %v12464_v18 }
 0xd3d   : > { %10755 = vmatpush3.bf16.msra.mxu0 %v11979_v34 }
 0xd3e   : > { %10756 = vmatprep.subr.bf16.mxu0 %v12464_v18 }
 0xd41   : > { %10757 = vmatpush3.bf16.msra.mxu0 %v11980_v52 }
 0xd42   : > { %10758 = vmatprep.subr.bf16.mxu0 %v12464_v18 }
 0xd45   : > { %10759 = vmatpush3.bf16.msra.mxu0 %v9033_v41 }
 0xd46   : > { %10764 = vmatprep.subr.bf16.mxu0 %v12464_v18 }
 0xdfb   : > { %v8962_v15 = vpop.f32.mrb[232].mxu0 }
 0xdfc   : > { %v8968_v37 = vpack.c.bf16 %v8962_v15, %v8962_v15  ;;  %v8964_v14 = vpop.f32.mrb[233].mxu0 }
 0xdfd   : > { %v8965_v53 = vpop.f32.mrb[234].mxu0 }
 0xdfe   : > { %v8966_v46 = vpop.f32.mrb[235].mxu0  ;;  %10761 = vmatmul.mubr.msk.bf16.vlgmr.msra.gmra.mrb[236].mxu0 %vm7243_vm8, %v8968_v37 }
 0xdff   : > { %10766 = vmatprep.mubr.msk.bf16.mxu0 %vm12465_vm9, %v12464_v18  ;;  %10765 = vmatpush3.bf16.msra.mxu0 %v11982_v31 }
 0xed1   : > { %v9069_v8 = vpop.f32.mrb[236].mxu0 }
 0xed2   : > { %v9075_v29 = vmax.f32 %v9069_v8, 0.0  ;;  %v10762_v17 = vpop.f32.mrb[237].mxu0 }
 0xed3   : > { %v9072_v6 = vpop.f32.mrb[238].mxu0 }
 0xed4   : > { %v9083_v55 = vmul.f32 %v9917_v33, %v9075_v29  ;;  %v10763_v32 = vpop.f32.mrb[239].mxu0 }
 0xed6   : > { %v9091_v18 = vadd.f32 %v9918_v23, %v9083_v55 }
 0xed8   : > { %v9092_v3 = vpack.c.bf16 %v9091_v18, %v9091_v18 }
 0xeda   : > { %10767 = vmatmul.mubr.msk.bf16.vlgmr.msra.gmra.mrb[240].mxu0 %vm9101_vm12, %v9092_v3 }
 0xfad   : > { %v9139_v10 = vpop.f32.mrb[240].mxu0 }
 0xfae   : > { %v10768_v22 = vpop.f32.mrb[241].mxu0  ;;  %v9146_v28 = vsel %vm9145_vm13, %v9139_v10, -inf }
 0xfaf   : > { %9147 = vmax.xlane.f32.xlu1 %v9146_v28  ;;  %v9142_v30 = vpop.f32.mrb[242].mxu0 }
 0xfb0   : > { %v10769_v56 = vpop.f32.mrb[243].mxu0 }
0x103c   : > { %v9148_v60 = vpop.xlane.xlu1 %9147 }
0x103d   : > { %v9149_v62 = vsub.f32 %v9139_v10, %v9148_v60 }
0x103f   : > { %v9150_v42 = vmul.f32 1.442695, %v9149_v62 }
0x1041   : > { %11983 = vpow2.f32 %v9150_v42 }
0x104b   : > { %v11984_v36 = vpop.eup %11983 }
0x104c   : > { %v9152_v21 = vsel %vm9145_vm13, %v11984_v36, 0.0 }
0x104d   : > { %9153 = vadd.xlane.f32.xlu0 %v9152_v21 }
0x10da   : > { %v9154_v4 = vpop.xlane.xlu0 %9153 }
0x10db   : > { %11985 = vlog2.f32 %v9154_v4 }
0x10e5   : > { %v11986_v5 = vpop.eup %11985 }
0x10e6   : > { %v9156_v13 = vmul.f32 0.6931472, %v11986_v5 }
0x10e8   : > { %v9157_v20 = vsub.f32 %v9149_v62, %v9156_v13 }
0x10ea   : > { %9158 = vst.msk [vmem:[%s900_s8] sm:$0xff] %vm9145_vm13, %v9157_v20 }
0x10eb   : > { %12364 = shalt.err (!%p12361_p3)
}
0x10ec   : > { %s12365_s29 = scalar_lea.hbm %s16501_s27, 128  ;;  %s12369_s5 = scalar_lea.hbm %s16987_s22, 256 }
0x10ed   : > { %p12366_p4 = scmp.ne.s32.totalorder %s16501_s27, %s12365_s29  ;;  %p12370_p11 = scmp.lt.u32.totalorder %s16501_s27, %s16987_s22 }
0x10ee   : > { %p12371_p13 = scmp.lt.u32.totalorder %s12369_s5, %s12365_s29  ;;  %p12373_p0 = scmp.lt.u32.totalorder %s12365_s29, %s16501_s27 }
0x10ef   : > { %p12367_p7 = pnand %p12366_p4, %p16988_p6 }
0x10f0   : > { %p12372_p1 = por %p12371_p13, %p12370_p11 }
0x10f1   : > { %p12368_p8 = pneg %p12367_p7 }
0x10f2   : > { %p12374_p5 = por %p12373_p0, %p12372_p1 }
0x10f4   : > { %p12375_p9 = pnand %p12374_p5, %p12368_p8 }
0x10f6   : > { %12378 = shalt.err (!%p12375_p9)
}
0x10f7   : > { %11375 = dma.vmem_to_hbm [thread:$0]  (%p16988_p6), %s16503_s7, 128, %s16501_s27, %s9160_s21  }
0x10f8 PF: > { %s16989_s2 = sld [smem:[#allocation35_spill]]  ;;  %s16990_s11 = sld [smem:[#allocation32_spill]] }
0x10f9   : > { %s16991_s28 = sld [smem:[#allocation39_spill]] }
0x10fe   : > { %p11447_p12 = scmp.ge.s32.totalorder %s16989_s2, 2  ;;  %s9185_s26 = sand.u32 1, %s16990_s11  }
0x10ff   : > { %p16992_p10 = scmp.ne.s32.totalorder %s16991_s28, 0  ;;  %s9186_s6 = scalar_lea.sflag [#allocation4], %s9185_s26 }
0x1101   : > { %p11418_p2 = pnand %p11447_p12, %p16992_p10 }
0x1103   : > { %12424 = dma.done.wait (!%p11418_p2), %s9186_s6, 128  }
0x1104   : > { %12426 = vsyncadd (!%p11418_p2), %s9186_s6, 4294967168  ;;  %s16993_s28 = sld [smem:[#allocation36_spill]]  ;;  %s16994_s5 = sld [smem:[#allocation33_spill]] }
0x1105   : > { %s16995_s26 = sld [smem:[#allocation34_spill]]  ;;  %s16996_s27 = sld [smem:[#allocation37_spill]] }
0x110a   : > { %p41_p3 = scmp.ge.s32.totalorder %s16993_s28, 4  }
0x110c   :  { %43 = sbr.rel (!%p41_p3) target bundleno = 27 (0x1b), region = 214 }
0x1113   :  { %9191 = vsyncpa [#allocation3], 1 }
0x1114   :  { %9193 = vsyncpa [#allocation3 + $0x1], 1 }
0x1115   :  { %9194 = vsyncpa [#allocation6], 1 }
0x1116   :  { %9195 = vsyncpa [#allocation9], 1 }
0x1117   :  { %9196 = vsyncpa [#allocation12], 1 }
0x1118   :  { %9197 = vsyncpa [#allocation15], 1 }
0x1119   :  { %9198 = vsyncpa [#allocation18], 1 }
0x111a   :  { %9199 = vsyncpa [#allocation21], 1 }
0x111b   :  { %9200 = vsyncpa [#allocation4], 1 }
0x111c   :  { %9202 = vsyncpa [#allocation4 + $0x1], 1 }

</bundles_post_ra>
